<compile_context>
chip_gen: v7x
topology: tpu7x:2x2x1
jax: 0.10.0
libtpu: 0.0.40
codegen_flags: <defaults>
</compile_context>

<pallas_src>
import math
import numpy as np
import jax
import jax.numpy as jnp
from jax import lax
from jax.experimental import pallas as pl
from jax.experimental.pallas import tpu as pltpu

BATCH = 2
SEQ_LEN = 8          # args.maxlen
HIDDEN = 32          # args.hidden_units
NUM_HEADS = 2        # args.num_heads
NUM_BLOCKS = 2       # args.num_blocks
ITEM_TOTAL = 20
LN_EPS = 1e-8
NEG_INF = -1e9       # large-negative additive mask (finite; no inf-inf risk)


def _layernorm(v, g, b):
    mu = jnp.mean(v, axis=-1, keepdims=True)
    var = jnp.mean((v - mu) ** 2, axis=-1, keepdims=True)
    return (v - mu) / jnp.sqrt(var + LN_EPS) * g + b


def sasrec_kernel(x_ref, mask_ref, amask_ref, hmask_ref, mats_ref, vecs_ref,
                  pn_ref, out_ref):
    H, nh, nb = HIDDEN, NUM_HEADS, NUM_BLOCKS
    hd = H // nh
    scale = 1.0 / math.sqrt(hd)
    R = x_ref.shape[0]          # rows per tile (B_T * L)

    def vec(row, w=H):
        # one packed bias / LN vector -> (1, w); static sublane index, lane offset 0
        return vecs_ref[row:row + 1, 0:w]

    def mat(blk, j, w=H):
        # one packed weight matrix -> (H, w); rows start at a multiple of H (8-sublane aligned)
        r0 = (blk * 5 + j) * H
        return mats_ref[r0:r0 + H, 0:w]

    x = x_ref[...]            # (R, H)  batch folded into sublanes
    mask = mask_ref[...]      # (R, H)  padding mask broadcast over lanes
    amask = amask_ref[...]    # (R, nh*R) additive block-causal mask, pre-tiled per head
    hmask = hmask_ref[...]    # (nh*R, H) head-selector rows
    x = x * mask

    for i in range(nb):
        v0 = i * 9
        # --- self-attention: Q is layernormed, K/V are not (SASRec quirk) ---
        q_in = _layernorm(x, vec(v0 + 0), vec(v0 + 1))
        q = jnp.dot(q_in, mat(i, 0), preferred_element_type=jnp.float32) + vec(v0 + 2)
        kv = jnp.dot(x, mat(i, 1, 2 * H), preferred_element_type=jnp.float32) + vec(v0 + 3, 2 * H)
        k = kv[:, :H]
        v = kv[:, H:]

        # Head-packed attention: one (R,H)x(H,nh*R) score matmul, one (R,nh*R)x(nh*R,H) PV matmul.
        kcat = jnp.concatenate([k] * nh, axis=0) * hmask        # (nh*R, H)
        vcat = jnp.concatenate([v] * nh, axis=0) * hmask        # (nh*R, H)
        sc = lax.dot_general(q, kcat, (((1,), (1,)), ((), ())),
                             preferred_element_type=jnp.float32) * scale + amask   # (R, nh*R)

        p_blocks = []
        inv_full = jnp.zeros_like(q)                            # (R, H) per-head inverse denominators
        for h in range(nh):
            s_h = sc[:, h * R:(h + 1) * R]                      # 128-lane-aligned static slice
            m_h = jnp.max(s_h, axis=-1, keepdims=True)
            p_h = jnp.exp(s_h - m_h)                            # unnormalized probabilities
            d_h = jnp.sum(p_h, axis=-1, keepdims=True)          # (R, 1)
            inv_full = inv_full + pl.reciprocal(d_h, approx=False) * hmask[h * R:h * R + 1, :]
            p_blocks.append(p_h)
        p_all = jnp.concatenate(p_blocks, axis=-1)              # (R, nh*R)
        attn = jnp.dot(p_all, vcat, preferred_element_type=jnp.float32) * inv_full
        attn_out = jnp.dot(attn, mat(i, 2), preferred_element_type=jnp.float32) + vec(v0 + 4)
        x = q_in + attn_out

        # --- FFWUnoff: residual over the layernormed input ---
        x = _layernorm(x, vec(v0 + 5), vec(v0 + 6))
        h1 = jnp.maximum(
            jnp.dot(x, mat(i, 3), preferred_element_type=jnp.float32) + vec(v0 + 7), 0.0)
        x = x + jnp.dot(h1, mat(i, 4), preferred_element_type=jnp.float32) + vec(v0 + 8)
        x = x * mask

    log_feat = _layernorm(x, vec(nb * 9 + 0), vec(nb * 9 + 1))
    # pn_ref: (2, R, H) stacked [pos_emb; neg_emb] -> both logits in one reduce + one lane-dense store.
    out_ref[0] = jnp.sum(log_feat[None, :, :] * pn_ref[...], axis=-1)   # (2, R)


def init_params(key):
    """Deterministic parameter init mirroring SASRec._init_weights shapes."""
    H, L, nb = HIDDEN, SEQ_LEN, NUM_BLOCKS
    keys = jax.random.split(key, 8)

    def xavier(k, shape):
        fan_out, fan_in = shape[-2], shape[-1]
        std = math.sqrt(2.0 / (fan_in + fan_out))
        return (std * jax.random.normal(k, shape)).astype(jnp.float32)

    item_emb = xavier(keys[0], (ITEM_TOTAL + 1, H))
    item_emb = item_emb.at[0].set(0.0)                 # padding_idx = 0
    position_emb = xavier(keys[1], (L, H))

    return {
        "item_emb": item_emb,
        "position_emb": position_emb,
        "ln1_g": jnp.ones((nb, H), jnp.float32),
        "ln1_b": jnp.zeros((nb, H), jnp.float32),
        "in_w": xavier(keys[2], (nb, 3 * H, H)).reshape(nb, 3, H, H),
        "in_b": jnp.zeros((nb, 3, H), jnp.float32),
        "out_w": xavier(keys[3], (nb, H, H)),
        "out_b": jnp.zeros((nb, H), jnp.float32),
        "ln2_g": jnp.ones((nb, H), jnp.float32),
        "ln2_b": jnp.zeros((nb, H), jnp.float32),
        "fc1_w": xavier(keys[4], (nb, H, H)),
        "fc1_b": jnp.zeros((nb, H), jnp.float32),
        "fc2_w": xavier(keys[5], (nb, H, H)),
        "fc2_b": jnp.zeros((nb, H), jnp.float32),
        "last_g": jnp.ones((1, H), jnp.float32),
        "last_b": jnp.zeros((1, H), jnp.float32),
    }


def _pack_kernel_weights(params):
    """Pack all weights into two slabs (one matrix slab, one vector slab)."""
    H, nb = HIDDEN, NUM_BLOCKS
    in_w = params["in_w"]                                    # (nb, 3, H, H) PyTorch (out,in)
    wq_t = jnp.transpose(in_w[:, 0], (0, 2, 1))              # (nb, H, H)
    wk_t = jnp.transpose(in_w[:, 1], (0, 2, 1))
    wv_t = jnp.transpose(in_w[:, 2], (0, 2, 1))
    wkv_t = jnp.concatenate([wk_t, wv_t], axis=-1)           # (nb, H, 2H) fused K|V
    wo_t = jnp.transpose(params["out_w"], (0, 2, 1))
    w1_t = jnp.transpose(params["fc1_w"], (0, 2, 1))
    w2_t = jnp.transpose(params["fc2_w"], (0, 2, 1))

    def pad2h(m):                                            # (nb, H, H) -> (nb, H, 2H)
        return jnp.pad(m, ((0, 0), (0, 0), (0, H)))

    # matrix slab: per block the row-stacked order is [wq, wkv, wo, w1, w2]
    mats = jnp.concatenate([pad2h(wq_t), wkv_t, pad2h(wo_t), pad2h(w1_t), pad2h(w2_t)],
                           axis=1)                           # (nb, 5H, 2H)
    mats = mats.reshape(nb * 5 * H, 2 * H).astype(jnp.float32)

    def pad1(v):                                             # (nb, H) -> (nb, 1, 2H)
        return jnp.pad(v, ((0, 0), (0, H)))[:, None, :]

    bq = params["in_b"][:, 0]
    bkv = jnp.concatenate([params["in_b"][:, 1], params["in_b"][:, 2]], axis=-1)   # (nb, 2H)
    vecs = jnp.concatenate([
        pad1(params["ln1_g"]), pad1(params["ln1_b"]), pad1(bq),
        bkv[:, None, :],
        pad1(params["out_b"]), pad1(params["ln2_g"]), pad1(params["ln2_b"]),
        pad1(params["fc1_b"]), pad1(params["fc2_b"])], axis=1)                     # (nb, 9, 2H)
    vecs = vecs.reshape(nb * 9, 2 * H)
    last = jnp.pad(jnp.concatenate([params["last_g"], params["last_b"]], axis=0),
                   ((0, 0), (0, H)))                                               # (2, 2H)
    vecs = jnp.concatenate([vecs, last], axis=0).astype(jnp.float32)               # (nb*9+2, 2H)
    return mats, vecs


def sasrec_forward(params, user_ids, seq, pos, neg):
    """SASRec.forward(user_ids, seq, pos, neg) -> (pos_logits, neg_logits), shapes (B, L)."""
    del user_ids  # unused in the reference forward as well
    B, L = seq.shape
    H, nh, hd = HIDDEN, NUM_HEADS, HIDDEN // NUM_HEADS

    # Fold sequences onto sublanes so each tile is R = B_T*L = 128 rows (lane/sublane dense),
    # padding the batch with empty (all-zero) sequences as needed.  Keep an even number of
    # tiles so the "parallel" grid axis can be split across v7x's two TensorCores.
    B_T = max(1, 128 // L)
    R = B_T * L
    n_tiles = -(-B // B_T)
    n_tiles += n_tiles % 2          # round up to even (costs at most one padded tile)
    B_pad = n_tiles * B_T

    pad = B_pad - B
    seq_p = jnp.pad(seq, ((0, pad), (0, 0)))
    pos_p = jnp.pad(pos, ((0, pad), (0, 0)))
    neg_p = jnp.pad(neg, ((0, pad), (0, 0)))

    item_tab = params["item_emb"]
    x0 = (item_tab[seq_p] * math.sqrt(H) + params["position_emb"][None, :L, :])
    x0 = x0.reshape(B_pad * L, H).astype(jnp.float32)
    mask = jnp.broadcast_to((seq_p != 0).astype(jnp.float32)[..., None],
                            (B_pad, L, H)).reshape(B_pad * L, H)
    pn = jnp.stack([item_tab[pos_p].reshape(B_pad * L, H),
                    item_tab[neg_p].reshape(B_pad * L, H)], axis=0)     # (2, B_pad*L, H)

    # Host-side constant masks.
    r = np.arange(R)
    block_causal = (r[:, None] // L == r[None, :] // L) & (r[None, :] <= r[:, None])
    amask_1 = np.where(block_causal, 0.0, NEG_INF).astype(np.float32)   # (R, R)
    amask_t = jnp.asarray(np.tile(amask_1, (1, nh)))                    # (R, nh*R)
    hsel = (np.arange(H)[None, :] // hd == np.arange(nh)[:, None]).astype(np.float32)  # (nh, H)
    hmask_rows = jnp.asarray(np.repeat(hsel, R, axis=0))                # (nh*R, H)

    mats, vecs = _pack_kernel_weights(params)

    def full_spec(a):
        nd = a.ndim
        return pl.BlockSpec(a.shape, lambda t, _nd=nd: (0,) * _nd)

    row_spec = pl.BlockSpec((R, H), lambda t: (t, 0))
    in_specs = [row_spec,                                  # x0
                row_spec,                                  # padding mask
                full_spec(amask_t),                        # additive causal mask
                full_spec(hmask_rows),                     # head-selector rows
                full_spec(mats),                           # packed weight matrices
                full_spec(vecs),                           # packed biases / LN params
                pl.BlockSpec((2, R, H), lambda t: (0, t, 0))]   # pos/neg embeddings
    out_specs = pl.BlockSpec((1, 2, R), lambda t: (t, 0, 0))
    out_shape = jax.ShapeDtypeStruct((n_tiles, 2, R), jnp.float32)

    out = pl.pallas_call(
        sasrec_kernel,
        grid=(n_tiles,),
        in_specs=in_specs,
        out_specs=out_specs,
        out_shape=out_shape,
        compiler_params=pltpu.CompilerParams(dimension_semantics=("parallel",)),
    )(x0, mask, amask_t, hmask_rows, mats, vecs, pn)

    logits = jnp.transpose(out.reshape(n_tiles, 2, B_T, L), (1, 0, 2, 3))
    logits = logits.reshape(2, B_pad, L)[:, :B, :]
    return logits[0], logits[1]


def sasrec_reference(params, seq, pos, neg):
    """Pure-JAX reference of the PyTorch forward (eval mode)."""
    B, L = seq.shape
    H, nh, hd = HIDDEN, NUM_HEADS, HIDDEN // NUM_HEADS
    item_tab = params["item_emb"]
    x = item_tab[seq] * math.sqrt(H) + params["position_emb"][None, :L, :]
    mask = (seq != 0).astype(jnp.float32)[..., None]
    x = x * mask
    row = jnp.arange(L)[:, None]
    col = jnp.arange(L)[None, :]
    causal = jnp.where(row >= col, 0.0, -jnp.inf)
    for i in range(NUM_BLOCKS):
        q_in = _layernorm(x, params["ln1_g"][i], params["ln1_b"][i])
        Wq, Wk, Wv = params["in_w"][i]
        bq, bk, bv = params["in_b"][i]
        q = q_in @ Wq.T + bq
        k = x @ Wk.T + bk
        v = x @ Wv.T + bv
        qh = q.reshape(B, L, nh, hd)
        kh = k.reshape(B, L, nh, hd)
        vh = v.reshape(B, L, nh, hd)
        sc = jnp.einsum("blhd,bmhd->bhlm", qh, kh) / math.sqrt(hd) + causal
        p = jax.nn.softmax(sc, axis=-1)
        attn = jnp.einsum("bhlm,bmhd->blhd", p, vh).reshape(B, L, H)
        attn = attn @ params["out_w"][i].T + params["out_b"][i]
        x = q_in + attn
        x = _layernorm(x, params["ln2_g"][i], params["ln2_b"][i])
        h1 = jax.nn.relu(x @ params["fc1_w"][i].T + params["fc1_b"][i])
        x = x + (h1 @ params["fc2_w"][i].T + params["fc2_b"][i])
        x = x * mask
    lf = _layernorm(x, params["last_g"][0], params["last_b"][0])
    pos_e = item_tab[pos]
    neg_e = item_tab[neg]
    return (lf * pos_e).sum(-1), (lf * neg_e).sum(-1)


if __name__ == "__main__":
    key = jax.random.PRNGKey(0)
    pkey, skey, poskey, negkey = jax.random.split(key, 4)
    params = init_params(pkey)

    seq = jax.random.randint(skey, (BATCH, SEQ_LEN), 0, ITEM_TOTAL + 1, dtype=jnp.int32)
    seq = seq.at[:, :2].set(0)  # leading padding positions (padding_idx = 0)
    pos = jax.random.randint(poskey, (BATCH, SEQ_LEN), 1, ITEM_TOTAL + 1, dtype=jnp.int32)
    neg = jax.random.randint(negkey, (BATCH, SEQ_LEN), 1, ITEM_TOTAL + 1, dtype=jnp.int32)
    user_ids = jnp.arange(BATCH, dtype=jnp.int32)

    pos_logits, neg_logits = sasrec_forward(params, user_ids, seq, pos, neg)
    jax.block_until_ready((pos_logits, neg_logits))

    ref_pos, ref_neg = sasrec_reference(params, seq, pos, neg)
    np.testing.assert_allclose(np.asarray(pos_logits), np.asarray(ref_pos), rtol=1e-4, atol=1e-4)
    np.testing.assert_allclose(np.asarray(neg_logits), np.asarray(ref_neg), rtol=1e-4, atol=1e-4)

    print("KERNEL_OK")
</pallas_src>

<mosaic_0001>
module attributes {stable_mosaic.version = 11 : i64} {
  func.func @sasrec_kernel(%arg0: i32, %arg1: memref<128x32xf32, #tpu.memory_space<vmem>>, %arg2: memref<128x32xf32, #tpu.memory_space<vmem>>, %arg3: memref<128x256xf32, #tpu.memory_space<vmem>>, %arg4: memref<256x32xf32, #tpu.memory_space<vmem>>, %arg5: memref<320x64xf32, #tpu.memory_space<vmem>>, %arg6: memref<20x64xf32, #tpu.memory_space<vmem>>, %arg7: memref<2x128x32xf32, #tpu.memory_space<vmem>>, %arg8: memref<1x2x128xf32, #tpu.memory_space<vmem>>) attributes {dimension_semantics = [#tpu.dimension_semantics<parallel>], iteration_bounds = array<i64: 2>, scalar_prefetch = 0 : i64, scratch_operands = 0 : i64, tpu.core_type = #tpu.core_type<tc>, window_params = [{transform_indices = @transform_0, window_bounds = array<i64: 128, 32>}, {transform_indices = @transform_1, window_bounds = array<i64: 128, 32>}, {pipeline_mode = #tpu.pipeline_mode<synchronous>, transform_indices = @transform_2, window_bounds = array<i64: 128, 256>}, {pipeline_mode = #tpu.pipeline_mode<synchronous>, transform_indices = @transform_3, window_bounds = array<i64: 256, 32>}, {pipeline_mode = #tpu.pipeline_mode<synchronous>, transform_indices = @transform_4, window_bounds = array<i64: 320, 64>}, {pipeline_mode = #tpu.pipeline_mode<synchronous>, transform_indices = @transform_5, window_bounds = array<i64: 20, 64>}, {transform_indices = @transform_6, window_bounds = array<i64: 2, 128, 32>}, {transform_indices = @transform_7, window_bounds = array<i64: 1, 2, 128>}]} {
    %c0 = arith.constant 0 : index
    %c0_0 = arith.constant 0 : index
    %0 = vector.load %arg1[%c0, %c0_0] : memref<128x32xf32, #tpu.memory_space<vmem>>, vector<128x32xf32>
    %c0_1 = arith.constant 0 : index
    %c0_2 = arith.constant 0 : index
    %1 = vector.load %arg2[%c0_1, %c0_2] : memref<128x32xf32, #tpu.memory_space<vmem>>, vector<128x32xf32>
    %c0_3 = arith.constant 0 : index
    %c0_4 = arith.constant 0 : index
    %2 = vector.load %arg3[%c0_3, %c0_4] : memref<128x256xf32, #tpu.memory_space<vmem>>, vector<128x256xf32>
    %c0_5 = arith.constant 0 : index
    %c0_6 = arith.constant 0 : index
    %3 = vector.load %arg4[%c0_5, %c0_6] : memref<256x32xf32, #tpu.memory_space<vmem>>, vector<256x32xf32>
    %4 = arith.mulf %0, %1 : vector<128x32xf32>
    %c0_7 = arith.constant 0 : index
    %c0_8 = arith.constant 0 : index
    %5 = vector.load %arg6[%c0_7, %c0_8] : memref<20x64xf32, #tpu.memory_space<vmem>>, vector<1x32xf32>
    %c1 = arith.constant 1 : index
    %c0_9 = arith.constant 0 : index
    %6 = vector.load %arg6[%c1, %c0_9] : memref<20x64xf32, #tpu.memory_space<vmem>>, vector<1x32xf32>
    %cst = arith.constant dense<0.000000e+00> : vector<128xf32>
    %7 = vector.multi_reduction <add>, %4, %cst [1] : vector<128x32xf32> to vector<128xf32>
    %8 = vector.shape_cast %7 : vector<128xf32> to vector<128x1xf32>
    %cst_10 = arith.constant 3.200000e+01 : f32
    %9 = vector.broadcast %cst_10 : f32 to vector<128x1xf32>
    %10 = arith.divf %8, %9 : vector<128x1xf32>
    %11 = vector.broadcast %10 : vector<128x1xf32> to vector<128x32xf32>
    %12 = arith.subf %4, %11 : vector<128x32xf32>
    %13 = arith.mulf %12, %12 : vector<128x32xf32>
    %cst_11 = arith.constant dense<0.000000e+00> : vector<128xf32>
    %14 = vector.multi_reduction <add>, %13, %cst_11 [1] : vector<128x32xf32> to vector<128xf32>
    %15 = vector.shape_cast %14 : vector<128xf32> to vector<128x1xf32>
    %cst_12 = arith.constant 3.200000e+01 : f32
    %16 = vector.broadcast %cst_12 : f32 to vector<128x1xf32>
    %17 = arith.divf %15, %16 : vector<128x1xf32>
    %18 = vector.broadcast %10 : vector<128x1xf32> to vector<128x32xf32>
    %19 = arith.subf %4, %18 : vector<128x32xf32>
    %cst_13 = arith.constant 9.99999993E-9 : f32
    %20 = vector.broadcast %cst_13 : f32 to vector<128x1xf32>
    %21 = arith.addf %17, %20 : vector<128x1xf32>
    %22 = math.sqrt %21 : vector<128x1xf32>
    %23 = vector.broadcast %22 : vector<128x1xf32> to vector<128x32xf32>
    %24 = arith.divf %19, %23 : vector<128x32xf32>
    %25 = vector.broadcast %5 : vector<1x32xf32> to vector<128x32xf32>
    %26 = arith.mulf %24, %25 : vector<128x32xf32>
    %27 = vector.broadcast %6 : vector<1x32xf32> to vector<128x32xf32>
    %28 = arith.addf %26, %27 : vector<128x32xf32>
    %c0_14 = arith.constant 0 : index
    %c0_15 = arith.constant 0 : index
    %29 = vector.load %arg5[%c0_14, %c0_15] : memref<320x64xf32, #tpu.memory_space<vmem>>, vector<32x32xf32>
    %cst_16 = arith.constant dense<0.000000e+00> : vector<128x32xf32>
    %30 = tpu.matmul %28, %29, %cst_16 {dimension_numbers = #tpu.dot_dimension_numbers<[1], [0], [0], [1], [0, 0, 1, 1], [], []>} : vector<128x32xf32>, vector<32x32xf32>, vector<128x32xf32> -> vector<128x32xf32>
    %c2 = arith.constant 2 : index
    %c0_17 = arith.constant 0 : index
    %31 = vector.load %arg6[%c2, %c0_17] : memref<20x64xf32, #tpu.memory_space<vmem>>, vector<1x32xf32>
    %32 = vector.broadcast %31 : vector<1x32xf32> to vector<128x32xf32>
    %33 = arith.addf %30, %32 : vector<128x32xf32>
    %c32 = arith.constant 32 : index
    %c0_18 = arith.constant 0 : index
    %34 = vector.load %arg5[%c32, %c0_18] : memref<320x64xf32, #tpu.memory_space<vmem>>, vector<32x64xf32>
    %cst_19 = arith.constant dense<0.000000e+00> : vector<128x64xf32>
    %35 = tpu.matmul %4, %34, %cst_19 {dimension_numbers = #tpu.dot_dimension_numbers<[1], [0], [0], [1], [0, 0, 1, 1], [], []>} : vector<128x32xf32>, vector<32x64xf32>, vector<128x64xf32> -> vector<128x64xf32>
    %c3 = arith.constant 3 : index
    %c0_20 = arith.constant 0 : index
    %36 = vector.load %arg6[%c3, %c0_20] : memref<20x64xf32, #tpu.memory_space<vmem>>, vector<1x64xf32>
    %37 = vector.broadcast %36 : vector<1x64xf32> to vector<128x64xf32>
    %38 = arith.addf %35, %37 : vector<128x64xf32>
    %39 = vector.extract_strided_slice %38 {offsets = [0, 0], sizes = [128, 32], strides = [1, 1]} : vector<128x64xf32> to vector<128x32xf32>
    %40 = vector.extract_strided_slice %38 {offsets = [0, 32], sizes = [128, 32], strides = [1, 1]} : vector<128x64xf32> to vector<128x32xf32>
    %41 = tpu.concatenate %39, %39 in 0 : vector<128x32xf32>, vector<128x32xf32> -> vector<256x32xf32>
    %42 = arith.mulf %41, %3 : vector<256x32xf32>
    %43 = tpu.concatenate %40, %40 in 0 : vector<128x32xf32>, vector<128x32xf32> -> vector<256x32xf32>
    %44 = arith.mulf %43, %3 : vector<256x32xf32>
    %cst_21 = arith.constant dense<0.000000e+00> : vector<128x256xf32>
    %45 = tpu.matmul %33, %42, %cst_21 {dimension_numbers = #tpu.dot_dimension_numbers<[1], [1], [0], [0], [0, 0, 1, 0], [], []>} : vector<128x32xf32>, vector<256x32xf32>, vector<128x256xf32> -> vector<128x256xf32>
    %cst_22 = arith.constant 2.500000e-01 : f32
    %46 = vector.broadcast %cst_22 : f32 to vector<128x256xf32>
    %47 = arith.mulf %45, %46 : vector<128x256xf32>
    %48 = arith.addf %47, %2 : vector<128x256xf32>
    %cst_23 = arith.constant 0.000000e+00 : f32
    %49 = vector.broadcast %cst_23 : f32 to vector<128x32xf32>
    %50 = vector.extract_strided_slice %48 {offsets = [0, 0], sizes = [128, 128], strides = [1, 1]} : vector<128x256xf32> to vector<128x128xf32>
    %cst_24 = arith.constant dense<0xFF800000> : vector<128xf32>
    %51 = vector.multi_reduction <maximumf>, %50, %cst_24 [1] : vector<128x128xf32> to vector<128xf32>
    %52 = vector.shape_cast %51 : vector<128xf32> to vector<128x1xf32>
    %53 = vector.broadcast %52 : vector<128x1xf32> to vector<128x128xf32>
    %54 = arith.subf %50, %53 : vector<128x128xf32>
    %55 = math.exp %54 : vector<128x128xf32>
    %cst_25 = arith.constant dense<0.000000e+00> : vector<128xf32>
    %56 = vector.multi_reduction <add>, %55, %cst_25 [1] : vector<128x128xf32> to vector<128xf32>
    %57 = vector.shape_cast %56 : vector<128xf32> to vector<128x1xf32>
    %58 = tpu.reciprocal %57 : vector<128x1xf32> -> vector<128x1xf32>
    %59 = vector.extract_strided_slice %3 {offsets = [0, 0], sizes = [1, 32], strides = [1, 1]} : vector<256x32xf32> to vector<1x32xf32>
    %60 = vector.broadcast %58 : vector<128x1xf32> to vector<128x32xf32>
    %61 = vector.broadcast %59 : vector<1x32xf32> to vector<128x32xf32>
    %62 = arith.mulf %60, %61 : vector<128x32xf32>
    %63 = arith.addf %49, %62 : vector<128x32xf32>
    %64 = vector.extract_strided_slice %48 {offsets = [0, 128], sizes = [128, 128], strides = [1, 1]} : vector<128x256xf32> to vector<128x128xf32>
    %cst_26 = arith.constant dense<0xFF800000> : vector<128xf32>
    %65 = vector.multi_reduction <maximumf>, %64, %cst_26 [1] : vector<128x128xf32> to vector<128xf32>
    %66 = vector.shape_cast %65 : vector<128xf32> to vector<128x1xf32>
    %67 = vector.broadcast %66 : vector<128x1xf32> to vector<128x128xf32>
    %68 = arith.subf %64, %67 : vector<128x128xf32>
    %69 = math.exp %68 : vector<128x128xf32>
    %cst_27 = arith.constant dense<0.000000e+00> : vector<128xf32>
    %70 = vector.multi_reduction <add>, %69, %cst_27 [1] : vector<128x128xf32> to vector<128xf32>
    %71 = vector.shape_cast %70 : vector<128xf32> to vector<128x1xf32>
    %72 = tpu.reciprocal %71 : vector<128x1xf32> -> vector<128x1xf32>
    %73 = vector.extract_strided_slice %3 {offsets = [128, 0], sizes = [1, 32], strides = [1, 1]} : vector<256x32xf32> to vector<1x32xf32>
    %74 = vector.broadcast %72 : vector<128x1xf32> to vector<128x32xf32>
    %75 = vector.broadcast %73 : vector<1x32xf32> to vector<128x32xf32>
    %76 = arith.mulf %74, %75 : vector<128x32xf32>
    %77 = arith.addf %63, %76 : vector<128x32xf32>
    %78 = tpu.concatenate %55, %69 in 1 : vector<128x128xf32>, vector<128x128xf32> -> vector<128x256xf32>
    %cst_28 = arith.constant dense<0.000000e+00> : vector<128x32xf32>
    %79 = tpu.matmul %78, %44, %cst_28 {dimension_numbers = #tpu.dot_dimension_numbers<[1], [0], [0], [1], [0, 0, 1, 1], [], []>} : vector<128x256xf32>, vector<256x32xf32>, vector<128x32xf32> -> vector<128x32xf32>
    %80 = arith.mulf %79, %77 : vector<128x32xf32>
    %c64 = arith.constant 64 : index
    %c0_29 = arith.constant 0 : index
    %81 = vector.load %arg5[%c64, %c0_29] : memref<320x64xf32, #tpu.memory_space<vmem>>, vector<32x32xf32>
    %cst_30 = arith.constant dense<0.000000e+00> : vector<128x32xf32>
    %82 = tpu.matmul %80, %81, %cst_30 {dimension_numbers = #tpu.dot_dimension_numbers<[1], [0], [0], [1], [0, 0, 1, 1], [], []>} : vector<128x32xf32>, vector<32x32xf32>, vector<128x32xf32> -> vector<128x32xf32>
    %c4 = arith.constant 4 : index
    %c0_31 = arith.constant 0 : index
    %83 = vector.load %arg6[%c4, %c0_31] : memref<20x64xf32, #tpu.memory_space<vmem>>, vector<1x32xf32>
    %84 = vector.broadcast %83 : vector<1x32xf32> to vector<128x32xf32>
    %85 = arith.addf %82, %84 : vector<128x32xf32>
    %86 = arith.addf %28, %85 : vector<128x32xf32>
    %c5 = arith.constant 5 : index
    %c0_32 = arith.constant 0 : index
    %87 = vector.load %arg6[%c5, %c0_32] : memref<20x64xf32, #tpu.memory_space<vmem>>, vector<1x32xf32>
    %c6 = arith.constant 6 : index
    %c0_33 = arith.constant 0 : index
    %88 = vector.load %arg6[%c6, %c0_33] : memref<20x64xf32, #tpu.memory_space<vmem>>, vector<1x32xf32>
    %cst_34 = arith.constant dense<0.000000e+00> : vector<128xf32>
    %89 = vector.multi_reduction <add>, %86, %cst_34 [1] : vector<128x32xf32> to vector<128xf32>
    %90 = vector.shape_cast %89 : vector<128xf32> to vector<128x1xf32>
    %cst_35 = arith.constant 3.200000e+01 : f32
    %91 = vector.broadcast %cst_35 : f32 to vector<128x1xf32>
    %92 = arith.divf %90, %91 : vector<128x1xf32>
    %93 = vector.broadcast %92 : vector<128x1xf32> to vector<128x32xf32>
    %94 = arith.subf %86, %93 : vector<128x32xf32>
    %95 = arith.mulf %94, %94 : vector<128x32xf32>
    %cst_36 = arith.constant dense<0.000000e+00> : vector<128xf32>
    %96 = vector.multi_reduction <add>, %95, %cst_36 [1] : vector<128x32xf32> to vector<128xf32>
    %97 = vector.shape_cast %96 : vector<128xf32> to vector<128x1xf32>
    %cst_37 = arith.constant 3.200000e+01 : f32
    %98 = vector.broadcast %cst_37 : f32 to vector<128x1xf32>
    %99 = arith.divf %97, %98 : vector<128x1xf32>
    %100 = vector.broadcast %92 : vector<128x1xf32> to vector<128x32xf32>
    %101 = arith.subf %86, %100 : vector<128x32xf32>
    %cst_38 = arith.constant 9.99999993E-9 : f32
    %102 = vector.broadcast %cst_38 : f32 to vector<128x1xf32>
    %103 = arith.addf %99, %102 : vector<128x1xf32>
    %104 = math.sqrt %103 : vector<128x1xf32>
    %105 = vector.broadcast %104 : vector<128x1xf32> to vector<128x32xf32>
    %106 = arith.divf %101, %105 : vector<128x32xf32>
    %107 = vector.broadcast %87 : vector<1x32xf32> to vector<128x32xf32>
    %108 = arith.mulf %106, %107 : vector<128x32xf32>
    %109 = vector.broadcast %88 : vector<1x32xf32> to vector<128x32xf32>
    %110 = arith.addf %108, %109 : vector<128x32xf32>
    %c96 = arith.constant 96 : index
    %c0_39 = arith.constant 0 : index
    %111 = vector.load %arg5[%c96, %c0_39] : memref<320x64xf32, #tpu.memory_space<vmem>>, vector<32x32xf32>
    %cst_40 = arith.constant dense<0.000000e+00> : vector<128x32xf32>
    %112 = tpu.matmul %110, %111, %cst_40 {dimension_numbers = #tpu.dot_dimension_numbers<[1], [0], [0], [1], [0, 0, 1, 1], [], []>} : vector<128x32xf32>, vector<32x32xf32>, vector<128x32xf32> -> vector<128x32xf32>
    %c7 = arith.constant 7 : index
    %c0_41 = arith.constant 0 : index
    %113 = vector.load %arg6[%c7, %c0_41] : memref<20x64xf32, #tpu.memory_space<vmem>>, vector<1x32xf32>
    %114 = vector.broadcast %113 : vector<1x32xf32> to vector<128x32xf32>
    %115 = arith.addf %112, %114 : vector<128x32xf32>
    %cst_42 = arith.constant 0.000000e+00 : f32
    %116 = vector.broadcast %cst_42 : f32 to vector<128x32xf32>
    %117 = arith.maximumf %115, %116 : vector<128x32xf32>
    %c128 = arith.constant 128 : index
    %c0_43 = arith.constant 0 : index
    %118 = vector.load %arg5[%c128, %c0_43] : memref<320x64xf32, #tpu.memory_space<vmem>>, vector<32x32xf32>
    %cst_44 = arith.constant dense<0.000000e+00> : vector<128x32xf32>
    %119 = tpu.matmul %117, %118, %cst_44 {dimension_numbers = #tpu.dot_dimension_numbers<[1], [0], [0], [1], [0, 0, 1, 1], [], []>} : vector<128x32xf32>, vector<32x32xf32>, vector<128x32xf32> -> vector<128x32xf32>
    %120 = arith.addf %110, %119 : vector<128x32xf32>
    %c8 = arith.constant 8 : index
    %c0_45 = arith.constant 0 : index
    %121 = vector.load %arg6[%c8, %c0_45] : memref<20x64xf32, #tpu.memory_space<vmem>>, vector<1x32xf32>
    %122 = vector.broadcast %121 : vector<1x32xf32> to vector<128x32xf32>
    %123 = arith.addf %120, %122 : vector<128x32xf32>
    %124 = arith.mulf %123, %1 : vector<128x32xf32>
    %c9 = arith.constant 9 : index
    %c0_46 = arith.constant 0 : index
    %125 = vector.load %arg6[%c9, %c0_46] : memref<20x64xf32, #tpu.memory_space<vmem>>, vector<1x32xf32>
    %c10 = arith.constant 10 : index
    %c0_47 = arith.constant 0 : index
    %126 = vector.load %arg6[%c10, %c0_47] : memref<20x64xf32, #tpu.memory_space<vmem>>, vector<1x32xf32>
    %cst_48 = arith.constant dense<0.000000e+00> : vector<128xf32>
    %127 = vector.multi_reduction <add>, %124, %cst_48 [1] : vector<128x32xf32> to vector<128xf32>
    %128 = vector.shape_cast %127 : vector<128xf32> to vector<128x1xf32>
    %cst_49 = arith.constant 3.200000e+01 : f32
    %129 = vector.broadcast %cst_49 : f32 to vector<128x1xf32>
    %130 = arith.divf %128, %129 : vector<128x1xf32>
    %131 = vector.broadcast %130 : vector<128x1xf32> to vector<128x32xf32>
    %132 = arith.subf %124, %131 : vector<128x32xf32>
    %133 = arith.mulf %132, %132 : vector<128x32xf32>
    %cst_50 = arith.constant dense<0.000000e+00> : vector<128xf32>
    %134 = vector.multi_reduction <add>, %133, %cst_50 [1] : vector<128x32xf32> to vector<128xf32>
    %135 = vector.shape_cast %134 : vector<128xf32> to vector<128x1xf32>
    %cst_51 = arith.constant 3.200000e+01 : f32
    %136 = vector.broadcast %cst_51 : f32 to vector<128x1xf32>
    %137 = arith.divf %135, %136 : vector<128x1xf32>
    %138 = vector.broadcast %130 : vector<128x1xf32> to vector<128x32xf32>
    %139 = arith.subf %124, %138 : vector<128x32xf32>
    %cst_52 = arith.constant 9.99999993E-9 : f32
    %140 = vector.broadcast %cst_52 : f32 to vector<128x1xf32>
    %141 = arith.addf %137, %140 : vector<128x1xf32>
    %142 = math.sqrt %141 : vector<128x1xf32>
    %143 = vector.broadcast %142 : vector<128x1xf32> to vector<128x32xf32>
    %144 = arith.divf %139, %143 : vector<128x32xf32>
    %145 = vector.broadcast %125 : vector<1x32xf32> to vector<128x32xf32>
    %146 = arith.mulf %144, %145 : vector<128x32xf32>
    %147 = vector.broadcast %126 : vector<1x32xf32> to vector<128x32xf32>
    %148 = arith.addf %146, %147 : vector<128x32xf32>
    %c160 = arith.constant 160 : index
    %c0_53 = arith.constant 0 : index
    %149 = vector.load %arg5[%c160, %c0_53] : memref<320x64xf32, #tpu.memory_space<vmem>>, vector<32x32xf32>
    %cst_54 = arith.constant dense<0.000000e+00> : vector<128x32xf32>
    %150 = tpu.matmul %148, %149, %cst_54 {dimension_numbers = #tpu.dot_dimension_numbers<[1], [0], [0], [1], [0, 0, 1, 1], [], []>} : vector<128x32xf32>, vector<32x32xf32>, vector<128x32xf32> -> vector<128x32xf32>
    %c11 = arith.constant 11 : index
    %c0_55 = arith.constant 0 : index
    %151 = vector.load %arg6[%c11, %c0_55] : memref<20x64xf32, #tpu.memory_space<vmem>>, vector<1x32xf32>
    %152 = vector.broadcast %151 : vector<1x32xf32> to vector<128x32xf32>
    %153 = arith.addf %150, %152 : vector<128x32xf32>
    %c192 = arith.constant 192 : index
    %c0_56 = arith.constant 0 : index
    %154 = vector.load %arg5[%c192, %c0_56] : memref<320x64xf32, #tpu.memory_space<vmem>>, vector<32x64xf32>
    %cst_57 = arith.constant dense<0.000000e+00> : vector<128x64xf32>
    %155 = tpu.matmul %124, %154, %cst_57 {dimension_numbers = #tpu.dot_dimension_numbers<[1], [0], [0], [1], [0, 0, 1, 1], [], []>} : vector<128x32xf32>, vector<32x64xf32>, vector<128x64xf32> -> vector<128x64xf32>
    %c12 = arith.constant 12 : index
    %c0_58 = arith.constant 0 : index
    %156 = vector.load %arg6[%c12, %c0_58] : memref<20x64xf32, #tpu.memory_space<vmem>>, vector<1x64xf32>
    %157 = vector.broadcast %156 : vector<1x64xf32> to vector<128x64xf32>
    %158 = arith.addf %155, %157 : vector<128x64xf32>
    %159 = vector.extract_strided_slice %158 {offsets = [0, 0], sizes = [128, 32], strides = [1, 1]} : vector<128x64xf32> to vector<128x32xf32>
    %160 = vector.extract_strided_slice %158 {offsets = [0, 32], sizes = [128, 32], strides = [1, 1]} : vector<128x64xf32> to vector<128x32xf32>
    %161 = tpu.concatenate %159, %159 in 0 : vector<128x32xf32>, vector<128x32xf32> -> vector<256x32xf32>
    %162 = arith.mulf %161, %3 : vector<256x32xf32>
    %163 = tpu.concatenate %160, %160 in 0 : vector<128x32xf32>, vector<128x32xf32> -> vector<256x32xf32>
    %164 = arith.mulf %163, %3 : vector<256x32xf32>
    %cst_59 = arith.constant dense<0.000000e+00> : vector<128x256xf32>
    %165 = tpu.matmul %153, %162, %cst_59 {dimension_numbers = #tpu.dot_dimension_numbers<[1], [1], [0], [0], [0, 0, 1, 0], [], []>} : vector<128x32xf32>, vector<256x32xf32>, vector<128x256xf32> -> vector<128x256xf32>
    %cst_60 = arith.constant 2.500000e-01 : f32
    %166 = vector.broadcast %cst_60 : f32 to vector<128x256xf32>
    %167 = arith.mulf %165, %166 : vector<128x256xf32>
    %168 = arith.addf %167, %2 : vector<128x256xf32>
    %cst_61 = arith.constant 0.000000e+00 : f32
    %169 = vector.broadcast %cst_61 : f32 to vector<128x32xf32>
    %170 = vector.extract_strided_slice %168 {offsets = [0, 0], sizes = [128, 128], strides = [1, 1]} : vector<128x256xf32> to vector<128x128xf32>
    %cst_62 = arith.constant dense<0xFF800000> : vector<128xf32>
    %171 = vector.multi_reduction <maximumf>, %170, %cst_62 [1] : vector<128x128xf32> to vector<128xf32>
    %172 = vector.shape_cast %171 : vector<128xf32> to vector<128x1xf32>
    %173 = vector.broadcast %172 : vector<128x1xf32> to vector<128x128xf32>
    %174 = arith.subf %170, %173 : vector<128x128xf32>
    %175 = math.exp %174 : vector<128x128xf32>
    %cst_63 = arith.constant dense<0.000000e+00> : vector<128xf32>
    %176 = vector.multi_reduction <add>, %175, %cst_63 [1] : vector<128x128xf32> to vector<128xf32>
    %177 = vector.shape_cast %176 : vector<128xf32> to vector<128x1xf32>
    %178 = tpu.reciprocal %177 : vector<128x1xf32> -> vector<128x1xf32>
    %179 = vector.extract_strided_slice %3 {offsets = [0, 0], sizes = [1, 32], strides = [1, 1]} : vector<256x32xf32> to vector<1x32xf32>
    %180 = vector.broadcast %178 : vector<128x1xf32> to vector<128x32xf32>
    %181 = vector.broadcast %179 : vector<1x32xf32> to vector<128x32xf32>
    %182 = arith.mulf %180, %181 : vector<128x32xf32>
    %183 = arith.addf %169, %182 : vector<128x32xf32>
    %184 = vector.extract_strided_slice %168 {offsets = [0, 128], sizes = [128, 128], strides = [1, 1]} : vector<128x256xf32> to vector<128x128xf32>
    %cst_64 = arith.constant dense<0xFF800000> : vector<128xf32>
    %185 = vector.multi_reduction <maximumf>, %184, %cst_64 [1] : vector<128x128xf32> to vector<128xf32>
    %186 = vector.shape_cast %185 : vector<128xf32> to vector<128x1xf32>
    %187 = vector.broadcast %186 : vector<128x1xf32> to vector<128x128xf32>
    %188 = arith.subf %184, %187 : vector<128x128xf32>
    %189 = math.exp %188 : vector<128x128xf32>
    %cst_65 = arith.constant dense<0.000000e+00> : vector<128xf32>
    %190 = vector.multi_reduction <add>, %189, %cst_65 [1] : vector<128x128xf32> to vector<128xf32>
    %191 = vector.shape_cast %190 : vector<128xf32> to vector<128x1xf32>
    %192 = tpu.reciprocal %191 : vector<128x1xf32> -> vector<128x1xf32>
    %193 = vector.extract_strided_slice %3 {offsets = [128, 0], sizes = [1, 32], strides = [1, 1]} : vector<256x32xf32> to vector<1x32xf32>
    %194 = vector.broadcast %192 : vector<128x1xf32> to vector<128x32xf32>
    %195 = vector.broadcast %193 : vector<1x32xf32> to vector<128x32xf32>
    %196 = arith.mulf %194, %195 : vector<128x32xf32>
    %197 = arith.addf %183, %196 : vector<128x32xf32>
    %198 = tpu.concatenate %175, %189 in 1 : vector<128x128xf32>, vector<128x128xf32> -> vector<128x256xf32>
    %cst_66 = arith.constant dense<0.000000e+00> : vector<128x32xf32>
    %199 = tpu.matmul %198, %164, %cst_66 {dimension_numbers = #tpu.dot_dimension_numbers<[1], [0], [0], [1], [0, 0, 1, 1], [], []>} : vector<128x256xf32>, vector<256x32xf32>, vector<128x32xf32> -> vector<128x32xf32>
    %200 = arith.mulf %199, %197 : vector<128x32xf32>
    %c224 = arith.constant 224 : index
    %c0_67 = arith.constant 0 : index
    %201 = vector.load %arg5[%c224, %c0_67] : memref<320x64xf32, #tpu.memory_space<vmem>>, vector<32x32xf32>
    %cst_68 = arith.constant dense<0.000000e+00> : vector<128x32xf32>
    %202 = tpu.matmul %200, %201, %cst_68 {dimension_numbers = #tpu.dot_dimension_numbers<[1], [0], [0], [1], [0, 0, 1, 1], [], []>} : vector<128x32xf32>, vector<32x32xf32>, vector<128x32xf32> -> vector<128x32xf32>
    %c13 = arith.constant 13 : index
    %c0_69 = arith.constant 0 : index
    %203 = vector.load %arg6[%c13, %c0_69] : memref<20x64xf32, #tpu.memory_space<vmem>>, vector<1x32xf32>
    %204 = vector.broadcast %203 : vector<1x32xf32> to vector<128x32xf32>
    %205 = arith.addf %202, %204 : vector<128x32xf32>
    %206 = arith.addf %148, %205 : vector<128x32xf32>
    %c14 = arith.constant 14 : index
    %c0_70 = arith.constant 0 : index
    %207 = vector.load %arg6[%c14, %c0_70] : memref<20x64xf32, #tpu.memory_space<vmem>>, vector<1x32xf32>
    %c15 = arith.constant 15 : index
    %c0_71 = arith.constant 0 : index
    %208 = vector.load %arg6[%c15, %c0_71] : memref<20x64xf32, #tpu.memory_space<vmem>>, vector<1x32xf32>
    %cst_72 = arith.constant dense<0.000000e+00> : vector<128xf32>
    %209 = vector.multi_reduction <add>, %206, %cst_72 [1] : vector<128x32xf32> to vector<128xf32>
    %210 = vector.shape_cast %209 : vector<128xf32> to vector<128x1xf32>
    %cst_73 = arith.constant 3.200000e+01 : f32
    %211 = vector.broadcast %cst_73 : f32 to vector<128x1xf32>
    %212 = arith.divf %210, %211 : vector<128x1xf32>
    %213 = vector.broadcast %212 : vector<128x1xf32> to vector<128x32xf32>
    %214 = arith.subf %206, %213 : vector<128x32xf32>
    %215 = arith.mulf %214, %214 : vector<128x32xf32>
    %cst_74 = arith.constant dense<0.000000e+00> : vector<128xf32>
    %216 = vector.multi_reduction <add>, %215, %cst_74 [1] : vector<128x32xf32> to vector<128xf32>
    %217 = vector.shape_cast %216 : vector<128xf32> to vector<128x1xf32>
    %cst_75 = arith.constant 3.200000e+01 : f32
    %218 = vector.broadcast %cst_75 : f32 to vector<128x1xf32>
    %219 = arith.divf %217, %218 : vector<128x1xf32>
    %220 = vector.broadcast %212 : vector<128x1xf32> to vector<128x32xf32>
    %221 = arith.subf %206, %220 : vector<128x32xf32>
    %cst_76 = arith.constant 9.99999993E-9 : f32
    %222 = vector.broadcast %cst_76 : f32 to vector<128x1xf32>
    %223 = arith.addf %219, %222 : vector<128x1xf32>
    %224 = math.sqrt %223 : vector<128x1xf32>
    %225 = vector.broadcast %224 : vector<128x1xf32> to vector<128x32xf32>
    %226 = arith.divf %221, %225 : vector<128x32xf32>
    %227 = vector.broadcast %207 : vector<1x32xf32> to vector<128x32xf32>
    %228 = arith.mulf %226, %227 : vector<128x32xf32>
    %229 = vector.broadcast %208 : vector<1x32xf32> to vector<128x32xf32>
    %230 = arith.addf %228, %229 : vector<128x32xf32>
    %c256 = arith.constant 256 : index
    %c0_77 = arith.constant 0 : index
    %231 = vector.load %arg5[%c256, %c0_77] : memref<320x64xf32, #tpu.memory_space<vmem>>, vector<32x32xf32>
    %cst_78 = arith.constant dense<0.000000e+00> : vector<128x32xf32>
    %232 = tpu.matmul %230, %231, %cst_78 {dimension_numbers = #tpu.dot_dimension_numbers<[1], [0], [0], [1], [0, 0, 1, 1], [], []>} : vector<128x32xf32>, vector<32x32xf32>, vector<128x32xf32> -> vector<128x32xf32>
    %c16 = arith.constant 16 : index
    %c0_79 = arith.constant 0 : index
    %233 = vector.load %arg6[%c16, %c0_79] : memref<20x64xf32, #tpu.memory_space<vmem>>, vector<1x32xf32>
    %234 = vector.broadcast %233 : vector<1x32xf32> to vector<128x32xf32>
    %235 = arith.addf %232, %234 : vector<128x32xf32>
    %cst_80 = arith.constant 0.000000e+00 : f32
    %236 = vector.broadcast %cst_80 : f32 to vector<128x32xf32>
    %237 = arith.maximumf %235, %236 : vector<128x32xf32>
    %c288 = arith.constant 288 : index
    %c0_81 = arith.constant 0 : index
    %238 = vector.load %arg5[%c288, %c0_81] : memref<320x64xf32, #tpu.memory_space<vmem>>, vector<32x32xf32>
    %cst_82 = arith.constant dense<0.000000e+00> : vector<128x32xf32>
    %239 = tpu.matmul %237, %238, %cst_82 {dimension_numbers = #tpu.dot_dimension_numbers<[1], [0], [0], [1], [0, 0, 1, 1], [], []>} : vector<128x32xf32>, vector<32x32xf32>, vector<128x32xf32> -> vector<128x32xf32>
    %240 = arith.addf %230, %239 : vector<128x32xf32>
    %c17 = arith.constant 17 : index
    %c0_83 = arith.constant 0 : index
    %241 = vector.load %arg6[%c17, %c0_83] : memref<20x64xf32, #tpu.memory_space<vmem>>, vector<1x32xf32>
    %242 = vector.broadcast %241 : vector<1x32xf32> to vector<128x32xf32>
    %243 = arith.addf %240, %242 : vector<128x32xf32>
    %244 = arith.mulf %243, %1 : vector<128x32xf32>
    %c18 = arith.constant 18 : index
    %c0_84 = arith.constant 0 : index
    %245 = vector.load %arg6[%c18, %c0_84] : memref<20x64xf32, #tpu.memory_space<vmem>>, vector<1x32xf32>
    %c19 = arith.constant 19 : index
    %c0_85 = arith.constant 0 : index
    %246 = vector.load %arg6[%c19, %c0_85] : memref<20x64xf32, #tpu.memory_space<vmem>>, vector<1x32xf32>
    %cst_86 = arith.constant dense<0.000000e+00> : vector<128xf32>
    %247 = vector.multi_reduction <add>, %244, %cst_86 [1] : vector<128x32xf32> to vector<128xf32>
    %248 = vector.shape_cast %247 : vector<128xf32> to vector<128x1xf32>
    %cst_87 = arith.constant 3.200000e+01 : f32
    %249 = vector.broadcast %cst_87 : f32 to vector<128x1xf32>
    %250 = arith.divf %248, %249 : vector<128x1xf32>
    %251 = vector.broadcast %250 : vector<128x1xf32> to vector<128x32xf32>
    %252 = arith.subf %244, %251 : vector<128x32xf32>
    %253 = arith.mulf %252, %252 : vector<128x32xf32>
    %cst_88 = arith.constant dense<0.000000e+00> : vector<128xf32>
    %254 = vector.multi_reduction <add>, %253, %cst_88 [1] : vector<128x32xf32> to vector<128xf32>
    %255 = vector.shape_cast %254 : vector<128xf32> to vector<128x1xf32>
    %cst_89 = arith.constant 3.200000e+01 : f32
    %256 = vector.broadcast %cst_89 : f32 to vector<128x1xf32>
    %257 = arith.divf %255, %256 : vector<128x1xf32>
    %258 = vector.broadcast %250 : vector<128x1xf32> to vector<128x32xf32>
    %259 = arith.subf %244, %258 : vector<128x32xf32>
    %cst_90 = arith.constant 9.99999993E-9 : f32
    %260 = vector.broadcast %cst_90 : f32 to vector<128x1xf32>
    %261 = arith.addf %257, %260 : vector<128x1xf32>
    %262 = math.sqrt %261 : vector<128x1xf32>
    %263 = vector.broadcast %262 : vector<128x1xf32> to vector<128x32xf32>
    %264 = arith.divf %259, %263 : vector<128x32xf32>
    %265 = vector.broadcast %245 : vector<1x32xf32> to vector<128x32xf32>
    %266 = arith.mulf %264, %265 : vector<128x32xf32>
    %267 = vector.broadcast %246 : vector<1x32xf32> to vector<128x32xf32>
    %268 = arith.addf %266, %267 : vector<128x32xf32>
    %269 = vector.shape_cast %268 : vector<128x32xf32> to vector<1x128x32xf32>
    %c0_91 = arith.constant 0 : index
    %c0_92 = arith.constant 0 : index
    %c0_93 = arith.constant 0 : index
    %270 = vector.load %arg7[%c0_91, %c0_92, %c0_93] : memref<2x128x32xf32, #tpu.memory_space<vmem>>, vector<2x128x32xf32>
    %271 = vector.broadcast %269 : vector<1x128x32xf32> to vector<2x128x32xf32>
    %272 = arith.mulf %271, %270 : vector<2x128x32xf32>
    %cst_94 = arith.constant dense<0.000000e+00> : vector<2x128xf32>
    %273 = vector.multi_reduction <add>, %272, %cst_94 [2] : vector<2x128x32xf32> to vector<2x128xf32>
    %c0_95 = arith.constant 0 : index
    %c0_96 = arith.constant 0 : index
    %c0_97 = arith.constant 0 : index
    %274 = vector.load %arg8[%c0_95, %c0_96, %c0_97] : memref<1x2x128xf32, #tpu.memory_space<vmem>>, vector<1x2x128xf32>
    %275 = vector.shape_cast %274 : vector<1x2x128xf32> to vector<2x128xf32>
    %276 = vector.shape_cast %273 : vector<2x128xf32> to vector<1x2x128xf32>
    tpu.vector_store %arg8[%c0_95, %c0_96, %c0_97], %276 {strides = array<i32>} : memref<1x2x128xf32, #tpu.memory_space<vmem>>, vector<1x2x128xf32>,
    return
  }
  func.func @transform_0(%arg0: i32) -> (i32, i32) {
    %c0_i32 = arith.constant 0 : i32
    %c0_i32_0 = arith.constant 0 : i32
    return %arg0, %c0_i32 : i32, i32
  }
  func.func @transform_1(%arg0: i32) -> (i32, i32) {
    %c0_i32 = arith.constant 0 : i32
    %c0_i32_0 = arith.constant 0 : i32
    return %arg0, %c0_i32 : i32, i32
  }
  func.func @transform_2(%arg0: i32) -> (i32, i32) {
    %c0_i32 = arith.constant 0 : i32
    %c0_i32_0 = arith.constant 0 : i32
    %c0_i32_1 = arith.constant 0 : i32
    return %c0_i32, %c0_i32_0 : i32, i32
  }
  func.func @transform_3(%arg0: i32) -> (i32, i32) {
    %c0_i32 = arith.constant 0 : i32
    %c0_i32_0 = arith.constant 0 : i32
    %c0_i32_1 = arith.constant 0 : i32
    return %c0_i32, %c0_i32_0 : i32, i32
  }
  func.func @transform_4(%arg0: i32) -> (i32, i32) {
    %c0_i32 = arith.constant 0 : i32
    %c0_i32_0 = arith.constant 0 : i32
    %c0_i32_1 = arith.constant 0 : i32
    return %c0_i32, %c0_i32_0 : i32, i32
  }
  func.func @transform_5(%arg0: i32) -> (i32, i32) {
    %c0_i32 = arith.constant 0 : i32
    %c0_i32_0 = arith.constant 0 : i32
    %c0_i32_1 = arith.constant 0 : i32
    return %c0_i32, %c0_i32_0 : i32, i32
  }
  func.func @transform_6(%arg0: i32) -> (i32, i32, i32) {
    %c0_i32 = arith.constant 0 : i32
    %c0_i32_0 = arith.constant 0 : i32
    %c0_i32_1 = arith.constant 0 : i32
    return %c0_i32, %arg0, %c0_i32_0 : i32, i32, i32
  }
  func.func @transform_7(%arg0: i32) -> (i32, i32, i32) {
    %c0_i32 = arith.constant 0 : i32
    %c0_i32_0 = arith.constant 0 : i32
    %c0_i32_1 = arith.constant 0 : i32
    return %arg0, %c0_i32, %c0_i32_0 : i32, i32, i32
  }
}

</mosaic_0001>

<bundles_post_ra>
// kernel: tpu_custom_call.1
= control target key start
LH: loop header
LB: loop body
LE: loop exit
PB: predicated region body
PF: predicated region fallthrough
CT: control target
= control target key end

     0   :  { %12 = vsyncpa [#allocation4], 0  ;;  %s13683_s0 = inlined_call_operand.vmem [shape: f32[256,32], index: 0, kind: input, shape index: {}]   ;;  %s13684_s1 = inlined_call_operand.vmem [shape: f32[256,32], index: 1, kind: input, shape index: {}]   ;;  %s13685_s2 = inlined_call_operand.vmem [shape: f32[128,256], index: 2, kind: input, shape index: {}]   ;;  %s13686_s3 = inlined_call_operand.vmem [shape: f32[256,32], index: 3, kind: input, shape index: {}]   ;;  %s13687_s4 = inlined_call_operand.vmem [shape: f32[320,64], index: 4, kind: input, shape index: {}]   ;;  %s13688_s5 = inlined_call_operand.vmem [shape: f32[20,64], index: 5, kind: input, shape index: {}]   ;;  %s13689_s6 = inlined_call_operand.vmem [shape: f32[2,256,32], index: 6, kind: input, shape index: {}]   ;;  %s13690_s7 = inlined_call_operand.hbm [shape: f32[2,2,128], index: 7, kind: output, shape index: {}]  }
   0x1   :  { %14 = vsyncpa [#allocation4 + $0x1], 0  ;;  %s9618_s24 = smov 0   ;;  %s9620_s25 = smov 0  }
   0x2   :  { %s9622_s26 = smov 0   ;;  %s9624_s27 = smov 0  }
   0x3 LB: > { %s9639_s28 = sadd.s32 4294967295, %s9573_s27   ;;  %s7294_s29 = sadd.s32 4294967294, %s9573_s27   ;;  %s9573_s27 = sphi %s9624_s27, %s13971_s27   ;;  %s9569_s26 = sphi %s9622_s26, %s13970_s26   ;;  %s9565_s25 = sphi %s9620_s25, %s13969_s25   ;;  %s9561_s24 = sphi %s9618_s24, %s13968_s24  }
   0x4   : > { %s9643_s30 = sadd.s32 1, %s9573_s27   ;;  %s163_s8 = sadd.s32 1, %s9569_s26 }
   0x5   : > { %s160_s9 = ssub.s32 %s9573_s27, %s9643_s30  ;;  %p170_p0 = scmp.ne.s32.totalorder %s9569_s26, %s9565_s25 }
   0x6   : > { %p161_p1 = scmp.eq.s32.totalorder %s160_s9, 0  ;;  %p171_p2 = scmp.eq.s32.totalorder %s9573_s27, 0 }
   0x7   : > { %p200_p3 = scmp.eq.s32.totalorder %s9639_s28, 1  ;;  %p205_p4 = scmp.ne.s32.totalorder %s9565_s25, %s9561_s24 }
   0x8   : > { %s9655_s10 = scalar_select %p161_p1, %s9569_s26, %s163_s8  }
   0x9   : > { %p172_p5 = por %p171_p2, %p170_p0  ;;  %p9657_p6 = por %p200_p3, %p170_p0 }
   0xa   : > { %p206_p7 = scmp.eq.s32.totalorder %s7294_s29, 1  ;;  %p7296_p9 = scmp.ge.s32.totalorder %s9573_s27, 2 }
   0xc   : > { %p9661_p8 = por %p206_p7, %p205_p4  ;;  %234 = sbr.rel (%p7296_p9) target bundleno = 39 (0x27), region = 32 }
  0x13   : > { %255 = sbr.rel (!%p172_p5) target bundleno = 39 (0x27), region = 44  ;;  %s257_s13 = sand.u32 (%p172_p5), 1, %s9569_s26  }
  0x14   : > { %s7587_s14 = sshll.u32 (%p172_p5), %s9573_s27, 7  ;;  %s7297_s15 = sshll.u32 (%p172_p5), %s257_s13, 8 }
  0x15   : > { %s9673_s18 = scalar_lea.vmem (%p172_p5), %s13689_s6, %s7587_s14  ;;  %s9678_s19 = scalar_lea.vmem (%p172_p5), [#allocation2], %s7297_s15 }
  0x16   : > { %v352_v0 = vld [vmem:[%s9673_s18] sm:$0xff] (%p172_p5)  ;;  %v354_v1 = vld [vmem:[%s9673_s18 + $0x8] sm:$0xff] (%p172_p5)  ;;  %v356_v2 = vld [vmem:[%s9673_s18 + $0x10] sm:$0xff] (%p172_p5) }
  0x17   : > { %353 = vst [vmem:[%s9678_s19] sm:$0xff] (%p172_p5), %v352_v0  ;;  %355 = vst [vmem:[%s9678_s19 + $0x8] sm:$0xff] (%p172_p5), %v354_v1  ;;  %v358_v3 = vld [vmem:[%s9673_s18 + $0x18] sm:$0xff] (%p172_p5)  ;;  %v360_v4 = vld [vmem:[%s9673_s18 + $0x20] sm:$0xff] (%p172_p5) }
  0x18   : > { %357 = vst [vmem:[%s9678_s19 + $0x10] sm:$0xff] (%p172_p5), %v356_v2  ;;  %v362_v5 = vld [vmem:[%s9673_s18 + $0x28] sm:$0xff] (%p172_p5)  ;;  %359 = vst [vmem:[%s9678_s19 + $0x18] sm:$0xff] (%p172_p5), %v358_v3  ;;  %v364_v6 = vld [vmem:[%s9673_s18 + $0x30] sm:$0xff] (%p172_p5) }
  0x19   : > { %361 = vst [vmem:[%s9678_s19 + $0x20] sm:$0xff] (%p172_p5), %v360_v4  ;;  %363 = vst [vmem:[%s9678_s19 + $0x28] sm:$0xff] (%p172_p5), %v362_v5  ;;  %v366_v7 = vld [vmem:[%s9673_s18 + $0x38] sm:$0xff] (%p172_p5)  ;;  %v368_v8 = vld [vmem:[%s9673_s18 + $0x40] sm:$0xff] (%p172_p5) }
  0x1a   : > { %365 = vst [vmem:[%s9678_s19 + $0x30] sm:$0xff] %v364_v6  ;;  %367 = vst [vmem:[%s9678_s19 + $0x38] sm:$0xff] %v366_v7  ;;  %v370_v9 = vld [vmem:[%s9673_s18 + $0x48] sm:$0xff]  ;;  %v372_v10 = vld [vmem:[%s9673_s18 + $0x50] sm:$0xff] }
  0x1b   : > { %369 = vst [vmem:[%s9678_s19 + $0x40] sm:$0xff] %v368_v8  ;;  %v374_v11 = vld [vmem:[%s9673_s18 + $0x58] sm:$0xff]  ;;  %371 = vst [vmem:[%s9678_s19 + $0x48] sm:$0xff] %v370_v9  ;;  %v376_v12 = vld [vmem:[%s9673_s18 + $0x60] sm:$0xff] }
  0x1c   : > { %373 = vst [vmem:[%s9678_s19 + $0x50] sm:$0xff] %v372_v10  ;;  %375 = vst [vmem:[%s9678_s19 + $0x58] sm:$0xff] %v374_v11  ;;  %v378_v13 = vld [vmem:[%s9673_s18 + $0x68] sm:$0xff]  ;;  %v380_v14 = vld [vmem:[%s9673_s18 + $0x70] sm:$0xff] }
  0x1d   : > { %377 = vst [vmem:[%s9678_s19 + $0x60] sm:$0xff] %v376_v12  ;;  %379 = vst [vmem:[%s9678_s19 + $0x68] sm:$0xff] %v378_v13  ;;  %v382_v15 = vld [vmem:[%s9673_s18 + $0x78] sm:$0xff]  ;;  %v384_v16 = vld [vmem:[%s9673_s18 + $0x100] sm:$0xff] }
  0x1e   : > { %381 = vst [vmem:[%s9678_s19 + $0x70] sm:$0xff] %v380_v14  ;;  %v386_v17 = vld [vmem:[%s9673_s18 + $0x108] sm:$0xff]  ;;  %383 = vst [vmem:[%s9678_s19 + $0x78] sm:$0xff] %v382_v15  ;;  %v388_v18 = vld [vmem:[%s9673_s18 + $0x110] sm:$0xff] }
  0x1f   : > { %385 = vst [vmem:[%s9678_s19 + $0x80] sm:$0xff] %v384_v16  ;;  %387 = vst [vmem:[%s9678_s19 + $0x88] sm:$0xff] %v386_v17  ;;  %v390_v19 = vld [vmem:[%s9673_s18 + $0x118] sm:$0xff]  ;;  %v392_v20 = vld [vmem:[%s9673_s18 + $0x120] sm:$0xff] }
  0x20   : > { %389 = vst [vmem:[%s9678_s19 + $0x90] sm:$0xff] %v388_v18  ;;  %391 = vst [vmem:[%s9678_s19 + $0x98] sm:$0xff] %v390_v19  ;;  %v394_v21 = vld [vmem:[%s9673_s18 + $0x128] sm:$0xff]  ;;  %v396_v22 = vld [vmem:[%s9673_s18 + $0x130] sm:$0xff] }
  0x21   : > { %393 = vst [vmem:[%s9678_s19 + $0xa0] sm:$0xff] %v392_v20  ;;  %v398_v23 = vld [vmem:[%s9673_s18 + $0x138] sm:$0xff]  ;;  %395 = vst [vmem:[%s9678_s19 + $0xa8] sm:$0xff] %v394_v21  ;;  %v400_v24 = vld [vmem:[%s9673_s18 + $0x140] sm:$0xff] }
  0x22   : > { %397 = vst [vmem:[%s9678_s19 + $0xb0] sm:$0xff] %v396_v22  ;;  %399 = vst [vmem:[%s9678_s19 + $0xb8] sm:$0xff] %v398_v23  ;;  %v402_v25 = vld [vmem:[%s9673_s18 + $0x148] sm:$0xff]  ;;  %v404_v26 = vld [vmem:[%s9673_s18 + $0x150] sm:$0xff] }
  0x23   : > { %401 = vst [vmem:[%s9678_s19 + $0xc0] sm:$0xff] %v400_v24  ;;  %403 = vst [vmem:[%s9678_s19 + $0xc8] sm:$0xff] %v402_v25  ;;  %v406_v27 = vld [vmem:[%s9673_s18 + $0x158] sm:$0xff]  ;;  %v408_v28 = vld [vmem:[%s9673_s18 + $0x160] sm:$0xff] }
  0x24   : > { %405 = vst [vmem:[%s9678_s19 + $0xd0] sm:$0xff] %v404_v26  ;;  %v410_v29 = vld [vmem:[%s9673_s18 + $0x168] sm:$0xff]  ;;  %407 = vst [vmem:[%s9678_s19 + $0xd8] sm:$0xff] %v406_v27  ;;  %v412_v30 = vld [vmem:[%s9673_s18 + $0x170] sm:$0xff] }
  0x25   : > { %409 = vst [vmem:[%s9678_s19 + $0xe0] sm:$0xff] %v408_v28  ;;  %411 = vst [vmem:[%s9678_s19 + $0xe8] sm:$0xff] %v410_v29  ;;  %v414_v31 = vld [vmem:[%s9673_s18 + $0x178] sm:$0xff] }
  0x26   : > { %413 = vst [vmem:[%s9678_s19 + $0xf0] sm:$0xff] %v412_v30  ;;  %415 = vst [vmem:[%s9678_s19 + $0xf8] sm:$0xff] %v414_v31 }
  0x27 PF: > { %p7300_p10 = scmp.ge.s32.totalorder %s9573_s27, 1  ;;  %p420_p11 = scmp.lt.s32.totalorder %s9573_s27, 3 }
  0x29   : > { %p421_p12 = pnand %p7300_p10, %p420_p11 }
  0x2b   : > { %424 = sbr.rel (%p421_p12) target bundleno = 4925 (0x133d), region = 82 }
  0x32   : > { %s7303_s20 = sshll.u32 %s9639_s28, 4  ;;  %vm595_vm0 = vcmask 261120   ;;  %s9575_s19 = smov 32  }
  0x33   : > { %p469_p13 = scmp.lt.s32.totalorder %s7303_s20, 31  ;;  %vm10137_vm1 = vmpackc.low %vm595_vm0, %vm595_vm0  ;;  %s9576_s14 = smov 96  }
  0x34   : > { %s7584_s17 = sshll.u32 %s9639_s28, 5 }
  0x35   : > { %s13973_s20 = smov (!%p469_p13, %s7303_s20), 31  ;;  %s13639_s23 = scalar_lea.hbm %s13690_s7, %s7584_s17 }
  0x36   : > { %s7304_s21 = sshll.u32 %s13973_s20, 3 }
  0x37   : > { %s9747_s29 = scalar_lea.vmem %s13683_s0, %s7304_s21  ;;  %s9752_s13 = scalar_lea.vmem %s13684_s1, %s7304_s21 }
  0x38   : > { %v481_v32 = vld [vmem:[%s9747_s29] sm:$0xff]  ;;  %v483_v34 = vld [vmem:[%s9747_s29 + $0x10] sm:$0xff]  ;;  %v482_v37 = vld [vmem:[%s9747_s29 + $0x8] sm:$0xff] }
  0x39   : > { %v497_v33 = vld [vmem:[%s9752_s13] sm:$0xff]  ;;  %v499_v36 = vld [vmem:[%s9752_s13 + $0x10] sm:$0xff]  ;;  %v498_v38 = vld [vmem:[%s9752_s13 + $0x8] sm:$0xff] }
  0x3a   : > { %v9757_v35 = vmul.f32 %v497_v33, %v481_v32  ;;  %v9762_v39 = vmul.f32 %v499_v36, %v483_v34  ;;  %v9764_v40 = vmul.f32 %v498_v38, %v482_v37  ;;  %v484_v41 = vld [vmem:[%s9747_s29 + $0x18] sm:$0xff]  ;;  %v485_v43 = vld [vmem:[%s9747_s29 + $0x20] sm:$0xff]  ;;  %v486_v47 = vld [vmem:[%s9747_s29 + $0x28] sm:$0xff] }
  0x3b   : > { %v500_v42 = vld [vmem:[%s9752_s13 + $0x18] sm:$0xff]  ;;  %v501_v46 = vld [vmem:[%s9752_s13 + $0x20] sm:$0xff]  ;;  %v502_v48 = vld [vmem:[%s9752_s13 + $0x28] sm:$0xff] }
  0x3c   : > { %v596_v44 = vsel %vm595_vm0, %v9757_v35, 0.0  ;;  %v9771_v45 = vmul.f32 %v500_v42, %v484_v41  ;;  %8116 = vmatprep.mubr.msk.f32.mxu1 %vm595_vm0, %v9757_v35  ;;  %v602_v49 = vsel %vm595_vm0, %v9762_v39, 0.0  ;;  %v599_v50 = vsel %vm595_vm0, %v9764_v40, 0.0  ;;  %v487_v54 = vld [vmem:[%s9747_s29 + $0x30] sm:$0xff]  ;;  %v488_v56 = vld [vmem:[%s9747_s29 + $0x38] sm:$0xff]  ;;  %v489_v62 = vld [vmem:[%s9747_s29 + $0x40] sm:$0xff] }
  0x3d   : > { %597 = vadd.xlane.f32.xlu0 %v596_v44  ;;  %603 = vadd.xlane.f32.xlu1 %v602_v49  ;;  %v9782_v51 = vmul.f32 %v501_v46, %v485_v43  ;;  %v9786_v53 = vmul.f32 %v502_v48, %v486_v47  ;;  %v503_v55 = vld [vmem:[%s9752_s13 + $0x30] sm:$0xff]  ;;  %v504_v57 = vld [vmem:[%s9752_s13 + $0x38] sm:$0xff]  ;;  %v505_v63 = vld [vmem:[%s9752_s13 + $0x40] sm:$0xff] }
  0x3e   : > { %v605_v52 = vsel %vm595_vm0, %v9771_v45, 0.0  ;;  %v9794_v59 = vmul.f32 %v503_v55, %v487_v54  ;;  %v9798_v61 = vmul.f32 %v504_v57, %v488_v56  ;;  %v490_v0 = vld [vmem:[%s9747_s29 + $0x48] sm:$0xff]  ;;  %v9806_v3 = vmul.f32 %v505_v63, %v489_v62  ;;  %v491_v6 = vld [vmem:[%s9747_s29 + $0x50] sm:$0xff]  ;;  %v492_v8 = vld [vmem:[%s9747_s29 + $0x58] sm:$0xff] }
  0x3f   : > { %v608_v58 = vsel %vm595_vm0, %v9782_v51, 0.0  ;;  %v611_v60 = vsel %vm595_vm0, %v9786_v53, 0.0  ;;  %v506_v1 = vld [vmem:[%s9752_s13 + $0x48] sm:$0xff]  ;;  %v507_v7 = vld [vmem:[%s9752_s13 + $0x50] sm:$0xff]  ;;  %v508_v9 = vld [vmem:[%s9752_s13 + $0x58] sm:$0xff] }
  0x40   : > { %v614_v2 = vsel %vm595_vm0, %v9794_v59, 0.0  ;;  %v617_v4 = vsel %vm595_vm0, %v9798_v61, 0.0  ;;  %v9810_v5 = vmul.f32 %v506_v1, %v490_v0  ;;  %v620_v10 = vsel %vm595_vm0, %v9806_v3, 0.0  ;;  %v493_v14 = vld [vmem:[%s9747_s29 + $0x60] sm:$0xff]  ;;  %v494_v16 = vld [vmem:[%s9747_s29 + $0x68] sm:$0xff]  ;;  %v495_v22 = vld [vmem:[%s9747_s29 + $0x70] sm:$0xff] }
  0x41   : > { %600 = vadd.xlane.f32.xlu0 %v599_v50  ;;  %606 = vadd.xlane.f32.xlu1 %v605_v52  ;;  %v9818_v11 = vmul.f32 %v507_v7, %v491_v6  ;;  %v9822_v13 = vmul.f32 %v508_v9, %v492_v8  ;;  %v509_v15 = vld [vmem:[%s9752_s13 + $0x60] sm:$0xff]  ;;  %v510_v17 = vld [vmem:[%s9752_s13 + $0x68] sm:$0xff]  ;;  %v511_v23 = vld [vmem:[%s9752_s13 + $0x70] sm:$0xff] }
  0x42   : > { %v623_v12 = vsel %vm595_vm0, %v9810_v5, 0.0  ;;  %v9830_v19 = vmul.f32 %v509_v15, %v493_v14  ;;  %v9834_v21 = vmul.f32 %v510_v17, %v494_v16  ;;  %v496_v24 = vld [vmem:[%s9747_s29 + $0x78] sm:$0xff]  ;;  %v9842_v27 = vmul.f32 %v511_v23, %v495_v22  ;;  %v1159_v32 = vld [vmem:[%s13687_s4 + $0x20] sm:$0xff]  ;;  %v1160_v33 = vld [vmem:[%s13687_s4 + $0x28] sm:$0xff]  ;;  %s9577_s29 = smov [#allocation3]  }
  0x43   : > { %v626_v18 = vsel %vm595_vm0, %v9818_v11, 0.0  ;;  %v629_v20 = vsel %vm595_vm0, %v9822_v13, 0.0  ;;  %v512_v25 = vld [vmem:[%s9752_s13 + $0x78] sm:$0xff]  ;;  %v1161_v34 = vld [vmem:[%s13687_s4 + $0x30] sm:$0xff]  ;;  %v8404_v36 = vpack.c.bf16 %v1160_v33, %v1159_v32  ;;  %s9515_s8 = sshll.u32 %s9577_s29, 4  ;;  %s9516_s8 = int_to_ptr.vmem [resolvable:$false] %s9515_s8 }
  0x44   : > { %v632_v26 = vsel %vm595_vm0, %v9830_v19, 0.0  ;;  %v635_v28 = vsel %vm595_vm0, %v9834_v21, 0.0  ;;  %v9846_v29 = vmul.f32 %v512_v25, %v496_v24  ;;  %v638_v30 = vsel %vm595_vm0, %v9842_v27, 0.0  ;;  %v1162_v37 = vld [vmem:[%s13687_s4 + $0x38] sm:$0xff]  ;;  %s9517_s9 = scalar_lea.vmem %s9516_s8, 64 }
  0x45   : > { %609 = vadd.xlane.f32.xlu0 %v608_v58  ;;  %612 = vadd.xlane.f32.xlu1 %v611_v60  ;;  %v8408_v38 = vpack.c.bf16 %v1162_v37, %v1161_v34 }
  0x46   : > { %v641_v31 = vsel %vm595_vm0, %v9846_v29, 0.0  ;;  %8405 = vmatprep.subr.bf16.mxu1 %v8404_v36 }
  0x47   : > { %8407 = vmatpush3.bf16.msra.mxu1 %v8404_v36 }
  0x48   : > { %8409 = vmatprep.subr.bf16.mxu1 %v8408_v38 }
  0x49   : > { %615 = vadd.xlane.f32.xlu0 %v614_v2  ;;  %618 = vadd.xlane.f32.xlu1 %v617_v4 }
  0x4b   : > { %8411 = vmatpush3.bf16.msra.mxu1 %v8408_v38 }
  0x4d   : > { %621 = vadd.xlane.f32.xlu0 %v620_v10  ;;  %624 = vadd.xlane.f32.xlu1 %v623_v12 }
  0x4e   : > { %8117 = vmatmul.mubr.msk.f32.vlgmr.msra.gmra.mrb[0].mxu1 %vm595_vm0, %v9764_v40 }
  0x4f   : > { %8119 = vmatprep.mubr.msk.f32.mxu1 %vm595_vm0, %v9762_v39 }
  0x51   : > { %627 = vadd.xlane.f32.xlu0 %v626_v18  ;;  %630 = vadd.xlane.f32.xlu1 %v629_v20 }
  0x52   : > { %8120 = vmatmul.mubr.msk.f32.gmra.mrb[2].mxu1 %vm595_vm0, %v9771_v45 }
  0x53   : > { %8122 = vmatprep.mubr.msk.f32.mxu1 %vm595_vm0, %v9782_v51 }
  0x55   : > { %633 = vadd.xlane.f32.xlu0 %v632_v26  ;;  %636 = vadd.xlane.f32.xlu1 %v635_v28 }
  0x56   : > { %8123 = vmatmul.mubr.msk.f32.gmra.mrb[4].mxu1 %vm595_vm0, %v9786_v53 }
  0x57   : > { %8125 = vmatprep.mubr.msk.f32.mxu1 %vm595_vm0, %v9794_v59 }
  0x59   : > { %639 = vadd.xlane.f32.xlu0 %v638_v30  ;;  %642 = vadd.xlane.f32.xlu1 %v641_v31 }
  0x5a   : > { %8126 = vmatmul.mubr.msk.f32.gmra.mrb[6].mxu1 %vm595_vm0, %v9798_v61 }
  0x5b   : > { %8128 = vmatprep.mubr.msk.f32.mxu1 %vm595_vm0, %v9806_v3 }
  0x5e   : > { %8129 = vmatmul.mubr.msk.f32.gmra.mrb[8].mxu1 %vm595_vm0, %v9810_v5 }
  0x5f   : > { %8131 = vmatprep.mubr.msk.f32.mxu1 %vm595_vm0, %v9818_v11 }
  0x62   : > { %8132 = vmatmul.mubr.msk.f32.gmra.mrb[10].mxu1 %vm595_vm0, %v9822_v13 }
  0x63   : > { %8134 = vmatprep.mubr.msk.f32.mxu1 %vm595_vm0, %v9830_v19 }
  0x66   : > { %8135 = vmatmul.mubr.msk.f32.gmra.mrb[12].mxu1 %vm595_vm0, %v9834_v21 }
  0x67   : > { %8137 = vmatprep.mubr.msk.f32.mxu1 %vm595_vm0, %v9842_v27 }
  0x6a   : > { %8138 = vmatmul.mubr.msk.f32.gmra.mrb[14].mxu1 %vm595_vm0, %v9846_v29 }
  0xca   : > { %v598_v41 = vpop.xlane.xlu0 %597  ;;  %v604_v43 = vpop.xlane.xlu1 %603 }
  0xcb   : > { %v645_v42 = vmul.f32 0.03125, %v598_v41  ;;  %v647_v44 = vmul.f32 0.03125, %v604_v43 }
  0xcd   : > { %v9895_v46 = vsub.f32 %v9757_v35, %v645_v42  ;;  %v9898_v47 = vsub.f32 %v9762_v39, %v647_v44 }
  0xce   : > { %v601_v48 = vpop.xlane.xlu0 %600  ;;  %v607_v50 = vpop.xlane.xlu1 %606 }
  0xcf   : > { %v646_v49 = vmul.f32 0.03125, %v601_v48  ;;  %v677_v52 = vmul.f32 %v9895_v46, %v9895_v46  ;;  %v648_v54 = vmul.f32 0.03125, %v607_v50  ;;  %v679_v55 = vmul.f32 %v9898_v47, %v9898_v47 }
  0xd1   : > { %v9905_v56 = vsub.f32 %v9764_v40, %v646_v49  ;;  %v693_v57 = vsel %vm595_vm0, %v677_v52, 0.0  ;;  %v9909_v35 = vsub.f32 %v9771_v45, %v648_v54  ;;  %v699_v62 = vsel %vm595_vm0, %v679_v55, 0.0 }
  0xd2   : > { %694 = vadd.xlane.f32.xlu0 %v693_v57  ;;  %v610_v39 = vpop.xlane.xlu0 %609  ;;  %v613_v60 = vpop.xlane.xlu1 %612 }
  0xd3   : > { %v649_v58 = vmul.f32 0.03125, %v610_v39  ;;  %v678_v63 = vmul.f32 %v9905_v56, %v9905_v56  ;;  %v650_v0 = vmul.f32 0.03125, %v613_v60  ;;  %v680_v1 = vmul.f32 %v9909_v35, %v9909_v35 }
  0xd5   : > { %v9917_v40 = vsub.f32 %v9782_v51, %v649_v58  ;;  %v696_v2 = vsel %vm595_vm0, %v678_v63, 0.0  ;;  %v9921_v45 = vsub.f32 %v9786_v53, %v650_v0  ;;  %v702_v8 = vsel %vm595_vm0, %v680_v1, 0.0  ;;  %v958_v1 = vld [vmem:[%s13687_s4 + $0x8] sm:$0xff] }
  0xd6   : > { %700 = vadd.xlane.f32.xlu0 %v699_v62  ;;  %697 = vadd.xlane.f32.xlu1 %v696_v2  ;;  %v616_v4 = vpop.xlane.xlu0 %615  ;;  %v619_v7 = vpop.xlane.xlu1 %618 }
  0xd7   : > { %v651_v6 = vmul.f32 0.03125, %v616_v4  ;;  %v681_v9 = vmul.f32 %v9917_v40, %v9917_v40  ;;  %v652_v10 = vmul.f32 0.03125, %v619_v7  ;;  %v682_v51 = vmul.f32 %v9921_v45, %v9921_v45  ;;  %v959_v4 = vld [vmem:[%s13687_s4 + $0x10] sm:$0xff] }
  0xd9   : > { %v9929_v12 = vsub.f32 %v9794_v59, %v651_v6  ;;  %v705_v53 = vsel %vm595_vm0, %v681_v9, 0.0  ;;  %v9933_v14 = vsub.f32 %v9798_v61, %v652_v10  ;;  %v708_v18 = vsel %vm595_vm0, %v682_v51, 0.0  ;;  %v960_v6 = vld [vmem:[%s13687_s4 + $0x18] sm:$0xff]  ;;  %v10009_v9 = vld [vmem:[%s13686_s3] sm:$0xff]  ;;  %v10019_v51 = vld [vmem:[%s13686_s3 + $0x8] sm:$0xff] }
  0xda   : > { %703 = vadd.xlane.f32.xlu1 %v702_v8  ;;  %706 = vadd.xlane.f32.xlu0 %v705_v53  ;;  %v622_v15 = vpop.xlane.xlu0 %621  ;;  %v625_v17 = vpop.xlane.xlu1 %624  ;;  %v8400_v7 = vpack.c.bf16 %v960_v6, %v959_v4  ;;  %v562_v8 = vld [vmem:[%s13686_s3 + $0x88] sm:$0xff]  ;;  %v561_v10 = vld [vmem:[%s13686_s3 + $0x80] sm:$0xff]  ;;  %v563_v53 = vld [vmem:[%s13686_s3 + $0x90] sm:$0xff] }
  0xdb   : > { %v653_v16 = vmul.f32 0.03125, %v622_v15  ;;  %v683_v20 = vmul.f32 %v9929_v12, %v9929_v12  ;;  %v654_v22 = vmul.f32 0.03125, %v625_v17  ;;  %v684_v59 = vmul.f32 %v9933_v14, %v9933_v14  ;;  %v564_v15 = vld [vmem:[%s13686_s3 + $0x98] sm:$0xff] }
  0xdc   : > { %v548_v17 = vld [vmem:[%s13686_s3 + $0x18] sm:$0xff] }
  0xdd   : > { %v9941_v23 = vsub.f32 %v9806_v3, %v653_v16  ;;  %v711_v61 = vsel %vm595_vm0, %v683_v20, 0.0  ;;  %v9945_v24 = vsub.f32 %v9810_v5, %v654_v22  ;;  %v714_v30 = vsel %vm595_vm0, %v684_v59, 0.0  ;;  %v547_v16 = vld [vmem:[%s13686_s3 + $0x10] sm:$0xff]  ;;  %v566_v20 = vld [vmem:[%s13686_s3 + $0xa8] sm:$0xff]  ;;  %v549_v22 = vld [vmem:[%s13686_s3 + $0x20] sm:$0xff] }
  0xde   : > { %709 = vadd.xlane.f32.xlu1 %v708_v18  ;;  %712 = vadd.xlane.f32.xlu0 %v711_v61  ;;  %v628_v25 = vpop.xlane.xlu0 %627  ;;  %v631_v28 = vpop.xlane.xlu1 %630  ;;  %v565_v18 = vld [vmem:[%s13686_s3 + $0xa0] sm:$0xff]  ;;  %v550_v59 = vld [vmem:[%s13686_s3 + $0x28] sm:$0xff]  ;;  %v10059_v61 = vld [vmem:[%s13686_s3 + $0xb0] sm:$0xff] }
  0xdf   : > { %v655_v26 = vmul.f32 0.03125, %v628_v25  ;;  %v685_v31 = vmul.f32 %v9941_v23, %v9941_v23  ;;  %v656_v32 = vmul.f32 0.03125, %v631_v28  ;;  %v686_v3 = vmul.f32 %v9945_v24, %v9945_v24  ;;  %v10064_v25 = vld [vmem:[%s13686_s3 + $0xb8] sm:$0xff] }
  0xe0   : > { %v552_v28 = vld [vmem:[%s13686_s3 + $0x38] sm:$0xff] }
  0xe1   : > { %v9953_v33 = vsub.f32 %v9818_v11, %v655_v26  ;;  %v717_v5 = vsel %vm595_vm0, %v685_v31, 0.0  ;;  %v9957_v34 = vsub.f32 %v9822_v13, %v656_v32  ;;  %v720_v41 = vsel %vm595_vm0, %v686_v3, 0.0  ;;  %v10073_v26 = vld [vmem:[%s13686_s3 + $0x30] sm:$0xff]  ;;  %v10089_v31 = vld [vmem:[%s13686_s3 + $0xc8] sm:$0xff]  ;;  %v10096_v32 = vld [vmem:[%s13688_s5 + $0x3] ss:$0 sm:$0xff] }
  0xe2   : > { %715 = vadd.xlane.f32.xlu1 %v714_v30  ;;  %718 = vadd.xlane.f32.xlu0 %v717_v5  ;;  %v634_v36 = vpop.xlane.xlu0 %633  ;;  %v637_v38 = vpop.xlane.xlu1 %636  ;;  %v10084_v30 = vld [vmem:[%s13686_s3 + $0xc0] sm:$0xff]  ;;  %v10108_v5 = vld [vmem:[%s13686_s3 + $0x48] sm:$0xff] }
  0xe3   : > { %v657_v37 = vmul.f32 0.03125, %v634_v36  ;;  %v687_v42 = vmul.f32 %v9953_v33, %v9953_v33  ;;  %v658_v43 = vmul.f32 0.03125, %v637_v38  ;;  %v688_v11 = vmul.f32 %v9957_v34, %v9957_v34  ;;  %v10103_v3 = vld [vmem:[%s13686_s3 + $0x40] sm:$0xff] }
  0xe5   : > { %v9965_v44 = vsub.f32 %v9830_v19, %v657_v37  ;;  %v723_v13 = vsel %vm595_vm0, %v687_v42, 0.0  ;;  %v9969_v48 = vsub.f32 %v9834_v21, %v658_v43  ;;  %v726_v54 = vsel %vm595_vm0, %v688_v11, 0.0  ;;  %v10123_v42 = vld [vmem:[%s13686_s3 + $0xd0] sm:$0xff]  ;;  %v10129_v11 = vld [vmem:[%s13686_s3 + $0xd8] sm:$0xff] }
  0xe6   : > { %721 = vadd.xlane.f32.xlu1 %v720_v41  ;;  %724 = vadd.xlane.f32.xlu0 %v723_v13  ;;  %v640_v49 = vpop.xlane.xlu0 %639  ;;  %v643_v52 = vpop.xlane.xlu1 %642 }
  0xe7   : > { %13787 = vst [vmem:[#allocation6_spill] sm:$0xff] %v9969_v48  ;;  %v659_v50 = vmul.f32 0.03125, %v640_v49  ;;  %v689_v55 = vmul.f32 %v9965_v44, %v9965_v44  ;;  %v660_v57 = vmul.f32 0.03125, %v643_v52  ;;  %v690_v19 = vmul.f32 %v9969_v48, %v9969_v48 }
  0xe8   : > { %v13793_v52 = vmov 0 }
  0xe9   : > { %v9977_v39 = vsub.f32 %v9842_v27, %v659_v50  ;;  %v729_v21 = vsel %vm595_vm0, %v689_v55, 0.0  ;;  %v9981_v58 = vsub.f32 %v9846_v29, %v660_v57  ;;  %v732_v60 = vsel %vm595_vm0, %v690_v19, 0.0  ;;  %v957_v29 = vld [vmem:[%s13687_s4] sm:$0xff]  ;;  %v10151_v19 = vld [vmem:[%s13686_s3 + $0x50] sm:$0xff] }
  0xea   : > { %727 = vadd.xlane.f32.xlu1 %v726_v54  ;;  %730 = vadd.xlane.f32.xlu0 %v729_v21  ;;  %v8396_v2 = vpack.c.bf16 %v958_v1, %v957_v29  ;;  %v13794_v52 = vsel %vm10137_vm1, 4294967295, %v13793_v52 }
  0xeb   : > { %13788 = vst [vmem:[#allocation7_spill] sm:$0xff] %v9977_v39  ;;  %13789 = vst [vmem:[#allocation8_spill] sm:$0xff] %v9981_v58  ;;  %v691_v62 = vmul.f32 %v9977_v39, %v9977_v39  ;;  %v692_v63 = vmul.f32 %v9981_v58, %v9981_v58 }
  0xec   : > { %8397 = vmatprep.subr.bf16.mxu0 %v8396_v2  ;;  %13795 = vst [vmem:[#allocation12_spill] sm:$0xff] %v13794_v52 }
  0xed   : > { %v735_v0 = vsel %vm595_vm0, %v691_v62, 0.0  ;;  %v738_v27 = vsel %vm595_vm0, %v692_v63, 0.0  ;;  %8399 = vmatpush3.bf16.msra.mxu0 %v8396_v2  ;;  %v10162_v62 = vld [vmem:[%s13686_s3 + $0x58] sm:$0xff] }
  0xee   : > { %733 = vadd.xlane.f32.xlu1 %v732_v60  ;;  %736 = vadd.xlane.f32.xlu0 %v735_v0 }
  0xef   : > { %8401 = vmatprep.subr.bf16.mxu0 %v8400_v7 }
  0xf1   : > { %8403 = vmatpush3.bf16.msra.mxu0 %v8400_v7  ;;  %v10189_v7 = vld [vmem:[%s13686_s3 + $0xe0] sm:$0xff] }
  0xf2   : > { %739 = vadd.xlane.f32.xlu1 %v738_v27 }
 0x103   : > { %1459 = vrot.lane.b32.xlu1 %v562_v8, %s9575_s19 }
 0x104   : > { %1457 = vrot.lane.b32.xlu0 %v561_v10, %s9575_s19 }
 0x107   : > { %1425 = vrot.lane.b32.xlu1 %v10009_v9, %s9575_s19 }
 0x108   : > { %1461 = vrot.lane.b32.xlu0 %v563_v53, %s9575_s19 }
 0x10b   : > { %1427 = vrot.lane.b32.xlu1 %v10019_v51, %s9575_s19 }
 0x10c   : > { %1429 = vrot.lane.b32.xlu0 %v547_v16, %s9575_s19 }
 0x10f   : > { %1463 = vrot.lane.b32.xlu1 %v564_v15, %s9575_s19 }
 0x110   : > { %1465 = vrot.lane.b32.xlu0 %v565_v18, %s9575_s19 }
 0x113   : > { %1431 = vrot.lane.b32.xlu1 %v548_v17, %s9575_s19 }
 0x114   : > { %1433 = vrot.lane.b32.xlu0 %v549_v22, %s9575_s19 }
 0x117   : > { %1467 = vrot.lane.b32.xlu1 %v566_v20, %s9575_s19 }
 0x118   : > { %1469 = vrot.lane.b32.xlu0 %v10059_v61, %s9575_s19 }
 0x11b   : > { %1435 = vrot.lane.b32.xlu1 %v550_v59, %s9575_s19 }
 0x11c   : > { %1437 = vrot.lane.b32.xlu0 %v10073_v26, %s9575_s19 }
 0x11f   : > { %1471 = vrot.lane.b32.xlu1 %v10064_v25, %s9575_s19 }
 0x120   : > { %1473 = vrot.lane.b32.xlu0 %v10084_v30, %s9575_s19 }
 0x121   : > { %v8118_v36 = vpop.f32.mrb[0].mxu1 }
 0x122   : > { %v10111_v37 = vadd.f32 %v8118_v36, %v10096_v32  ;;  %v1282_v38 = vpop.f32.mrb[1].mxu1 }
 0x123   : > { %1439 = vrot.lane.b32.xlu1 %v552_v28, %s9575_s19  ;;  %v10116_v41 = vadd.f32 %v10096_v32, %v1282_v38 }
 0x124   : > { %13790 = vst [vmem:[#allocation9_spill] sm:$0xff] %v10111_v37  ;;  %1441 = vrot.lane.b32.xlu0 %v10103_v3, %s9575_s19  ;;  %v1378_v43 = vmul.f32 %v10111_v37, %v562_v8 }
 0x125   : > { %13791 = vst [vmem:[#allocation10_spill] sm:$0xff] %v10116_v41  ;;  %v1377_v13 = vmul.f32 %v10116_v41, %v561_v10  ;;  %v8121_v49 = vpop.f32.mrb[2].mxu1 }
 0x126   : > { %v10133_v50 = vadd.f32 %v8121_v49, %v10096_v32  ;;  %v1292_v54 = vpop.f32.mrb[3].mxu1 }
 0x127   : > { %1475 = vrot.lane.b32.xlu1 %v10089_v31, %s9575_s19  ;;  %v8412_v55 = vpack.c.bf16 %v1378_v43, %v1377_v13  ;;  %v10144_v57 = vadd.f32 %v10096_v32, %v1292_v54 }
 0x128   : > { %13792 = vst [vmem:[#allocation11_spill] sm:$0xff] %v10133_v50  ;;  %1477 = vrot.lane.b32.xlu0 %v10123_v42, %s9575_s19  ;;  %v10154_v21 = vmul.f32 %v10133_v50, %v548_v17  ;;  %v10157_v60 = vmul.f32 %v10133_v50, %v564_v15 }
 0x129   : > { %13796 = vst [vmem:[#allocation13_spill] sm:$0xff] %v10144_v57  ;;  %8414 = vmatprep.subr.msk.bf16.mxu0 %vm10137_vm1, %v8412_v55  ;;  %v10167_v63 = vmul.f32 %v10144_v57, %v547_v16  ;;  %v10170_v0 = vmul.f32 %v10144_v57, %v563_v53  ;;  %v8124_v27 = vpop.f32.mrb[4].mxu1  ;;  %v10200_v53 = vld [vmem:[%s13686_s3 + $0xe8] sm:$0xff] }
 0x12a   : > { %v10173_v29 = vadd.f32 %v8124_v27, %v10096_v32  ;;  %v1302_v1 = vpop.f32.mrb[5].mxu1  ;;  %v558_v55 = vld [vmem:[%s13686_s3 + $0x68] sm:$0xff] }
 0x12b   : > { %1443 = vrot.lane.b32.xlu1 %v10108_v5, %s9575_s19  ;;  %v10180_v4 = vadd.f32 %v10096_v32, %v1302_v1 }
 0x12c   : > { %13797 = vst [vmem:[#allocation14_spill] sm:$0xff] %v10173_v29  ;;  %1445 = vrot.lane.b32.xlu0 %v10151_v19, %s9575_s19  ;;  %v10192_v8 = vmul.f32 %v10173_v29, %v550_v59  ;;  %v10195_v10 = vmul.f32 %v10173_v29, %v566_v20 }
 0x12d   : > { %13798 = vst [vmem:[#allocation15_spill] sm:$0xff] %v10180_v4  ;;  %v10203_v15 = vmul.f32 %v10180_v4, %v549_v22  ;;  %v10206_v16 = vmul.f32 %v10180_v4, %v565_v18  ;;  %v8127_v17 = vpop.f32.mrb[6].mxu1  ;;  %v10225_v18 = vld [vmem:[%s13686_s3 + $0x60] sm:$0xff] }
 0x12e   : > { %13799 = vst [vmem:[#allocation16_spill] sm:$0xff] %v10192_v8  ;;  %v10209_v36 = vadd.f32 %v8127_v17, %v10096_v32  ;;  %v1312_v59 = vpop.f32.mrb[7].mxu1 }
 0x12f   : > { %1479 = vrot.lane.b32.xlu1 %v10129_v11, %s9575_s19  ;;  %13800 = vst [vmem:[#allocation17_spill] sm:$0xff] %v10203_v15  ;;  %v10216_v38 = vadd.f32 %v10096_v32, %v1312_v59 }
 0x130   : > { %13801 = vst [vmem:[#allocation18_spill] sm:$0xff] %v10209_v36  ;;  %1481 = vrot.lane.b32.xlu0 %v10189_v7, %s9575_s19  ;;  %v10228_v13 = vmul.f32 %v10209_v36, %v552_v28  ;;  %v10232_v49 = vmul.f32 %v10209_v36, %v10064_v25 }
 0x131   : > { %13802 = vst [vmem:[#allocation19_spill] sm:$0xff] %v10216_v38  ;;  %v10239_v27 = vmul.f32 %v10216_v38, %v10073_v26  ;;  %v10243_v1 = vmul.f32 %v10216_v38, %v10059_v61  ;;  %v8130_v17 = vpop.f32.mrb[8].mxu1  ;;  %v10276_v61 = vld [vmem:[%s13686_s3 + $0xf8] sm:$0xff] }
 0x132   : > { %13803 = vst [vmem:[#allocation20_spill] sm:$0xff] %v10228_v13  ;;  %13804 = vst [vmem:[#allocation21_spill] sm:$0xff] %v10232_v49  ;;  %v10246_v28 = vadd.f32 %v8130_v17, %v10096_v32  ;;  %v1322_v59 = vpop.f32.mrb[9].mxu1 }
 0x133   : > { %1447 = vrot.lane.b32.xlu1 %v10162_v62, %s9575_s19  ;;  %13805 = vst [vmem:[#allocation22_spill] sm:$0xff] %v10239_v27  ;;  %13806 = vst [vmem:[#allocation23_spill] sm:$0xff] %v10243_v1  ;;  %v10255_v26 = vadd.f32 %v10096_v32, %v1322_v59 }
 0x134   : > { %13807 = vst [vmem:[#allocation24_spill] sm:$0xff] %v10246_v28  ;;  %1449 = vrot.lane.b32.xlu0 %v10225_v18, %s9575_s19  ;;  %v10267_v17 = vmul.f32 %v10246_v28, %v10108_v5  ;;  %v10271_v59 = vmul.f32 %v10246_v28, %v10089_v31  ;;  %13812 = vst [vmem:[#allocation29_spill] sm:$0xff] %v10276_v61 }
 0x135   : > { %13808 = vst [vmem:[#allocation25_spill] sm:$0xff] %v10255_v26  ;;  %v8133_v2 = vpop.f32.mrb[10].mxu1  ;;  %v10280_v36 = vmul.f32 %v10255_v26, %v10103_v3  ;;  %v10284_v5 = vmul.f32 %v10255_v26, %v10084_v30  ;;  %v10304_v30 = vld [vmem:[%s13686_s3 + $0x70] sm:$0xff] }
 0x136   : > { %13810 = vst [vmem:[#allocation27_spill] sm:$0xff] %v10267_v17  ;;  %13811 = vst [vmem:[#allocation28_spill] sm:$0xff] %v10271_v59  ;;  %v1332_v38 = vpop.f32.mrb[11].mxu1 }
 0x137   : > { %1483 = vrot.lane.b32.xlu1 %v10200_v53, %s9575_s19  ;;  %13813 = vst [vmem:[#allocation30_spill] sm:$0xff] %v10280_v36  ;;  %13814 = vst [vmem:[#allocation31_spill] sm:$0xff] %v10284_v5 }
 0x138   : > { %13817 = vst [vmem:[#allocation34_spill] sm:$0xff] %v10304_v30 }
 0x13b   : > { %1451 = vrot.lane.b32.xlu1 %v558_v55, %s9575_s19 }
 0x13f   : > { %1487 = vrot.lane.b32.xlu1 %v10276_v61, %s9575_s19 }
 0x15f   : > { %v695_v43 = vpop.xlane.xlu0 %694 }
 0x160   : > { %v741_v54 = vmul.f32 0.03125, %v695_v43 }
 0x162   : > { %v10248_v25 = vadd.f32 1e-08, %v741_v54  ;;  %v10263_v54 = vld [vmem:[%s13686_s3 + $0xf0] sm:$0xff] }
 0x163   : > { %v698_v20 = vpop.xlane.xlu1 %697  ;;  %v701_v22 = vpop.xlane.xlu0 %700  ;;  %13809 = vst [vmem:[#allocation26_spill] sm:$0xff] %v10263_v54  ;;  %1485 = vrot.lane.b32.xlu0 %v10263_v54, %s9575_s19 }
 0x164   : > { %v742_v43 = vmul.f32 0.03125, %v698_v20  ;;  %v743_v6 = vmul.f32 0.03125, %v701_v22  ;;  %8837 = vrsqrt.f32 %v10248_v25  ;;  %v10292_v20 = vadd.f32 %v8133_v2, %v10096_v32 }
 0x165   : > { %v10295_v22 = vadd.f32 %v10096_v32, %v1332_v38  ;;  %v8136_v38 = vpop.f32.mrb[12].mxu1  ;;  %vm775_vm2 = vcmp.eq.f32.partialorder %v10248_v25, inf  ;;  %vm777_vm6 = vcmp.eq.f32.partialorder %v10248_v25, 0.0 }
 0x166   : > { %v10287_v31 = vadd.f32 1e-08, %v742_v43  ;;  %13815 = vst [vmem:[#allocation32_spill] sm:$0xff] %v10292_v20  ;;  %v10297_v3 = vadd.f32 1e-08, %v743_v6  ;;  %v10314_v6 = vld [vmem:[%s13686_s3 + $0x78] sm:$0xff]  ;;  %v10321_v43 = vmul.f32 %v10111_v37, %v10019_v51  ;;  %v10325_v2 = vmul.f32 %v10292_v20, %v10162_v62 }
 0x167   : > { %13816 = vst [vmem:[#allocation33_spill] sm:$0xff] %v10295_v22  ;;  %v704_v28 = vpop.xlane.xlu1 %703  ;;  %v707_v29 = vpop.xlane.xlu0 %706  ;;  %13818 = vst [vmem:[#allocation35_spill] sm:$0xff] %v10314_v6  ;;  %1453 = vrot.lane.b32.xlu0 %v10304_v30, %s9575_s19  ;;  %1455 = vrot.lane.b32.xlu1 %v10314_v6, %s9575_s19  ;;  %v10338_v51 = vadd.f32 %v8136_v38, %v10096_v32 }
 0x168   : > { %8839 = vrsqrt.f32 %v10287_v31  ;;  %v1342_v26 = vpop.f32.mrb[13].mxu1  ;;  %v744_v54 = vmul.f32 0.03125, %v704_v28  ;;  %v745_v61 = vmul.f32 0.03125, %v707_v29  ;;  %13819 = vst [vmem:[#allocation36_spill] sm:$0xff] %v10325_v2  ;;  %v10331_v28 = vmul.f32 %v10116_v41, %v10009_v9 }
 0x169   : > { %8841 = vrsqrt.f32 %v10297_v3  ;;  %v10335_v29 = vmul.f32 %v10295_v22, %v10151_v19  ;;  %13821 = vst [vmem:[#allocation38_spill] sm:$0xff] %v10338_v51  ;;  %v10341_v30 = vadd.f32 %v10096_v32, %v1342_v26  ;;  %v10350_v59 = vmul.f32 %v10338_v51, %v558_v55  ;;  %v10356_v38 = vpop.f32.mrb[14].mxu1 }
 0x16a   : > { %v10343_v62 = vadd.f32 1e-08, %v744_v54  ;;  %v10345_v4 = vadd.f32 1e-08, %v745_v61  ;;  %v10359_v26 = vpop.f32.mrb[15].mxu1  ;;  %vm782_vm3 = vcmp.eq.f32.partialorder %v10287_v31, inf }
 0x16b   : > { %v710_v36 = vpop.xlane.xlu1 %709  ;;  %v713_v17 = vpop.xlane.xlu0 %712  ;;  %13820 = vst [vmem:[#allocation37_spill] sm:$0xff] %v10335_v29  ;;  %13822 = vst [vmem:[#allocation39_spill] sm:$0xff] %v10341_v30  ;;  %v10354_v19 = vmul.f32 %v10341_v30, %v10225_v18  ;;  %v778_v29 = vand.u32 2147483648, %v10248_v25  ;;  %vm784_vm4 = vcmp.eq.f32.partialorder %v10287_v31, 0.0  ;;  %v785_v54 = vand.u32 2147483648, %v10287_v31 }
 0x16c   : > { %v746_v5 = vmul.f32 0.03125, %v710_v36  ;;  %v747_v6 = vmul.f32 0.03125, %v713_v17  ;;  %13823 = vst [vmem:[#allocation40_spill] sm:$0xff] %v10350_v59  ;;  %8843 = vrsqrt.f32 %v10343_v62  ;;  %vm789_vm5 = vcmp.eq.f32.partialorder %v10297_v3, inf }
 0x16d   : > { %13824 = vst [vmem:[#allocation41_spill] sm:$0xff] %v10354_v19  ;;  %8845 = vrsqrt.f32 %v10345_v4  ;;  %vm791_vm7 = vcmp.eq.f32.partialorder %v10297_v3, 0.0  ;;  %v10384_v19 = vmul.f32 %v10292_v20, %v10129_v11  ;;  %v10388_v59 = vmul.f32 %v10295_v22, %v10123_v42 }
 0x16e   : > { %v8838_v17 = vpop.eup %8837  ;;  %v10365_v55 = vadd.f32 1e-08, %v746_v5  ;;  %v10367_v18 = vadd.f32 1e-08, %v747_v6  ;;  %v792_v5 = vand.u32 2147483648, %v10297_v3  ;;  %vm796_vm8 = vcmp.eq.f32.partialorder %v10343_v62, inf }
 0x16f   : > { %v716_v36 = vpop.xlane.xlu1 %715  ;;  %v719_v61 = vpop.xlane.xlu0 %718  ;;  %v10399_v11 = vmul.f32 %v10338_v51, %v10200_v53  ;;  %v799_v20 = vand.u32 2147483648, %v10343_v62  ;;  %vm803_vm9 = vcmp.eq.f32.partialorder %v10345_v4, inf  ;;  %v10412_v53 = vmul.f32 %v10341_v30, %v10189_v7 }
 0x170   : > { %v748_v9 = vmul.f32 0.03125, %v716_v36  ;;  %v749_v2 = vmul.f32 0.03125, %v719_v61  ;;  %8847 = vrsqrt.f32 %v10365_v55  ;;  %v774_v36 = vmul.f32 %v8838_v17, %v10248_v25 }
 0x171   : > { %8849 = vrsqrt.f32 %v10367_v18  ;;  %vm810_vm10 = vcmp.eq.f32.partialorder %v10365_v55, inf  ;;  %vm798_vm11 = vcmp.eq.f32.partialorder %v10343_v62, 0.0  ;;  %vm805_vm12 = vcmp.eq.f32.partialorder %v10345_v4, 0.0 }
 0x172   : > { %v8840_v13 = vpop.eup %8839  ;;  %v10392_v1 = vadd.f32 1e-08, %v748_v9  ;;  %v10394_v17 = vadd.f32 1e-08, %v749_v2  ;;  %v813_v42 = vand.u32 2147483648, %v10365_v55  ;;  %vm812_vm13 = vcmp.eq.f32.partialorder %v10365_v55, 0.0 }
 0x173   : > { %v8842_v6 = vpop.eup %8841  ;;  %v722_v61 = vpop.xlane.xlu1 %721  ;;  %v781_v50 = vmul.f32 %v8840_v13, %v10287_v31  ;;  %vm817_vm14 = vcmp.eq.f32.partialorder %v10367_v18, inf  ;;  %vm819_vm15 = vcmp.eq.f32.partialorder %v10367_v18, 0.0 }
 0x174   : > { %v725_v27 = vpop.xlane.xlu0 %724  ;;  %v788_v57 = vmul.f32 %v8842_v6, %v10297_v3  ;;  %v750_v49 = vmul.f32 0.03125, %v722_v61  ;;  %8851 = vrsqrt.f32 %v10392_v1  ;;  %v827_v41 = vand.u32 2147483648, %v10392_v1 }
 0x175   : > { %v751_v15 = vmul.f32 0.03125, %v725_v27  ;;  %8853 = vrsqrt.f32 %v10394_v17  ;;  %v776_v27 = vsel %vm775_vm2, %v10248_v25, %v774_v36  ;;  %v783_v6 = vsel %vm782_vm3, %v10287_v31, %v781_v50 }
 0x176   : > { %v8844_v9 = vpop.eup %8843  ;;  %v790_v61 = vsel %vm789_vm5, %v10297_v3, %v788_v57  ;;  %v10423_v36 = vadd.f32 1e-08, %v750_v49  ;;  %v820_v57 = vand.u32 2147483648, %v10367_v18  ;;  %v786_v49 = vsel %vm784_vm4, %v785_v54, %v783_v6 }
 0x177   : > { %v728_v13 = vpop.xlane.xlu1 %727  ;;  %v8846_v51 = vpop.eup %8845  ;;  %v795_v7 = vmul.f32 %v8844_v9, %v10343_v62  ;;  %v10427_v30 = vadd.f32 1e-08, %v751_v15  ;;  %vm824_vm2 = vcmp.eq.f32.partialorder %v10392_v1, inf  ;;  %v793_v8 = vsel %vm791_vm7, %v792_v5, %v790_v61 }
 0x178   : > { %v731_v2 = vpop.xlane.xlu0 %730  ;;  %v752_v50 = vmul.f32 0.03125, %v728_v13  ;;  %8855 = vrsqrt.f32 %v10423_v36  ;;  %v779_v13 = vsel %vm777_vm6, %v778_v29, %v776_v27  ;;  %v802_v58 = vmul.f32 %v8846_v51, %v10345_v4 }
 0x179   : > { %v753_v22 = vmul.f32 0.03125, %v731_v2  ;;  %8857 = vrsqrt.f32 %v10427_v30  ;;  %vm831_vm3 = vcmp.eq.f32.partialorder %v10394_v17, inf  ;;  %v797_v54 = vsel %vm796_vm8, %v10343_v62, %v795_v7 }
 0x17a   : > { %v8848_v2 = vpop.eup %8847  ;;  %vm826_vm4 = vcmp.eq.f32.partialorder %v10392_v1, 0.0  ;;  %v10449_v25 = vadd.f32 1e-08, %v752_v50  ;;  %8859 = vrcp.f32 %v779_v13  ;;  %vm833_vm5 = vcmp.eq.f32.partialorder %v10394_v17, 0.0 }
 0x17b   : > { %v734_v9 = vpop.xlane.xlu1 %733  ;;  %v8850_v31 = vpop.eup %8849  ;;  %v809_v6 = vmul.f32 %v8848_v2, %v10365_v55  ;;  %v10451_v29 = vadd.f32 1e-08, %v753_v22  ;;  %v834_v27 = vand.u32 2147483648, %v10394_v17  ;;  %vm838_vm6 = vcmp.eq.f32.partialorder %v10423_v36, inf }
 0x17c   : > { %v737_v15 = vpop.xlane.xlu0 %736  ;;  %v816_v3 = vmul.f32 %v8850_v31, %v10367_v18  ;;  %v754_v51 = vmul.f32 0.03125, %v734_v9  ;;  %8861 = vrsqrt.f32 %v10449_v25  ;;  %v804_v7 = vsel %vm803_vm9, %v10345_v4, %v802_v58 }
 0x17d   : > { %v755_v5 = vmul.f32 0.03125, %v737_v15  ;;  %vm840_vm7 = vcmp.eq.f32.partialorder %v10423_v36, 0.0  ;;  %v841_v22 = vand.u32 2147483648, %v10423_v36  ;;  %vm845_vm8 = vcmp.eq.f32.partialorder %v10427_v30, inf }
 0x17e   : > { %v8852_v61 = vpop.eup %8851  ;;  %8863 = vrsqrt.f32 %v10451_v29  ;;  %v800_v15 = vsel %vm798_vm11, %v799_v20, %v797_v54  ;;  %v811_v13 = vsel %vm810_vm10, %v10365_v55, %v809_v6  ;;  %v848_v58 = vand.u32 2147483648, %v10427_v30 }
 0x17f   : > { %v740_v50 = vpop.xlane.xlu1 %739  ;;  %v8854_v9 = vpop.eup %8853  ;;  %v823_v2 = vmul.f32 %v8852_v61, %v10392_v1  ;;  %v818_v31 = vsel %vm817_vm14, %v10367_v18, %v816_v3  ;;  %vm847_vm9 = vcmp.eq.f32.partialorder %v10427_v30, 0.0  ;;  %v10477_v39 = vadd.f32 1e-08, %v754_v51 }
 0x180   : > { %v830_v37 = vmul.f32 %v8854_v9, %v10394_v17  ;;  %v10479_v62 = vadd.f32 1e-08, %v755_v5  ;;  %v13825_v20 = vand.u32 2147483648, %v10345_v4  ;;  %v756_v6 = vmul.f32 0.03125, %v740_v50 }
 0x181   : > { %8865 = vrcp.f32 %v786_v49  ;;  %v8442_v61 = vpack.c.bf16 %v10384_v19, %v10388_v59  ;;  %v814_v3 = vsel %vm812_vm13, %v813_v42, %v811_v13  ;;  %vm852_vm10 = vcmp.eq.f32.partialorder %v10449_v25, inf }
 0x182   : > { %v807_v54 = vsel %vm805_vm12, %v13825_v20, %v804_v7  ;;  %v8856_v48 = vpop.eup %8855  ;;  %vm854_vm11 = vcmp.eq.f32.partialorder %v10449_v25, 0.0  ;;  %8867 = vrsqrt.f32 %v10477_v39  ;;  %v821_v4 = vsel %vm819_vm15, %v820_v57, %v818_v31  ;;  %v10540_v20 = vld [vmem:[%s13688_s5 + $0x1] ss:$0 sm:$0xff] }
 0x183   : > { %v8858_v51 = vpop.eup %8857  ;;  %v825_v49 = vsel %vm824_vm2, %v10392_v1, %v823_v2  ;;  %v837_v5 = vmul.f32 %v8856_v48, %v10423_v36  ;;  %v855_v7 = vand.u32 2147483648, %v10449_v25  ;;  %v832_v55 = vsel %vm831_vm3, %v10394_v17, %v830_v37 }
 0x184   : > { %v844_v42 = vmul.f32 %v8858_v51, %v10427_v30  ;;  %vm859_vm12 = vcmp.eq.f32.partialorder %v10451_v29, inf  ;;  %8869 = vrsqrt.f32 %v10479_v62  ;;  %vm861_vm13 = vcmp.eq.f32.partialorder %v10451_v29, 0.0  ;;  %v8860_v48 = vpop.eup %8859 }
 0x185   : > { %v862_v18 = vand.u32 2147483648, %v10451_v29  ;;  %v10507_v57 = vadd.f32 1e-08, %v756_v6  ;;  %8871 = vrcp.f32 %v793_v8  ;;  %v828_v50 = vsel %vm826_vm4, %v827_v41, %v825_v49  ;;  %v10526_v41 = vld [vmem:[%s13688_s5] ss:$0 sm:$0xff] }
 0x186   : > { %v839_v37 = vsel %vm838_vm6, %v10423_v36, %v837_v5  ;;  %8873 = vrcp.f32 %v800_v15  ;;  %v10516_v9 = vadd.f32 %v10356_v38, %v10096_v32  ;;  %v8862_v13 = vpop.eup %8861  ;;  %v835_v2 = vsel %vm833_vm5, %v834_v27, %v832_v55 }
 0x187   : > { %vm866_vm14 = vcmp.eq.f32.partialorder %v10477_v39, inf  ;;  %vm868_vm15 = vcmp.eq.f32.partialorder %v10477_v39, 0.0  ;;  %8875 = vrsqrt.f32 %v10507_v57  ;;  %v846_v1 = vsel %vm845_vm8, %v10427_v30, %v844_v42 }
 0x188   : > { %v8864_v8 = vpop.eup %8863  ;;  %v851_v38 = vmul.f32 %v8862_v13, %v10449_v25  ;;  %v886_v17 = vmul.f32 %v8860_v48, %v9895_v46  ;;  %8877 = vrcp.f32 %v807_v54  ;;  %v842_v27 = vsel %vm840_vm7, %v841_v22, %v839_v37 }
 0x189   : > { %v858_v15 = vmul.f32 %v8864_v8, %v10451_v29  ;;  %v869_v31 = vand.u32 2147483648, %v10477_v39  ;;  %8879 = vrcp.f32 %v814_v3  ;;  %v8448_v36 = vpack.c.bf16 %v10399_v11, %v10412_v53 }
 0x18a   : > { %v853_v6 = vsel %vm852_vm10, %v10449_v25, %v851_v38  ;;  %v921_v46 = vmul.f32 %v10526_v41, %v886_v17  ;;  %8881 = vrcp.f32 %v821_v4  ;;  %v849_v54 = vsel %vm847_vm9, %v848_v58, %v846_v1 }
 0x18b   : > { %v8866_v22 = vpop.eup %8865  ;;  %v860_v51 = vsel %vm859_vm12, %v10451_v29, %v858_v15  ;;  %8883 = vrcp.f32 %v828_v50  ;;  %v10555_v3 = vadd.f32 %v10096_v32, %v10359_v26  ;;  %v856_v4 = vsel %vm854_vm11, %v855_v7, %v853_v6 }
 0x18c   : > { %v8868_v49 = vpop.eup %8867  ;;  %v10560_v5 = vadd.f32 %v10540_v20, %v921_v46  ;;  %v888_v55 = vmul.f32 %v8866_v22, %v9905_v56  ;;  %8885 = vrcp.f32 %v835_v2  ;;  %v863_v30 = vsel %vm861_vm13, %v862_v18, %v860_v51 }
 0x18d   : > { %v865_v58 = vmul.f32 %v8868_v49, %v10477_v39  ;;  %vm873_vm2 = vcmp.eq.f32.partialorder %v10479_v62, inf  ;;  %8887 = vrcp.f32 %v842_v27  ;;  %vm875_vm3 = vcmp.eq.f32.partialorder %v10479_v62, 0.0 }
 0x18e   : > { %v8870_v32 = vpop.eup %8869  ;;  %v876_v26 = vand.u32 2147483648, %v10479_v62  ;;  %8084 = vmatprep.mubr.msk.f32.mxu0 %vm595_vm0, %v10560_v5  ;;  %v922_v25 = vmul.f32 %v10526_v41, %v888_v55  ;;  %8889 = vrcp.f32 %v849_v54  ;;  %vm880_vm4 = vcmp.eq.f32.partialorder %v10507_v57, inf }
 0x18f   : > { %v8872_v56 = vpop.eup %8871  ;;  %v867_v29 = vsel %vm866_vm14, %v10477_v39, %v865_v58  ;;  %v872_v7 = vmul.f32 %v8870_v32, %v10479_v62  ;;  %8891 = vrcp.f32 %v856_v4  ;;  %vm882_vm5 = vcmp.eq.f32.partialorder %v10507_v57, 0.0 }
 0x190   : > { %v8874_v42 = vpop.eup %8873  ;;  %v870_v18 = vsel %vm868_vm15, %v869_v31, %v867_v29  ;;  %v10580_v48 = vadd.f32 %v10540_v20, %v922_v25  ;;  %v890_v50 = vmul.f32 %v8872_v56, %v9898_v47  ;;  %8893 = vrcp.f32 %v863_v30 }
 0x191   : > { %v8876_v37 = vpop.eup %8875  ;;  %v874_v13 = vsel %vm873_vm2, %v10479_v62, %v872_v7  ;;  %v883_v2 = vand.u32 2147483648, %v10507_v57  ;;  %v892_v8 = vmul.f32 %v8874_v42, %v9909_v35  ;;  %8895 = vrcp.f32 %v870_v18  ;;  %v10651_v42 = vpop.permute.xlu1 %1459 }
 0x192   : > { %v8878_v1 = vpop.eup %8877  ;;  %v877_v39 = vsel %vm875_vm3, %v876_v26, %v874_v13  ;;  %v879_v38 = vmul.f32 %v8876_v37, %v10507_v57  ;;  %8085 = vmatmul.mubr.msk.f32.vlgmr.msra.gmra.mrb[0].mxu0 %vm595_vm0, %v10580_v48  ;;  %v923_v47 = vmul.f32 %v10526_v41, %v890_v50  ;;  %v13826_v35 = vpack.c.bf16 %v10321_v43, %v10331_v28 }
 0x193   : > { %v8880_v17 = vpop.eup %8879  ;;  %v924_v27 = vmul.f32 %v10526_v41, %v892_v8  ;;  %v894_v15 = vmul.f32 %v8878_v1, %v9917_v40  ;;  %8897 = vrcp.f32 %v877_v39  ;;  %v13827_v40 = vpack.c.bf16 %v10157_v60, %v10170_v0  ;;  %13828 = vst [vmem:[#allocation42_spill] sm:$0xff] %v10651_v42  ;;  %v13831_v1 = vld [vmem:[#allocation6_spill] sm:$0xff] }
 0x194   : > { %8417 = vmatpush3.bf16.xpose.msk.msra.mxu0 %vm10137_vm1, %v13826_v35  ;;  %v8882_v62 = vpop.eup %8881  ;;  %v881_v31 = vsel %vm880_vm4, %v10507_v57, %v879_v38  ;;  %v10606_v6 = vadd.f32 %v10540_v20, %v923_v47  ;;  %v896_v46 = vmul.f32 %v8880_v17, %v9921_v45  ;;  %v13833_v38 = vld [vmem:[#allocation7_spill] sm:$0xff]  ;;  %v13834_v17 = vld [vmem:[#allocation9_spill] sm:$0xff]  ;;  %v13836_v35 = vld [vmem:[#allocation10_spill] sm:$0xff] }
 0x195   : > { %8420 = vmatprep.subr.msk.bf16.mxu0 %vm10137_vm1, %v13827_v40  ;;  %v8884_v43 = vpop.eup %8883  ;;  %v884_v28 = vsel %vm882_vm5, %v883_v2, %v881_v31  ;;  %v10617_v22 = vadd.f32 %v10540_v20, %v924_v27  ;;  %v925_v54 = vmul.f32 %v10526_v41, %v894_v15  ;;  %v898_v51 = vmul.f32 %v8882_v62, %v9929_v12  ;;  %v10688_v15 = vpop.permute.xlu0 %1457  ;;  %v13837_v40 = vld [vmem:[#allocation8_spill] sm:$0xff] }
 0x196   : > { %v8886_v49 = vpop.eup %8885  ;;  %8087 = vmatprep.mubr.msk.f32.mxu0 %vm595_vm0, %v10606_v6  ;;  %v926_v45 = vmul.f32 %v10526_v41, %v896_v46  ;;  %v900_v60 = vmul.f32 %v8884_v43, %v9933_v14  ;;  %8899 = vrcp.f32 %v884_v28  ;;  %v13829_v2 = vpack.c.bf16 %v10154_v21, %v10167_v63  ;;  %v10677_v21 = vpop.permute.xlu1 %1425  ;;  %13835 = vst [vmem:[#allocation7_spill] sm:$0xff] %v10688_v15 }
 0x197   : > { %v8888_v0 = vpop.eup %8887  ;;  %8088 = vmatmul.mubr.msk.f32.gmra.mrb[2].mxu0 %vm595_vm0, %v10617_v22  ;;  %v10628_v57 = vadd.f32 %v10540_v20, %v925_v54  ;;  %v927_v4 = vmul.f32 %v10526_v41, %v898_v51  ;;  %v902_v12 = vmul.f32 %v8886_v49, %v9941_v23  ;;  %13832 = vst [vmem:[#allocation6_spill] sm:$0xff] %v10677_v21 }
 0x198   : > { %v8890_v55 = vpop.eup %8889  ;;  %v10633_v30 = vadd.f32 %v10540_v20, %v926_v45  ;;  %v928_v58 = vmul.f32 %v10526_v41, %v900_v60  ;;  %v904_v14 = vmul.f32 %v8888_v0, %v9945_v24  ;;  %v1538_v27 = vmul.f32 %v10651_v42, %v13834_v17  ;;  %v13838_v0 = vld [vmem:[#allocation16_spill] sm:$0xff] }
 0x199   : > { %v8892_v32 = vpop.eup %8891  ;;  %8090 = vmatprep.mubr.msk.f32.mxu0 %vm595_vm0, %v10628_v57  ;;  %v10640_v26 = vadd.f32 %v10540_v20, %v927_v4  ;;  %v929_v25 = vmul.f32 %v10526_v41, %v902_v12  ;;  %v906_v56 = vmul.f32 %v8890_v55, %v9953_v33  ;;  %v1521_v62 = vmul.f32 %v10677_v21, %v13836_v35  ;;  %v13839_v4 = vld [vmem:[#allocation17_spill] sm:$0xff]  ;;  %v10716_v55 = vpop.permute.xlu0 %1461 }
 0x19a   : > { %v8894_v23 = vpop.eup %8893  ;;  %v10647_v29 = vadd.f32 %v10540_v20, %v928_v58  ;;  %v930_v24 = vmul.f32 %v10526_v41, %v904_v14  ;;  %v908_v7 = vmul.f32 %v8892_v32, %v9957_v34  ;;  %v13830_v34 = vpack.c.bf16 %v10195_v10, %v10206_v16  ;;  %v10701_v54 = vpop.permute.xlu1 %1427  ;;  %13841 = vst [vmem:[#allocation9_spill] sm:$0xff] %v10716_v55  ;;  %v13842_v14 = vld [vmem:[#allocation21_spill] sm:$0xff]  ;;  %v13843_v32 = vld [vmem:[#allocation23_spill] sm:$0xff] }
 0x19b   : > { %8091 = vmatmul.mubr.msk.f32.gmra.mrb[4].mxu0 %vm595_vm0, %v10633_v30  ;;  %v8896_v18 = vpop.eup %8895  ;;  %v10656_v50 = vadd.f32 %v10540_v20, %v929_v25  ;;  %v931_v33 = vmul.f32 %v10526_v41, %v906_v56  ;;  %v910_v37 = vmul.f32 %v8894_v23, %v9965_v44  ;;  %v1537_v28 = vmul.f32 %v10688_v15, %v13836_v35 }
 0x19c   : > { %8093 = vmatprep.mubr.msk.f32.mxu0 %vm595_vm0, %v10640_v26  ;;  %8423 = vmatpush3.bf16.xpose.msk.msra.mxu0 %vm10137_vm1, %v13829_v2  ;;  %v10673_v8 = vadd.f32 %v10540_v20, %v930_v24  ;;  %v932_v44 = vmul.f32 %v10526_v41, %v908_v7  ;;  %v912_v39 = vmul.f32 %v8896_v18, %v13831_v1  ;;  %v13846_v7 = vld [vmem:[#allocation13_spill] sm:$0xff] }
 0x19d   : > { %v8898_v13 = vpop.eup %8897  ;;  %8426 = vmatprep.subr.msk.bf16.mxu0 %vm10137_vm1, %v13830_v34  ;;  %v10682_v10 = vadd.f32 %v10540_v20, %v931_v33  ;;  %v933_v16 = vmul.f32 %v10526_v41, %v910_v37  ;;  %v1522_v45 = vmul.f32 %v10701_v54, %v13834_v17  ;;  %v8677_v60 = vpack.i.bf16 %v1538_v27, %v1537_v28  ;;  %v13847_v37 = vld [vmem:[#allocation11_spill] sm:$0xff]  ;;  %v13854_v17 = vld [vmem:[#allocation28_spill] sm:$0xff] }
 0x19e   : > { %v914_v47 = vmul.f32 %v8898_v13, %v13833_v38  ;;  %v10695_v31 = vadd.f32 %v10540_v20, %v932_v44  ;;  %v934_v46 = vmul.f32 %v10526_v41, %v912_v39  ;;  %v13840_v12 = vpack.c.bf16 %v13838_v0, %v13839_v4  ;;  %v10729_v24 = vpop.permute.xlu1 %1463  ;;  %v13855_v27 = vld [vmem:[#allocation31_spill] sm:$0xff] }
 0x19f   : > { %8094 = vmatmul.mubr.msk.f32.gmra.mrb[6].mxu0 %vm595_vm0, %v10647_v29  ;;  %v10706_v51 = vadd.f32 %v10540_v20, %v933_v16  ;;  %v8682_v58 = vpack.i.bf16 %v1522_v45, %v1521_v62  ;;  %v13844_v25 = vpack.c.bf16 %v13842_v14, %v13843_v32  ;;  %13845 = vst [vmem:[#allocation10_spill] sm:$0xff] %v10729_v24  ;;  %v13851_v16 = vld [vmem:[#allocation22_spill] sm:$0xff] }
 0x1a0   : > { %v8900_v63 = vpop.eup %8899  ;;  %8096 = vmatprep.mubr.msk.f32.mxu0 %vm595_vm0, %v10656_v50  ;;  %v935_v49 = vmul.f32 %v10526_v41, %v914_v47  ;;  %v10726_v56 = vadd.f32 %v10540_v20, %v934_v46  ;;  %8678 = vrot.lane.b32.xlu0 %v8677_v60, %s9576_s14  ;;  %v1539_v18 = vmul.f32 %v10716_v55, %v13846_v7  ;;  %v13858_v46 = vld [vmem:[#allocation15_spill] sm:$0xff] }
 0x1a1   : > { %v916_v43 = vmul.f32 %v8900_v63, %v13837_v40  ;;  %v1540_v13 = vmul.f32 %v10729_v24, %v13847_v37  ;;  %8683 = vrot.lane.b32.xlu1 %v8682_v58, %s9576_s14  ;;  %v13850_v63 = vld [vmem:[#allocation20_spill] sm:$0xff]  ;;  %v13856_v35 = vpack.c.bf16 %v13854_v17, %v13855_v27  ;;  %v13863_v58 = vld [vmem:[#allocation30_spill] sm:$0xff]  ;;  %v13875_v17 = vld [vmem:[#allocation29_spill] sm:$0xff] }
 0x1a2   : > { %v10737_v33 = vadd.f32 %v10540_v20, %v935_v49  ;;  %v10749_v44 = vpop.permute.xlu1 %1431  ;;  %v13852_v38 = vpack.c.bf16 %v13850_v63, %v13851_v16  ;;  %v13872_v63 = vld [vmem:[#allocation37_spill] sm:$0xff]  ;;  %v1392_v27 = vmul.f32 %v10516_v9, %v13875_v17  ;;  %v538_v55 = vld [vmem:[%s13685_s2 + $0xc8] sm:$0xff] }
 0x1a3   : > { %8097 = vmatmul.mubr.msk.f32.gmra.mrb[8].mxu0 %vm595_vm0, %v10673_v8  ;;  %v936_v23 = vmul.f32 %v10526_v41, %v916_v43  ;;  %v10742_v41 = vpop.permute.xlu0 %1429  ;;  %v8687_v2 = vpack.i.bf16 %v1540_v13, %v1539_v18  ;;  %13849 = vst [vmem:[#allocation16_spill] sm:$0xff] %v10749_v44  ;;  %v1524_v39 = vmul.f32 %v10749_v44, %v13847_v37  ;;  %v13859_v43 = vld [vmem:[#allocation14_spill] sm:$0xff] }
 0x1a4   : > { %8099 = vmatprep.mubr.msk.f32.mxu0 %vm595_vm0, %v10682_v10  ;;  %8429 = vmatpush3.bf16.xpose.msk.msra.mxu0 %vm10137_vm1, %v13840_v12  ;;  %13848 = vst [vmem:[#allocation8_spill] sm:$0xff] %v10742_v41  ;;  %v1523_v1 = vmul.f32 %v10742_v41, %v13846_v7  ;;  %v13862_v12 = vld [vmem:[#allocation27_spill] sm:$0xff]  ;;  %v13868_v37 = vld [vmem:[#allocation18_spill] sm:$0xff] }
 0x1a5   : > { %8432 = vmatprep.subr.msk.bf16.mxu0 %vm10137_vm1, %v13844_v25  ;;  %v10747_v34 = vadd.f32 %v10540_v20, %v936_v23  ;;  %8688 = vrot.lane.b32.xlu1 %v8687_v2, %s9576_s14  ;;  %v13864_v14 = vpack.c.bf16 %v13862_v12, %v13863_v58  ;;  %v13867_v7 = vld [vmem:[#allocation19_spill] sm:$0xff] }
 0x1a6   : > { %v8692_v47 = vpack.i.bf16 %v1524_v39, %v1523_v1  ;;  %v10772_v62 = vpop.permute.xlu1 %1467 }
 0x1a7   : > { %8100 = vmatmul.mubr.msk.f32.gmra.mrb[10].mxu0 %vm595_vm0, %v10695_v31  ;;  %v10763_v20 = vpop.permute.xlu0 %1465  ;;  %13857 = vst [vmem:[#allocation21_spill] sm:$0xff] %v10772_v62  ;;  %v1542_v28 = vmul.f32 %v10772_v62, %v13859_v43 }
 0x1a8   : > { %8102 = vmatprep.mubr.msk.f32.mxu0 %vm595_vm0, %v10706_v51  ;;  %13853 = vst [vmem:[#allocation17_spill] sm:$0xff] %v10763_v20  ;;  %v1541_v40 = vmul.f32 %v10763_v20, %v13858_v46  ;;  %8693 = vrot.lane.b32.xlu0 %v8692_v47, %s9576_s14 }
 0x1aa   : > { %v8697_v45 = vpack.i.bf16 %v1542_v28, %v1541_v40  ;;  %v10781_v60 = vpop.permute.xlu1 %1435 }
 0x1ab   : > { %8103 = vmatmul.mubr.msk.f32.gmra.mrb[12].mxu0 %vm595_vm0, %v10726_v56  ;;  %v10779_v49 = vpop.permute.xlu0 %1433  ;;  %13861 = vst [vmem:[#allocation13_spill] sm:$0xff] %v10781_v60  ;;  %v1526_v4 = vmul.f32 %v10781_v60, %v13859_v43  ;;  %v13878_v43 = vld [vmem:[#allocation25_spill] sm:$0xff] }
 0x1ac   : > { %8105 = vmatprep.mubr.msk.f32.mxu0 %vm595_vm0, %v10737_v33  ;;  %8435 = vmatpush3.bf16.xpose.msk.msra.mxu0 %vm10137_vm1, %v13852_v38  ;;  %13860 = vst [vmem:[#allocation23_spill] sm:$0xff] %v10779_v49  ;;  %v1525_v0 = vmul.f32 %v10779_v49, %v13858_v46  ;;  %v530_v49 = vld [vmem:[%s13685_s2 + $0x88] sm:$0xff] }
 0x1ad   : > { %8438 = vmatprep.subr.msk.bf16.mxu0 %vm10137_vm1, %v13856_v35  ;;  %8698 = vrot.lane.b32.xlu1 %v8697_v45, %s9576_s14  ;;  %v13876_v35 = vld [vmem:[#allocation26_spill] sm:$0xff]  ;;  %v13879_v45 = vld [vmem:[#allocation24_spill] sm:$0xff] }
 0x1ae   : > { %v8702_v25 = vpack.i.bf16 %v1526_v4, %v1525_v0  ;;  %v10800_v23 = vpop.permute.xlu1 %1471  ;;  %v1391_v46 = vmul.f32 %v10555_v3, %v13876_v35 }
 0x1af   : > { %8106 = vmatmul.mubr.msk.f32.gmra.mrb[14].mxu0 %vm595_vm0, %v10747_v34  ;;  %v10793_v32 = vpop.permute.xlu0 %1469  ;;  %13866 = vst [vmem:[#allocation20_spill] sm:$0xff] %v10800_v23  ;;  %v1544_v13 = vmul.f32 %v10800_v23, %v13868_v37  ;;  %v529_v23 = vld [vmem:[%s13685_s2 + $0x80] sm:$0xff] }
 0x1b0   : > { %13865 = vst [vmem:[#allocation11_spill] sm:$0xff] %v10793_v32  ;;  %v1543_v18 = vmul.f32 %v10793_v32, %v13867_v7  ;;  %v8454_v11 = vpack.c.bf16 %v1392_v27, %v1391_v46 }
 0x1b1   : > { %8703 = vrot.lane.b32.xlu1 %v8702_v25, %s9576_s14 }
 0x1b2   : > { %v8707_v1 = vpack.i.bf16 %v1544_v13, %v1543_v18  ;;  %v10809_v39 = vpop.permute.xlu1 %1439  ;;  %v13885_v13 = vld [vmem:[#allocation41_spill] sm:$0xff] }
 0x1b3   : > { %v10807_v2 = vpop.permute.xlu0 %1437  ;;  %13870 = vst [vmem:[#allocation28_spill] sm:$0xff] %v10809_v39  ;;  %v1528_v19 = vmul.f32 %v10809_v39, %v13868_v37  ;;  %v13884_v37 = vld [vmem:[#allocation40_spill] sm:$0xff] }
 0x1b4   : > { %8441 = vmatpush3.bf16.xpose.msk.msra.mxu0 %vm10137_vm1, %v13864_v14  ;;  %13869 = vst [vmem:[#allocation22_spill] sm:$0xff] %v10807_v2  ;;  %v1527_v59 = vmul.f32 %v10807_v2, %v13867_v7  ;;  %8708 = vrot.lane.b32.xlu0 %v8707_v1, %s9576_s14  ;;  %v13882_v14 = vld [vmem:[#allocation35_spill] sm:$0xff]  ;;  %v13883_v7 = vld [vmem:[#allocation34_spill] sm:$0xff]  ;;  %v13886_v1 = vpack.c.bf16 %v13884_v37, %v13885_v13 }
 0x1b5   : > { %8444 = vmatprep.subr.msk.bf16.mxu0 %vm10137_vm1, %v8442_v61  ;;  %v13871_v61 = vld [vmem:[#allocation36_spill] sm:$0xff]  ;;  %v1376_v25 = vmul.f32 %v10516_v9, %v13882_v14  ;;  %v1375_v18 = vmul.f32 %v10555_v3, %v13883_v7  ;;  %v13896_v14 = vld [vmem:[#allocation38_spill] sm:$0xff] }
 0x1b6   : > { %v13873_v16 = vpack.c.bf16 %v13871_v61, %v13872_v63  ;;  %v8712_v47 = vpack.i.bf16 %v1528_v19, %v1527_v59  ;;  %v10832_v40 = vpop.permute.xlu1 %1475  ;;  %v13889_v63 = vld [vmem:[#allocation33_spill] sm:$0xff] }
 0x1b7   : > { %v10821_v38 = vpop.permute.xlu0 %1473  ;;  %13877 = vst [vmem:[#allocation15_spill] sm:$0xff] %v10832_v40  ;;  %v1546_v0 = vmul.f32 %v10832_v40, %v13879_v45  ;;  %v8457_v27 = vpack.c.bf16 %v1376_v25, %v1375_v18 }
 0x1b8   : > { %13874 = vst [vmem:[#allocation31_spill] sm:$0xff] %v10821_v38  ;;  %v1545_v28 = vmul.f32 %v10821_v38, %v13878_v43  ;;  %8713 = vrot.lane.b32.xlu0 %v8712_v47, %s9576_s14  ;;  %v13890_v47 = vld [vmem:[#allocation32_spill] sm:$0xff] }
 0x1ba   : > { %v8717_v12 = vpack.i.bf16 %v1546_v0, %v1545_v28  ;;  %v10841_v53 = vpop.permute.xlu1 %1443 }
 0x1bb   : > { %v10839_v4 = vpop.permute.xlu0 %1441  ;;  %13881 = vst [vmem:[#allocation27_spill] sm:$0xff] %v10841_v53  ;;  %v1530_v58 = vmul.f32 %v10841_v53, %v13879_v45 }
 0x1bc   : > { %8447 = vmatpush3.bf16.xpose.msk.msra.mxu0 %vm10137_vm1, %v13873_v16  ;;  %13880 = vst [vmem:[#allocation14_spill] sm:$0xff] %v10839_v4  ;;  %8718 = vrot.lane.b32.xlu0 %v8717_v12, %s9576_s14 }
 0x1bd   : > { %8450 = vmatprep.subr.msk.bf16.mxu0 %vm10137_vm1, %v8448_v36  ;;  %v1529_v36 = vmul.f32 %v10839_v4, %v13878_v43 }
 0x1be   : > { %v10861_v61 = vpop.permute.xlu1 %1479 }
 0x1bf   : > { %v10857_v59 = vpop.permute.xlu0 %1477  ;;  %v8722_v19 = vpack.i.bf16 %v1530_v58, %v1529_v36  ;;  %13888 = vst [vmem:[#allocation19_spill] sm:$0xff] %v10861_v61  ;;  %v1548_v17 = vmul.f32 %v10861_v61, %v13890_v47  ;;  %v13895_v36 = vld [vmem:[#allocation39_spill] sm:$0xff] }
 0x1c0   : > { %13887 = vst [vmem:[#allocation30_spill] sm:$0xff] %v10857_v59  ;;  %v1547_v16 = vmul.f32 %v10857_v59, %v13889_v63 }
 0x1c1   : > { %8723 = vrot.lane.b32.xlu0 %v8722_v19, %s9576_s14 }
 0x1c2   : > { %v8727_v46 = vpack.i.bf16 %v1548_v17, %v1547_v16  ;;  %v10870_v43 = vpop.permute.xlu1 %1447 }
 0x1c3   : > { %v10868_v35 = vpop.permute.xlu0 %1445  ;;  %13892 = vst [vmem:[#allocation36_spill] sm:$0xff] %v10870_v43  ;;  %v1532_v45 = vmul.f32 %v10870_v43, %v13890_v47 }
 0x1c4   : > { %8453 = vmatpush3.bf16.xpose.msk.msra.mxu0 %vm10137_vm1, %v13886_v1  ;;  %13891 = vst [vmem:[#allocation18_spill] sm:$0xff] %v10868_v35  ;;  %v1531_v28 = vmul.f32 %v10868_v35, %v13889_v63  ;;  %v521_v35 = vld [vmem:[%s13685_s2 + $0x40] sm:$0xff] }
 0x1c5   : > { %8456 = vmatprep.subr.msk.bf16.mxu0 %vm10137_vm1, %v8454_v11  ;;  %8728 = vrot.lane.b32.xlu0 %v8727_v46, %s9576_s14 }
 0x1c6   : > { %v8732_v12 = vpack.i.bf16 %v1532_v45, %v1531_v28  ;;  %v10881_v11 = vpop.permute.xlu1 %1483 }
 0x1c7   : > { %v10879_v0 = vpop.permute.xlu0 %1481  ;;  %13894 = vst [vmem:[#allocation29_spill] sm:$0xff] %v10881_v11  ;;  %v1550_v25 = vmul.f32 %v10881_v11, %v13896_v14 }
 0x1c8   : > { %13893 = vst [vmem:[#allocation37_spill] sm:$0xff] %v10879_v0  ;;  %v1549_v58 = vmul.f32 %v10879_v0, %v13895_v36 }
 0x1c9   : > { %8733 = vrot.lane.b32.xlu0 %v8732_v12, %s9576_s14 }
 0x1ca   : > { %v8737_v18 = vpack.i.bf16 %v1550_v25, %v1549_v58  ;;  %v10890_v37 = vpop.permute.xlu1 %1451 }
 0x1cb   : > { %v10888_v7 = vpop.permute.xlu0 %1449  ;;  %13898 = vst [vmem:[#allocation25_spill] sm:$0xff] %v10890_v37  ;;  %v1534_v1 = vmul.f32 %v10890_v37, %v13896_v14 }
 0x1cc   : > { %8459 = vmatpush3.bf16.xpose.msk.msra.mxu0 %vm10137_vm1, %v8457_v27  ;;  %13897 = vst [vmem:[#allocation26_spill] sm:$0xff] %v10888_v7  ;;  %v1533_v13 = vmul.f32 %v10888_v7, %v13895_v36 }
 0x1cd   : > { %8738 = vrot.lane.b32.xlu0 %v8737_v18, %s9576_s14 }
 0x1ce   : > { %v8742_v63 = vpack.i.bf16 %v1534_v1, %v1533_v13  ;;  %v10899_v16 = vpop.permute.xlu1 %1487 }
 0x1cf   : > { %13900 = vst [vmem:[#allocation35_spill] sm:$0xff] %v10899_v16  ;;  %v1552_v17 = vmul.f32 %v10899_v16, %v10516_v9 }
 0x1d1   : > { %8743 = vrot.lane.b32.xlu0 %v8742_v63, %s9576_s14 }
 0x1d5   : > { %v10897_v19 = vpop.permute.xlu0 %1485 }
 0x1d6   : > { %13899 = vst [vmem:[#allocation24_spill] sm:$0xff] %v10897_v19  ;;  %v1551_v47 = vmul.f32 %v10897_v19, %v10555_v3 }
 0x1d8   : > { %v8747_v27 = vpack.i.bf16 %v1552_v17, %v1551_v47 }
 0x1d9   : > { %v10907_v46 = vpop.permute.xlu1 %1455  ;;  %v10909_v28 = vpop.permute.xlu0 %1453 }
 0x1da   : > { %8748 = vrot.lane.b32.xlu0 %v8747_v27, %s9576_s14  ;;  %13901 = vst [vmem:[#allocation34_spill] sm:$0xff] %v10907_v46  ;;  %13902 = vst [vmem:[#allocation40_spill] sm:$0xff] %v10909_v28 }
 0x212   : > { %v8679_v45 = vpop.permute.xlu0 %8678 }
 0x213   : > { %v8684_v12 = vpop.permute.xlu1 %8683  ;;  %v8681_v36 = vunpack.i.h.bf16 %v8679_v45  ;;  %v8680_v58 = vunpack.i.l.bf16 %v8679_v45 }
 0x214   : > { %v8686_v14 = vunpack.i.h.bf16 %v8684_v12  ;;  %v8685_v25 = vunpack.i.l.bf16 %v8684_v12 }
 0x215   : > { %v8460_v13 = vpack.c.bf16 %v8681_v36, %v8680_v58 }
 0x216   : > { %v8462_v18 = vpack.c.bf16 %v8686_v14, %v8685_v25 }
 0x217   : > { %8461 = vmatprep.subr.bf16.mxu1 %v8460_v13  ;;  %v8689_v1 = vpop.permute.xlu1 %8688 }
 0x218   : > { %8463 = vmatpush3.bf16.msra.mxu1 %v8462_v18  ;;  %v8691_v19 = vunpack.i.h.bf16 %v8689_v1  ;;  %v8690_v63 = vunpack.i.l.bf16 %v8689_v1 }
 0x21a   : > { %v8694_v47 = vpop.permute.xlu0 %8693  ;;  %v8464_v7 = vpack.c.bf16 %v8691_v19, %v8690_v63 }
 0x21b   : > { %v8696_v17 = vunpack.i.h.bf16 %v8694_v47  ;;  %v8695_v27 = vunpack.i.l.bf16 %v8694_v47 }
 0x21c   : > { %8465 = vmatprep.subr.bf16.mxu1 %v8464_v7 }
 0x21d   : > { %v8466_v16 = vpack.c.bf16 %v8696_v17, %v8695_v27 }
 0x21f   : > { %v8699_v0 = vpop.permute.xlu1 %8698  ;;  %8467 = vmatpush3.bf16.msra.mxu1 %v8466_v16 }
 0x220   : > { %v8701_v11 = vunpack.i.h.bf16 %v8699_v0  ;;  %v8700_v37 = vunpack.i.l.bf16 %v8699_v0 }
 0x222   : > { %v8468_v45 = vpack.c.bf16 %v8701_v11, %v8700_v37 }
 0x223   : > { %v8704_v59 = vpop.permute.xlu1 %8703 }
 0x224   : > { %v8706_v12 = vunpack.i.h.bf16 %v8704_v59  ;;  %v8705_v14 = vunpack.i.l.bf16 %v8704_v59  ;;  %8469 = vmatprep.subr.bf16.mxu1 %v8468_v45 }
 0x226   : > { %v8470_v36 = vpack.c.bf16 %v8706_v12, %v8705_v14  ;;  %v8709_v58 = vpop.permute.xlu0 %8708 }
 0x227   : > { %v8711_v25 = vunpack.i.h.bf16 %v8709_v58  ;;  %v8710_v18 = vunpack.i.l.bf16 %v8709_v58 }
 0x228   : > { %8471 = vmatpush3.bf16.msra.mxu1 %v8470_v36 }
 0x229   : > { %v8472_v13 = vpack.c.bf16 %v8711_v25, %v8710_v18 }
 0x22a   : > { %v8714_v1 = vpop.permute.xlu0 %8713 }
 0x22b   : > { %v8716_v47 = vunpack.i.h.bf16 %v8714_v1  ;;  %v8715_v17 = vunpack.i.l.bf16 %v8714_v1  ;;  %8473 = vmatprep.subr.bf16.mxu1 %v8472_v13 }
 0x22d   : > { %v8474_v19 = vpack.c.bf16 %v8716_v47, %v8715_v17 }
 0x22e   : > { %v8719_v63 = vpop.permute.xlu0 %8718 }
 0x22f   : > { %v8721_v0 = vunpack.i.h.bf16 %v8719_v63  ;;  %v8720_v7 = vunpack.i.l.bf16 %v8719_v63  ;;  %8475 = vmatpush3.bf16.msra.mxu1 %v8474_v19 }
 0x231   : > { %v8476_v11 = vpack.c.bf16 %v8721_v0, %v8720_v7 }
 0x233   : > { %v8724_v37 = vpop.permute.xlu0 %8723  ;;  %8477 = vmatprep.subr.bf16.mxu1 %v8476_v11 }
 0x234   : > { %v8726_v16 = vunpack.i.h.bf16 %v8724_v37  ;;  %v8725_v59 = vunpack.i.l.bf16 %v8724_v37 }
 0x236   : > { %v8478_v27 = vpack.c.bf16 %v8726_v16, %v8725_v59 }
 0x237   : > { %v8729_v45 = vpop.permute.xlu0 %8728 }
 0x238   : > { %v8731_v12 = vunpack.i.h.bf16 %v8729_v45  ;;  %v8730_v14 = vunpack.i.l.bf16 %v8729_v45  ;;  %8479 = vmatpush3.bf16.msra.mxu1 %v8478_v27  ;;  %v7309_v45 = vld [vmem:[%s13688_s5 + $0x2] ss:$0 sm:$0xff] }
 0x23a   : > { %v8480_v36 = vpack.c.bf16 %v8731_v12, %v8730_v14 }
 0x23b   : > { %v8734_v58 = vpop.permute.xlu0 %8733 }
 0x23c   : > { %v8736_v25 = vunpack.i.h.bf16 %v8734_v58  ;;  %v8735_v18 = vunpack.i.l.bf16 %v8734_v58  ;;  %8481 = vmatprep.subr.bf16.mxu1 %v8480_v36 }
 0x23e   : > { %v8482_v13 = vpack.c.bf16 %v8736_v25, %v8735_v18 }
 0x23f   : > { %v8739_v1 = vpop.permute.xlu0 %8738 }
 0x240   : > { %v8741_v47 = vunpack.i.h.bf16 %v8739_v1  ;;  %v8740_v17 = vunpack.i.l.bf16 %v8739_v1  ;;  %8483 = vmatpush3.bf16.msra.mxu1 %v8482_v13 }
 0x242   : > { %v8484_v19 = vpack.c.bf16 %v8741_v47, %v8740_v17 }
 0x243   : > { %v8744_v63 = vpop.permute.xlu0 %8743 }
 0x244   : > { %v8746_v0 = vunpack.i.h.bf16 %v8744_v63  ;;  %v8745_v7 = vunpack.i.l.bf16 %v8744_v63  ;;  %8485 = vmatprep.subr.bf16.mxu1 %v8484_v19 }
 0x246   : > { %v8486_v11 = vpack.c.bf16 %v8746_v0, %v8745_v7 }
 0x248   : > { %8487 = vmatpush3.bf16.msra.mxu1 %v8486_v11 }
 0x24c   : > { %v8749_v37 = vpop.permute.xlu0 %8748 }
 0x24d   : > { %v8751_v16 = vunpack.i.h.bf16 %v8749_v37  ;;  %v8750_v59 = vunpack.i.l.bf16 %v8749_v37 }
 0x24f   : > { %v8488_v27 = vpack.c.bf16 %v8751_v16, %v8750_v59 }
 0x251   : > { %8489 = vmatprep.subr.bf16.mxu1 %v8488_v27 }
 0x265   : > { %v8086_v12 = vpop.f32.mrb[0].mxu0 }
 0x266   : > { %v1080_v14 = vpop.f32.mrb[1].mxu0  ;;  %v1086_v58 = vadd.f32 %v8086_v12, %v7309_v45 }
 0x267   : > { %v1081_v36 = vadd.f32 %v7309_v45, %v1080_v14 }
 0x269   : > { %7660 = vmatprep.mubr.msk.f32.mxu0 %vm595_vm0, %v1081_v36 }
 0x26a   : > { %v8089_v25 = vpop.f32.mrb[2].mxu0  ;;  %7661 = vmatmul.mubr.msk.f32.vlgmr.msra.gmra.mrb[16].mxu0 %vm595_vm0, %v1081_v36 }
 0x26b   : > { %v1090_v18 = vpop.f32.mrb[3].mxu0  ;;  %7662 = vmatprep.mubr.msk.f32.mxu0 %vm595_vm0, %v1086_v58  ;;  %v1096_v17 = vadd.f32 %v8089_v25, %v7309_v45 }
 0x26c   : > { %v1091_v13 = vadd.f32 %v7309_v45, %v1090_v18 }
 0x26e   : > { %v8092_v1 = vpop.f32.mrb[4].mxu0  ;;  %7663 = vmatmul.mubr.msk.f32.gmra.mrb[18].mxu0 %vm595_vm0, %v1086_v58 }
 0x26f   : > { %v1100_v47 = vpop.f32.mrb[5].mxu0  ;;  %7664 = vmatprep.mubr.msk.f32.mxu0 %vm595_vm0, %v1091_v13  ;;  %v1106_v37 = vadd.f32 %v8092_v1, %v7309_v45 }
 0x270   : > { %v1101_v0 = vadd.f32 %v7309_v45, %v1100_v47 }
 0x272   : > { %v8095_v19 = vpop.f32.mrb[6].mxu0  ;;  %7665 = vmatmul.mubr.msk.f32.gmra.mrb[20].mxu0 %vm595_vm0, %v1091_v13 }
 0x273   : > { %v1110_v63 = vpop.f32.mrb[7].mxu0  ;;  %7666 = vmatprep.mubr.msk.f32.mxu0 %vm595_vm0, %v1096_v17  ;;  %v1116_v36 = vadd.f32 %v8095_v19, %v7309_v45 }
 0x274   : > { %v1111_v27 = vadd.f32 %v7309_v45, %v1110_v63 }
 0x276   : > { %v8098_v7 = vpop.f32.mrb[8].mxu0  ;;  %7667 = vmatmul.mubr.msk.f32.gmra.mrb[22].mxu0 %vm595_vm0, %v1096_v17 }
 0x277   : > { %v1120_v11 = vpop.f32.mrb[9].mxu0  ;;  %7668 = vmatprep.mubr.msk.f32.mxu0 %vm595_vm0, %v1101_v0  ;;  %v1126_v13 = vadd.f32 %v8098_v7, %v7309_v45 }
 0x278   : > { %v1121_v18 = vadd.f32 %v7309_v45, %v1120_v11  ;;  %v513_v11 = vld [vmem:[%s13685_s2] sm:$0xff] }
 0x27a   : > { %v8101_v16 = vpop.f32.mrb[10].mxu0  ;;  %7669 = vmatmul.mubr.msk.f32.gmra.mrb[24].mxu0 %vm595_vm0, %v1101_v0 }
 0x27b   : > { %v1130_v59 = vpop.f32.mrb[11].mxu0  ;;  %7670 = vmatprep.mubr.msk.f32.mxu0 %vm595_vm0, %v1106_v37  ;;  %v1136_v47 = vadd.f32 %v8101_v16, %v7309_v45 }
 0x27c   : > { %v1131_v1 = vadd.f32 %v7309_v45, %v1130_v59  ;;  %v514_v59 = vld [vmem:[%s13685_s2 + $0x8] sm:$0xff] }
 0x27e   : > { %v8104_v12 = vpop.f32.mrb[12].mxu0  ;;  %7671 = vmatmul.mubr.msk.f32.gmra.mrb[26].mxu0 %vm595_vm0, %v1106_v37 }
 0x27f   : > { %v1140_v14 = vpop.f32.mrb[13].mxu0  ;;  %7672 = vmatprep.mubr.msk.f32.mxu0 %vm595_vm0, %v1111_v27  ;;  %v1146_v19 = vadd.f32 %v8104_v12, %v7309_v45 }
 0x280   : > { %v1141_v17 = vadd.f32 %v7309_v45, %v1140_v14 }
 0x282   : > { %v8107_v58 = vpop.f32.mrb[14].mxu0  ;;  %7673 = vmatmul.mubr.msk.f32.gmra.mrb[28].mxu0 %vm595_vm0, %v1111_v27 }
 0x283   : > { %v1150_v25 = vpop.f32.mrb[15].mxu0  ;;  %7674 = vmatprep.mubr.msk.f32.mxu0 %vm595_vm0, %v1116_v36  ;;  %v1156_v0 = vadd.f32 %v8107_v58, %v7309_v45 }
 0x284   : > { %v1151_v63 = vadd.f32 %v7309_v45, %v1150_v25 }
 0x286   : > { %7675 = vmatmul.mubr.msk.f32.gmra.mrb[30].mxu0 %vm595_vm0, %v1116_v36  ;;  %v515_v36 = vld [vmem:[%s13685_s2 + $0x10] sm:$0xff] }
 0x287   : > { %7676 = vmatprep.mubr.msk.f32.mxu0 %vm595_vm0, %v1121_v18 }
 0x28a   : > { %7677 = vmatmul.mubr.msk.f32.gmra.mrb[32].mxu0 %vm595_vm0, %v1121_v18  ;;  %v516_v18 = vld [vmem:[%s13685_s2 + $0x18] sm:$0xff] }
 0x28b   : > { %7678 = vmatprep.mubr.msk.f32.mxu0 %vm595_vm0, %v1126_v13 }
 0x28e   : > { %7679 = vmatmul.mubr.msk.f32.gmra.mrb[34].mxu0 %vm595_vm0, %v1126_v13 }
 0x28f   : > { %7680 = vmatprep.mubr.msk.f32.mxu0 %vm595_vm0, %v1131_v1 }
 0x292   : > { %7681 = vmatmul.mubr.msk.f32.gmra.mrb[36].mxu0 %vm595_vm0, %v1131_v1 }
 0x293   : > { %7682 = vmatprep.mubr.msk.f32.mxu0 %vm595_vm0, %v1136_v47 }
 0x296   : > { %7683 = vmatmul.mubr.msk.f32.gmra.mrb[38].mxu0 %vm595_vm0, %v1136_v47 }
 0x297   : > { %7684 = vmatprep.mubr.msk.f32.mxu0 %vm595_vm0, %v1141_v17 }
 0x29a   : > { %7685 = vmatmul.mubr.msk.f32.gmra.mrb[40].mxu0 %vm595_vm0, %v1141_v17 }
 0x29b   : > { %7686 = vmatprep.mubr.msk.f32.mxu0 %vm595_vm0, %v1146_v19 }
 0x29e   : > { %7687 = vmatmul.mubr.msk.f32.gmra.mrb[42].mxu0 %vm595_vm0, %v1146_v19  ;;  %v517_v19 = vld [vmem:[%s13685_s2 + $0x20] sm:$0xff] }
 0x29f   : > { %7688 = vmatprep.mubr.msk.f32.mxu0 %vm595_vm0, %v1151_v63 }
 0x2a2   : > { %7689 = vmatmul.mubr.msk.f32.gmra.mrb[44].mxu0 %vm595_vm0, %v1151_v63 }
 0x2a3   : > { %7690 = vmatprep.mubr.msk.f32.mxu0 %vm595_vm0, %v1156_v0 }
 0x2a6   : > { %7691 = vmatmul.mubr.msk.f32.gmra.mrb[46].mxu0 %vm595_vm0, %v1156_v0 }
 0x33d   : > { %v1763_v7 = vpop.f32.mrb[16].mxu0 }
 0x33e   : > { %v1858_v37 = vmul.f32 0.25, %v1763_v7  ;;  %v1765_v16 = vpop.f32.mrb[17].mxu0 }
 0x33f   : > { %v1859_v27 = vmul.f32 0.25, %v1765_v16 }
 0x340   : > { %v10952_v12 = vadd.f32 %v1858_v37, %v513_v11 }
 0x341   : > { %v1769_v45 = vpop.f32.mrb[18].mxu0  ;;  %v10954_v14 = vadd.f32 %v1859_v27, %v514_v59  ;;  %v518_v59 = vld [vmem:[%s13685_s2 + $0x28] sm:$0xff] }
 0x342   : > { %v1860_v58 = vmul.f32 0.25, %v1769_v45  ;;  %v1771_v25 = vpop.f32.mrb[19].mxu0  ;;  %1922 = vmax.xlane.f32.xlu1 %v10952_v12 }
 0x343   : > { %v1861_v13 = vmul.f32 0.25, %v1771_v25  ;;  %2086 = vmax.xlane.f32.xlu0 %v10954_v14  ;;  %v519_v25 = vld [vmem:[%s13685_s2 + $0x30] sm:$0xff] }
 0x344   : > { %v10964_v1 = vadd.f32 %v1860_v58, %v515_v36 }
 0x345   : > { %v1775_v47 = vpop.f32.mrb[20].mxu0  ;;  %v10966_v17 = vadd.f32 %v1861_v13, %v516_v18 }
 0x346   : > { %v1862_v63 = vmul.f32 0.25, %v1775_v47  ;;  %v1777_v0 = vpop.f32.mrb[21].mxu0 }
 0x347   : > { %2088 = vmax.xlane.f32.xlu1 %v10966_v17  ;;  %1924 = vmax.xlane.f32.xlu0 %v10964_v1  ;;  %v1863_v11 = vmul.f32 0.25, %v1777_v0 }
 0x348   : > { %v10973_v7 = vadd.f32 %v1862_v63, %v517_v19  ;;  %v520_v63 = vld [vmem:[%s13685_s2 + $0x38] sm:$0xff] }
 0x349   : > { %v1781_v37 = vpop.f32.mrb[22].mxu0  ;;  %v10979_v36 = vadd.f32 %v1863_v11, %v518_v59 }
 0x34a   : > { %v1783_v16 = vpop.f32.mrb[23].mxu0  ;;  %v1864_v27 = vmul.f32 0.25, %v1781_v37 }
 0x34b   : > { %1926 = vmax.xlane.f32.xlu1 %v10973_v7  ;;  %v1865_v18 = vmul.f32 0.25, %v1783_v16  ;;  %v1536_v16 = vmul.f32 %v10907_v46, %v10516_v9 }
 0x34c   : > { %v10985_v47 = vadd.f32 %v1864_v27, %v519_v25  ;;  %v1535_v27 = vmul.f32 %v10909_v28, %v10555_v3 }
 0x34d   : > { %v1787_v45 = vpop.f32.mrb[24].mxu0  ;;  %v10991_v37 = vadd.f32 %v1865_v18, %v520_v63  ;;  %v522_v18 = vld [vmem:[%s13685_s2 + $0x48] sm:$0xff] }
 0x34e   : > { %v1789_v58 = vpop.f32.mrb[25].mxu0  ;;  %v1866_v0 = vmul.f32 0.25, %v1787_v45  ;;  %v8752_v63 = vpack.i.bf16 %v1536_v16, %v1535_v27 }
 0x34f   : > { %2090 = vmax.xlane.f32.xlu1 %v10979_v36  ;;  %v1867_v25 = vmul.f32 0.25, %v1789_v58 }
 0x350   : > { %v11001_v43 = vadd.f32 %v1866_v0, %v521_v35  ;;  %v523_v35 = vld [vmem:[%s13685_s2 + $0x50] sm:$0xff] }
 0x351   : > { %v1793_v13 = vpop.f32.mrb[26].mxu0  ;;  %v11008_v9 = vadd.f32 %v1867_v25, %v522_v18 }
 0x352   : > { %v1795_v19 = vpop.f32.mrb[27].mxu0  ;;  %v1868_v38 = vmul.f32 0.25, %v1793_v13  ;;  %v524_v13 = vld [vmem:[%s13685_s2 + $0x58] sm:$0xff] }
 0x353   : > { %1928 = vmax.xlane.f32.xlu1 %v10985_v47  ;;  %v1869_v58 = vmul.f32 0.25, %v1795_v19 }
 0x354   : > { %v11014_v28 = vadd.f32 %v1868_v38, %v523_v35 }
 0x355   : > { %v1799_v11 = vpop.f32.mrb[28].mxu0  ;;  %v11020_v25 = vadd.f32 %v1869_v58, %v524_v13 }
 0x356   : > { %v1801_v59 = vpop.f32.mrb[29].mxu0  ;;  %v1870_v16 = vmul.f32 0.25, %v1799_v11  ;;  %v526_v11 = vld [vmem:[%s13685_s2 + $0x68] sm:$0xff] }
 0x357   : > { %2092 = vmax.xlane.f32.xlu1 %v10991_v37  ;;  %v1871_v38 = vmul.f32 0.25, %v1801_v59  ;;  %v528_v59 = vld [vmem:[%s13685_s2 + $0x78] sm:$0xff] }
 0x359   : > { %v1805_v61 = vpop.f32.mrb[30].mxu0  ;;  %v11036_v53 = vadd.f32 %v1871_v38, %v526_v11 }
 0x35a   : > { %v1807_v45 = vpop.f32.mrb[31].mxu0  ;;  %v1872_v20 = vmul.f32 0.25, %v1805_v61 }
 0x35b   : > { %1930 = vmax.xlane.f32.xlu1 %v11001_v43  ;;  %v1873_v58 = vmul.f32 0.25, %v1807_v45 }
 0x35d   : > { %v1811_v4 = vpop.f32.mrb[32].mxu0  ;;  %8753 = vrot.lane.b32.xlu0 %v8752_v63, %s9576_s14  ;;  %v525_v63 = vld [vmem:[%s13685_s2 + $0x60] sm:$0xff] }
 0x35e   : > { %v1813_v3 = vpop.f32.mrb[33].mxu0  ;;  %v11028_v35 = vadd.f32 %v1870_v16, %v525_v63  ;;  %v11042_v16 = vadd.f32 %v1873_v58, %v528_v59  ;;  %v1874_v63 = vmul.f32 0.25, %v1811_v4  ;;  %v527_v4 = vld [vmem:[%s13685_s2 + $0x70] sm:$0xff] }
 0x35f   : > { %2094 = vmax.xlane.f32.xlu1 %v11008_v9  ;;  %v1875_v11 = vmul.f32 0.25, %v1813_v3 }
 0x360   : > { %v11048_v38 = vadd.f32 %v1874_v63, %v529_v23  ;;  %v531_v23 = vld [vmem:[%s13685_s2 + $0x90] sm:$0xff]  ;;  %v11062_v63 = vadd.f32 %v1872_v20, %v527_v4  ;;  %v540_v20 = vld [vmem:[%s13685_s2 + $0xd8] sm:$0xff] }
 0x361   : > { %v1817_v0 = vpop.f32.mrb[34].mxu0  ;;  %v11057_v59 = vadd.f32 %v1875_v11, %v530_v49  ;;  %v532_v11 = vld [vmem:[%s13685_s2 + $0x98] sm:$0xff] }
 0x362   : > { %v1819_v46 = vpop.f32.mrb[35].mxu0  ;;  %v1876_v62 = vmul.f32 0.25, %v1817_v0 }
 0x363   : > { %1932 = vmax.xlane.f32.xlu1 %v11014_v28  ;;  %v1877_v0 = vmul.f32 0.25, %v1819_v46  ;;  %v533_v46 = vld [vmem:[%s13685_s2 + $0xa0] sm:$0xff] }
 0x364   : > { %v11069_v49 = vadd.f32 %v1876_v62, %v531_v23 }
 0x365   : > { %v1823_v27 = vpop.f32.mrb[36].mxu0  ;;  %v11081_v4 = vadd.f32 %v1877_v0, %v532_v11 }
 0x366   : > { %v1825_v18 = vpop.f32.mrb[37].mxu0  ;;  %v1878_v62 = vmul.f32 0.25, %v1823_v27  ;;  %v534_v27 = vld [vmem:[%s13685_s2 + $0xa8] sm:$0xff] }
 0x367   : > { %2096 = vmax.xlane.f32.xlu1 %v11020_v25 }
 0x369   : > { %v11026_v19 = vpop.f32.mrb[38].mxu0 }
 0x36a   : > { %v1831_v40 = vpop.f32.mrb[39].mxu0 }
 0x36b   : > { %1934 = vmax.xlane.f32.xlu1 %v11028_v35 }
 0x36d   : > { %v11034_v13 = vpop.f32.mrb[40].mxu0 }
 0x36e   : > { %v1837_v32 = vpop.f32.mrb[41].mxu0 }
 0x36f   : > { %2098 = vmax.xlane.f32.xlu1 %v11036_v53  ;;  %v1883_v61 = vmul.f32 0.25, %v1837_v32 }
 0x371   : > { %v1841_v2 = vpop.f32.mrb[42].mxu0  ;;  %v11074_v32 = vadd.f32 %v1883_v61, %v538_v55  ;;  %v542_v55 = vld [vmem:[%s13685_s2 + $0xe8] sm:$0xff]  ;;  %v1879_v61 = vmul.f32 0.25, %v1825_v18  ;;  %v536_v18 = vld [vmem:[%s13685_s2 + $0xb8] sm:$0xff] }
 0x372   : > { %v1843_v45 = vpop.f32.mrb[43].mxu0 }
 0x373   : > { %2100 = vmax.xlane.f32.xlu1 %v11042_v16  ;;  %v1885_v41 = vmul.f32 0.25, %v1843_v45  ;;  %v11093_v45 = vadd.f32 %v1878_v62, %v533_v46 }
 0x375   : > { %v1847_v39 = vpop.f32.mrb[44].mxu0  ;;  %v11086_v24 = vadd.f32 %v1885_v41, %v540_v20  ;;  %v544_v41 = vld [vmem:[%s13685_s2 + $0xf8] sm:$0xff]  ;;  %v1881_v20 = vmul.f32 0.25, %v1831_v40 }
 0x376   : > { %v1849_v58 = vpop.f32.mrb[45].mxu0 }
 0x377   : > { %1938 = vmax.xlane.f32.xlu1 %v11048_v38  ;;  %v1887_v23 = vmul.f32 0.25, %v1849_v58  ;;  %v11105_v58 = vadd.f32 %v1879_v61, %v534_v27  ;;  %v11115_v46 = vadd.f32 %v1881_v20, %v536_v18  ;;  %v537_v61 = vld [vmem:[%s13685_s2 + $0xc0] sm:$0xff]  ;;  %v1886_v20 = vmul.f32 0.25, %v1847_v39 }
 0x379   : > { %v1853_v60 = vpop.f32.mrb[46].mxu0  ;;  %v11098_v11 = vadd.f32 %v1887_v23, %v542_v55  ;;  %v535_v23 = vld [vmem:[%s13685_s2 + $0xb0] sm:$0xff]  ;;  %v1882_v55 = vmul.f32 0.25, %v11034_v13  ;;  %v541_v13 = vld [vmem:[%s13685_s2 + $0xe0] sm:$0xff] }
 0x37a   : > { %v1855_v3 = vpop.f32.mrb[47].mxu0  ;;  %v11140_v18 = vadd.f32 %v1886_v20, %v541_v13 }
 0x37b   : > { %2102 = vmax.xlane.f32.xlu1 %v11057_v59  ;;  %v1889_v0 = vmul.f32 0.25, %v1855_v3  ;;  %v1880_v3 = vmul.f32 0.25, %v11026_v19  ;;  %v11128_v27 = vadd.f32 %v1882_v55, %v537_v61  ;;  %v1884_v19 = vmul.f32 0.25, %v1841_v2  ;;  %v543_v2 = vld [vmem:[%s13685_s2 + $0xf0] sm:$0xff] }
 0x37c   : > { %1936 = vmax.xlane.f32.xlu0 %v11062_v63 }
 0x37d   : > { %v11110_v62 = vadd.f32 %v1889_v0, %v544_v41  ;;  %v11121_v40 = vadd.f32 %v1880_v3, %v535_v23  ;;  %v539_v0 = vld [vmem:[%s13685_s2 + $0xd0] sm:$0xff]  ;;  %v1888_v3 = vmul.f32 0.25, %v1853_v60 }
 0x37e   : > { %v11134_v41 = vadd.f32 %v1884_v19, %v539_v0 }
 0x37f   : > { %1940 = vmax.xlane.f32.xlu1 %v11069_v49  ;;  %v11146_v23 = vadd.f32 %v1888_v3, %v543_v2 }
 0x380   : > { %2110 = vmax.xlane.f32.xlu0 %v11074_v32 }
 0x383   : > { %2104 = vmax.xlane.f32.xlu1 %v11081_v4 }
 0x384   : > { %2112 = vmax.xlane.f32.xlu0 %v11086_v24 }
 0x387   : > { %1942 = vmax.xlane.f32.xlu1 %v11093_v45 }
 0x388   : > { %2114 = vmax.xlane.f32.xlu0 %v11098_v11 }
 0x38b   : > { %2106 = vmax.xlane.f32.xlu1 %v11105_v58 }
 0x38c   : > { %2116 = vmax.xlane.f32.xlu0 %v11110_v62 }
 0x38f   : > { %2108 = vmax.xlane.f32.xlu1 %v11115_v46 }
 0x393   : > { %1944 = vmax.xlane.f32.xlu1 %v11121_v40 }
 0x397   : > { %1946 = vmax.xlane.f32.xlu1 %v11128_v27 }
 0x39b   : > { %1948 = vmax.xlane.f32.xlu1 %v11134_v41 }
 0x39f   : > { %1950 = vmax.xlane.f32.xlu1 %v11140_v18 }
 0x3a3   : > { %1952 = vmax.xlane.f32.xlu1 %v11146_v23 }
 0x3cf   : > { %v1923_v39 = vpop.xlane.xlu1 %1922 }
 0x3d0   : > { %v1954_v55 = vsub.f32 %v10952_v12, %v1923_v39  ;;  %v2087_v61 = vpop.xlane.xlu0 %2086 }
 0x3d1   : > { %v2118_v19 = vsub.f32 %v10954_v14, %v2087_v61 }
 0x3d2   : > { %v1970_v0 = vmul.f32 1.442695, %v1954_v55 }
 0x3d3   : > { %v2134_v20 = vmul.f32 1.442695, %v2118_v19 }
 0x3d4   : > { %8901 = vpow2.f32 %v1970_v0  ;;  %v2089_v60 = vpop.xlane.xlu1 %2088  ;;  %v1925_v13 = vpop.xlane.xlu0 %1924 }
 0x3d5   : > { %8903 = vpow2.f32 %v2134_v20  ;;  %v2119_v44 = vsub.f32 %v10966_v17, %v2089_v60  ;;  %v1955_v52 = vsub.f32 %v10964_v1, %v1925_v13 }
 0x3d7   : > { %v2136_v3 = vmul.f32 1.442695, %v2119_v44  ;;  %v1972_v2 = vmul.f32 1.442695, %v1955_v52 }
 0x3d8   : > { %v1927_v15 = vpop.xlane.xlu1 %1926  ;;  %v8754_v21 = vpop.permute.xlu0 %8753 }
 0x3d9   : > { %8905 = vpow2.f32 %v2136_v3  ;;  %v1956_v12 = vsub.f32 %v10973_v7, %v1927_v15  ;;  %v8756_v39 = vunpack.i.h.bf16 %v8754_v21  ;;  %v8755_v42 = vunpack.i.l.bf16 %v8754_v21 }
 0x3da   : > { %8907 = vpow2.f32 %v1972_v2 }
 0x3db   : > { %v1974_v14 = vmul.f32 1.442695, %v1956_v12  ;;  %v8490_v55 = vpack.c.bf16 %v8756_v39, %v8755_v42 }
 0x3dc   : > { %v2091_v61 = vpop.xlane.xlu1 %2090 }
 0x3dd   : > { %8909 = vpow2.f32 %v1974_v14  ;;  %v2120_v19 = vsub.f32 %v10979_v36, %v2091_v61  ;;  %8491 = vmatpush3.bf16.msra.mxu1 %v8490_v55 }
 0x3de   : > { %v8902_v17 = vpop.eup %8901 }
 0x3df   : > { %v8904_v0 = vpop.eup %8903  ;;  %v2138_v1 = vmul.f32 1.442695, %v2120_v19  ;;  %2002 = vadd.xlane.f32.xlu0 %v8902_v17 }
 0x3e0   : > { %v1929_v52 = vpop.xlane.xlu1 %1928  ;;  %2166 = vadd.xlane.f32.xlu1 %v8904_v0  ;;  %2442 = vmatprep.mubr.f32.mxu1 %v8904_v0 }
 0x3e1   : > { %8911 = vpow2.f32 %v2138_v1  ;;  %v1957_v15 = vsub.f32 %v10985_v47, %v1929_v52  ;;  %2443 = vmatmul.mubr.f32.vlgmr.msra.gmra.mrb[16].mxu1 %v8902_v17 }
 0x3e3   : > { %v8906_v21 = vpop.eup %8905  ;;  %v1976_v44 = vmul.f32 1.442695, %v1957_v15 }
 0x3e4   : > { %v8908_v7 = vpop.eup %8907  ;;  %v2093_v42 = vpop.xlane.xlu1 %2092  ;;  %2168 = vadd.xlane.f32.xlu1 %v8906_v21  ;;  %2447 = vmatprep.mubr.f32.mxu1 %v8906_v21 }
 0x3e5   : > { %8913 = vpow2.f32 %v1976_v44  ;;  %v2121_v36 = vsub.f32 %v10991_v37, %v2093_v42  ;;  %2004 = vadd.xlane.f32.xlu0 %v8908_v7  ;;  %2448 = vmatmul.mubr.f32.gmra.mrb[18].mxu1 %v8908_v7 }
 0x3e7   : > { %v8910_v20 = vpop.eup %8909  ;;  %v2140_v60 = vmul.f32 1.442695, %v2121_v36 }
 0x3e8   : > { %v1931_v13 = vpop.xlane.xlu1 %1930 }
 0x3e9   : > { %8915 = vpow2.f32 %v2140_v60  ;;  %v1958_v3 = vsub.f32 %v11001_v43, %v1931_v13  ;;  %2006 = vadd.xlane.f32.xlu0 %v8910_v20 }
 0x3eb   : > { %v8912_v47 = vpop.eup %8911  ;;  %v1978_v2 = vmul.f32 1.442695, %v1958_v3 }
 0x3ec   : > { %v2095_v12 = vpop.xlane.xlu1 %2094  ;;  %2170 = vadd.xlane.f32.xlu1 %v8912_v47  ;;  %2452 = vmatprep.mubr.f32.mxu1 %v8912_v47 }
 0x3ed   : > { %8917 = vpow2.f32 %v1978_v2  ;;  %v2122_v39 = vsub.f32 %v11008_v9, %v2095_v12  ;;  %2453 = vmatmul.mubr.f32.gmra.mrb[20].mxu1 %v8910_v20 }
 0x3ef   : > { %v8914_v14 = vpop.eup %8913  ;;  %v2142_v37 = vmul.f32 1.442695, %v2122_v39 }
 0x3f0   : > { %v1933_v55 = vpop.xlane.xlu1 %1932  ;;  %2008 = vadd.xlane.f32.xlu0 %v8914_v14 }
 0x3f1   : > { %8919 = vpow2.f32 %v2142_v37  ;;  %v1959_v61 = vsub.f32 %v11014_v28, %v1933_v55 }
 0x3f3   : > { %v8916_v19 = vpop.eup %8915  ;;  %v1980_v17 = vmul.f32 1.442695, %v1959_v61 }
 0x3f4   : > { %v2097_v43 = vpop.xlane.xlu1 %2096  ;;  %2172 = vadd.xlane.f32.xlu1 %v8916_v19  ;;  %2457 = vmatprep.mubr.f32.mxu1 %v8916_v19 }
 0x3f5   : > { %8921 = vpow2.f32 %v1980_v17  ;;  %v2123_v0 = vsub.f32 %v11020_v25, %v2097_v43  ;;  %2458 = vmatmul.mubr.f32.gmra.mrb[22].mxu1 %v8914_v14 }
 0x3f7   : > { %v8918_v1 = vpop.eup %8917  ;;  %v2144_v52 = vmul.f32 1.442695, %v2123_v0 }
 0x3f8   : > { %v1935_v9 = vpop.xlane.xlu1 %1934  ;;  %2010 = vadd.xlane.f32.xlu0 %v8918_v1 }
 0x3f9   : > { %8923 = vpow2.f32 %v2144_v52  ;;  %v1960_v15 = vsub.f32 %v11028_v35, %v1935_v9  ;;  %v2539_v35 = vld [vmem:[%s13687_s4 + $0x40] sm:$0xff] }
 0x3fb   : > { %v8920_v21 = vpop.eup %8919  ;;  %v1982_v44 = vmul.f32 1.442695, %v1960_v15 }
 0x3fc   : > { %v2099_v7 = vpop.xlane.xlu1 %2098  ;;  %2174 = vadd.xlane.f32.xlu1 %v8920_v21  ;;  %2462 = vmatprep.mubr.f32.mxu1 %v8920_v21 }
 0x3fd   : > { %8925 = vpow2.f32 %v1982_v44  ;;  %v2124_v28 = vsub.f32 %v11036_v53, %v2099_v7  ;;  %2463 = vmatmul.mubr.f32.gmra.mrb[24].mxu1 %v8918_v1  ;;  %v2540_v53 = vld [vmem:[%s13687_s4 + $0x48] sm:$0xff] }
 0x3fe   : > { %v8492_v2 = vpack.c.bf16 %v2540_v53, %v2539_v35 }
 0x3ff   : > { %v8922_v42 = vpop.eup %8921  ;;  %v2146_v36 = vmul.f32 1.442695, %v2124_v28 }
 0x400   : > { %v2101_v25 = vpop.xlane.xlu1 %2100  ;;  %2012 = vadd.xlane.f32.xlu0 %v8922_v42  ;;  %8493 = vmatprep.subr.bf16.mxu1 %v8492_v2 }
 0x401   : > { %8927 = vpow2.f32 %v2146_v36  ;;  %v2125_v20 = vsub.f32 %v11042_v16, %v2101_v25  ;;  %8495 = vmatpush3.bf16.msra.mxu1 %v8492_v2 }
 0x403   : > { %v8924_v60 = vpop.eup %8923  ;;  %v2148_v13 = vmul.f32 1.442695, %v2125_v20 }
 0x404   : > { %v1939_v3 = vpop.xlane.xlu1 %1938  ;;  %2176 = vadd.xlane.f32.xlu1 %v8924_v60  ;;  %2467 = vmatprep.mubr.f32.mxu1 %v8924_v60 }
 0x405   : > { %8929 = vpow2.f32 %v2148_v13  ;;  %2468 = vmatmul.mubr.f32.gmra.mrb[26].mxu1 %v8922_v42  ;;  %v1962_v14 = vsub.f32 %v11048_v38, %v1939_v3 }
 0x407   : > { %v8926_v47 = vpop.eup %8925  ;;  %v1986_v43 = vmul.f32 1.442695, %v1962_v14 }
 0x408   : > { %v2103_v12 = vpop.xlane.xlu1 %2102  ;;  %2014 = vadd.xlane.f32.xlu0 %v8926_v47 }
 0x409   : > { %v2126_v16 = vsub.f32 %v11057_v59, %v2103_v12  ;;  %v1937_v39 = vpop.xlane.xlu0 %1936 }
 0x40a   : > { %v1961_v37 = vsub.f32 %v11062_v63, %v1937_v39 }
 0x40b   : > { %v8928_v55 = vpop.eup %8927  ;;  %v2150_v61 = vmul.f32 1.442695, %v2126_v16 }
 0x40c   : > { %v1984_v19 = vmul.f32 1.442695, %v1961_v37  ;;  %v1941_v17 = vpop.xlane.xlu1 %1940  ;;  %2178 = vadd.xlane.f32.xlu1 %v8928_v55  ;;  %2472 = vmatprep.mubr.f32.mxu1 %v8928_v55 }
 0x40d   : > { %8931 = vpow2.f32 %v2150_v61  ;;  %2473 = vmatmul.mubr.f32.gmra.mrb[28].mxu1 %v8926_v47  ;;  %v1963_v0 = vsub.f32 %v11069_v49, %v1941_v17  ;;  %v2111_v52 = vpop.xlane.xlu0 %2110 }
 0x40e   : > { %8933 = vpow2.f32 %v1984_v19  ;;  %v2130_v20 = vsub.f32 %v11074_v32, %v2111_v52  ;;  %v2542_v19 = vld [vmem:[%s13687_s4 + $0x58] sm:$0xff] }
 0x40f   : > { %v8930_v59 = vpop.eup %8929  ;;  %8935 = vpow2.f32 %v1986_v43  ;;  %v1988_v63 = vmul.f32 1.442695, %v1963_v0 }
 0x410   : > { %v2105_v1 = vpop.xlane.xlu1 %2104  ;;  %2180 = vadd.xlane.f32.xlu1 %v8930_v59  ;;  %2477 = vmatprep.mubr.f32.mxu1 %v8930_v59  ;;  %v2158_v47 = vmul.f32 1.442695, %v2130_v20  ;;  %v13773_v20 = vlaneseq }
 0x411   : > { %v2127_v38 = vsub.f32 %v11081_v4, %v2105_v1  ;;  %v2113_v49 = vpop.xlane.xlu0 %2112 }
 0x413   : > { %v2152_v9 = vmul.f32 1.442695, %v2127_v38 }
 0x414   : > { %v1943_v15 = vpop.xlane.xlu1 %1942 }
 0x415   : > { %8937 = vpow2.f32 %v2152_v9  ;;  %v1964_v21 = vsub.f32 %v11093_v45, %v1943_v15  ;;  %v2115_v3 = vpop.xlane.xlu0 %2114 }
 0x416   : > { %8939 = vpow2.f32 %v1988_v63  ;;  %v2132_v39 = vsub.f32 %v11098_v11, %v2115_v3 }
 0x417   : > { %v8932_v44 = vpop.eup %8931  ;;  %v1990_v7 = vmul.f32 1.442695, %v1964_v21 }
 0x418   : > { %v8934_v28 = vpop.eup %8933  ;;  %v2107_v42 = vpop.xlane.xlu1 %2106  ;;  %2182 = vadd.xlane.f32.xlu1 %v8932_v44  ;;  %v2162_v17 = vmul.f32 1.442695, %v2132_v39 }
 0x419   : > { %8941 = vpow2.f32 %v1990_v7  ;;  %v2128_v36 = vsub.f32 %v11105_v58, %v2107_v42  ;;  %2016 = vadd.xlane.f32.xlu0 %v8934_v28  ;;  %2478 = vmatmul.mubr.f32.gmra.mrb[30].mxu1 %v8934_v28  ;;  %v8936_v25 = vpop.eup %8935  ;;  %v2131_v58 = vsub.f32 %v11086_v24, %v2113_v49  ;;  %v2117_v37 = vpop.xlane.xlu0 %2116 }
 0x41a   : > { %2482 = vmatprep.mubr.f32.mxu1 %v8932_v44  ;;  %v2133_v11 = vsub.f32 %v11110_v62, %v2117_v37 }
 0x41b   : > { %v2154_v4 = vmul.f32 1.442695, %v2128_v36 }
 0x41c   : > { %v2109_v60 = vpop.xlane.xlu1 %2108  ;;  %v2164_v38 = vmul.f32 1.442695, %v2133_v11 }
 0x41d   : > { %8943 = vpow2.f32 %v2154_v4  ;;  %v2129_v45 = vsub.f32 %v11115_v46, %v2109_v60  ;;  %2018 = vadd.xlane.f32.xlu0 %v8936_v25  ;;  %2483 = vmatmul.mubr.f32.gmra.mrb[32].mxu1 %v8936_v25  ;;  %v2160_v46 = vmul.f32 1.442695, %v2131_v58  ;;  %v9414_v58 = vld [vmem:[%s13686_s3 + $0x80] sm:$0xff] }
 0x41f   : > { %v8938_v13 = vpop.eup %8937  ;;  %v2156_v35 = vmul.f32 1.442695, %v2129_v45  ;;  %v11194_v45 = vshrl.u32 %v13773_v20, 7  ;;  %v13932_v20 = vld [vmem:[#allocation18_spill] sm:$0xff] }
 0x420   : > { %v8940_v53 = vpop.eup %8939  ;;  %v1945_v2 = vpop.xlane.xlu1 %1944  ;;  %2184 = vadd.xlane.f32.xlu1 %v8938_v13  ;;  %2487 = vmatprep.mubr.f32.mxu1 %v8938_v13 }
 0x421   : > { %8945 = vpow2.f32 %v2156_v35  ;;  %v1965_v12 = vsub.f32 %v11121_v40, %v1945_v2  ;;  %2020 = vadd.xlane.f32.xlu0 %v8940_v53  ;;  %2488 = vmatmul.mubr.f32.gmra.mrb[34].mxu1 %v8940_v53  ;;  %v2541_v40 = vld [vmem:[%s13687_s4 + $0x50] sm:$0xff]  ;;  %13903 = vst [vmem:[#allocation41_spill] sm:$0xff] %v11194_v45  ;;  %v2052_v3 = vsub.s32 0, %v11194_v45  ;;  %v9413_v53 = vld [vmem:[%s13686_s3] sm:$0xff] }
 0x422   : > { %8947 = vpow2.f32 %v2158_v47  ;;  %v8496_v0 = vpack.c.bf16 %v2542_v19, %v2541_v40  ;;  %v9462_v45 = vld [vmem:[%s13686_s3 + $0xf0] sm:$0xff] }
 0x423   : > { %v8942_v32 = vpop.eup %8941  ;;  %v1992_v16 = vmul.f32 1.442695, %v1965_v12  ;;  %v11200_v47 = vrot.slane %v9413_v53, %v2052_v3  ;;  %v11205_v2 = vrot.slane %v9414_v58, %v2052_v3 }
 0x424   : > { %v1947_v14 = vpop.xlane.xlu1 %1946  ;;  %8497 = vmatprep.subr.bf16.mxu1 %v8496_v0 }
 0x425   : > { %8949 = vpow2.f32 %v1992_v16  ;;  %v1966_v55 = vsub.f32 %v11128_v27, %v1947_v14  ;;  %2022 = vadd.xlane.f32.xlu0 %v8942_v32  ;;  %8499 = vmatpush3.bf16.msra.mxu1 %v8496_v0  ;;  %13904 = vst [vmem:[#allocation33_spill] sm:$0xff] %v11200_v47  ;;  %13905 = vst [vmem:[#allocation32_spill] sm:$0xff] %v11205_v2 }
 0x426   : > { %8951 = vpow2.f32 %v2160_v46 }
 0x427   : > { %v8944_v24 = vpop.eup %8943  ;;  %v1994_v61 = vmul.f32 1.442695, %v1966_v55 }
 0x428   : > { %v1949_v43 = vpop.xlane.xlu1 %1948  ;;  %2186 = vadd.xlane.f32.xlu1 %v8944_v24  ;;  %2492 = vmatprep.mubr.f32.mxu1 %v8944_v24 }
 0x429   : > { %8953 = vpow2.f32 %v1994_v61  ;;  %v1967_v27 = vsub.f32 %v11134_v41, %v1949_v43  ;;  %2493 = vmatmul.mubr.f32.gmra.mrb[36].mxu1 %v8942_v32 }
 0x42a   : > { %8955 = vpow2.f32 %v2162_v17 }
 0x42b   : > { %v8946_v59 = vpop.eup %8945  ;;  %v1996_v1 = vmul.f32 1.442695, %v1967_v27 }
 0x42c   : > { %v1951_v63 = vpop.xlane.xlu1 %1950  ;;  %2188 = vadd.xlane.f32.xlu1 %v8946_v59  ;;  %2497 = vmatprep.mubr.f32.mxu1 %v8946_v59  ;;  %v8948_v52 = vpop.eup %8947 }
 0x42d   : > { %8957 = vpow2.f32 %v1996_v1  ;;  %v1968_v62 = vsub.f32 %v11140_v18, %v1951_v63 }
 0x42e   : > { %8959 = vpow2.f32 %v2164_v38 }
 0x42f   : > { %v8950_v9 = vpop.eup %8949  ;;  %v1998_v15 = vmul.f32 1.442695, %v1968_v62 }
 0x430   : > { %v1953_v21 = vpop.xlane.xlu1 %1952  ;;  %2024 = vadd.xlane.f32.xlu0 %v8950_v9  ;;  %2190 = vadd.xlane.f32.xlu1 %v8948_v52  ;;  %v8952_v44 = vpop.eup %8951 }
 0x431   : > { %8961 = vpow2.f32 %v1998_v15  ;;  %v1969_v41 = vsub.f32 %v11146_v23, %v1953_v21  ;;  %2498 = vmatmul.mubr.f32.gmra.mrb[38].mxu1 %v8950_v9 }
 0x432   : > { %2502 = vmatprep.mubr.f32.mxu1 %v8948_v52 }
 0x433   : > { %v8954_v7 = vpop.eup %8953  ;;  %v2000_v28 = vmul.f32 1.442695, %v1969_v41 }
 0x434   : > { %2026 = vadd.xlane.f32.xlu0 %v8954_v7  ;;  %2192 = vadd.xlane.f32.xlu1 %v8952_v44  ;;  %v8956_v18 = vpop.eup %8955 }
 0x435   : > { %8963 = vpow2.f32 %v2000_v28  ;;  %2503 = vmatmul.mubr.f32.gmra.mrb[40].mxu1 %v8954_v7 }
 0x436   : > { %2507 = vmatprep.mubr.f32.mxu1 %v8952_v44 }
 0x437   : > { %v8958_v42 = vpop.eup %8957 }
 0x438   : > { %2028 = vadd.xlane.f32.xlu0 %v8958_v42  ;;  %2194 = vadd.xlane.f32.xlu1 %v8956_v18  ;;  %v8960_v49 = vpop.eup %8959 }
 0x439   : > { %2508 = vmatmul.mubr.f32.gmra.mrb[42].mxu1 %v8958_v42 }
 0x43a   : > { %2512 = vmatprep.mubr.f32.mxu1 %v8956_v18 }
 0x43b   : > { %v8962_v36 = vpop.eup %8961 }
 0x43c   : > { %2030 = vadd.xlane.f32.xlu0 %v8962_v36  ;;  %2196 = vadd.xlane.f32.xlu1 %v8960_v49 }
 0x43d   : > { %2513 = vmatmul.mubr.f32.gmra.mrb[44].mxu1 %v8962_v36 }
 0x43e   : > { %2517 = vmatprep.mubr.f32.mxu1 %v8960_v49 }
 0x43f   : > { %v8964_v23 = vpop.eup %8963 }
 0x440   : > { %2032 = vadd.xlane.f32.xlu0 %v8964_v23 }
 0x441   : > { %2518 = vmatmul.mubr.f32.gmra.mrb[46].mxu1 %v8964_v23 }
 0x46c   : > { %v2003_v25 = vpop.xlane.xlu0 %2002 }
 0x46d   : > { %v2167_v4 = vpop.xlane.xlu1 %2166  ;;  %8965 = vrcp.f32 %v2003_v25 }
 0x46e   : > { %8967 = vrcp.f32 %v2167_v4 }
 0x471   : > { %v2169_v60 = vpop.xlane.xlu1 %2168 }
 0x472   : > { %v2005_v13 = vpop.xlane.xlu0 %2004  ;;  %8969 = vrcp.f32 %v2169_v60 }
 0x473   : > { %8971 = vrcp.f32 %v2005_v13 }
 0x476   : > { %v2007_v16 = vpop.xlane.xlu0 %2006 }
 0x477   : > { %v8966_v35 = vpop.eup %8965 }
 0x478   : > { %v8968_v12 = vpop.eup %8967  ;;  %v2054_v39 = vmul.f32 %v8966_v35, %v11200_v47 }
 0x479   : > { %v2171_v32 = vpop.xlane.xlu1 %2170  ;;  %v2218_v14 = vmul.f32 %v8968_v12, %v11205_v2 }
 0x47a   : > { %8973 = vrcp.f32 %v2171_v32 }
 0x47b   : > { %8975 = vrcp.f32 %v2007_v16  ;;  %v2234_v61 = vadd.f32 %v2218_v14, %v2054_v39 }
 0x47c   : > { %v8970_v46 = vpop.eup %8969 }
 0x47d   : > { %v8972_v37 = vpop.eup %8971  ;;  %v2219_v17 = vmul.f32 %v8970_v46, %v11205_v2  ;;  %v2009_v27 = vpop.xlane.xlu0 %2008 }
 0x47e   : > { %v2055_v19 = vmul.f32 %v8972_v37, %v11200_v47 }
 0x480   : > { %v2235_v1 = vadd.f32 %v2219_v17, %v2055_v19 }
 0x481   : > { %v2173_v11 = vpop.xlane.xlu1 %2172 }
 0x482   : > { %8977 = vrcp.f32 %v2173_v11 }
 0x483   : > { %8979 = vrcp.f32 %v2009_v27 }
 0x484   : > { %v8974_v63 = vpop.eup %8973 }
 0x485   : > { %v8976_v52 = vpop.eup %8975  ;;  %v2220_v15 = vmul.f32 %v8974_v63, %v11205_v2  ;;  %v2011_v21 = vpop.xlane.xlu0 %2010 }
 0x486   : > { %v2056_v44 = vmul.f32 %v8976_v52, %v11200_v47 }
 0x488   : > { %v2236_v28 = vadd.f32 %v2220_v15, %v2056_v44 }
 0x489   : > { %v2175_v9 = vpop.xlane.xlu1 %2174 }
 0x48a   : > { %8981 = vrcp.f32 %v2175_v9 }
 0x48b   : > { %8983 = vrcp.f32 %v2011_v21 }
 0x48c   : > { %v8978_v42 = vpop.eup %8977 }
 0x48d   : > { %v8980_v36 = vpop.eup %8979  ;;  %v2221_v4 = vmul.f32 %v8978_v42, %v11205_v2  ;;  %v2013_v25 = vpop.xlane.xlu0 %2012 }
 0x48e   : > { %v2057_v13 = vmul.f32 %v8980_v36, %v11200_v47 }
 0x490   : > { %v2237_v53 = vadd.f32 %v2221_v4, %v2057_v13 }
 0x491   : > { %v2177_v23 = vpop.xlane.xlu1 %2176 }
 0x492   : > { %8985 = vrcp.f32 %v2177_v23 }
 0x493   : > { %8987 = vrcp.f32 %v2013_v25 }
 0x494   : > { %v8982_v35 = vpop.eup %8981 }
 0x495   : > { %v8984_v12 = vpop.eup %8983  ;;  %v2222_v46 = vmul.f32 %v8982_v35, %v11205_v2  ;;  %v2015_v39 = vpop.xlane.xlu0 %2014 }
 0x496   : > { %v2058_v37 = vmul.f32 %v8984_v12, %v11200_v47 }
 0x499   : > { %v2179_v16 = vpop.xlane.xlu1 %2178 }
 0x49a   : > { %8989 = vrcp.f32 %v2179_v16 }
 0x49b   : > { %8991 = vrcp.f32 %v2015_v39 }
 0x4a6   : > { %v2017_v19 = vpop.xlane.xlu0 %2016 }
 0x4a7   : > { %8993 = vrcp.f32 %v2017_v19 }
 0x4b4   : > { %v7724_v55 = vpop.f32.mrb[16].mxu1 }
 0x4b5   : > { %v7725_v24 = vpop.f32.mrb[17].mxu1 }
 0x4b6   : > { %v7726_v40 = vadd.f32 %v7725_v24, %v7724_v55  ;;  %v2238_v24 = vadd.f32 %v2222_v46, %v2058_v37 }
 0x4b8   : > { %v2523_v43 = vmul.f32 %v7726_v40, %v2234_v61  ;;  %v7727_v0 = vpop.f32.mrb[18].mxu1  ;;  %v8986_v40 = vpop.eup %8985 }
 0x4b9   : > { %v7728_v59 = vpop.f32.mrb[19].mxu1  ;;  %v8988_v11 = vpop.eup %8987 }
 0x4ba   : > { %v7729_v38 = vadd.f32 %v7728_v59, %v7727_v0  ;;  %8148 = vmatprep.mubr.msk.f32.mxu1 %vm595_vm0, %v2523_v43  ;;  %v2223_v43 = vmul.f32 %v8986_v40, %v11205_v2  ;;  %v2059_v27 = vmul.f32 %v8988_v11, %v11200_v47  ;;  %v2181_v59 = vpop.xlane.xlu1 %2180  ;;  %v8990_v52 = vpop.eup %8989 }
 0x4bb   : > { %v8992_v15 = vpop.eup %8991  ;;  %8995 = vrcp.f32 %v2181_v59 }
 0x4bc   : > { %v2524_v62 = vmul.f32 %v7729_v38, %v2235_v1  ;;  %v2019_v38 = vpop.xlane.xlu0 %2018  ;;  %v2239_v63 = vadd.f32 %v2223_v43, %v2059_v27 }
 0x4bd   : > { %8997 = vrcp.f32 %v2019_v38 }
 0x4be   : > { %8149 = vmatmul.mubr.msk.f32.vlgmr.msra.gmra.mrb[48].mxu1 %vm595_vm0, %v2524_v62  ;;  %v2183_v21 = vpop.xlane.xlu1 %2182 }
 0x4bf   : > { %8999 = vrcp.f32 %v2183_v21 }
 0x4c0   : > { %v7730_v41 = vpop.f32.mrb[20].mxu1  ;;  %v2021_v44 = vpop.xlane.xlu0 %2020 }
 0x4c1   : > { %v7731_v7 = vpop.f32.mrb[21].mxu1 }
 0x4c2   : > { %v7732_v18 = vadd.f32 %v7731_v7, %v7730_v41  ;;  %v2224_v41 = vmul.f32 %v8990_v52, %v11205_v2 }
 0x4c4   : > { %v2525_v49 = vmul.f32 %v7732_v18, %v2236_v28  ;;  %v2060_v28 = vmul.f32 %v8992_v15, %v11200_v47  ;;  %v2185_v18 = vpop.xlane.xlu1 %2184  ;;  %v2023_v4 = vpop.xlane.xlu0 %2022 }
 0x4c5   : > { %9001 = vrcp.f32 %v2185_v18 }
 0x4c6   : > { %8151 = vmatprep.mubr.msk.f32.mxu1 %vm595_vm0, %v2525_v49  ;;  %v2240_v49 = vadd.f32 %v2224_v41, %v2060_v28  ;;  %9003 = vrcp.f32 %v2021_v44 }
 0x4c8   : > { %v7733_v60 = vpop.f32.mrb[22].mxu1  ;;  %v2187_v25 = vpop.xlane.xlu1 %2186 }
 0x4c9   : > { %v7734_v3 = vpop.f32.mrb[23].mxu1  ;;  %9005 = vrcp.f32 %v2187_v25 }
 0x4ca   : > { %v7735_v58 = vadd.f32 %v7734_v3, %v7733_v60  ;;  %v8994_v60 = vpop.eup %8993  ;;  %v2025_v3 = vpop.xlane.xlu0 %2024  ;;  %9007 = vrcp.f32 %v2023_v4 }
 0x4cb   : > { %v8996_v13 = vpop.eup %8995  ;;  %v2061_v35 = vmul.f32 %v8994_v60, %v11200_v47  ;;  %9009 = vrcp.f32 %v2025_v3 }
 0x4cc   : > { %v2526_v32 = vmul.f32 %v7735_v58, %v2237_v53  ;;  %v8998_v53 = vpop.eup %8997  ;;  %v2189_v58 = vpop.xlane.xlu1 %2188 }
 0x4cd   : > { %v9000_v16 = vpop.eup %8999  ;;  %9011 = vrcp.f32 %v2189_v58 }
 0x4ce   : > { %8152 = vmatmul.mubr.msk.f32.gmra.mrb[50].mxu1 %vm595_vm0, %v2526_v32  ;;  %v2225_v32 = vmul.f32 %v8996_v13, %v11205_v2 }
 0x4cf   : > { %v9002_v39 = vpop.eup %9001 }
 0x4d0   : > { %v7736_v14 = vpop.f32.mrb[24].mxu1  ;;  %v2191_v43 = vpop.xlane.xlu1 %2190 }
 0x4d1   : > { %v7737_v55 = vpop.f32.mrb[25].mxu1 }
 0x4d2   : > { %v7738_v61 = vadd.f32 %v7737_v55, %v7736_v14  ;;  %v2241_v14 = vadd.f32 %v2225_v32, %v2061_v35  ;;  %v2062_v55 = vmul.f32 %v8998_v53, %v11200_v47 }
 0x4d4   : > { %v2527_v17 = vmul.f32 %v7738_v61, %v2238_v24  ;;  %v9004_v24 = vpop.eup %9003  ;;  %v2027_v61 = vpop.xlane.xlu0 %2026 }
 0x4d5   : > { %v2063_v59 = vmul.f32 %v9004_v24, %v11200_v47  ;;  %v9006_v21 = vpop.eup %9005  ;;  %v2193_v41 = vpop.xlane.xlu1 %2192  ;;  %9013 = vrcp.f32 %v2027_v61 }
 0x4d6   : > { %8154 = vmatprep.mubr.msk.f32.mxu1 %vm595_vm0, %v2527_v17  ;;  %v2226_v17 = vmul.f32 %v9000_v16, %v11205_v2  ;;  %v2228_v28 = vmul.f32 %v9006_v21, %v11205_v2  ;;  %9015 = vrcp.f32 %v2191_v43 }
 0x4d8   : > { %v7739_v0 = vpop.f32.mrb[26].mxu1  ;;  %v2029_v52 = vpop.xlane.xlu0 %2028 }
 0x4d9   : > { %v7740_v1 = vpop.f32.mrb[27].mxu1  ;;  %9017 = vrcp.f32 %v2029_v52 }
 0x4da   : > { %v7741_v62 = vadd.f32 %v7740_v1, %v7739_v0  ;;  %v2242_v0 = vadd.f32 %v2226_v17, %v2062_v55  ;;  %v2227_v1 = vmul.f32 %v9002_v39, %v11205_v2  ;;  %9019 = vrcp.f32 %v2193_v41 }
 0x4dc   : > { %v2528_v9 = vmul.f32 %v7741_v62, %v2239_v63  ;;  %v2031_v18 = vpop.xlane.xlu0 %2030 }
 0x4dd   : > { %9021 = vrcp.f32 %v2031_v18 }
 0x4de   : > { %8155 = vmatmul.mubr.msk.f32.gmra.mrb[52].mxu1 %vm595_vm0, %v2528_v9  ;;  %v2243_v9 = vadd.f32 %v2227_v1, %v2063_v59 }
 0x4e0   : > { %v7742_v7 = vpop.f32.mrb[28].mxu1  ;;  %v2033_v35 = vpop.xlane.xlu0 %2032 }
 0x4e1   : > { %v7743_v42 = vpop.f32.mrb[29].mxu1 }
 0x4e2   : > { %v7744_v36 = vadd.f32 %v7743_v42, %v7742_v7  ;;  %v9008_v7 = vpop.eup %9007 }
 0x4e3   : > { %v9010_v60 = vpop.eup %9009 }
 0x4e4   : > { %v2529_v23 = vmul.f32 %v7744_v36, %v2240_v49  ;;  %v2064_v49 = vmul.f32 %v9008_v7, %v11200_v47  ;;  %v9012_v3 = vpop.eup %9011  ;;  %v2065_v53 = vmul.f32 %v9010_v60, %v11200_v47 }
 0x4e5   : > { %v9014_v58 = vpop.eup %9013  ;;  %v2229_v16 = vmul.f32 %v9012_v3, %v11205_v2 }
 0x4e6   : > { %8157 = vmatprep.mubr.msk.f32.mxu1 %vm595_vm0, %v2529_v23  ;;  %v2195_v23 = vpop.xlane.xlu1 %2194  ;;  %v2244_v4 = vadd.f32 %v2228_v28, %v2064_v49  ;;  %v2066_v55 = vmul.f32 %v9014_v58, %v11200_v47  ;;  %v11258_v58 = vld [vmem:[%s13688_s5 + $0x4] ss:$0 sm:$0xff] }
 0x4e7   : > { %9023 = vrcp.f32 %v2195_v23 }
 0x4e8   : > { %9025 = vrcp.f32 %v2033_v35 }
 0x4ec   : > { %v7745_v12 = vpop.f32.mrb[30].mxu1 }
 0x4ed   : > { %v7746_v46 = vpop.f32.mrb[31].mxu1 }
 0x4ee   : > { %v7747_v37 = vadd.f32 %v7746_v46, %v7745_v12  ;;  %v2197_v12 = vpop.xlane.xlu1 %2196  ;;  %v9016_v46 = vpop.eup %9015 }
 0x4ef   : > { %v9018_v24 = vpop.eup %9017  ;;  %9027 = vrcp.f32 %v2197_v12 }
 0x4f0   : > { %v2530_v40 = vmul.f32 %v7747_v37, %v2241_v14  ;;  %v7748_v19 = vpop.f32.mrb[32].mxu1  ;;  %v2245_v14 = vadd.f32 %v2229_v16, %v2065_v53  ;;  %v9020_v17 = vpop.eup %9019 }
 0x4f1   : > { %v7749_v11 = vpop.f32.mrb[33].mxu1  ;;  %v9022_v59 = vpop.eup %9021 }
 0x4f2   : > { %v7750_v27 = vadd.f32 %v7749_v11, %v7748_v19  ;;  %8158 = vmatmul.mubr.msk.f32.gmra.mrb[54].mxu1 %vm595_vm0, %v2530_v40  ;;  %v2230_v19 = vmul.f32 %v9016_v46, %v11205_v2  ;;  %v2068_v21 = vmul.f32 %v9022_v59, %v11200_v47 }
 0x4f4   : > { %v2531_v38 = vmul.f32 %v7750_v27, %v2242_v0  ;;  %v7751_v63 = vpop.f32.mrb[34].mxu1  ;;  %v2246_v43 = vadd.f32 %v2230_v19, %v2066_v55  ;;  %v2067_v27 = vmul.f32 %v9018_v24, %v11200_v47 }
 0x4f5   : > { %v7752_v62 = vpop.f32.mrb[35].mxu1 }
 0x4f6   : > { %v7753_v15 = vadd.f32 %v7752_v62, %v7751_v63  ;;  %8160 = vmatprep.mubr.msk.f32.mxu1 %vm595_vm0, %v2531_v38  ;;  %v2231_v63 = vmul.f32 %v9020_v17, %v11205_v2  ;;  %v9024_v62 = vpop.eup %9023 }
 0x4f7   : > { %v9026_v41 = vpop.eup %9025  ;;  %v2232_v28 = vmul.f32 %v9024_v62, %v11205_v2 }
 0x4f8   : > { %v2532_v44 = vmul.f32 %v7753_v15, %v2243_v9  ;;  %v2247_v9 = vadd.f32 %v2231_v63, %v2067_v27  ;;  %v2069_v23 = vmul.f32 %v9026_v41, %v11200_v47 }
 0x4f9   : > { %v9028_v18 = vpop.eup %9027  ;;  %v2248_v49 = vadd.f32 %v2232_v28, %v2068_v21 }
 0x4fa   : > { %8161 = vmatmul.mubr.msk.f32.gmra.mrb[56].mxu1 %vm595_vm0, %v2532_v44  ;;  %v2233_v60 = vmul.f32 %v9028_v18, %v11205_v2  ;;  %v13940_v2 = vld [vmem:[#allocation40_spill] sm:$0xff] }
 0x4fc   : > { %v7754_v42 = vpop.f32.mrb[36].mxu1  ;;  %v2249_v3 = vadd.f32 %v2233_v60, %v2069_v23 }
 0x4fd   : > { %v7755_v36 = vpop.f32.mrb[37].mxu1 }
 0x4fe   : > { %v7756_v25 = vadd.f32 %v7755_v36, %v7754_v42 }
 0x500   : > { %v2533_v13 = vmul.f32 %v7756_v25, %v2244_v4 }
 0x502   : > { %8163 = vmatprep.mubr.msk.f32.mxu1 %vm595_vm0, %v2533_v13 }
 0x504   : > { %v7757_v32 = vpop.f32.mrb[38].mxu1 }
 0x505   : > { %v7758_v39 = vpop.f32.mrb[39].mxu1 }
 0x506   : > { %v7759_v37 = vadd.f32 %v7758_v39, %v7757_v32 }
 0x508   : > { %v2534_v61 = vmul.f32 %v7759_v37, %v2245_v14  ;;  %v7760_v40 = vpop.f32.mrb[40].mxu1 }
 0x509   : > { %v7761_v11 = vpop.f32.mrb[41].mxu1 }
 0x50a   : > { %v7762_v0 = vadd.f32 %v7761_v11, %v7760_v40  ;;  %8164 = vmatmul.mubr.msk.f32.gmra.mrb[58].mxu1 %vm595_vm0, %v2534_v61 }
 0x50c   : > { %v2535_v1 = vmul.f32 %v7762_v0, %v2246_v43  ;;  %v7763_v38 = vpop.f32.mrb[42].mxu1 }
 0x50d   : > { %v7764_v52 = vpop.f32.mrb[43].mxu1 }
 0x50e   : > { %v7765_v15 = vadd.f32 %v7764_v52, %v7763_v38  ;;  %8166 = vmatprep.mubr.msk.f32.mxu1 %vm595_vm0, %v2535_v1 }
 0x510   : > { %v2536_v44 = vmul.f32 %v7765_v15, %v2247_v9  ;;  %v7766_v7 = vpop.f32.mrb[44].mxu1 }
 0x511   : > { %v7767_v42 = vpop.f32.mrb[45].mxu1 }
 0x512   : > { %v7768_v36 = vadd.f32 %v7767_v42, %v7766_v7  ;;  %8167 = vmatmul.mubr.msk.f32.gmra.mrb[60].mxu1 %vm595_vm0, %v2536_v44 }
 0x514   : > { %v2537_v4 = vmul.f32 %v7768_v36, %v2248_v49  ;;  %v7769_v25 = vpop.f32.mrb[46].mxu1 }
 0x515   : > { %v7770_v13 = vpop.f32.mrb[47].mxu1 }
 0x516   : > { %v7771_v35 = vadd.f32 %v7770_v13, %v7769_v25  ;;  %8169 = vmatprep.mubr.msk.f32.mxu1 %vm595_vm0, %v2537_v4 }
 0x518   : > { %v2538_v53 = vmul.f32 %v7771_v35, %v2249_v3 }
 0x51a   : > { %8170 = vmatmul.mubr.msk.f32.gmra.mrb[62].mxu1 %vm595_vm0, %v2538_v53 }
 0x591   : > { %v8150_v12 = vpop.f32.mrb[48].mxu1 }
 0x592   : > { %v2668_v32 = vadd.f32 %v8150_v12, %v11258_v58  ;;  %v2662_v16 = vpop.f32.mrb[49].mxu1 }
 0x593   : > { %v2663_v46 = vadd.f32 %v11258_v58, %v2662_v16 }
 0x594   : > { %v11263_v39 = vadd.f32 %v2668_v32, %v10580_v48 }
 0x595   : > { %v11266_v14 = vadd.f32 %v2663_v46, %v10560_v5 }
 0x596   : > { %v2762_v37 = vsel %vm595_vm0, %v11263_v39, 0.0 }
 0x597   : > { %2763 = vadd.xlane.f32.xlu1 %v2762_v37  ;;  %v2759_v55 = vsel %vm595_vm0, %v11266_v14, 0.0 }
 0x598   : > { %2760 = vadd.xlane.f32.xlu0 %v2759_v55 }
 0x5a1   : > { %v8153_v24 = vpop.f32.mrb[50].mxu1 }
 0x5a2   : > { %v2678_v61 = vadd.f32 %v8153_v24, %v11258_v58  ;;  %v2672_v40 = vpop.f32.mrb[51].mxu1 }
 0x5a3   : > { %v2673_v19 = vadd.f32 %v11258_v58, %v2672_v40  ;;  %v3119_v40 = vld [vmem:[%s13687_s4 + $0x60] sm:$0xff] }
 0x5a4   : > { %v11275_v48 = vadd.f32 %v2678_v61, %v10617_v22 }
 0x5a5   : > { %v11278_v5 = vadd.f32 %v2673_v19, %v10606_v6 }
 0x5a6   : > { %v2768_v17 = vsel %vm595_vm0, %v11275_v48, 0.0 }
 0x5a7   : > { %2769 = vadd.xlane.f32.xlu1 %v2768_v17  ;;  %v2765_v11 = vsel %vm595_vm0, %v11278_v5, 0.0 }
 0x5a8   : > { %2766 = vadd.xlane.f32.xlu0 %v2765_v11 }
 0x5b1   : > { %v8156_v43 = vpop.f32.mrb[52].mxu1 }
 0x5b2   : > { %v2688_v0 = vadd.f32 %v8156_v43, %v11258_v58  ;;  %v2682_v27 = vpop.f32.mrb[53].mxu1 }
 0x5b3   : > { %v2683_v59 = vadd.f32 %v11258_v58, %v2682_v27 }
 0x5b4   : > { %v11287_v22 = vadd.f32 %v2688_v0, %v10633_v30 }
 0x5b5   : > { %v11290_v6 = vadd.f32 %v2683_v59, %v10628_v57 }
 0x5b6   : > { %v2774_v1 = vsel %vm595_vm0, %v11287_v22, 0.0 }
 0x5b7   : > { %2775 = vadd.xlane.f32.xlu1 %v2774_v1  ;;  %v2771_v38 = vsel %vm595_vm0, %v11290_v6, 0.0 }
 0x5b8   : > { %2772 = vadd.xlane.f32.xlu0 %v2771_v38 }
 0x5c5   : > { %v8159_v63 = vpop.f32.mrb[54].mxu1 }
 0x5c6   : > { %v2698_v62 = vadd.f32 %v8159_v63, %v11258_v58  ;;  %v2692_v52 = vpop.f32.mrb[55].mxu1 }
 0x5c7   : > { %v2693_v9 = vadd.f32 %v11258_v58, %v2692_v52 }
 0x5c8   : > { %v11299_v30 = vadd.f32 %v2698_v62, %v10647_v29 }
 0x5c9   : > { %v11302_v57 = vadd.f32 %v2693_v9, %v10640_v26 }
 0x5ca   : > { %v2780_v15 = vsel %vm595_vm0, %v11299_v30, 0.0 }
 0x5cb   : > { %2781 = vadd.xlane.f32.xlu1 %v2780_v15  ;;  %v2777_v21 = vsel %vm595_vm0, %v11302_v57, 0.0 }
 0x5cc   : > { %2778 = vadd.xlane.f32.xlu0 %v2777_v21 }
 0x5cd   : > { %v8162_v41 = vpop.f32.mrb[56].mxu1 }
 0x5ce   : > { %v2708_v44 = vadd.f32 %v8162_v41, %v11258_v58  ;;  %v2702_v7 = vpop.f32.mrb[57].mxu1 }
 0x5cf   : > { %v2703_v28 = vadd.f32 %v11258_v58, %v2702_v7 }
 0x5d0   : > { %v11311_v29 = vadd.f32 %v2708_v44, %v10673_v8 }
 0x5d1   : > { %v11314_v26 = vadd.f32 %v2703_v28, %v10656_v50 }
 0x5d2   : > { %v2786_v18 = vsel %vm595_vm0, %v11311_v29, 0.0 }
 0x5d3   : > { %2787 = vadd.xlane.f32.xlu1 %v2786_v18  ;;  %v2783_v42 = vsel %vm595_vm0, %v11314_v26, 0.0 }
 0x5d4   : > { %2784 = vadd.xlane.f32.xlu0 %v2783_v42 }
 0x5dd   : > { %v8165_v49 = vpop.f32.mrb[58].mxu1 }
 0x5de   : > { %v2718_v36 = vadd.f32 %v8165_v49, %v11258_v58  ;;  %v2712_v23 = vpop.f32.mrb[59].mxu1 }
 0x5df   : > { %v2713_v4 = vadd.f32 %v11258_v58, %v2712_v23 }
 0x5e0   : > { %v11323_v8 = vadd.f32 %v2718_v36, %v10695_v31 }
 0x5e1   : > { %v11326_v50 = vadd.f32 %v2713_v4, %v10682_v10 }
 0x5e2   : > { %v2792_v25 = vsel %vm595_vm0, %v11323_v8, 0.0 }
 0x5e3   : > { %2793 = vadd.xlane.f32.xlu1 %v2792_v25  ;;  %v2789_v60 = vsel %vm595_vm0, %v11326_v50, 0.0 }
 0x5e4   : > { %2790 = vadd.xlane.f32.xlu0 %v2789_v60 }
 0x5e5   : > { %v8168_v13 = vpop.f32.mrb[60].mxu1 }
 0x5e6   : > { %v2728_v3 = vadd.f32 %v8168_v13, %v11258_v58  ;;  %v2722_v35 = vpop.f32.mrb[61].mxu1 }
 0x5e7   : > { %v2723_v53 = vadd.f32 %v11258_v58, %v2722_v35 }
 0x5e8   : > { %v11335_v31 = vadd.f32 %v2728_v3, %v10726_v56 }
 0x5e9   : > { %v11338_v10 = vadd.f32 %v2723_v53, %v10706_v51  ;;  %v3121_v53 = vld [vmem:[%s13687_s4 + $0x70] sm:$0xff] }
 0x5ea   : > { %v2798_v12 = vsel %vm595_vm0, %v11335_v31, 0.0 }
 0x5eb   : > { %2799 = vadd.xlane.f32.xlu1 %v2798_v12  ;;  %v2795_v32 = vsel %vm595_vm0, %v11338_v10, 0.0  ;;  %v3122_v12 = vld [vmem:[%s13687_s4 + $0x78] sm:$0xff] }
 0x5ec   : > { %2796 = vadd.xlane.f32.xlu0 %v2795_v32 }
 0x5ed   : > { %v8171_v16 = vpop.f32.mrb[62].mxu1 }
 0x5ee   : > { %v2738_v46 = vadd.f32 %v8171_v16, %v11258_v58  ;;  %v2732_v37 = vpop.f32.mrb[63].mxu1  ;;  %v8504_v16 = vpack.c.bf16 %v3122_v12, %v3121_v53  ;;  %v3338_v12 = vld [vmem:[%s13687_s4 + $0x88] sm:$0xff] }
 0x5ef   : > { %v2733_v55 = vadd.f32 %v11258_v58, %v2732_v37 }
 0x5f0   : > { %v11347_v56 = vadd.f32 %v2738_v46, %v10747_v34  ;;  %v3120_v34 = vld [vmem:[%s13687_s4 + $0x68] sm:$0xff] }
 0x5f1   : > { %v11350_v51 = vadd.f32 %v2733_v55, %v10737_v33  ;;  %v8500_v58 = vpack.c.bf16 %v3120_v34, %v3119_v40 }
 0x5f2   : > { %v2804_v24 = vsel %vm595_vm0, %v11347_v56, 0.0 }
 0x5f3   : > { %2805 = vadd.xlane.f32.xlu1 %v2804_v24  ;;  %v2801_v61 = vsel %vm595_vm0, %v11350_v51, 0.0  ;;  %8501 = vmatprep.subr.bf16.mxu0 %v8500_v58 }
 0x5f4   : > { %2802 = vadd.xlane.f32.xlu0 %v2801_v61  ;;  %8503 = vmatpush3.bf16.msra.mxu0 %v8500_v58 }
 0x5f5   : > { %8505 = vmatprep.subr.bf16.mxu0 %v8504_v16 }
 0x5f8   : > { %8507 = vmatpush3.bf16.msra.mxu0 %v8504_v16 }
 0x624   : > { %v2764_v33 = vpop.xlane.xlu1 %2763 }
 0x625   : > { %v2808_v19 = vmul.f32 0.03125, %v2764_v33  ;;  %v2761_v17 = vpop.xlane.xlu0 %2760 }
 0x626   : > { %v2807_v11 = vmul.f32 0.03125, %v2761_v17 }
 0x627   : > { %v11363_v43 = vsub.f32 %v11263_v39, %v2808_v19 }
 0x628   : > { %v11366_v0 = vsub.f32 %v11266_v14, %v2807_v11 }
 0x629   : > { %v2840_v27 = vmul.f32 %v11363_v43, %v11363_v43 }
 0x62a   : > { %v2839_v59 = vmul.f32 %v11366_v0, %v11366_v0 }
 0x62b   : > { %v2858_v1 = vsel %vm595_vm0, %v2840_v27, 0.0 }
 0x62c   : > { %2859 = vadd.xlane.f32.xlu1 %v2858_v1  ;;  %v2855_v38 = vsel %vm595_vm0, %v2839_v59, 0.0 }
 0x62d   : > { %2856 = vadd.xlane.f32.xlu0 %v2855_v38 }
 0x634   : > { %v2770_v63 = vpop.xlane.xlu1 %2769 }
 0x635   : > { %v2810_v62 = vmul.f32 0.03125, %v2770_v63  ;;  %v2767_v52 = vpop.xlane.xlu0 %2766 }
 0x636   : > { %v2809_v39 = vmul.f32 0.03125, %v2767_v52 }
 0x637   : > { %v11375_v9 = vsub.f32 %v11275_v48, %v2810_v62 }
 0x638   : > { %v11378_v14 = vsub.f32 %v11278_v5, %v2809_v39 }
 0x639   : > { %v2842_v15 = vmul.f32 %v11375_v9, %v11375_v9 }
 0x63a   : > { %v2841_v21 = vmul.f32 %v11378_v14, %v11378_v14 }
 0x63b   : > { %v2864_v41 = vsel %vm595_vm0, %v2842_v15, 0.0 }
 0x63c   : > { %2865 = vadd.xlane.f32.xlu1 %v2864_v41  ;;  %v2861_v44 = vsel %vm595_vm0, %v2841_v21, 0.0 }
 0x63d   : > { %2862 = vadd.xlane.f32.xlu0 %v2861_v44 }
 0x644   : > { %v2776_v7 = vpop.xlane.xlu1 %2775 }
 0x645   : > { %v2812_v28 = vmul.f32 0.03125, %v2776_v7  ;;  %v2773_v18 = vpop.xlane.xlu0 %2772 }
 0x646   : > { %v2811_v48 = vmul.f32 0.03125, %v2773_v18 }
 0x647   : > { %v11387_v42 = vsub.f32 %v11287_v22, %v2812_v28 }
 0x648   : > { %v11390_v5 = vsub.f32 %v11290_v6, %v2811_v48 }
 0x649   : > { %v2844_v49 = vmul.f32 %v11387_v42, %v11387_v42 }
 0x64a   : > { %v2843_v36 = vmul.f32 %v11390_v5, %v11390_v5 }
 0x64b   : > { %v2870_v23 = vsel %vm595_vm0, %v2844_v49, 0.0 }
 0x64c   : > { %2871 = vadd.xlane.f32.xlu1 %v2870_v23  ;;  %v2867_v4 = vsel %vm595_vm0, %v2843_v36, 0.0 }
 0x64d   : > { %2868 = vadd.xlane.f32.xlu0 %v2867_v4 }
 0x658   : > { %v2782_v25 = vpop.xlane.xlu1 %2781 }
 0x659   : > { %v2814_v60 = vmul.f32 0.03125, %v2782_v25  ;;  %v2779_v13 = vpop.xlane.xlu0 %2778 }
 0x65a   : > { %v2813_v22 = vmul.f32 0.03125, %v2779_v13 }
 0x65b   : > { %v11399_v3 = vsub.f32 %v11299_v30, %v2814_v60 }
 0x65c   : > { %v11402_v6 = vsub.f32 %v11302_v57, %v2813_v22 }
 0x65d   : > { %v2846_v35 = vmul.f32 %v11399_v3, %v11399_v3 }
 0x65e   : > { %v2845_v32 = vmul.f32 %v11402_v6, %v11402_v6 }
 0x65f   : > { %v2876_v30 = vsel %vm595_vm0, %v2846_v35, 0.0 }
 0x660   : > { %v2788_v46 = vpop.xlane.xlu1 %2787  ;;  %2877 = vadd.xlane.f32.xlu1 %v2876_v30  ;;  %v2873_v57 = vsel %vm595_vm0, %v2845_v32, 0.0 }
 0x661   : > { %v2816_v37 = vmul.f32 0.03125, %v2788_v46  ;;  %2874 = vadd.xlane.f32.xlu0 %v2873_v57  ;;  %v2785_v55 = vpop.xlane.xlu0 %2784 }
 0x662   : > { %v2815_v24 = vmul.f32 0.03125, %v2785_v55 }
 0x663   : > { %v11417_v61 = vsub.f32 %v11311_v29, %v2816_v37 }
 0x664   : > { %v11420_v40 = vsub.f32 %v11314_v26, %v2815_v24 }
 0x665   : > { %v2848_v34 = vmul.f32 %v11417_v61, %v11417_v61 }
 0x666   : > { %v2847_v58 = vmul.f32 %v11420_v40, %v11420_v40 }
 0x667   : > { %v2882_v33 = vsel %vm595_vm0, %v2848_v34, 0.0 }
 0x668   : > { %2883 = vadd.xlane.f32.xlu1 %v2882_v33  ;;  %v2879_v19 = vsel %vm595_vm0, %v2847_v58, 0.0 }
 0x669   : > { %2880 = vadd.xlane.f32.xlu0 %v2879_v19 }
 0x670   : > { %v2794_v17 = vpop.xlane.xlu1 %2793 }
 0x671   : > { %v2818_v11 = vmul.f32 0.03125, %v2794_v17  ;;  %v2791_v27 = vpop.xlane.xlu0 %2790 }
 0x672   : > { %v2817_v29 = vmul.f32 0.03125, %v2791_v27 }
 0x673   : > { %v11429_v59 = vsub.f32 %v11323_v8, %v2818_v11 }
 0x674   : > { %v11432_v26 = vsub.f32 %v11326_v50, %v2817_v29 }
 0x675   : > { %v2850_v1 = vmul.f32 %v11429_v59, %v11429_v59 }
 0x676   : > { %v2849_v38 = vmul.f32 %v11432_v26, %v11432_v26 }
 0x677   : > { %v2888_v63 = vsel %vm595_vm0, %v2850_v1, 0.0 }
 0x678   : > { %v2800_v62 = vpop.xlane.xlu1 %2799  ;;  %2889 = vadd.xlane.f32.xlu1 %v2888_v63  ;;  %v2885_v52 = vsel %vm595_vm0, %v2849_v38, 0.0 }
 0x679   : > { %v2820_v39 = vmul.f32 0.03125, %v2800_v62  ;;  %2886 = vadd.xlane.f32.xlu0 %v2885_v52  ;;  %v2797_v15 = vpop.xlane.xlu0 %2796  ;;  %v11473_v62 = vld [vmem:[%s13688_s5 + $0x5] ss:$0 sm:$0xff] }
 0x67a   : > { %v2819_v8 = vmul.f32 0.03125, %v2797_v15 }
 0x67b   : > { %v11441_v21 = vsub.f32 %v11335_v31, %v2820_v39 }
 0x67c   : > { %v11444_v50 = vsub.f32 %v11338_v10, %v2819_v8 }
 0x67d   : > { %v2852_v41 = vmul.f32 %v11441_v21, %v11441_v21 }
 0x67e   : > { %v2851_v44 = vmul.f32 %v11444_v50, %v11444_v50 }
 0x67f   : > { %v2894_v7 = vsel %vm595_vm0, %v2852_v41, 0.0 }
 0x680   : > { %2895 = vadd.xlane.f32.xlu1 %v2894_v7  ;;  %v2806_v28 = vpop.xlane.xlu1 %2805  ;;  %v2891_v18 = vsel %vm595_vm0, %v2851_v44, 0.0 }
 0x681   : > { %v2822_v48 = vmul.f32 0.03125, %v2806_v28  ;;  %2892 = vadd.xlane.f32.xlu0 %v2891_v18  ;;  %v2803_v49 = vpop.xlane.xlu0 %2802 }
 0x682   : > { %v2821_v31 = vmul.f32 0.03125, %v2803_v49 }
 0x683   : > { %v11453_v36 = vsub.f32 %v11347_v56, %v2822_v48  ;;  %v11480_v48 = vld [vmem:[%s13688_s5 + $0x6] ss:$0 sm:$0xff] }
 0x684   : > { %v11456_v10 = vsub.f32 %v11350_v51, %v2821_v31  ;;  %v3337_v51 = vld [vmem:[%s13687_s4 + $0x80] sm:$0xff] }
 0x685   : > { %v2854_v23 = vmul.f32 %v11453_v36, %v11453_v36  ;;  %v8508_v16 = vpack.c.bf16 %v3338_v12, %v3337_v51 }
 0x686   : > { %v2853_v4 = vmul.f32 %v11456_v10, %v11456_v10 }
 0x687   : > { %v2900_v25 = vsel %vm595_vm0, %v2854_v23, 0.0  ;;  %8509 = vmatprep.subr.bf16.mxu1 %v8508_v16 }
 0x688   : > { %2901 = vadd.xlane.f32.xlu1 %v2900_v25  ;;  %v2897_v60 = vsel %vm595_vm0, %v2853_v4, 0.0  ;;  %8511 = vmatpush3.bf16.msra.mxu1 %v8508_v16 }
 0x689   : > { %2898 = vadd.xlane.f32.xlu0 %v2897_v60 }
 0x6b9   : > { %v2860_v13 = vpop.xlane.xlu1 %2859 }
 0x6ba   : > { %v2904_v22 = vmul.f32 0.03125, %v2860_v13  ;;  %v2857_v35 = vpop.xlane.xlu0 %2856 }
 0x6bb   : > { %v2903_v56 = vmul.f32 0.03125, %v2857_v35 }
 0x6bc   : > { %v2920_v53 = vadd.f32 1e-08, %v2904_v22 }
 0x6bd   : > { %v2919_v32 = vadd.f32 1e-08, %v2903_v56 }
 0x6be   : > { %9029 = vrsqrt.f32 %v2920_v53  ;;  %vm2944_vm6 = vcmp.eq.f32.partialorder %v2920_v53, inf  ;;  %vm2946_vm7 = vcmp.eq.f32.partialorder %v2920_v53, 0.0  ;;  %v2947_v37 = vand.u32 2147483648, %v2920_v53 }
 0x6bf   : > { %9031 = vrsqrt.f32 %v2919_v32  ;;  %vm2937_vm8 = vcmp.eq.f32.partialorder %v2919_v32, inf  ;;  %v2940_v58 = vand.u32 2147483648, %v2919_v32  ;;  %vm2939_vm9 = vcmp.eq.f32.partialorder %v2919_v32, 0.0 }
 0x6c8   : > { %v9030_v30 = vpop.eup %9029 }
 0x6c9   : > { %v9032_v46 = vpop.eup %9031  ;;  %v2943_v57 = vmul.f32 %v9030_v30, %v2920_v53  ;;  %v2866_v24 = vpop.xlane.xlu1 %2865 }
 0x6ca   : > { %v2936_v55 = vmul.f32 %v9032_v46, %v2919_v32  ;;  %v2906_v33 = vmul.f32 0.03125, %v2866_v24  ;;  %v2863_v19 = vpop.xlane.xlu0 %2862 }
 0x6cb   : > { %v2945_v34 = vsel %vm2944_vm6, %v2920_v53, %v2943_v57  ;;  %v2905_v27 = vmul.f32 0.03125, %v2863_v19 }
 0x6cc   : > { %v2948_v17 = vsel %vm2946_vm7, %v2947_v37, %v2945_v34  ;;  %v2938_v11 = vsel %vm2937_vm8, %v2919_v32, %v2936_v55  ;;  %v2922_v1 = vadd.f32 1e-08, %v2906_v33 }
 0x6cd   : > { %9033 = vrcp.f32 %v2948_v17  ;;  %v2941_v29 = vsel %vm2939_vm9, %v2940_v58, %v2938_v11  ;;  %v2921_v38 = vadd.f32 1e-08, %v2905_v27 }
 0x6ce   : > { %9035 = vrcp.f32 %v2941_v29  ;;  %vm2958_vm10 = vcmp.eq.f32.partialorder %v2922_v1, inf  ;;  %vm2960_vm11 = vcmp.eq.f32.partialorder %v2922_v1, 0.0  ;;  %v2961_v31 = vand.u32 2147483648, %v2922_v1 }
 0x6cf   : > { %9037 = vrsqrt.f32 %v2922_v1  ;;  %vm2951_vm12 = vcmp.eq.f32.partialorder %v2921_v38, inf  ;;  %vm2953_vm13 = vcmp.eq.f32.partialorder %v2921_v38, 0.0 }
 0x6d0   : > { %9039 = vrsqrt.f32 %v2921_v38 }
 0x6d7   : > { %v9034_v63 = vpop.eup %9033 }
 0x6d8   : > { %v9036_v52 = vpop.eup %9035  ;;  %v3050_v39 = vmul.f32 %v9034_v63, %v11363_v43 }
 0x6d9   : > { %v9038_v15 = vpop.eup %9037  ;;  %v2872_v8 = vpop.xlane.xlu1 %2871  ;;  %v3048_v41 = vmul.f32 %v9036_v52, %v11366_v0  ;;  %v2954_v0 = vand.u32 2147483648, %v2921_v38 }
 0x6da   : > { %v9040_v44 = vpop.eup %9039  ;;  %v2957_v7 = vmul.f32 %v9038_v15, %v2922_v1  ;;  %v2908_v28 = vmul.f32 0.03125, %v2872_v8  ;;  %v2869_v18 = vpop.xlane.xlu0 %2868  ;;  %v3084_v49 = vmul.f32 %v11473_v62, %v3050_v39 }
 0x6db   : > { %v2950_v23 = vmul.f32 %v9040_v44, %v2921_v38  ;;  %v2907_v43 = vmul.f32 0.03125, %v2869_v18  ;;  %v3083_v4 = vmul.f32 %v11473_v62, %v3048_v41 }
 0x6dc   : > { %v2959_v25 = vsel %vm2958_vm10, %v2922_v1, %v2957_v7  ;;  %v2924_v60 = vadd.f32 1e-08, %v2908_v28  ;;  %v11489_v51 = vadd.f32 %v11480_v48, %v3084_v49 }
 0x6dd   : > { %v2952_v13 = vsel %vm2951_vm12, %v2921_v38, %v2950_v23  ;;  %v2923_v22 = vadd.f32 1e-08, %v2907_v43  ;;  %v11485_v35 = vadd.f32 %v11480_v48, %v3083_v4  ;;  %v2962_v56 = vsel %vm2960_vm11, %v2961_v31, %v2959_v25 }
 0x6de   : > { %v2955_v53 = vsel %vm2953_vm13, %v2954_v0, %v2952_v13  ;;  %9041 = vrsqrt.f32 %v2924_v60  ;;  %vm2972_vm14 = vcmp.eq.f32.partialorder %v2924_v60, inf  ;;  %vm2974_vm15 = vcmp.eq.f32.partialorder %v2924_v60, 0.0 }
 0x6df   : > { %9043 = vrsqrt.f32 %v2923_v22  ;;  %8180 = vmatprep.mubr.msk.f32.mxu0 %vm595_vm0, %v11485_v35  ;;  %v2975_v46 = vand.u32 2147483648, %v2924_v60  ;;  %vm2965_vm2 = vcmp.eq.f32.partialorder %v2923_v22, inf  ;;  %v2968_v24 = vand.u32 2147483648, %v2923_v22 }
 0x6e0   : > { %8181 = vmatmul.mubr.msk.f32.vlgmr.msra.gmra.mrb[48].mxu0 %vm595_vm0, %v11489_v51  ;;  %9045 = vrcp.f32 %v2955_v53  ;;  %vm2967_vm3 = vcmp.eq.f32.partialorder %v2923_v22, 0.0 }
 0x6e1   : > { %9047 = vrcp.f32 %v2962_v56 }
 0x6e8   : > { %v9042_v12 = vpop.eup %9041 }
 0x6e9   : > { %v9044_v32 = vpop.eup %9043  ;;  %v2971_v16 = vmul.f32 %v9042_v12, %v2924_v60 }
 0x6ea   : > { %v9046_v30 = vpop.eup %9045  ;;  %v2964_v57 = vmul.f32 %v9044_v32, %v2923_v22 }
 0x6eb   : > { %v9048_v37 = vpop.eup %9047  ;;  %v2973_v55 = vsel %vm2972_vm14, %v2924_v60, %v2971_v16  ;;  %v3052_v34 = vmul.f32 %v9046_v30, %v11378_v14 }
 0x6ec   : > { %v2976_v58 = vsel %vm2974_vm15, %v2975_v46, %v2973_v55  ;;  %v2966_v33 = vsel %vm2965_vm2, %v2923_v22, %v2964_v57  ;;  %v3054_v19 = vmul.f32 %v9048_v37, %v11375_v9 }
 0x6ed   : > { %v2969_v17 = vsel %vm2967_vm3, %v2968_v24, %v2966_v33  ;;  %v2878_v11 = vpop.xlane.xlu1 %2877  ;;  %v3085_v27 = vmul.f32 %v11473_v62, %v3052_v34  ;;  %9049 = vrcp.f32 %v2976_v58 }
 0x6ee   : > { %v2910_v29 = vmul.f32 0.03125, %v2878_v11  ;;  %v2875_v1 = vpop.xlane.xlu0 %2874  ;;  %v3086_v38 = vmul.f32 %v11473_v62, %v3054_v19  ;;  %9051 = vrcp.f32 %v2969_v17 }
 0x6ef   : > { %v2909_v63 = vmul.f32 0.03125, %v2875_v1  ;;  %v11500_v52 = vadd.f32 %v11480_v48, %v3085_v27 }
 0x6f0   : > { %v2926_v14 = vadd.f32 1e-08, %v2910_v29  ;;  %v11503_v39 = vadd.f32 %v11480_v48, %v3086_v38 }
 0x6f1   : > { %v2925_v15 = vadd.f32 1e-08, %v2909_v63  ;;  %8183 = vmatprep.mubr.msk.f32.mxu0 %vm595_vm0, %v11500_v52 }
 0x6f2   : > { %9053 = vrsqrt.f32 %v2926_v14  ;;  %8184 = vmatmul.mubr.msk.f32.gmra.mrb[50].mxu0 %vm595_vm0, %v11503_v39  ;;  %vm2986_vm4 = vcmp.eq.f32.partialorder %v2926_v14, inf  ;;  %vm2988_vm5 = vcmp.eq.f32.partialorder %v2926_v14, 0.0  ;;  %v2989_v13 = vand.u32 2147483648, %v2926_v14 }
 0x6f3   : > { %9055 = vrsqrt.f32 %v2925_v15  ;;  %vm2979_vm6 = vcmp.eq.f32.partialorder %v2925_v15, inf  ;;  %v2982_v53 = vand.u32 2147483648, %v2925_v15  ;;  %vm2981_vm7 = vcmp.eq.f32.partialorder %v2925_v15, 0.0 }
 0x6f5   : > { %v2884_v9 = vpop.xlane.xlu1 %2883 }
 0x6f6   : > { %v2912_v8 = vmul.f32 0.03125, %v2884_v9  ;;  %v2881_v41 = vpop.xlane.xlu0 %2880 }
 0x6f7   : > { %v9050_v44 = vpop.eup %9049  ;;  %v2911_v7 = vmul.f32 0.03125, %v2881_v41 }
 0x6f8   : > { %v9052_v28 = vpop.eup %9051  ;;  %v2928_v18 = vadd.f32 1e-08, %v2912_v8  ;;  %v3058_v49 = vmul.f32 %v9050_v44, %v11387_v42 }
 0x6f9   : > { %v2927_v31 = vadd.f32 1e-08, %v2911_v7  ;;  %v3056_v23 = vmul.f32 %v9052_v28, %v11390_v5 }
 0x6fa   : > { %9057 = vrsqrt.f32 %v2928_v18  ;;  %v3088_v25 = vmul.f32 %v11473_v62, %v3058_v49  ;;  %vm3000_vm8 = vcmp.eq.f32.partialorder %v2928_v18, inf  ;;  %vm3002_vm9 = vcmp.eq.f32.partialorder %v2928_v18, 0.0 }
 0x6fb   : > { %9059 = vrsqrt.f32 %v2927_v31  ;;  %v3087_v4 = vmul.f32 %v11473_v62, %v3056_v23  ;;  %v3003_v55 = vand.u32 2147483648, %v2928_v18  ;;  %vm2993_vm10 = vcmp.eq.f32.partialorder %v2927_v31, inf }
 0x6fc   : > { %v9054_v43 = vpop.eup %9053  ;;  %v11517_v5 = vadd.f32 %v11480_v48, %v3088_v25  ;;  %v2996_v19 = vand.u32 2147483648, %v2927_v31  ;;  %vm2995_vm11 = vcmp.eq.f32.partialorder %v2927_v31, 0.0 }
 0x6fd   : > { %v9056_v0 = vpop.eup %9055  ;;  %v2985_v60 = vmul.f32 %v9054_v43, %v2926_v14  ;;  %v11514_v56 = vadd.f32 %v11480_v48, %v3087_v4 }
 0x6fe   : > { %v2978_v22 = vmul.f32 %v9056_v0, %v2925_v15 }
 0x6ff   : > { %v2987_v42 = vsel %vm2986_vm4, %v2926_v14, %v2985_v60  ;;  %8186 = vmatprep.mubr.msk.f32.mxu0 %vm595_vm0, %v11514_v56 }
 0x700   : > { %v2990_v12 = vsel %vm2988_vm5, %v2989_v13, %v2987_v42  ;;  %v2980_v32 = vsel %vm2979_vm6, %v2925_v15, %v2978_v22  ;;  %8187 = vmatmul.mubr.msk.f32.gmra.mrb[52].mxu0 %vm595_vm0, %v11517_v5 }
 0x701   : > { %v2983_v16 = vsel %vm2981_vm7, %v2982_v53, %v2980_v32  ;;  %9061 = vrcp.f32 %v2990_v12 }
 0x702   : > { %9063 = vrcp.f32 %v2983_v16 }
 0x704   : > { %v9058_v30 = vpop.eup %9057 }
 0x705   : > { %v9060_v46 = vpop.eup %9059  ;;  %v2999_v57 = vmul.f32 %v9058_v30, %v2928_v18  ;;  %v2890_v37 = vpop.xlane.xlu1 %2889 }
 0x706   : > { %v2992_v24 = vmul.f32 %v9060_v46, %v2927_v31  ;;  %v2914_v34 = vmul.f32 0.03125, %v2890_v37  ;;  %v2887_v58 = vpop.xlane.xlu0 %2886 }
 0x707   : > { %v3001_v33 = vsel %vm3000_vm8, %v2928_v18, %v2999_v57  ;;  %v2913_v17 = vmul.f32 0.03125, %v2887_v58 }
 0x708   : > { %v3004_v11 = vsel %vm3002_vm9, %v3003_v55, %v3001_v33  ;;  %v2994_v27 = vsel %vm2993_vm10, %v2927_v31, %v2992_v24  ;;  %v2930_v29 = vadd.f32 1e-08, %v2914_v34 }
 0x709   : > { %v2997_v1 = vsel %vm2995_vm11, %v2996_v19, %v2994_v27  ;;  %v2929_v38 = vadd.f32 1e-08, %v2913_v17  ;;  %9065 = vrcp.f32 %v3004_v11 }
 0x70a   : > { %9067 = vrsqrt.f32 %v2930_v29  ;;  %vm3014_vm12 = vcmp.eq.f32.partialorder %v2930_v29, inf  ;;  %vm3016_vm13 = vcmp.eq.f32.partialorder %v2930_v29, 0.0  ;;  %v3017_v60 = vand.u32 2147483648, %v2930_v29 }
 0x70b   : > { %v9062_v63 = vpop.eup %9061  ;;  %9069 = vrsqrt.f32 %v2929_v38  ;;  %vm3007_vm14 = vcmp.eq.f32.partialorder %v2929_v38, inf  ;;  %vm3009_vm15 = vcmp.eq.f32.partialorder %v2929_v38, 0.0  ;;  %v3010_v16 = vand.u32 2147483648, %v2929_v38 }
 0x70c   : > { %v9064_v14 = vpop.eup %9063  ;;  %v3062_v15 = vmul.f32 %v9062_v63, %v11399_v3  ;;  %9071 = vrcp.f32 %v2997_v1 }
 0x70d   : > { %v2896_v9 = vpop.xlane.xlu1 %2895  ;;  %v3060_v8 = vmul.f32 %v9064_v14, %v11402_v6 }
 0x70e   : > { %v2916_v41 = vmul.f32 0.03125, %v2896_v9  ;;  %v2893_v44 = vpop.xlane.xlu0 %2892  ;;  %v3090_v7 = vmul.f32 %v11473_v62, %v3062_v15 }
 0x70f   : > { %v2915_v28 = vmul.f32 0.03125, %v2893_v44  ;;  %v3089_v18 = vmul.f32 %v11473_v62, %v3060_v8 }
 0x710   : > { %v2932_v49 = vadd.f32 1e-08, %v2916_v41  ;;  %v11531_v43 = vadd.f32 %v11480_v48, %v3090_v7 }
 0x711   : > { %v2931_v31 = vadd.f32 1e-08, %v2915_v28  ;;  %v11528_v23 = vadd.f32 %v11480_v48, %v3089_v18 }
 0x712   : > { %9073 = vrsqrt.f32 %v2932_v49  ;;  %vm3028_vm2 = vcmp.eq.f32.partialorder %v2932_v49, inf  ;;  %v3031_v27 = vand.u32 2147483648, %v2932_v49  ;;  %vm3030_vm3 = vcmp.eq.f32.partialorder %v2932_v49, 0.0 }
 0x713   : > { %v9066_v3 = vpop.eup %9065  ;;  %9075 = vrsqrt.f32 %v2931_v31  ;;  %8189 = vmatprep.mubr.msk.f32.mxu0 %vm595_vm0, %v11528_v23  ;;  %vm3021_vm4 = vcmp.eq.f32.partialorder %v2931_v31, inf  ;;  %vm3023_vm5 = vcmp.eq.f32.partialorder %v2931_v31, 0.0 }
 0x714   : > { %v9068_v6 = vpop.eup %9067  ;;  %8190 = vmatmul.mubr.msk.f32.gmra.mrb[54].mxu0 %vm595_vm0, %v11531_v43  ;;  %v3066_v4 = vmul.f32 %v9066_v3, %v11417_v61 }
 0x715   : > { %v9070_v25 = vpop.eup %9069  ;;  %v3013_v0 = vmul.f32 %v9068_v6, %v2930_v29  ;;  %v2902_v13 = vpop.xlane.xlu1 %2901 }
 0x716   : > { %v9072_v22 = vpop.eup %9071  ;;  %v3006_v42 = vmul.f32 %v9070_v25, %v2929_v38  ;;  %v2918_v53 = vmul.f32 0.03125, %v2902_v13  ;;  %v2899_v12 = vpop.xlane.xlu0 %2898  ;;  %v3092_v55 = vmul.f32 %v11473_v62, %v3066_v4 }
 0x717   : > { %v3015_v32 = vsel %vm3014_vm12, %v2930_v29, %v3013_v0  ;;  %v2917_v30 = vmul.f32 0.03125, %v2899_v12  ;;  %v3064_v46 = vmul.f32 %v9072_v22, %v11420_v40 }
 0x718   : > { %v3018_v57 = vsel %vm3016_vm13, %v3017_v60, %v3015_v32  ;;  %v3008_v37 = vsel %vm3007_vm14, %v2929_v38, %v3006_v42  ;;  %v2934_v61 = vadd.f32 1e-08, %v2918_v53  ;;  %v11545_v40 = vadd.f32 %v11480_v48, %v3092_v55 }
 0x719   : > { %v3011_v24 = vsel %vm3009_vm15, %v3010_v16, %v3008_v37  ;;  %v2933_v34 = vadd.f32 1e-08, %v2917_v30  ;;  %v3091_v58 = vmul.f32 %v11473_v62, %v3064_v46  ;;  %9077 = vrcp.f32 %v3018_v57 }
 0x71a   : > { %9079 = vrsqrt.f32 %v2934_v61  ;;  %v3024_v38 = vand.u32 2147483648, %v2931_v31  ;;  %vm3042_vm6 = vcmp.eq.f32.partialorder %v2934_v61, inf  ;;  %vm3044_vm7 = vcmp.eq.f32.partialorder %v2934_v61, 0.0 }
 0x71b   : > { %9081 = vrsqrt.f32 %v2933_v34  ;;  %v11542_v19 = vadd.f32 %v11480_v48, %v3091_v58  ;;  %v3045_v18 = vand.u32 2147483648, %v2934_v61  ;;  %vm3035_vm8 = vcmp.eq.f32.partialorder %v2933_v34, inf }
 0x71c   : > { %v9074_v33 = vpop.eup %9073  ;;  %9083 = vrcp.f32 %v3011_v24  ;;  %v3038_v6 = vand.u32 2147483648, %v2933_v34  ;;  %vm3037_vm9 = vcmp.eq.f32.partialorder %v2933_v34, 0.0  ;;  %v3339_v24 = vld [vmem:[%s13687_s4 + $0x90] sm:$0xff] }
 0x71d   : > { %v9076_v17 = vpop.eup %9075  ;;  %v3027_v11 = vmul.f32 %v9074_v33, %v2932_v49  ;;  %8192 = vmatprep.mubr.msk.f32.mxu0 %vm595_vm0, %v11542_v19 }
 0x71e   : > { %v3020_v29 = vmul.f32 %v9076_v17, %v2931_v31  ;;  %8193 = vmatmul.mubr.msk.f32.gmra.mrb[56].mxu0 %vm595_vm0, %v11545_v40 }
 0x71f   : > { %v3029_v1 = vsel %vm3028_vm2, %v2932_v49, %v3027_v11 }
 0x720   : > { %v3032_v63 = vsel %vm3030_vm3, %v3031_v27, %v3029_v1  ;;  %v3022_v14 = vsel %vm3021_vm4, %v2931_v31, %v3020_v29 }
 0x721   : > { %v3025_v15 = vsel %vm3023_vm5, %v3024_v38, %v3022_v14  ;;  %9085 = vrcp.f32 %v3032_v63 }
 0x722   : > { %9087 = vrcp.f32 %v3025_v15 }
 0x723   : > { %v9078_v9 = vpop.eup %9077 }
 0x724   : > { %v9080_v8 = vpop.eup %9079  ;;  %v3070_v41 = vmul.f32 %v9078_v9, %v11429_v59 }
 0x725   : > { %v9082_v44 = vpop.eup %9081  ;;  %v3041_v7 = vmul.f32 %v9080_v8, %v2934_v61 }
 0x726   : > { %v9084_v28 = vpop.eup %9083  ;;  %v3034_v49 = vmul.f32 %v9082_v44, %v2933_v34  ;;  %v3094_v0 = vmul.f32 %v11473_v62, %v3070_v41 }
 0x727   : > { %v3043_v3 = vsel %vm3042_vm6, %v2934_v61, %v3041_v7  ;;  %v3068_v4 = vmul.f32 %v9084_v28, %v11432_v26 }
 0x728   : > { %v3046_v31 = vsel %vm3044_vm7, %v3045_v18, %v3043_v3  ;;  %v3036_v25 = vsel %vm3035_vm8, %v2933_v34, %v3034_v49  ;;  %v11559_v53 = vadd.f32 %v11480_v48, %v3094_v0  ;;  %v3340_v34 = vld [vmem:[%s13687_s4 + $0x98] sm:$0xff] }
 0x729   : > { %v3039_v60 = vsel %vm3037_vm9, %v3038_v6, %v3036_v25  ;;  %v3093_v59 = vmul.f32 %v11473_v62, %v3068_v4  ;;  %9089 = vrcp.f32 %v3046_v31  ;;  %v8512_v58 = vpack.c.bf16 %v3340_v34, %v3339_v24 }
 0x72a   : > { %9091 = vrcp.f32 %v3039_v60 }
 0x72b   : > { %v9086_v13 = vpop.eup %9085  ;;  %v11556_v22 = vadd.f32 %v11480_v48, %v3093_v59  ;;  %8513 = vmatprep.subr.bf16.mxu1 %v8512_v58 }
 0x72c   : > { %v9088_v42 = vpop.eup %9087  ;;  %v3074_v26 = vmul.f32 %v9086_v13, %v11441_v21  ;;  %8515 = vmatpush3.bf16.msra.mxu1 %v8512_v58 }
 0x72d   : > { %8195 = vmatprep.mubr.msk.f32.mxu0 %vm595_vm0, %v11556_v22  ;;  %v3072_v12 = vmul.f32 %v9088_v42, %v11444_v50 }
 0x72e   : > { %8196 = vmatmul.mubr.msk.f32.gmra.mrb[58].mxu0 %vm595_vm0, %v11559_v53  ;;  %v3096_v32 = vmul.f32 %v11473_v62, %v3074_v26 }
 0x72f   : > { %v3095_v16 = vmul.f32 %v11473_v62, %v3072_v12 }
 0x730   : > { %v11573_v46 = vadd.f32 %v11480_v48, %v3096_v32 }
 0x731   : > { %v11570_v30 = vadd.f32 %v11480_v48, %v3095_v16 }
 0x733   : > { %v9090_v57 = vpop.eup %9089  ;;  %8198 = vmatprep.mubr.msk.f32.mxu0 %vm595_vm0, %v11570_v30 }
 0x734   : > { %v9092_v21 = vpop.eup %9091  ;;  %8199 = vmatmul.mubr.msk.f32.gmra.mrb[60].mxu0 %vm595_vm0, %v11573_v46  ;;  %v3078_v50 = vmul.f32 %v9090_v57, %v11453_v36 }
 0x735   : > { %v3076_v37 = vmul.f32 %v9092_v21, %v11456_v10  ;;  %v11602_v10 = vld [vmem:[%s13688_s5 + $0x7] ss:$0 sm:$0xff] }
 0x736   : > { %v3098_v61 = vmul.f32 %v11473_v62, %v3078_v50 }
 0x737   : > { %v3097_v55 = vmul.f32 %v11473_v62, %v3076_v37 }
 0x738   : > { %v11593_v36 = vadd.f32 %v11480_v48, %v3098_v61 }
 0x739   : > { %v11590_v33 = vadd.f32 %v11480_v48, %v3097_v55 }
 0x73b   : > { %8201 = vmatprep.mubr.msk.f32.mxu0 %vm595_vm0, %v11590_v33 }
 0x73c   : > { %8202 = vmatmul.mubr.msk.f32.gmra.mrb[62].mxu0 %vm595_vm0, %v11593_v36 }
 0x7b3   : > { %v8182_v62 = vpop.f32.mrb[48].mxu0 }
 0x7b4   : > { %v3248_v17 = vadd.f32 %v8182_v62, %v11602_v10  ;;  %v3242_v11 = vpop.f32.mrb[49].mxu0 }
 0x7b5   : > { %v3243_v48 = vadd.f32 %v11602_v10, %v3242_v11  ;;  %v4152_v11 = vld [vmem:[%s13687_s4 + $0xc8] sm:$0xff] }
 0x7b6   : > { %v3322_v29 = vmax.f32 %v3248_v17, 0.0  ;;  %v4151_v17 = vld [vmem:[%s13687_s4 + $0xc0] sm:$0xff] }
 0x7b7   : > { %v3321_v27 = vmax.f32 %v3243_v48, 0.0 }
 0x7b9   : > { %8212 = vmatprep.mubr.msk.f32.mxu1 %vm595_vm0, %v3321_v27 }
 0x7ba   : > { %8213 = vmatmul.mubr.msk.f32.vlgmr.msra.gmra.mrb[64].mxu1 %vm595_vm0, %v3322_v29  ;;  %v8524_v29 = vpack.c.bf16 %v4152_v11, %v4151_v17 }
 0x7bc   : > { %8525 = vmatprep.subr.bf16.mxu1 %v8524_v29 }
 0x7bd   : > { %8527 = vmatpush3.bf16.msra.mxu1 %v8524_v29 }
 0x7c5   : > { %v8185_v1 = vpop.f32.mrb[50].mxu0 }
 0x7c6   : > { %v3258_v38 = vadd.f32 %v8185_v1, %v11602_v10  ;;  %v3252_v63 = vpop.f32.mrb[51].mxu0 }
 0x7c7   : > { %v3253_v14 = vadd.f32 %v11602_v10, %v3252_v63  ;;  %v4153_v63 = vld [vmem:[%s13687_s4 + $0xd0] sm:$0xff] }
 0x7c8   : > { %v3324_v9 = vmax.f32 %v3258_v38, 0.0 }
 0x7c9   : > { %v3323_v15 = vmax.f32 %v3253_v14, 0.0  ;;  %v4154_v14 = vld [vmem:[%s13687_s4 + $0xd8] sm:$0xff] }
 0x7cb   : > { %8215 = vmatprep.mubr.msk.f32.mxu1 %vm595_vm0, %v3323_v15 }
 0x7cc   : > { %8216 = vmatmul.mubr.msk.f32.gmra.mrb[66].mxu1 %vm595_vm0, %v3324_v9  ;;  %v8528_v9 = vpack.c.bf16 %v4154_v14, %v4153_v63  ;;  %v9422_v63 = vld [vmem:[%s9752_s13 + $0x30] sm:$0xff] }
 0x7ce   : > { %8529 = vmatprep.subr.bf16.mxu1 %v8528_v9 }
 0x7cf   : > { %8531 = vmatpush3.bf16.msra.mxu1 %v8528_v9 }
 0x7d3   : > { %v8188_v8 = vpop.f32.mrb[52].mxu0 }
 0x7d4   : > { %v3268_v41 = vadd.f32 %v8188_v8, %v11602_v10  ;;  %v3262_v44 = vpop.f32.mrb[53].mxu0  ;;  %v11651_v8 = vld [vmem:[%s13688_s5 + $0x8] ss:$0 sm:$0xff] }
 0x7d5   : > { %v3263_v7 = vadd.f32 %v11602_v10, %v3262_v44 }
 0x7d6   : > { %v3326_v18 = vmax.f32 %v3268_v41, 0.0 }
 0x7d7   : > { %v3325_v28 = vmax.f32 %v3263_v7, 0.0 }
 0x7d9   : > { %8218 = vmatprep.mubr.msk.f32.mxu1 %vm595_vm0, %v3325_v28 }
 0x7da   : > { %8219 = vmatmul.mubr.msk.f32.gmra.mrb[68].mxu1 %vm595_vm0, %v3326_v18 }
 0x7e7   : > { %v8191_v49 = vpop.f32.mrb[54].mxu0 }
 0x7e8   : > { %v3278_v3 = vadd.f32 %v8191_v49, %v11602_v10  ;;  %v3272_v6 = vpop.f32.mrb[55].mxu0  ;;  %v9415_v49 = vld [vmem:[%s9752_s13 + $0x8] sm:$0xff] }
 0x7e9   : > { %v3273_v4 = vadd.f32 %v11602_v10, %v3272_v6  ;;  %v9416_v6 = vld [vmem:[%s9752_s13] sm:$0xff] }
 0x7ea   : > { %v3328_v25 = vmax.f32 %v3278_v3, 0.0 }
 0x7eb   : > { %v3327_v31 = vmax.f32 %v3273_v4, 0.0 }
 0x7ed   : > { %8221 = vmatprep.mubr.msk.f32.mxu1 %vm595_vm0, %v3327_v31 }
 0x7ee   : > { %8222 = vmatmul.mubr.msk.f32.gmra.mrb[70].mxu1 %vm595_vm0, %v3328_v25 }
 0x7f1   : > { %v8194_v0 = vpop.f32.mrb[56].mxu0 }
 0x7f2   : > { %v3288_v60 = vadd.f32 %v8194_v0, %v11602_v10  ;;  %v3282_v59 = vpop.f32.mrb[57].mxu0 }
 0x7f3   : > { %v3283_v13 = vadd.f32 %v11602_v10, %v3282_v59 }
 0x7f4   : > { %v3330_v26 = vmax.f32 %v3288_v60, 0.0 }
 0x7f5   : > { %v3329_v42 = vmax.f32 %v3283_v13, 0.0 }
 0x7f7   : > { %8224 = vmatprep.mubr.msk.f32.mxu1 %vm595_vm0, %v3329_v42  ;;  %v9417_v42 = vld [vmem:[%s9752_s13 + $0x18] sm:$0xff] }
 0x7f8   : > { %8225 = vmatmul.mubr.msk.f32.gmra.mrb[72].mxu1 %vm595_vm0, %v3330_v26 }
 0x801   : > { %v8197_v12 = vpop.f32.mrb[58].mxu0 }
 0x802   : > { %v3298_v32 = vadd.f32 %v8197_v12, %v11602_v10  ;;  %v3292_v16 = vpop.f32.mrb[59].mxu0  ;;  %v9418_v12 = vld [vmem:[%s9752_s13 + $0x10] sm:$0xff] }
 0x803   : > { %v3293_v57 = vadd.f32 %v11602_v10, %v3292_v16 }
 0x804   : > { %v3332_v50 = vmax.f32 %v3298_v32, 0.0 }
 0x805   : > { %v3331_v21 = vmax.f32 %v3293_v57, 0.0 }
 0x807   : > { %8227 = vmatprep.mubr.msk.f32.mxu1 %vm595_vm0, %v3331_v21  ;;  %v8200_v37 = vpop.f32.mrb[60].mxu0 }
 0x808   : > { %8228 = vmatmul.mubr.msk.f32.gmra.mrb[74].mxu1 %vm595_vm0, %v3332_v50  ;;  %v3308_v61 = vadd.f32 %v8200_v37, %v11602_v10  ;;  %v3302_v55 = vpop.f32.mrb[61].mxu0 }
 0x809   : > { %v3303_v24 = vadd.f32 %v11602_v10, %v3302_v55  ;;  %v9419_v55 = vld [vmem:[%s9752_s13 + $0x28] sm:$0xff] }
 0x80a   : > { %v3334_v58 = vmax.f32 %v3308_v61, 0.0 }
 0x80b   : > { %v3333_v34 = vmax.f32 %v3303_v24, 0.0 }
 0x80d   : > { %8230 = vmatprep.mubr.msk.f32.mxu1 %vm595_vm0, %v3333_v34  ;;  %v9420_v34 = vld [vmem:[%s9752_s13 + $0x20] sm:$0xff] }
 0x80e   : > { %8231 = vmatmul.mubr.msk.f32.gmra.mrb[76].mxu1 %vm595_vm0, %v3334_v58 }
 0x80f   : > { %v8203_v62 = vpop.f32.mrb[62].mxu0 }
 0x810   : > { %v3318_v48 = vadd.f32 %v8203_v62, %v11602_v10  ;;  %v3312_v27 = vpop.f32.mrb[63].mxu0 }
 0x811   : > { %v3313_v1 = vadd.f32 %v11602_v10, %v3312_v27 }
 0x812   : > { %v3336_v15 = vmax.f32 %v3318_v48, 0.0 }
 0x813   : > { %v3335_v38 = vmax.f32 %v3313_v1, 0.0  ;;  %v9421_v1 = vld [vmem:[%s9752_s13 + $0x38] sm:$0xff] }
 0x815   : > { %8233 = vmatprep.mubr.msk.f32.mxu1 %vm595_vm0, %v3335_v38 }
 0x816   : > { %8234 = vmatmul.mubr.msk.f32.gmra.mrb[78].mxu1 %vm595_vm0, %v3336_v15 }
 0x88d   : > { %v8214_v10 = vpop.f32.mrb[64].mxu1 }
 0x88e   : > { %v3535_v41 = vadd.f32 %v8214_v10, %v11489_v51  ;;  %v3455_v44 = vpop.f32.mrb[65].mxu1 }
 0x88f   : > { %v3534_v7 = vadd.f32 %v3455_v44, %v11485_v35 }
 0x890   : > { %v3556_v28 = vadd.f32 %v11651_v8, %v3535_v41 }
 0x891   : > { %v3555_v18 = vadd.f32 %v11651_v8, %v3534_v7 }
 0x892   : > { %v11658_v3 = vmul.f32 %v9415_v49, %v3556_v28  ;;  %v9423_v28 = vld [vmem:[%s9752_s13 + $0x48] sm:$0xff]  ;;  %v9424_v49 = vld [vmem:[%s9752_s13 + $0x40] sm:$0xff] }
 0x893   : > { %v11661_v4 = vmul.f32 %v9416_v6, %v3555_v18 }
 0x894   : > { %v3592_v31 = vsel %vm595_vm0, %v11658_v3, 0.0 }
 0x895   : > { %3593 = vadd.xlane.f32.xlu1 %v3592_v31  ;;  %8276 = vmatprep.mubr.msk.f32.mxu1 %vm595_vm0, %v11661_v4  ;;  %v3589_v35 = vsel %vm595_vm0, %v11661_v4, 0.0 }
 0x896   : > { %3590 = vadd.xlane.f32.xlu0 %v3589_v35  ;;  %8277 = vmatmul.mubr.msk.f32.vlgmr.msra.gmra.mrb[80].mxu1 %vm595_vm0, %v11658_v3 }
 0x89f   : > { %v8217_v51 = vpop.f32.mrb[66].mxu1 }
 0x8a0   : > { %v3537_v25 = vadd.f32 %v8217_v51, %v11503_v39  ;;  %v3465_v0 = vpop.f32.mrb[67].mxu1 }
 0x8a1   : > { %v3536_v60 = vadd.f32 %v3465_v0, %v11500_v52 }
 0x8a2   : > { %v3558_v59 = vadd.f32 %v11651_v8, %v3537_v25 }
 0x8a3   : > { %v3557_v13 = vadd.f32 %v11651_v8, %v3536_v60 }
 0x8a4   : > { %v11676_v26 = vmul.f32 %v9417_v42, %v3558_v59  ;;  %v9425_v59 = vld [vmem:[%s9752_s13 + $0x58] sm:$0xff]  ;;  %v9426_v42 = vld [vmem:[%s9752_s13 + $0x50] sm:$0xff] }
 0x8a5   : > { %v11679_v32 = vmul.f32 %v9418_v12, %v3557_v13 }
 0x8a6   : > { %v3598_v16 = vsel %vm595_vm0, %v11676_v26, 0.0 }
 0x8a7   : > { %3599 = vadd.xlane.f32.xlu1 %v3598_v16  ;;  %8279 = vmatprep.mubr.msk.f32.mxu1 %vm595_vm0, %v11679_v32  ;;  %v3595_v52 = vsel %vm595_vm0, %v11679_v32, 0.0 }
 0x8a8   : > { %3596 = vadd.xlane.f32.xlu0 %v3595_v52  ;;  %8280 = vmatmul.mubr.msk.f32.gmra.mrb[82].mxu1 %vm595_vm0, %v11676_v26 }
 0x8ad   : > { %v8220_v39 = vpop.f32.mrb[68].mxu1 }
 0x8ae   : > { %v3539_v57 = vadd.f32 %v8220_v39, %v11517_v5  ;;  %v3475_v21 = vpop.f32.mrb[69].mxu1 }
 0x8af   : > { %v3538_v50 = vadd.f32 %v3475_v21, %v11514_v56 }
 0x8b0   : > { %v3560_v37 = vadd.f32 %v11651_v8, %v3539_v57 }
 0x8b1   : > { %v3559_v61 = vadd.f32 %v11651_v8, %v3538_v50 }
 0x8b2   : > { %v11694_v24 = vmul.f32 %v9419_v55, %v3560_v37  ;;  %v9427_v37 = vld [vmem:[%s9752_s13 + $0x68] sm:$0xff] }
 0x8b3   : > { %v11697_v58 = vmul.f32 %v9420_v34, %v3559_v61  ;;  %v9428_v61 = vld [vmem:[%s9752_s13 + $0x60] sm:$0xff] }
 0x8b4   : > { %v3604_v62 = vsel %vm595_vm0, %v11694_v24, 0.0 }
 0x8b5   : > { %3605 = vadd.xlane.f32.xlu1 %v3604_v62  ;;  %8282 = vmatprep.mubr.msk.f32.mxu1 %vm595_vm0, %v11697_v58  ;;  %v3601_v56 = vsel %vm595_vm0, %v11697_v58, 0.0 }
 0x8b6   : > { %3602 = vadd.xlane.f32.xlu0 %v3601_v56  ;;  %8283 = vmatmul.mubr.msk.f32.gmra.mrb[84].mxu1 %vm595_vm0, %v11694_v24 }
 0x8c1   : > { %v8223_v5 = vpop.f32.mrb[70].mxu1 }
 0x8c2   : > { %v3541_v17 = vadd.f32 %v8223_v5, %v11531_v43  ;;  %v3485_v11 = vpop.f32.mrb[71].mxu1 }
 0x8c3   : > { %v3540_v48 = vadd.f32 %v3485_v11, %v11528_v23 }
 0x8c4   : > { %v3562_v27 = vadd.f32 %v11651_v8, %v3541_v17 }
 0x8c5   : > { %v3561_v29 = vadd.f32 %v11651_v8, %v3540_v48  ;;  %v3949_v48 = vld [vmem:[%s13687_s4 + $0xa0] sm:$0xff] }
 0x8c6   : > { %v11712_v38 = vmul.f32 %v9421_v1, %v3562_v27  ;;  %v3950_v27 = vld [vmem:[%s13687_s4 + $0xa8] sm:$0xff]  ;;  %v9429_v1 = vld [vmem:[%s9752_s13 + $0x78] sm:$0xff] }
 0x8c7   : > { %v11715_v14 = vmul.f32 %v9422_v63, %v3561_v29 }
 0x8c8   : > { %v3610_v15 = vsel %vm595_vm0, %v11712_v38, 0.0 }
 0x8c9   : > { %3611 = vadd.xlane.f32.xlu1 %v3610_v15  ;;  %8285 = vmatprep.mubr.msk.f32.mxu1 %vm595_vm0, %v11715_v14  ;;  %v3607_v23 = vsel %vm595_vm0, %v11715_v14, 0.0  ;;  %v9430_v15 = vld [vmem:[%s9752_s13 + $0x70] sm:$0xff] }
 0x8ca   : > { %3608 = vadd.xlane.f32.xlu0 %v3607_v23  ;;  %8286 = vmatmul.mubr.msk.f32.gmra.mrb[86].mxu1 %vm595_vm0, %v11712_v38 }
 0x8cb   : > { %v8226_v43 = vpop.f32.mrb[72].mxu1 }
 0x8cc   : > { %v3543_v9 = vadd.f32 %v8226_v43, %v11545_v40  ;;  %v3495_v10 = vpop.f32.mrb[73].mxu1  ;;  %v3951_v43 = vld [vmem:[%s13687_s4 + $0xb0] sm:$0xff] }
 0x8cd   : > { %v3542_v41 = vadd.f32 %v3495_v10, %v11542_v19 }
 0x8ce   : > { %v3564_v44 = vadd.f32 %v11651_v8, %v3543_v9 }
 0x8cf   : > { %v3563_v7 = vadd.f32 %v11651_v8, %v3542_v41 }
 0x8d0   : > { %v11730_v18 = vmul.f32 %v9423_v28, %v3564_v44 }
 0x8d1   : > { %v11733_v6 = vmul.f32 %v9424_v49, %v3563_v7 }
 0x8d2   : > { %v3616_v31 = vsel %vm595_vm0, %v11730_v18, 0.0 }
 0x8d3   : > { %3617 = vadd.xlane.f32.xlu1 %v3616_v31  ;;  %8288 = vmatprep.mubr.msk.f32.mxu1 %vm595_vm0, %v11733_v6  ;;  %v3613_v19 = vsel %vm595_vm0, %v11733_v6, 0.0 }
 0x8d4   : > { %3614 = vadd.xlane.f32.xlu0 %v3613_v19  ;;  %8289 = vmatmul.mubr.msk.f32.gmra.mrb[88].mxu1 %vm595_vm0, %v11730_v18 }
 0x8db   : > { %v8229_v40 = vpop.f32.mrb[74].mxu1 }
 0x8dc   : > { %v3545_v35 = vadd.f32 %v8229_v40, %v11559_v53  ;;  %v3505_v51 = vpop.f32.mrb[75].mxu1 }
 0x8dd   : > { %v3544_v25 = vadd.f32 %v3505_v51, %v11556_v22 }
 0x8de   : > { %v3566_v0 = vadd.f32 %v11651_v8, %v3545_v35 }
 0x8df   : > { %v3565_v60 = vadd.f32 %v11651_v8, %v3544_v25 }
 0x8e0   : > { %v11748_v13 = vmul.f32 %v9425_v59, %v3566_v0 }
 0x8e1   : > { %v11751_v12 = vmul.f32 %v9426_v42, %v3565_v60  ;;  %v8232_v16 = vpop.f32.mrb[76].mxu1 }
 0x8e2   : > { %v3622_v52 = vsel %vm595_vm0, %v11748_v13, 0.0  ;;  %v3547_v53 = vadd.f32 %v8232_v16, %v11573_v46  ;;  %v3515_v39 = vpop.f32.mrb[77].mxu1 }
 0x8e3   : > { %3623 = vadd.xlane.f32.xlu1 %v3622_v52  ;;  %8291 = vmatprep.mubr.msk.f32.mxu1 %vm595_vm0, %v11751_v12  ;;  %v3619_v22 = vsel %vm595_vm0, %v11751_v12, 0.0  ;;  %v3546_v57 = vadd.f32 %v3515_v39, %v11570_v30 }
 0x8e4   : > { %v3568_v21 = vadd.f32 %v11651_v8, %v3547_v53  ;;  %3620 = vadd.xlane.f32.xlu0 %v3619_v22  ;;  %8292 = vmatmul.mubr.msk.f32.gmra.mrb[90].mxu1 %vm595_vm0, %v11748_v13 }
 0x8e5   : > { %v3567_v50 = vadd.f32 %v11651_v8, %v3546_v57 }
 0x8e6   : > { %v11766_v46 = vmul.f32 %v9427_v37, %v3568_v21 }
 0x8e7   : > { %v11769_v55 = vmul.f32 %v9428_v61, %v3567_v50 }
 0x8e8   : > { %v3628_v34 = vsel %vm595_vm0, %v11766_v46, 0.0 }
 0x8e9   : > { %3629 = vadd.xlane.f32.xlu1 %v3628_v34  ;;  %v8235_v30 = vpop.f32.mrb[78].mxu1  ;;  %8294 = vmatprep.mubr.msk.f32.mxu1 %vm595_vm0, %v11769_v55  ;;  %v3625_v62 = vsel %vm595_vm0, %v11769_v55, 0.0 }
 0x8ea   : > { %v3549_v56 = vadd.f32 %v8235_v30, %v11593_v36  ;;  %3626 = vadd.xlane.f32.xlu0 %v3625_v62  ;;  %v3525_v5 = vpop.f32.mrb[79].mxu1  ;;  %8295 = vmatmul.mubr.msk.f32.gmra.mrb[92].mxu1 %vm595_vm0, %v11766_v46  ;;  %v8516_v36 = vpack.c.bf16 %v3950_v27, %v3949_v48 }
 0x8eb   : > { %v3548_v17 = vadd.f32 %v3525_v5, %v11590_v33 }
 0x8ec   : > { %v3570_v11 = vadd.f32 %v11651_v8, %v3549_v56  ;;  %8517 = vmatprep.subr.bf16.mxu0 %v8516_v36 }
 0x8ed   : > { %v3569_v29 = vadd.f32 %v11651_v8, %v3548_v17  ;;  %8519 = vmatpush3.bf16.msra.mxu0 %v8516_v36  ;;  %v3952_v8 = vld [vmem:[%s13687_s4 + $0xb8] sm:$0xff] }
 0x8ee   : > { %v11790_v63 = vmul.f32 %v9429_v1, %v3570_v11  ;;  %v8520_v10 = vpack.c.bf16 %v3952_v8, %v3951_v43  ;;  %v11870_v8 = vld [vmem:[%s13688_s5 + $0xc] ss:$0 sm:$0xff] }
 0x8ef   : > { %v11793_v23 = vmul.f32 %v9430_v15, %v3569_v29 }
 0x8f0   : > { %v3634_v33 = vsel %vm595_vm0, %v11790_v63, 0.0  ;;  %8521 = vmatprep.subr.bf16.mxu0 %v8520_v10 }
 0x8f1   : > { %3635 = vadd.xlane.f32.xlu1 %v3634_v33  ;;  %8297 = vmatprep.mubr.msk.f32.mxu1 %vm595_vm0, %v11793_v23  ;;  %v3631_v9 = vsel %vm595_vm0, %v11793_v23, 0.0 }
 0x8f2   : > { %8298 = vmatmul.mubr.msk.f32.gmra.mrb[94].mxu1 %vm595_vm0, %v11790_v63  ;;  %3632 = vadd.xlane.f32.xlu0 %v3631_v9 }
 0x8f3   : > { %8523 = vmatpush3.bf16.msra.mxu0 %v8520_v10 }
 0x922   : > { %v3594_v41 = vpop.xlane.xlu1 %3593 }
 0x923   : > { %v3638_v44 = vmul.f32 0.03125, %v3594_v41  ;;  %v3591_v7 = vpop.xlane.xlu0 %3590 }
 0x924   : > { %v3637_v28 = vmul.f32 0.03125, %v3591_v7  ;;  %v9431_v7 = vld [vmem:[%s13686_s3 + $0x8] sm:$0xff] }
 0x925   : > { %v11810_v49 = vsub.f32 %v11658_v3, %v3638_v44 }
 0x926   : > { %v11813_v31 = vsub.f32 %v11661_v4, %v3637_v28 }
 0x927   : > { %v3670_v19 = vmul.f32 %v11810_v49, %v11810_v49 }
 0x928   : > { %v3669_v40 = vmul.f32 %v11813_v31, %v11813_v31 }
 0x929   : > { %v3688_v35 = vsel %vm595_vm0, %v3670_v19, 0.0  ;;  %v9432_v19 = vld [vmem:[%s13686_s3 + $0x88] sm:$0xff] }
 0x92a   : > { %3689 = vadd.xlane.f32.xlu1 %v3688_v35  ;;  %v3685_v51 = vsel %vm595_vm0, %v3669_v40, 0.0 }
 0x92b   : > { %3686 = vadd.xlane.f32.xlu0 %v3685_v51  ;;  %v13906_v51 = vld [vmem:[#allocation42_spill] sm:$0xff] }
 0x934   : > { %v3600_v25 = vpop.xlane.xlu1 %3599 }
 0x935   : > { %v3640_v0 = vmul.f32 0.03125, %v3600_v25  ;;  %v3597_v60 = vpop.xlane.xlu0 %3596 }
 0x936   : > { %v3639_v3 = vmul.f32 0.03125, %v3597_v60 }
 0x937   : > { %v11822_v59 = vsub.f32 %v11676_v26, %v3640_v0  ;;  %v9433_v0 = vld [vmem:[%s13686_s3] sm:$0xff] }
 0x938   : > { %v11825_v4 = vsub.f32 %v11679_v32, %v3639_v3  ;;  %v9434_v3 = vld [vmem:[%s13686_s3 + $0x80] sm:$0xff] }
 0x939   : > { %v3672_v42 = vmul.f32 %v11822_v59, %v11822_v59 }
 0x93a   : > { %v3671_v16 = vmul.f32 %v11825_v4, %v11825_v4 }
 0x93b   : > { %v3694_v52 = vsel %vm595_vm0, %v3672_v42, 0.0 }
 0x93c   : > { %3695 = vadd.xlane.f32.xlu1 %v3694_v52  ;;  %v3691_v53 = vsel %vm595_vm0, %v3671_v16, 0.0  ;;  %v13907_v16 = vld [vmem:[#allocation6_spill] sm:$0xff] }
 0x93d   : > { %3692 = vadd.xlane.f32.xlu0 %v3691_v53  ;;  %v13908_v53 = vld [vmem:[#allocation7_spill] sm:$0xff] }
 0x942   : > { %v3606_v39 = vpop.xlane.xlu1 %3605 }
 0x943   : > { %v3642_v22 = vmul.f32 0.03125, %v3606_v39  ;;  %v3603_v57 = vpop.xlane.xlu0 %3602 }
 0x944   : > { %v3641_v26 = vmul.f32 0.03125, %v3603_v57 }
 0x945   : > { %v11834_v21 = vsub.f32 %v11694_v24, %v3642_v22 }
 0x946   : > { %v11837_v32 = vsub.f32 %v11697_v58, %v3641_v26 }
 0x947   : > { %v3674_v50 = vmul.f32 %v11834_v21, %v11834_v21 }
 0x948   : > { %v3673_v37 = vmul.f32 %v11837_v32, %v11837_v32 }
 0x949   : > { %v3700_v61 = vsel %vm595_vm0, %v3674_v50, 0.0 }
 0x94a   : > { %3701 = vadd.xlane.f32.xlu1 %v3700_v61  ;;  %v3697_v34 = vsel %vm595_vm0, %v3673_v37, 0.0 }
 0x94b   : > { %3698 = vadd.xlane.f32.xlu0 %v3697_v34 }
 0x956   : > { %v3612_v30 = vpop.xlane.xlu1 %3611 }
 0x957   : > { %v3644_v62 = vmul.f32 0.03125, %v3612_v30  ;;  %v3609_v56 = vpop.xlane.xlu0 %3608 }
 0x958   : > { %v3643_v24 = vmul.f32 0.03125, %v3609_v56 }
 0x959   : > { %v11846_v5 = vsub.f32 %v11712_v38, %v3644_v62 }
 0x95a   : > { %v11849_v58 = vsub.f32 %v11715_v14, %v3643_v24 }
 0x95b   : > { %v3676_v17 = vmul.f32 %v11846_v5, %v11846_v5 }
 0x95c   : > { %v3675_v11 = vmul.f32 %v11849_v58, %v11849_v58 }
 0x95d   : > { %v3706_v48 = vsel %vm595_vm0, %v3676_v17, 0.0 }
 0x95e   : > { %3707 = vadd.xlane.f32.xlu1 %v3706_v48  ;;  %v3703_v27 = vsel %vm595_vm0, %v3675_v11, 0.0 }
 0x95f   : > { %3704 = vadd.xlane.f32.xlu0 %v3703_v27 }
 0x960   : > { %v3618_v29 = vpop.xlane.xlu1 %3617 }
 0x961   : > { %v3646_v36 = vmul.f32 0.03125, %v3618_v29  ;;  %v3615_v1 = vpop.xlane.xlu0 %3614 }
 0x962   : > { %v3645_v38 = vmul.f32 0.03125, %v3615_v1 }
 0x963   : > { %v11858_v15 = vsub.f32 %v11730_v18, %v3646_v36 }
 0x964   : > { %v11861_v14 = vsub.f32 %v11733_v6, %v3645_v38 }
 0x965   : > { %v3678_v33 = vmul.f32 %v11858_v15, %v11858_v15 }
 0x966   : > { %v3677_v43 = vmul.f32 %v11861_v14, %v11861_v14 }
 0x967   : > { %v3712_v9 = vsel %vm595_vm0, %v3678_v33, 0.0 }
 0x968   : > { %3713 = vadd.xlane.f32.xlu1 %v3712_v9  ;;  %v3709_v18 = vsel %vm595_vm0, %v3677_v43, 0.0 }
 0x969   : > { %v8278_v10 = vpop.f32.mrb[80].mxu1  ;;  %3710 = vadd.xlane.f32.xlu0 %v3709_v18 }
 0x96a   : > { %v4280_v6 = vadd.f32 %v8278_v10, %v11870_v8  ;;  %v4274_v41 = vpop.f32.mrb[81].mxu1 }
 0x96b   : > { %v4275_v44 = vadd.f32 %v11870_v8, %v4274_v41  ;;  %v9436_v41 = vld [vmem:[%s13686_s3 + $0x98] sm:$0xff] }
 0x96c   : > { %v11879_v28 = vmul.f32 %v9431_v7, %v4280_v6  ;;  %v4370_v40 = vmul.f32 %v9432_v19, %v4280_v6  ;;  %v11885_v35 = vmul.f32 %v4280_v6, %v10701_v54  ;;  %v11888_v25 = vmul.f32 %v4280_v6, %v13906_v51  ;;  %v13912_v7 = vld [vmem:[#allocation16_spill] sm:$0xff] }
 0x96d   : > { %v11893_v60 = vmul.f32 %v9433_v0, %v4275_v44  ;;  %v4369_v42 = vmul.f32 %v9434_v3, %v4275_v44  ;;  %v11899_v52 = vmul.f32 %v4275_v44, %v13907_v16  ;;  %v11902_v54 = vmul.f32 %v4275_v44, %v13908_v53  ;;  %v9437_v3 = vld [vmem:[%s13686_s3 + $0x10] sm:$0xff] }
 0x96e   : > { %v9438_v16 = vld [vmem:[%s13686_s3 + $0x90] sm:$0xff] }
 0x96f   : > { %v8532_v22 = vpack.c.bf16 %v4370_v40, %v4369_v42  ;;  %v8762_v57 = vpack.i.bf16 %v11885_v35, %v11899_v52  ;;  %v8757_v26 = vpack.i.bf16 %v11888_v25, %v11902_v54  ;;  %v13913_v40 = vld [vmem:[#allocation10_spill] sm:$0xff]  ;;  %v9444_v35 = vld [vmem:[%s13686_s3 + $0xb8] sm:$0xff] }
 0x970   : > { %v3624_v50 = vpop.xlane.xlu1 %3623  ;;  %v13922_v25 = vld [vmem:[#allocation28_spill] sm:$0xff] }
 0x971   : > { %v3648_v37 = vmul.f32 0.03125, %v3624_v50  ;;  %v3621_v61 = vpop.xlane.xlu0 %3620  ;;  %8534 = vmatprep.subr.msk.bf16.mxu0 %vm10137_vm1, %v8532_v22  ;;  %v13914_v22 = vld [vmem:[#allocation8_spill] sm:$0xff] }
 0x972   : > { %v3647_v30 = vmul.f32 0.03125, %v3621_v61 }
 0x973   : > { %v11913_v62 = vsub.f32 %v11748_v13, %v3648_v37  ;;  %v13915_v37 = vld [vmem:[#allocation9_spill] sm:$0xff] }
 0x974   : > { %v11916_v56 = vsub.f32 %v11751_v12, %v3647_v30 }
 0x975   : > { %v3680_v24 = vmul.f32 %v11913_v62, %v11913_v62 }
 0x976   : > { %v3630_v17 = vpop.xlane.xlu1 %3629  ;;  %v3679_v11 = vmul.f32 %v11916_v56, %v11916_v56 }
 0x977   : > { %v3650_v48 = vmul.f32 0.03125, %v3630_v17  ;;  %v3718_v27 = vsel %vm595_vm0, %v3680_v24, 0.0  ;;  %v3627_v29 = vpop.xlane.xlu0 %3626 }
 0x978   : > { %3719 = vadd.xlane.f32.xlu1 %v3718_v27  ;;  %v3715_v36 = vsel %vm595_vm0, %v3679_v11, 0.0  ;;  %v3649_v1 = vmul.f32 0.03125, %v3627_v29 }
 0x979   : > { %v11925_v13 = vsub.f32 %v11766_v46, %v3650_v48  ;;  %3716 = vadd.xlane.f32.xlu0 %v3715_v36  ;;  %v9435_v46 = vld [vmem:[%s13686_s3 + $0x18] sm:$0xff] }
 0x97a   : > { %v11928_v12 = vsub.f32 %v11769_v55, %v3649_v1 }
 0x97b   : > { %13910 = vst [vmem:[#allocation39_spill] sm:$0xff] %v11925_v13  ;;  %v8281_v38 = vpop.f32.mrb[82].mxu1  ;;  %v3682_v33 = vmul.f32 %v11925_v13, %v11925_v13 }
 0x97c   : > { %13911 = vst [vmem:[#allocation38_spill] sm:$0xff] %v11928_v12  ;;  %v4290_v43 = vadd.f32 %v8281_v38, %v11870_v8  ;;  %v4284_v9 = vpop.f32.mrb[83].mxu1  ;;  %v3681_v18 = vmul.f32 %v11928_v12, %v11928_v12 }
 0x97d   : > { %v4285_v10 = vadd.f32 %v11870_v8, %v4284_v9  ;;  %v3724_v6 = vsel %vm595_vm0, %v3682_v33, 0.0 }
 0x97e   : > { %v11940_v55 = vmul.f32 %v9435_v46, %v4290_v43  ;;  %v11945_v44 = vmul.f32 %v9436_v41, %v4290_v43  ;;  %v4388_v19 = vmul.f32 %v4290_v43, %v13912_v7  ;;  %v11949_v51 = vmul.f32 %v4290_v43, %v13913_v40  ;;  %3725 = vadd.xlane.f32.xlu1 %v3724_v6  ;;  %v3636_v0 = vpop.xlane.xlu1 %3635  ;;  %v9440_v7 = vld [vmem:[%s13686_s3 + $0xa8] sm:$0xff]  ;;  %v13918_v40 = vld [vmem:[#allocation13_spill] sm:$0xff] }
 0x97f   : > { %v11954_v42 = vmul.f32 %v9437_v3, %v4285_v10  ;;  %v11959_v53 = vmul.f32 %v9438_v16, %v4285_v10  ;;  %v4387_v50 = vmul.f32 %v4285_v10, %v13914_v22  ;;  %v4403_v61 = vmul.f32 %v4285_v10, %v13915_v37  ;;  %v3633_v30 = vpop.xlane.xlu0 %3632  ;;  %v9441_v16 = vld [vmem:[%s13686_s3 + $0x20] sm:$0xff] }
 0x980   : > { %v3652_v24 = vmul.f32 0.03125, %v3636_v0  ;;  %v3721_v17 = vsel %vm595_vm0, %v3681_v18, 0.0  ;;  %v3651_v11 = vmul.f32 0.03125, %v3633_v30  ;;  %v13919_v0 = vld [vmem:[#allocation21_spill] sm:$0xff] }
 0x981   : > { %3722 = vadd.xlane.f32.xlu0 %v3721_v17  ;;  %v8772_v27 = vpack.i.bf16 %v4388_v19, %v4387_v50  ;;  %v8767_v29 = vpack.i.bf16 %v11949_v51, %v4403_v61  ;;  %v9442_v50 = vld [vmem:[%s13686_s3 + $0xa0] sm:$0xff]  ;;  %v13920_v61 = vld [vmem:[#allocation23_spill] sm:$0xff] }
 0x982   : > { %v11970_v1 = vsub.f32 %v11790_v63, %v3652_v24  ;;  %v11973_v38 = vsub.f32 %v11793_v23, %v3651_v11  ;;  %v9439_v23 = vld [vmem:[%s13686_s3 + $0x28] sm:$0xff]  ;;  %v13921_v24 = vld [vmem:[#allocation17_spill] sm:$0xff] }
 0x983   : > { %v13936_v11 = vld [vmem:[#allocation26_spill] sm:$0xff] }
 0x984   : > { %13916 = vst [vmem:[#allocation42_spill] sm:$0xff] %v11970_v1  ;;  %13917 = vst [vmem:[#allocation6_spill] sm:$0xff] %v11973_v38  ;;  %v3684_v33 = vmul.f32 %v11970_v1, %v11970_v1  ;;  %v3683_v43 = vmul.f32 %v11973_v38, %v11973_v38 }
 0x986   : > { %v3730_v9 = vsel %vm595_vm0, %v3684_v33, 0.0  ;;  %v3727_v18 = vsel %vm595_vm0, %v3683_v43, 0.0 }
 0x987   : > { %3731 = vadd.xlane.f32.xlu1 %v3730_v9  ;;  %3728 = vadd.xlane.f32.xlu0 %v3727_v18 }
 0x989   : > { %v8284_v10 = vpop.f32.mrb[84].mxu1 }
 0x98a   : > { %v4300_v6 = vadd.f32 %v8284_v10, %v11870_v8  ;;  %v4294_v63 = vpop.f32.mrb[85].mxu1 }
 0x98b   : > { %v4295_v46 = vadd.f32 %v11870_v8, %v4294_v63 }
 0x98c   : > { %v11986_v41 = vmul.f32 %v9439_v23, %v4300_v6  ;;  %v11991_v19 = vmul.f32 %v9440_v7, %v4300_v6  ;;  %v4390_v51 = vmul.f32 %v4300_v6, %v13918_v40  ;;  %v4406_v3 = vmul.f32 %v4300_v6, %v13919_v0  ;;  %v9446_v40 = vld [vmem:[%s13686_s3 + $0xb0] sm:$0xff]  ;;  %v13924_v0 = vld [vmem:[#allocation22_spill] sm:$0xff] }
 0x98d   : > { %v11998_v22 = vmul.f32 %v9441_v16, %v4295_v46  ;;  %v12003_v37 = vmul.f32 %v9442_v50, %v4295_v46  ;;  %v4389_v30 = vmul.f32 %v4295_v46, %v13920_v61  ;;  %v4405_v17 = vmul.f32 %v4295_v46, %v13921_v24  ;;  %v9443_v46 = vld [vmem:[%s13686_s3 + $0x38] sm:$0xff]  ;;  %v13925_v16 = vld [vmem:[#allocation11_spill] sm:$0xff] }
 0x98f   : > { %v8777_v33 = vpack.i.bf16 %v4406_v3, %v4405_v17  ;;  %v8782_v43 = vpack.i.bf16 %v4390_v51, %v4389_v30 }
 0x998   : > { %8763 = vrot.lane.b32.xlu1 %v8762_v57, %s9576_s14  ;;  %v13923_v57 = vld [vmem:[#allocation20_spill] sm:$0xff] }
 0x99c   : > { %8773 = vrot.lane.b32.xlu1 %v8772_v27, %s9576_s14  ;;  %v9445_v27 = vld [vmem:[%s13686_s3 + $0x30] sm:$0xff] }
 0x99d   : > { %8758 = vrot.lane.b32.xlu0 %v8757_v26, %s9576_s14  ;;  %v8287_v18 = vpop.f32.mrb[86].mxu1 }
 0x99e   : > { %v4310_v10 = vadd.f32 %v8287_v18, %v11870_v8  ;;  %v4304_v6 = vpop.f32.mrb[87].mxu1 }
 0x99f   : > { %v4305_v63 = vadd.f32 %v11870_v8, %v4304_v6 }
 0x9a0   : > { %v12025_v23 = vmul.f32 %v9443_v46, %v4310_v10  ;;  %v12030_v52 = vmul.f32 %v9444_v35, %v4310_v10  ;;  %v4392_v54 = vmul.f32 %v4310_v10, %v13922_v25  ;;  %v4408_v26 = vmul.f32 %v4310_v10, %v13923_v57  ;;  %v13926_v25 = vld [vmem:[#allocation27_spill] sm:$0xff] }
 0x9a1   : > { %v12037_v7 = vmul.f32 %v9445_v27, %v4305_v63  ;;  %v12042_v51 = vmul.f32 %v9446_v40, %v4305_v63  ;;  %v4391_v3 = vmul.f32 %v4305_v63, %v13924_v0  ;;  %v4407_v50 = vmul.f32 %v4305_v63, %v13925_v16  ;;  %8768 = vrot.lane.b32.xlu0 %v8767_v29, %s9576_s14  ;;  %v9447_v63 = vld [vmem:[%s13686_s3 + $0x48] sm:$0xff]  ;;  %v9450_v40 = vld [vmem:[%s13686_s3 + $0xc0] sm:$0xff] }
 0x9a2   : > { %v13927_v57 = vld [vmem:[#allocation15_spill] sm:$0xff] }
 0x9a3   : > { %v8787_v30 = vpack.i.bf16 %v4408_v26, %v4407_v50  ;;  %v8792_v24 = vpack.i.bf16 %v4392_v54, %v4391_v3  ;;  %v13928_v3 = vld [vmem:[#allocation14_spill] sm:$0xff]  ;;  %v13929_v50 = vld [vmem:[#allocation31_spill] sm:$0xff] }
 0x9a5   : > { %8778 = vrot.lane.b32.xlu0 %v8777_v33, %s9576_s14  ;;  %8788 = vrot.lane.b32.xlu1 %v8787_v30, %s9576_s14  ;;  %v9448_v33 = vld [vmem:[%s13686_s3 + $0xc8] sm:$0xff] }
 0x9a7   : > { %v8290_v18 = vpop.f32.mrb[88].mxu1 }
 0x9a8   : > { %v4320_v10 = vadd.f32 %v8290_v18, %v11870_v8  ;;  %v4314_v6 = vpop.f32.mrb[89].mxu1 }
 0x9a9   : > { %8783 = vrot.lane.b32.xlu0 %v8782_v43, %s9576_s14  ;;  %v4315_v29 = vadd.f32 %v11870_v8, %v4314_v6  ;;  %v9449_v43 = vld [vmem:[%s13686_s3 + $0x40] sm:$0xff] }
 0x9aa   : > { %v12059_v46 = vmul.f32 %v9447_v63, %v4320_v10  ;;  %v12064_v35 = vmul.f32 %v9448_v33, %v4320_v10  ;;  %v4394_v54 = vmul.f32 %v4320_v10, %v13926_v25  ;;  %v4410_v26 = vmul.f32 %v4320_v10, %v13927_v57 }
 0x9ab   : > { %v12071_v27 = vmul.f32 %v9449_v43, %v4315_v29  ;;  %v12076_v0 = vmul.f32 %v9450_v40, %v4315_v29  ;;  %v4393_v16 = vmul.f32 %v4315_v29, %v13928_v3  ;;  %v4409_v30 = vmul.f32 %v4315_v29, %v13929_v50 }
 0x9ad   : > { %8793 = vrot.lane.b32.xlu0 %v8792_v24, %s9576_s14  ;;  %v8802_v10 = vpack.i.bf16 %v4394_v54, %v4393_v16  ;;  %v8797_v6 = vpack.i.bf16 %v4410_v26, %v4409_v30  ;;  %v9451_v54 = vld [vmem:[%s13686_s3 + $0x58] sm:$0xff] }
 0x9ae   : > { %v9452_v16 = vld [vmem:[%s13686_s3 + $0xd8] sm:$0xff] }
 0x9af   : > { %8803 = vrot.lane.b32.xlu1 %v8802_v10, %s9576_s14  ;;  %v13930_v30 = vld [vmem:[#allocation36_spill] sm:$0xff] }
 0x9b1   : > { %8798 = vrot.lane.b32.xlu0 %v8797_v6, %s9576_s14  ;;  %v13931_v6 = vld [vmem:[#allocation19_spill] sm:$0xff] }
 0x9b7   : > { %v8293_v33 = vpop.f32.mrb[90].mxu1  ;;  %v3690_v25 = vpop.xlane.xlu1 %3689 }
 0x9b8   : > { %v4330_v57 = vadd.f32 %v8293_v33, %v11870_v8  ;;  %v4324_v43 = vpop.f32.mrb[91].mxu1  ;;  %v3734_v29 = vmul.f32 0.03125, %v3690_v25  ;;  %v3687_v40 = vpop.xlane.xlu0 %3686  ;;  %v9453_v25 = vld [vmem:[%s13686_s3 + $0x50] sm:$0xff] }
 0x9b9   : > { %v4325_v24 = vadd.f32 %v11870_v8, %v4324_v43  ;;  %v3733_v3 = vmul.f32 0.03125, %v3687_v40  ;;  %v9454_v40 = vld [vmem:[%s13686_s3 + $0xd0] sm:$0xff] }
 0x9ba   : > { %v12092_v26 = vmul.f32 %v9451_v54, %v4330_v57  ;;  %v12097_v50 = vmul.f32 %v9452_v16, %v4330_v57  ;;  %v4396_v10 = vmul.f32 %v4330_v57, %v13930_v30  ;;  %v4412_v33 = vmul.f32 %v4330_v57, %v13931_v6  ;;  %v13933_v16 = vld [vmem:[#allocation30_spill] sm:$0xff] }
 0x9bb   : > { %v12104_v43 = vmul.f32 %v9453_v25, %v4325_v24  ;;  %v12109_v54 = vmul.f32 %v9454_v40, %v4325_v24  ;;  %v4395_v18 = vmul.f32 %v4325_v24, %v13932_v20  ;;  %v4411_v63 = vmul.f32 %v4325_v24, %v13933_v16  ;;  %v9455_v24 = vld [vmem:[%s13686_s3 + $0x68] sm:$0xff]  ;;  %v13935_v16 = vld [vmem:[#allocation29_spill] sm:$0xff] }
 0x9bc   : > { %v12113_v61 = vadd.f32 1e-08, %v3734_v29  ;;  %v12115_v30 = vadd.f32 1e-08, %v3733_v3 }
 0x9bd   : > { %v8296_v6 = vpop.f32.mrb[92].mxu1  ;;  %v8807_v25 = vpack.i.bf16 %v4412_v33, %v4411_v63  ;;  %v8812_v17 = vpack.i.bf16 %v4396_v10, %v4395_v18  ;;  %v9456_v18 = vld [vmem:[%s13686_s3 + $0xe8] sm:$0xff]  ;;  %v13934_v10 = vld [vmem:[#allocation25_spill] sm:$0xff] }
 0x9be   : > { %9093 = vrsqrt.f32 %v12113_v61  ;;  %v4334_v40 = vpop.f32.mrb[93].mxu1  ;;  %v4340_v20 = vadd.f32 %v8296_v6, %v11870_v8  ;;  %v9457_v6 = vld [vmem:[%s13686_s3 + $0x60] sm:$0xff]  ;;  %vm3774_vm10 = vcmp.eq.f32.partialorder %v12113_v61, inf  ;;  %vm3776_vm11 = vcmp.eq.f32.partialorder %v12113_v61, 0.0 }
 0x9bf   : > { %9095 = vrsqrt.f32 %v12115_v30  ;;  %8808 = vrot.lane.b32.xlu1 %v8807_v25, %s9576_s14  ;;  %v4335_v29 = vadd.f32 %v11870_v8, %v4334_v40  ;;  %vm3767_vm12 = vcmp.eq.f32.partialorder %v12115_v30, inf  ;;  %vm3769_vm13 = vcmp.eq.f32.partialorder %v12115_v30, 0.0 }
 0x9c0   : > { %v12129_v63 = vmul.f32 %v9455_v24, %v4340_v20  ;;  %v12134_v3 = vmul.f32 %v9456_v18, %v4340_v20  ;;  %v4398_v33 = vmul.f32 %v4340_v20, %v13934_v10  ;;  %v4414_v25 = vmul.f32 %v4340_v20, %v13935_v16  ;;  %v9458_v24 = vld [vmem:[%s13686_s3 + $0xe0] sm:$0xff] }
 0x9c1   : > { %v12141_v40 = vmul.f32 %v9457_v6, %v4335_v29  ;;  %v12146_v57 = vmul.f32 %v9458_v24, %v4335_v29  ;;  %v4397_v9 = vmul.f32 %v4335_v29, %v13936_v11  ;;  %v13937_v18 = vld [vmem:[#allocation37_spill] sm:$0xff]  ;;  %v13939_v6 = vld [vmem:[#allocation35_spill] sm:$0xff] }
 0x9c2   : > { %v4413_v48 = vmul.f32 %v4335_v29, %v13937_v18  ;;  %v3777_v29 = vand.u32 2147483648, %v12113_v61 }
 0x9c3   : > { %8813 = vrot.lane.b32.xlu1 %v8812_v17, %s9576_s14  ;;  %v8822_v36 = vpack.i.bf16 %v4398_v33, %v4397_v9  ;;  %v9459_v17 = vld [vmem:[%s13686_s3 + $0x78] sm:$0xff] }
 0x9c4   : > { %v8817_v10 = vpack.i.bf16 %v4414_v25, %v4413_v48  ;;  %v9460_v25 = vld [vmem:[%s13686_s3 + $0xf8] sm:$0xff] }
 0x9c5   : > { %v8299_v16 = vpop.f32.mrb[94].mxu1 }
 0x9c6   : > { %v4350_v24 = vadd.f32 %v8299_v16, %v11870_v8  ;;  %v4344_v11 = vpop.f32.mrb[95].mxu1  ;;  %v13938_v16 = vld [vmem:[#allocation34_spill] sm:$0xff] }
 0x9c7   : > { %8818 = vrot.lane.b32.xlu1 %v8817_v10, %s9576_s14  ;;  %v4345_v48 = vadd.f32 %v11870_v8, %v4344_v11  ;;  %v9461_v11 = vld [vmem:[%s13686_s3 + $0x70] sm:$0xff] }
 0x9c8   : > { %v9094_v9 = vpop.eup %9093  ;;  %v12166_v33 = vmul.f32 %v9459_v17, %v4350_v24  ;;  %v12171_v18 = vmul.f32 %v9460_v25, %v4350_v24  ;;  %v12174_v20 = vmul.f32 %v4350_v24, %v13938_v16  ;;  %v4416_v10 = vmul.f32 %v4350_v24, %v13939_v6 }
 0x9c9   : > { %v9096_v39 = vpop.eup %9095  ;;  %v3773_v8 = vmul.f32 %v9094_v9, %v12113_v61  ;;  %v12181_v17 = vmul.f32 %v9461_v11, %v4345_v48  ;;  %v12186_v25 = vmul.f32 %v9462_v45, %v4345_v48  ;;  %v12189_v16 = vmul.f32 %v4345_v48, %v13940_v2  ;;  %v3696_v47 = vpop.xlane.xlu1 %3695  ;;  %v13942_v9 = vld [vmem:[#allocation24_spill] sm:$0xff] }
 0x9ca   : > { %v3766_v6 = vmul.f32 %v9096_v39, %v12115_v30  ;;  %v3770_v24 = vand.u32 2147483648, %v12115_v30  ;;  %v4415_v38 = vmul.f32 %v4345_v48, %v13942_v9  ;;  %v3736_v1 = vmul.f32 0.03125, %v3696_v47  ;;  %v3693_v13 = vpop.xlane.xlu0 %3692 }
 0x9cb   : > { %13941 = vst [vmem:[#allocation7_spill] sm:$0xff] %v12189_v16  ;;  %v3775_v11 = vsel %vm3774_vm10, %v12113_v61, %v3773_v8  ;;  %8823 = vrot.lane.b32.xlu1 %v8822_v36, %s9576_s14  ;;  %v3735_v2 = vmul.f32 0.03125, %v3693_v13 }
 0x9cc   : > { %v3778_v39 = vsel %vm3776_vm11, %v3777_v29, %v3775_v11  ;;  %v3768_v47 = vsel %vm3767_vm12, %v12115_v30, %v3766_v6  ;;  %v3752_v48 = vadd.f32 1e-08, %v3736_v1  ;;  %v8827_v9 = vpack.i.bf16 %v4416_v10, %v4415_v38 }
 0x9cd   : > { %9097 = vrcp.f32 %v3778_v39  ;;  %v3771_v8 = vsel %vm3769_vm13, %v3770_v24, %v3768_v47  ;;  %v3751_v45 = vadd.f32 1e-08, %v3735_v2 }
 0x9ce   : > { %9099 = vrsqrt.f32 %v3752_v48  ;;  %vm3788_vm14 = vcmp.eq.f32.partialorder %v3752_v48, inf  ;;  %v3791_v1 = vand.u32 2147483648, %v3752_v48  ;;  %vm3790_vm2 = vcmp.eq.f32.partialorder %v3752_v48, 0.0 }
 0x9cf   : > { %9101 = vrsqrt.f32 %v3751_v45  ;;  %8828 = vrot.lane.b32.xlu1 %v8827_v9, %s9576_s14  ;;  %vm3781_vm15 = vcmp.eq.f32.partialorder %v3751_v45, inf  ;;  %v3784_v13 = vand.u32 2147483648, %v3751_v45  ;;  %v12216_v9 = vld [vmem:[%s13688_s5 + $0x9] ss:$0 sm:$0xff]  ;;  %vm3783_vm3 = vcmp.eq.f32.partialorder %v3751_v45, 0.0 }
 0x9d0   : > { %9103 = vrcp.f32 %v3771_v8 }
 0x9d7   : > { %v9098_v36 = vpop.eup %9097  ;;  %v3702_v29 = vpop.xlane.xlu1 %3701 }
 0x9d8   : > { %v9100_v61 = vpop.eup %9099  ;;  %v3738_v38 = vmul.f32 0.03125, %v3702_v29  ;;  %v3699_v10 = vpop.xlane.xlu0 %3698  ;;  %v3880_v39 = vmul.f32 %v9098_v36, %v11810_v49  ;;  %v12222_v49 = vld [vmem:[%s13688_s5 + $0xa] ss:$0 sm:$0xff] }
 0x9d9   : > { %v9102_v11 = vpop.eup %9101  ;;  %v3787_v6 = vmul.f32 %v9100_v61, %v3752_v48  ;;  %v3737_v2 = vmul.f32 0.03125, %v3699_v10 }
 0x9da   : > { %v9104_v30 = vpop.eup %9103  ;;  %v3780_v24 = vmul.f32 %v9102_v11, %v3751_v45  ;;  %v3754_v12 = vadd.f32 1e-08, %v3738_v38  ;;  %v3914_v36 = vmul.f32 %v12216_v9, %v3880_v39 }
 0x9db   : > { %v3789_v47 = vsel %vm3788_vm14, %v3752_v48, %v3787_v6  ;;  %v3878_v8 = vmul.f32 %v9104_v30, %v11813_v31  ;;  %v3753_v29 = vadd.f32 1e-08, %v3737_v2  ;;  %v13943_v48 = vpack.c.bf16 %v11879_v28, %v11893_v60 }
 0x9dc   : > { %v3782_v61 = vsel %vm3781_vm15, %v3751_v45, %v3780_v24  ;;  %v3792_v16 = vsel %vm3790_vm2, %v3791_v1, %v3789_v47  ;;  %9105 = vrsqrt.f32 %v3754_v12  ;;  %v12230_v45 = vadd.f32 %v12222_v49, %v3914_v36 }
 0x9dd   : > { %v3785_v11 = vsel %vm3783_vm3, %v3784_v13, %v3782_v61  ;;  %9107 = vrsqrt.f32 %v3753_v29  ;;  %v3913_v6 = vmul.f32 %v12216_v9, %v3878_v8  ;;  %vm3802_vm4 = vcmp.eq.f32.partialorder %v3754_v12, inf }
 0x9de   : > { %9109 = vrcp.f32 %v3785_v11  ;;  %vm3804_vm5 = vcmp.eq.f32.partialorder %v3754_v12, 0.0  ;;  %v3805_v30 = vand.u32 2147483648, %v3754_v12  ;;  %vm3795_vm6 = vcmp.eq.f32.partialorder %v3753_v29, inf }
 0x9df   : > { %9111 = vrcp.f32 %v3792_v16  ;;  %v12227_v31 = vadd.f32 %v12222_v49, %v3913_v6  ;;  %v13944_v16 = vpack.c.bf16 %v11945_v44, %v11959_v53  ;;  %v3798_v28 = vand.u32 2147483648, %v3753_v29 }
 0x9e0   : > { %vm3797_vm7 = vcmp.eq.f32.partialorder %v3753_v29, 0.0 }
 0x9e1   : > { %8244 = vmatprep.mubr.msk.f32.mxu0 %vm595_vm0, %v12227_v31 }
 0x9e2   : > { %8245 = vmatmul.mubr.msk.f32.vlgmr.msra.gmra.mrb[64].mxu0 %vm595_vm0, %v12230_v45 }
 0x9e3   : > { %8537 = vmatpush3.bf16.xpose.msk.msra.mxu0 %vm10137_vm1, %v13943_v48  ;;  %v13945_v48 = vpack.c.bf16 %v11940_v55, %v11954_v42  ;;  %v13947_v42 = vpack.c.bf16 %v11986_v41, %v11998_v22 }
 0x9e4   : > { %8540 = vmatprep.subr.msk.bf16.mxu0 %vm10137_vm1, %v13944_v16 }
 0x9e6   : > { %v9106_v13 = vpop.eup %9105 }
 0x9e7   : > { %v9108_v1 = vpop.eup %9107  ;;  %v3801_v38 = vmul.f32 %v9106_v13, %v3754_v12 }
 0x9e8   : > { %v9110_v10 = vpop.eup %9109  ;;  %v3794_v24 = vmul.f32 %v9108_v1, %v3753_v29 }
 0x9e9   : > { %v9112_v2 = vpop.eup %9111  ;;  %v3803_v39 = vsel %vm3802_vm4, %v3754_v12, %v3801_v38  ;;  %v3882_v60 = vmul.f32 %v9110_v10, %v11825_v4 }
 0x9ea   : > { %v3806_v47 = vsel %vm3804_vm5, %v3805_v30, %v3803_v39  ;;  %v3796_v8 = vsel %vm3795_vm6, %v3753_v29, %v3794_v24  ;;  %v3884_v53 = vmul.f32 %v9112_v2, %v11822_v59  ;;  %v13946_v29 = vpack.c.bf16 %v11991_v19, %v12003_v37 }
 0x9eb   : > { %v3708_v44 = vpop.xlane.xlu1 %3707  ;;  %v3799_v61 = vsel %vm3797_vm7, %v3798_v28, %v3796_v8  ;;  %v3915_v6 = vmul.f32 %v12216_v9, %v3882_v60  ;;  %9113 = vrcp.f32 %v3806_v47  ;;  %8543 = vmatpush3.bf16.xpose.msk.msra.mxu0 %vm10137_vm1, %v13945_v48  ;;  %v13948_v37 = vpack.c.bf16 %v12030_v52, %v12042_v51 }
 0x9ec   : > { %v3740_v11 = vmul.f32 0.03125, %v3708_v44  ;;  %v3705_v36 = vpop.xlane.xlu0 %3704  ;;  %v3916_v4 = vmul.f32 %v12216_v9, %v3884_v53  ;;  %9115 = vrcp.f32 %v3799_v61  ;;  %8546 = vmatprep.subr.msk.bf16.mxu0 %vm10137_vm1, %v13946_v29  ;;  %v13952_v29 = vpack.c.bf16 %v12097_v50, %v12109_v54 }
 0x9ed   : > { %v3739_v12 = vmul.f32 0.03125, %v3705_v36  ;;  %v12261_v16 = vadd.f32 %v12222_v49, %v3915_v6  ;;  %v13950_v6 = vpack.c.bf16 %v12064_v35, %v12076_v0 }
 0x9ee   : > { %v3756_v59 = vadd.f32 1e-08, %v3740_v11  ;;  %v12264_v55 = vadd.f32 %v12222_v49, %v3916_v4 }
 0x9ef   : > { %v3755_v13 = vadd.f32 1e-08, %v3739_v12  ;;  %8247 = vmatprep.mubr.msk.f32.mxu0 %vm595_vm0, %v12261_v16 }
 0x9f0   : > { %9117 = vrsqrt.f32 %v3756_v59  ;;  %8248 = vmatmul.mubr.msk.f32.gmra.mrb[66].mxu0 %vm595_vm0, %v12264_v55  ;;  %vm3816_vm8 = vcmp.eq.f32.partialorder %v3756_v59, inf  ;;  %vm3818_vm9 = vcmp.eq.f32.partialorder %v3756_v59, 0.0  ;;  %v3819_v8 = vand.u32 2147483648, %v3756_v59 }
 0x9f1   : > { %9119 = vrsqrt.f32 %v3755_v13  ;;  %vm3809_vm10 = vcmp.eq.f32.partialorder %v3755_v13, inf  ;;  %vm3811_vm11 = vcmp.eq.f32.partialorder %v3755_v13, 0.0 }
 0x9f3   : > { %8549 = vmatpush3.bf16.xpose.msk.msra.mxu0 %vm10137_vm1, %v13947_v42 }
 0x9f4   : > { %8552 = vmatprep.subr.msk.bf16.mxu0 %vm10137_vm1, %v13948_v37 }
 0x9f5   : > { %v9114_v19 = vpop.eup %9113  ;;  %v3714_v1 = vpop.xlane.xlu1 %3713 }
 0x9f6   : > { %v9116_v38 = vpop.eup %9115  ;;  %v3742_v10 = vmul.f32 0.03125, %v3714_v1  ;;  %v3711_v30 = vpop.xlane.xlu0 %3710  ;;  %v3888_v24 = vmul.f32 %v9114_v19, %v11834_v21  ;;  %v3812_v21 = vand.u32 2147483648, %v3755_v13 }
 0x9f7   : > { %v3741_v2 = vmul.f32 0.03125, %v3711_v30  ;;  %v3886_v39 = vmul.f32 %v9116_v38, %v11837_v32  ;;  %v13949_v32 = vpack.c.bf16 %v12025_v23, %v12037_v7  ;;  %v13951_v7 = vpack.c.bf16 %v12059_v46, %v12071_v27 }
 0x9f8   : > { %v3758_v41 = vadd.f32 1e-08, %v3742_v10  ;;  %v3918_v47 = vmul.f32 %v12216_v9, %v3888_v24 }
 0x9f9   : > { %v3757_v28 = vadd.f32 1e-08, %v3741_v2  ;;  %v3917_v60 = vmul.f32 %v12216_v9, %v3886_v39 }
 0x9fa   : > { %v9118_v22 = vpop.eup %9117  ;;  %9121 = vrsqrt.f32 %v3758_v41  ;;  %v12298_v48 = vadd.f32 %v12222_v49, %v3918_v47  ;;  %vm3830_vm12 = vcmp.eq.f32.partialorder %v3758_v41, inf  ;;  %v3833_v50 = vand.u32 2147483648, %v3758_v41 }
 0x9fb   : > { %v9120_v52 = vpop.eup %9119  ;;  %v3815_v51 = vmul.f32 %v9118_v22, %v3756_v59  ;;  %9123 = vrsqrt.f32 %v3757_v28  ;;  %8555 = vmatpush3.bf16.xpose.msk.msra.mxu0 %vm10137_vm1, %v13949_v32  ;;  %v12290_v61 = vadd.f32 %v12222_v49, %v3917_v60  ;;  %vm3823_vm13 = vcmp.eq.f32.partialorder %v3757_v28, inf }
 0x9fc   : > { %v3808_v44 = vmul.f32 %v9120_v52, %v3755_v13  ;;  %8558 = vmatprep.subr.msk.bf16.mxu0 %vm10137_vm1, %v13950_v6  ;;  %v3826_v37 = vand.u32 2147483648, %v3757_v28  ;;  %vm3825_vm14 = vcmp.eq.f32.partialorder %v3757_v28, 0.0  ;;  %vm3832_vm15 = vcmp.eq.f32.partialorder %v3758_v41, 0.0 }
 0x9fd   : > { %v3817_v53 = vsel %vm3816_vm8, %v3756_v59, %v3815_v51  ;;  %8250 = vmatprep.mubr.msk.f32.mxu0 %vm595_vm0, %v12290_v61  ;;  %v13954_v47 = vpack.c.bf16 %v12134_v3, %v12146_v57 }
 0x9fe   : > { %v3820_v11 = vsel %vm3818_vm9, %v3819_v8, %v3817_v53  ;;  %v3810_v36 = vsel %vm3809_vm10, %v3755_v13, %v3808_v44  ;;  %8251 = vmatmul.mubr.msk.f32.gmra.mrb[68].mxu0 %vm595_vm0, %v12298_v48 }
 0x9ff   : > { %v3813_v12 = vsel %vm3811_vm11, %v3812_v21, %v3810_v36  ;;  %9125 = vrcp.f32 %v3820_v11  ;;  %v13955_v21 = vpack.c.bf16 %v12129_v63, %v12141_v40 }
 0xa00   : > { %9127 = vrcp.f32 %v3813_v12  ;;  %v13956_v12 = vpack.c.bf16 %v12171_v18, %v12186_v25 }
 0xa03   : > { %8561 = vmatpush3.bf16.xpose.msk.msra.mxu0 %vm10137_vm1, %v13951_v7 }
 0xa04   : > { %v9122_v23 = vpop.eup %9121  ;;  %8564 = vmatprep.subr.msk.bf16.mxu0 %vm10137_vm1, %v13952_v29 }
 0xa05   : > { %v3720_v35 = vpop.xlane.xlu1 %3719  ;;  %v9124_v0 = vpop.eup %9123  ;;  %v3829_v4 = vmul.f32 %v9122_v23, %v3758_v41 }
 0xa06   : > { %v3744_v59 = vmul.f32 0.03125, %v3720_v35  ;;  %v3717_v13 = vpop.xlane.xlu0 %3716  ;;  %v3822_v42 = vmul.f32 %v9124_v0, %v3757_v28 }
 0xa07   : > { %v3743_v19 = vmul.f32 0.03125, %v3717_v13  ;;  %v3831_v1 = vsel %vm3830_vm12, %v3758_v41, %v3829_v4 }
 0xa08   : > { %v12314_v46 = vadd.f32 1e-08, %v3744_v59  ;;  %v3824_v38 = vsel %vm3823_vm13, %v3757_v28, %v3822_v42  ;;  %v3834_v2 = vsel %vm3832_vm15, %v3833_v50, %v3831_v1  ;;  %v13953_v28 = vpack.c.bf16 %v12092_v26, %v12104_v43 }
 0xa09   : > { %v9126_v27 = vpop.eup %9125  ;;  %v12316_v10 = vadd.f32 1e-08, %v3743_v19  ;;  %v3827_v54 = vsel %vm3825_vm14, %v3826_v37, %v3824_v38 }
 0xa0a   : > { %v9128_v30 = vpop.eup %9127  ;;  %9129 = vrsqrt.f32 %v12314_v46  ;;  %v3892_v60 = vmul.f32 %v9126_v27, %v11846_v5  ;;  %vm3844_vm2 = vcmp.eq.f32.partialorder %v12314_v46, inf  ;;  %vm3846_vm3 = vcmp.eq.f32.partialorder %v12314_v46, 0.0 }
 0xa0b   : > { %9131 = vrsqrt.f32 %v12316_v10  ;;  %v3726_v24 = vpop.xlane.xlu1 %3725  ;;  %v3890_v22 = vmul.f32 %v9128_v30, %v11849_v58  ;;  %8567 = vmatpush3.bf16.xpose.msk.msra.mxu0 %vm10137_vm1, %v13953_v28  ;;  %v3847_v63 = vand.u32 2147483648, %v12314_v46  ;;  %vm3837_vm4 = vcmp.eq.f32.partialorder %v12316_v10, inf }
 0xa0c   : > { %v3746_v39 = vmul.f32 0.03125, %v3726_v24  ;;  %9133 = vrcp.f32 %v3827_v54  ;;  %8570 = vmatprep.subr.msk.bf16.mxu0 %vm10137_vm1, %v13954_v47  ;;  %v3920_v5 = vmul.f32 %v12216_v9, %v3892_v60  ;;  %vm3839_vm5 = vcmp.eq.f32.partialorder %v12316_v10, 0.0 }
 0xa0d   : > { %v3919_v58 = vmul.f32 %v12216_v9, %v3890_v22  ;;  %9135 = vrcp.f32 %v3834_v2  ;;  %v3840_v35 = vand.u32 2147483648, %v12316_v10  ;;  %v13957_v28 = vpack.c.bf16 %v12166_v33, %v12181_v17 }
 0xa0e   : > { %v12332_v41 = vadd.f32 1e-08, %v3746_v39  ;;  %v3723_v52 = vpop.xlane.xlu0 %3722  ;;  %v12343_v57 = vadd.f32 %v12222_v49, %v3920_v5 }
 0xa0f   : > { %v3745_v51 = vmul.f32 0.03125, %v3723_v52  ;;  %v12340_v43 = vadd.f32 %v12222_v49, %v3919_v58 }
 0xa10   : > { %9137 = vrsqrt.f32 %v12332_v41  ;;  %vm3858_vm6 = vcmp.eq.f32.partialorder %v12332_v41, inf  ;;  %vm3860_vm7 = vcmp.eq.f32.partialorder %v12332_v41, 0.0  ;;  %v3861_v29 = vand.u32 2147483648, %v12332_v41 }
 0xa11   : > { %v12337_v26 = vadd.f32 1e-08, %v3745_v51  ;;  %8253 = vmatprep.mubr.msk.f32.mxu0 %vm595_vm0, %v12340_v43 }
 0xa12   : > { %8254 = vmatmul.mubr.msk.f32.gmra.mrb[70].mxu0 %vm595_vm0, %v12343_v57 }
 0xa13   : > { %9139 = vrsqrt.f32 %v12337_v26  ;;  %8573 = vmatpush3.bf16.xpose.msk.msra.mxu0 %vm10137_vm1, %v13955_v21  ;;  %vm3851_vm8 = vcmp.eq.f32.partialorder %v12337_v26, inf  ;;  %vm3853_vm9 = vcmp.eq.f32.partialorder %v12337_v26, 0.0  ;;  %v3854_v60 = vand.u32 2147483648, %v12337_v26 }
 0xa14   : > { %v9130_v3 = vpop.eup %9129  ;;  %v3732_v8 = vpop.xlane.xlu1 %3731  ;;  %8576 = vmatprep.subr.msk.bf16.mxu0 %vm10137_vm1, %v13956_v12 }
 0xa15   : > { %v3729_v44 = vpop.xlane.xlu0 %3728  ;;  %v9132_v53 = vpop.eup %9131  ;;  %v3748_v32 = vmul.f32 0.03125, %v3732_v8  ;;  %v3843_v36 = vmul.f32 %v9130_v3, %v12314_v46 }
 0xa16   : > { %v3747_v11 = vmul.f32 0.03125, %v3729_v44  ;;  %v3836_v6 = vmul.f32 %v9132_v53, %v12316_v10  ;;  %v9134_v23 = vpop.eup %9133 }
 0xa17   : > { %v12365_v40 = vadd.f32 1e-08, %v3748_v32  ;;  %v3894_v25 = vmul.f32 %v9134_v23, %v11861_v14  ;;  %v9136_v4 = vpop.eup %9135  ;;  %v3845_v13 = vsel %vm3844_vm2, %v12314_v46, %v3843_v36 }
 0xa18   : > { %v12367_v7 = vadd.f32 1e-08, %v3747_v11  ;;  %v8764_v0 = vpop.permute.xlu1 %8763  ;;  %v3838_v42 = vsel %vm3837_vm4, %v12316_v10, %v3836_v6  ;;  %v3896_v50 = vmul.f32 %v9136_v4, %v11858_v15  ;;  %v3848_v2 = vsel %vm3846_vm3, %v3847_v63, %v3845_v13 }
 0xa19   : > { %v8759_v18 = vpop.permute.xlu0 %8758  ;;  %9141 = vrsqrt.f32 %v12365_v40  ;;  %v8766_v19 = vunpack.i.h.bf16 %v8764_v0  ;;  %v8765_v37 = vunpack.i.l.bf16 %v8764_v0  ;;  %v3921_v38 = vmul.f32 %v12216_v9, %v3894_v25 }
 0xa1a   : > { %v9138_v59 = vpop.eup %9137  ;;  %9143 = vrsqrt.f32 %v12367_v7  ;;  %v8761_v27 = vunpack.i.h.bf16 %v8759_v18  ;;  %v8760_v1 = vunpack.i.l.bf16 %v8759_v18  ;;  %v3841_v39 = vsel %vm3839_vm5, %v3840_v35, %v3838_v42 }
 0xa1b   : > { %v3857_v14 = vmul.f32 %v9138_v59, %v12332_v41  ;;  %8579 = vmatpush3.bf16.xpose.msk.msra.mxu0 %vm10137_vm1, %v13957_v28  ;;  %v8582_v47 = vpack.c.bf16 %v8766_v19, %v8765_v37  ;;  %v12402_v46 = vadd.f32 %v12222_v49, %v3921_v38  ;;  %v3922_v10 = vmul.f32 %v12216_v9, %v3896_v50 }
 0xa1c   : > { %v8774_v30 = vpop.permute.xlu1 %8773  ;;  %v8580_v51 = vpack.c.bf16 %v8761_v27, %v8760_v1  ;;  %9145 = vrcp.f32 %v3841_v39  ;;  %vm3872_vm1 = vcmp.eq.f32.partialorder %v12365_v40, inf  ;;  %vm3874_vm10 = vcmp.eq.f32.partialorder %v12365_v40, 0.0 }
 0xa1d   : > { %v8769_v54 = vpop.permute.xlu0 %8768  ;;  %v9140_v24 = vpop.eup %9139  ;;  %v3859_v22 = vsel %vm3858_vm6, %v12332_v41, %v3857_v14  ;;  %v8776_v52 = vunpack.i.h.bf16 %v8774_v30  ;;  %8256 = vmatprep.mubr.msk.f32.mxu0 %vm595_vm0, %v12402_v46  ;;  %v8775_v34 = vunpack.i.l.bf16 %v8774_v30  ;;  %v12411_v33 = vadd.f32 %v12222_v49, %v3922_v10 }
 0xa1e   : > { %v3850_v15 = vmul.f32 %v9140_v24, %v12337_v26  ;;  %v8771_v58 = vunpack.i.h.bf16 %v8769_v54  ;;  %v8770_v5 = vunpack.i.l.bf16 %v8769_v54  ;;  %v3862_v8 = vsel %vm3860_vm7, %v3861_v29, %v3859_v22  ;;  %8581 = vmatprep.subr.bf16.mxu1 %v8580_v51 }
 0xa1f   : > { %8257 = vmatmul.mubr.msk.f32.gmra.mrb[72].mxu0 %vm595_vm0, %v12411_v33  ;;  %8583 = vmatpush3.bf16.msra.mxu1 %v8582_v47  ;;  %9147 = vrcp.f32 %v3848_v2  ;;  %v3875_v41 = vand.u32 2147483648, %v12365_v40  ;;  %v8586_v12 = vpack.c.bf16 %v8776_v52, %v8775_v34  ;;  %vm3865_vm11 = vcmp.eq.f32.partialorder %v12367_v7, inf  ;;  %v13958_v52 = vld [vmem:[#allocation38_spill] sm:$0xff] }
 0xa20   : > { %v3852_v3 = vsel %vm3851_vm8, %v12337_v26, %v3850_v15  ;;  %v8789_v21 = vpop.permute.xlu1 %8788  ;;  %v8584_v11 = vpack.c.bf16 %v8771_v58, %v8770_v5  ;;  %v3868_v29 = vand.u32 2147483648, %v12367_v7  ;;  %vm3867_vm12 = vcmp.eq.f32.partialorder %v12367_v7, 0.0 }
 0xa21   : > { %v8779_v17 = vpop.permute.xlu0 %8778  ;;  %v3855_v44 = vsel %vm3853_vm9, %v3854_v60, %v3852_v3  ;;  %v8791_v0 = vunpack.i.h.bf16 %v8789_v21  ;;  %v8790_v18 = vunpack.i.l.bf16 %v8789_v21  ;;  %v13959_v3 = vld [vmem:[#allocation39_spill] sm:$0xff] }
 0xa22   : > { %v8781_v53 = vunpack.i.h.bf16 %v8779_v17  ;;  %v8780_v32 = vunpack.i.l.bf16 %v8779_v17  ;;  %9149 = vrcp.f32 %v3855_v44  ;;  %8585 = vmatprep.subr.bf16.mxu1 %v8584_v11 }
 0xa23   : > { %v9142_v36 = vpop.eup %9141  ;;  %9151 = vrcp.f32 %v3862_v8  ;;  %8587 = vmatpush3.bf16.msra.mxu1 %v8586_v12  ;;  %v8592_v30 = vpack.c.bf16 %v8791_v0, %v8790_v18 }
 0xa24   : > { %v9144_v26 = vpop.eup %9143  ;;  %v3871_v6 = vmul.f32 %v9142_v36, %v12365_v40  ;;  %v8588_v63 = vpack.c.bf16 %v8781_v53, %v8780_v32  ;;  %v8804_v27 = vpop.permute.xlu1 %8803 }
 0xa25   : > { %v8784_v23 = vpop.permute.xlu0 %8783  ;;  %v3864_v35 = vmul.f32 %v9144_v26, %v12367_v7  ;;  %v8806_v2 = vunpack.i.h.bf16 %v8804_v27  ;;  %v8805_v39 = vunpack.i.l.bf16 %v8804_v27  ;;  %v13960_v26 = vld [vmem:[#allocation42_spill] sm:$0xff] }
 0xa26   : > { %v8786_v25 = vunpack.i.h.bf16 %v8784_v23  ;;  %v3873_v4 = vsel %vm3872_vm1, %v12365_v40, %v3871_v6  ;;  %v8785_v59 = vunpack.i.l.bf16 %v8784_v23  ;;  %8589 = vmatprep.subr.bf16.mxu1 %v8588_v63  ;;  %v9146_v50 = vpop.eup %9145  ;;  %v13961_v23 = vld [vmem:[#allocation6_spill] sm:$0xff] }
 0xa27   : > { %v3876_v13 = vsel %vm3874_vm10, %v3875_v41, %v3873_v4  ;;  %v3866_v42 = vsel %vm3865_vm11, %v12367_v7, %v3864_v35  ;;  %v3898_v40 = vmul.f32 %v9146_v50, %v11916_v56  ;;  %v8598_v17 = vpack.c.bf16 %v8806_v2, %v8805_v39 }
 0xa28   : > { %v3869_v14 = vsel %vm3867_vm12, %v3868_v29, %v3866_v42  ;;  %v8590_v19 = vpack.c.bf16 %v8786_v25, %v8785_v59  ;;  %9153 = vrcp.f32 %v3876_v13 }
 0xa29   : > { %v8794_v37 = vpop.permute.xlu0 %8793  ;;  %9155 = vrcp.f32 %v3869_v14  ;;  %v9148_v24 = vpop.eup %9147  ;;  %v3923_v60 = vmul.f32 %v12216_v9, %v3898_v40 }
 0xa2a   : > { %v8796_v1 = vunpack.i.h.bf16 %v8794_v37  ;;  %v8795_v38 = vunpack.i.l.bf16 %v8794_v37  ;;  %8591 = vmatpush3.bf16.msra.mxu1 %v8590_v19  ;;  %v3900_v28 = vmul.f32 %v9148_v24, %v11913_v62  ;;  %v7446_v24 = vld [vmem:[%s13688_s5 + $0xb] ss:$0 sm:$0xff] }
 0xa2b   : > { %8593 = vmatprep.subr.bf16.mxu1 %v8592_v30  ;;  %v12436_v5 = vadd.f32 %v12222_v49, %v3923_v60 }
 0xa2c   : > { %v8594_v54 = vpack.c.bf16 %v8796_v1, %v8795_v38  ;;  %v9150_v22 = vpop.eup %9149  ;;  %v3924_v56 = vmul.f32 %v12216_v9, %v3900_v28 }
 0xa2d   : > { %v8799_v7 = vpop.permute.xlu0 %8798  ;;  %v9152_v10 = vpop.eup %9151  ;;  %v3902_v58 = vmul.f32 %v9150_v22, %v13958_v52  ;;  %8259 = vmatprep.mubr.msk.f32.mxu0 %vm595_vm0, %v12436_v5 }
 0xa2e   : > { %v8801_v15 = vunpack.i.h.bf16 %v8799_v7  ;;  %v8800_v47 = vunpack.i.l.bf16 %v8799_v7  ;;  %8595 = vmatpush3.bf16.msra.mxu1 %v8594_v54  ;;  %v3904_v34 = vmul.f32 %v9152_v10, %v13959_v3  ;;  %v12444_v62 = vadd.f32 %v12222_v49, %v3924_v56 }
 0xa2f   : > { %v3925_v8 = vmul.f32 %v12216_v9, %v3902_v58 }
 0xa30   : > { %v8596_v51 = vpack.c.bf16 %v8801_v15, %v8800_v47  ;;  %v3926_v53 = vmul.f32 %v12216_v9, %v3904_v34  ;;  %8260 = vmatmul.mubr.msk.f32.gmra.mrb[74].mxu0 %vm595_vm0, %v12444_v62 }
 0xa31   : > { %v8809_v44 = vpop.permute.xlu1 %8808  ;;  %v12448_v36 = vadd.f32 %v12222_v49, %v3925_v8 }
 0xa32   : > { %8597 = vmatprep.subr.bf16.mxu1 %v8596_v51  ;;  %v9154_v21 = vpop.eup %9153  ;;  %v8811_v32 = vunpack.i.h.bf16 %v8809_v44  ;;  %v8810_v11 = vunpack.i.l.bf16 %v8809_v44  ;;  %v12457_v35 = vadd.f32 %v12222_v49, %v3926_v53 }
 0xa33   : > { %8599 = vmatpush3.bf16.msra.mxu1 %v8598_v17  ;;  %v9156_v41 = vpop.eup %9155  ;;  %v3908_v6 = vmul.f32 %v9154_v21, %v13960_v26  ;;  %8262 = vmatprep.mubr.msk.f32.mxu0 %vm595_vm0, %v12448_v36 }
 0xa34   : > { %v8600_v12 = vpack.c.bf16 %v8811_v32, %v8810_v11  ;;  %v3906_v63 = vmul.f32 %v9156_v41, %v13961_v23  ;;  %8263 = vmatmul.mubr.msk.f32.gmra.mrb[76].mxu0 %vm595_vm0, %v12457_v35 }
 0xa35   : > { %v8814_v0 = vpop.permute.xlu1 %8813  ;;  %v3928_v18 = vmul.f32 %v12216_v9, %v3908_v6 }
 0xa36   : > { %v8816_v25 = vunpack.i.h.bf16 %v8814_v0  ;;  %v8815_v4 = vunpack.i.l.bf16 %v8814_v0  ;;  %8601 = vmatprep.subr.bf16.mxu1 %v8600_v12  ;;  %v3927_v29 = vmul.f32 %v12216_v9, %v3906_v63 }
 0xa37   : > { %v12467_v14 = vadd.f32 %v12222_v49, %v3928_v18 }
 0xa38   : > { %v8602_v59 = vpack.c.bf16 %v8816_v25, %v8815_v4  ;;  %v12464_v13 = vadd.f32 %v12222_v49, %v3927_v29 }
 0xa39   : > { %v8819_v42 = vpop.permute.xlu1 %8818 }
 0xa3a   : > { %v8821_v19 = vunpack.i.h.bf16 %v8819_v42  ;;  %v8820_v37 = vunpack.i.l.bf16 %v8819_v42  ;;  %8603 = vmatpush3.bf16.msra.mxu1 %v8602_v59  ;;  %8265 = vmatprep.mubr.msk.f32.mxu0 %vm595_vm0, %v12464_v13 }
 0xa3b   : > { %8266 = vmatmul.mubr.msk.f32.gmra.mrb[78].mxu0 %vm595_vm0, %v12467_v14 }
 0xa3c   : > { %v8604_v9 = vpack.c.bf16 %v8821_v19, %v8820_v37  ;;  %v9463_v37 = vld [vmem:[%s13685_s2] sm:$0xff] }
 0xa3d   : > { %v8824_v27 = vpop.permute.xlu1 %8823 }
 0xa3e   : > { %v8826_v1 = vunpack.i.h.bf16 %v8824_v27  ;;  %v8825_v38 = vunpack.i.l.bf16 %v8824_v27  ;;  %8605 = vmatprep.subr.bf16.mxu1 %v8604_v9  ;;  %v9464_v27 = vld [vmem:[%s13685_s2 + $0x8] sm:$0xff] }
 0xa40   : > { %v8606_v30 = vpack.c.bf16 %v8826_v1, %v8825_v38 }
 0xa41   : > { %v8829_v50 = vpop.permute.xlu1 %8828 }
 0xa42   : > { %v8831_v54 = vunpack.i.h.bf16 %v8829_v50  ;;  %v8830_v40 = vunpack.i.l.bf16 %v8829_v50  ;;  %8607 = vmatpush3.bf16.msra.mxu1 %v8606_v30 }
 0xa44   : > { %v8608_v49 = vpack.c.bf16 %v8831_v54, %v8830_v40  ;;  %v9465_v40 = vld [vmem:[%s13685_s2 + $0x10] sm:$0xff] }
 0xa46   : > { %8609 = vmatprep.subr.bf16.mxu1 %v8608_v49 }
 0xab5   : > { %v8246_v2 = vpop.f32.mrb[64].mxu0 }
 0xab6   : > { %v4072_v39 = vpop.f32.mrb[65].mxu0  ;;  %v4078_v22 = vadd.f32 %v8246_v2, %v7446_v24 }
 0xab7   : > { %v4073_v7 = vadd.f32 %v7446_v24, %v4072_v39 }
 0xab9   : > { %7904 = vmatprep.mubr.msk.f32.mxu0 %vm595_vm0, %v4073_v7 }
 0xaba   : > { %7905 = vmatmul.mubr.msk.f32.vlgmr.msra.gmra.mrb[80].mxu0 %vm595_vm0, %v4073_v7 }
 0xabb   : > { %7906 = vmatprep.mubr.msk.f32.mxu0 %vm595_vm0, %v4078_v22 }
 0xabe   : > { %7907 = vmatmul.mubr.msk.f32.gmra.mrb[82].mxu0 %vm595_vm0, %v4078_v22 }
 0xac3   : > { %v8249_v60 = vpop.f32.mrb[66].mxu0 }
 0xac4   : > { %v4082_v28 = vpop.f32.mrb[67].mxu0  ;;  %v4088_v47 = vadd.f32 %v8249_v60, %v7446_v24  ;;  %v9467_v60 = vld [vmem:[%s13685_s2 + $0x20] sm:$0xff] }
 0xac5   : > { %v4083_v15 = vadd.f32 %v7446_v24, %v4082_v28 }
 0xac7   : > { %7908 = vmatprep.mubr.msk.f32.mxu0 %vm595_vm0, %v4083_v15 }
 0xac8   : > { %7909 = vmatmul.mubr.msk.f32.gmra.mrb[84].mxu0 %vm595_vm0, %v4083_v15 }
 0xac9   : > { %7910 = vmatprep.mubr.msk.f32.mxu0 %vm595_vm0, %v4088_v47 }
 0xacc   : > { %7911 = vmatmul.mubr.msk.f32.gmra.mrb[86].mxu0 %vm595_vm0, %v4088_v47 }
 0xad1   : > { %v8252_v10 = vpop.f32.mrb[68].mxu0 }
 0xad2   : > { %v4092_v52 = vpop.f32.mrb[69].mxu0  ;;  %v4098_v56 = vadd.f32 %v8252_v10, %v7446_v24 }
 0xad3   : > { %v4093_v58 = vadd.f32 %v7446_v24, %v4092_v52 }
 0xad5   : > { %7912 = vmatprep.mubr.msk.f32.mxu0 %vm595_vm0, %v4093_v58 }
 0xad6   : > { %7913 = vmatmul.mubr.msk.f32.gmra.mrb[88].mxu0 %vm595_vm0, %v4093_v58  ;;  %v9468_v58 = vld [vmem:[%s13685_s2 + $0x28] sm:$0xff] }
 0xad7   : > { %7914 = vmatprep.mubr.msk.f32.mxu0 %vm595_vm0, %v4098_v56 }
 0xada   : > { %7915 = vmatmul.mubr.msk.f32.gmra.mrb[90].mxu0 %vm595_vm0, %v4098_v56 }
 0xae5   : > { %v8255_v51 = vpop.f32.mrb[70].mxu0 }
 0xae6   : > { %v4102_v3 = vpop.f32.mrb[71].mxu0  ;;  %v4108_v17 = vadd.f32 %v8255_v51, %v7446_v24 }
 0xae7   : > { %v4103_v34 = vadd.f32 %v7446_v24, %v4102_v3  ;;  %v9469_v3 = vld [vmem:[%s13685_s2 + $0x38] sm:$0xff] }
 0xae9   : > { %7916 = vmatprep.mubr.msk.f32.mxu0 %vm595_vm0, %v4103_v34 }
 0xaea   : > { %7917 = vmatmul.mubr.msk.f32.gmra.mrb[92].mxu0 %vm595_vm0, %v4103_v34 }
 0xaeb   : > { %7918 = vmatprep.mubr.msk.f32.mxu0 %vm595_vm0, %v4108_v17 }
 0xaee   : > { %7919 = vmatmul.mubr.msk.f32.gmra.mrb[94].mxu0 %vm595_vm0, %v4108_v17  ;;  %v9470_v17 = vld [vmem:[%s13685_s2 + $0x30] sm:$0xff] }
 0xaf2   : > { %v8258_v8 = vpop.f32.mrb[72].mxu0 }
 0xaf3   : > { %v4112_v44 = vpop.f32.mrb[73].mxu0  ;;  %v4118_v21 = vadd.f32 %v8258_v8, %v7446_v24 }
 0xaf4   : > { %v4113_v53 = vadd.f32 %v7446_v24, %v4112_v44 }
 0xaf6   : > { %7920 = vmatprep.mubr.msk.f32.mxu0 %vm595_vm0, %v4113_v53 }
 0xaf7   : > { %7921 = vmatmul.mubr.msk.f32.gmra.mrb[96].mxu0 %vm595_vm0, %v4113_v53 }
 0xaf8   : > { %7922 = vmatprep.mubr.msk.f32.mxu0 %vm595_vm0, %v4118_v21 }
 0xafb   : > { %7923 = vmatmul.mubr.msk.f32.gmra.mrb[98].mxu0 %vm595_vm0, %v4118_v21 }
 0xb03   : > { %v8261_v32 = vpop.f32.mrb[74].mxu0 }
 0xb04   : > { %v4122_v11 = vpop.f32.mrb[75].mxu0  ;;  %v4128_v26 = vadd.f32 %v8261_v32, %v7446_v24  ;;  %v9471_v32 = vld [vmem:[%s13685_s2 + $0x40] sm:$0xff] }
 0xb05   : > { %v4123_v41 = vadd.f32 %v7446_v24, %v4122_v11 }
 0xb07   : > { %7924 = vmatprep.mubr.msk.f32.mxu0 %vm595_vm0, %v4123_v41  ;;  %v8264_v6 = vpop.f32.mrb[76].mxu0 }
 0xb08   : > { %7925 = vmatmul.mubr.msk.f32.gmra.mrb[100].mxu0 %vm595_vm0, %v4123_v41  ;;  %v4132_v12 = vpop.f32.mrb[77].mxu0  ;;  %v4138_v18 = vadd.f32 %v8264_v6, %v7446_v24 }
 0xb09   : > { %7926 = vmatprep.mubr.msk.f32.mxu0 %vm595_vm0, %v4128_v26  ;;  %v4133_v23 = vadd.f32 %v7446_v24, %v4132_v12  ;;  %v9472_v12 = vld [vmem:[%s13685_s2 + $0x48] sm:$0xff] }
 0xb0c   : > { %7927 = vmatmul.mubr.msk.f32.gmra.mrb[102].mxu0 %vm595_vm0, %v4128_v26 }
 0xb0d   : > { %7928 = vmatprep.mubr.msk.f32.mxu0 %vm595_vm0, %v4133_v23 }
 0xb0e   : > { %v8267_v63 = vpop.f32.mrb[78].mxu0 }
 0xb0f   : > { %v4142_v0 = vpop.f32.mrb[79].mxu0  ;;  %v4148_v4 = vadd.f32 %v8267_v63, %v7446_v24 }
 0xb10   : > { %7929 = vmatmul.mubr.msk.f32.gmra.mrb[104].mxu0 %vm595_vm0, %v4133_v23  ;;  %v4143_v25 = vadd.f32 %v7446_v24, %v4142_v0  ;;  %v9466_v24 = vld [vmem:[%s13685_s2 + $0x18] sm:$0xff]  ;;  %v9473_v0 = vld [vmem:[%s13685_s2 + $0x50] sm:$0xff] }
 0xb11   : > { %7930 = vmatprep.mubr.msk.f32.mxu0 %vm595_vm0, %v4138_v18 }
 0xb14   : > { %7931 = vmatmul.mubr.msk.f32.gmra.mrb[106].mxu0 %vm595_vm0, %v4138_v18 }
 0xb15   : > { %7932 = vmatprep.mubr.msk.f32.mxu0 %vm595_vm0, %v4143_v25 }
 0xb18   : > { %7933 = vmatmul.mubr.msk.f32.gmra.mrb[108].mxu0 %vm595_vm0, %v4143_v25 }
 0xb19   : > { %7934 = vmatprep.mubr.msk.f32.mxu0 %vm595_vm0, %v4148_v4 }
 0xb1c   : > { %7935 = vmatmul.mubr.msk.f32.gmra.mrb[110].mxu0 %vm595_vm0, %v4148_v4  ;;  %v13962_v4 = vld [vmem:[#allocation7_spill] sm:$0xff] }
 0xb8d   : > { %v4627_v29 = vpop.f32.mrb[80].mxu0 }
 0xb8e   : > { %v4722_v59 = vmul.f32 0.25, %v4627_v29  ;;  %v4629_v42 = vpop.f32.mrb[81].mxu0  ;;  %v13963_v29 = vpack.i.bf16 %v12174_v20, %v13962_v4 }
 0xb8f   : > { %v4723_v19 = vmul.f32 0.25, %v4629_v42 }
 0xb90   : > { %v12511_v9 = vadd.f32 %v9463_v37, %v4722_v59  ;;  %v9474_v59 = vld [vmem:[%s13685_s2 + $0x58] sm:$0xff] }
 0xb91   : > { %v12516_v1 = vadd.f32 %v9464_v27, %v4723_v19  ;;  %v4633_v38 = vpop.f32.mrb[82].mxu0 }
 0xb92   : > { %v4724_v30 = vmul.f32 0.25, %v4633_v38  ;;  %4786 = vmax.xlane.f32.xlu0 %v12511_v9  ;;  %v4635_v50 = vpop.f32.mrb[83].mxu0  ;;  %v9475_v38 = vld [vmem:[%s13685_s2 + $0x60] sm:$0xff] }
 0xb93   : > { %v4725_v54 = vmul.f32 0.25, %v4635_v50  ;;  %4946 = vmax.xlane.f32.xlu1 %v12516_v1 }
 0xb94   : > { %v12523_v49 = vadd.f32 %v9465_v40, %v4724_v30  ;;  %v9476_v40 = vld [vmem:[%s13685_s2 + $0x68] sm:$0xff] }
 0xb95   : > { %v12528_v2 = vadd.f32 %v9466_v24, %v4725_v54 }
 0xb97   : > { %4788 = vmax.xlane.f32.xlu1 %v12523_v49  ;;  %4948 = vmax.xlane.f32.xlu0 %v12528_v2 }
 0xb9b   : > { %v4639_v39 = vpop.f32.mrb[84].mxu0 }
 0xb9c   : > { %v4726_v7 = vmul.f32 0.25, %v4639_v39  ;;  %v4641_v22 = vpop.f32.mrb[85].mxu0 }
 0xb9d   : > { %v4727_v15 = vmul.f32 0.25, %v4641_v22 }
 0xb9e   : > { %v12535_v28 = vadd.f32 %v9467_v60, %v4726_v7  ;;  %v9477_v7 = vld [vmem:[%s13685_s2 + $0x78] sm:$0xff] }
 0xb9f   : > { %v4645_v47 = vpop.f32.mrb[86].mxu0  ;;  %v12541_v56 = vadd.f32 %v9468_v58, %v4727_v15 }
 0xba0   : > { %4790 = vmax.xlane.f32.xlu0 %v12535_v28  ;;  %v4647_v10 = vpop.f32.mrb[87].mxu0  ;;  %v4728_v51 = vmul.f32 0.25, %v4645_v47 }
 0xba1   : > { %v4729_v52 = vmul.f32 0.25, %v4647_v10  ;;  %v9478_v10 = vld [vmem:[%s13685_s2 + $0x80] sm:$0xff] }
 0xba2   : > { %v12553_v8 = vadd.f32 %v9470_v17, %v4728_v51  ;;  %v9479_v17 = vld [vmem:[%s13685_s2 + $0x88] sm:$0xff] }
 0xba3   : > { %v12546_v34 = vadd.f32 %v9469_v3, %v4729_v52 }
 0xba4   : > { %4950 = vmax.xlane.f32.xlu0 %v12541_v56 }
 0xba5   : > { %4952 = vmax.xlane.f32.xlu1 %v12546_v34 }
 0xba8   : > { %4792 = vmax.xlane.f32.xlu0 %v12553_v8 }
 0xba9   : > { %v4651_v44 = vpop.f32.mrb[88].mxu0 }
 0xbaa   : > { %v4730_v53 = vmul.f32 0.25, %v4651_v44  ;;  %v4653_v21 = vpop.f32.mrb[89].mxu0 }
 0xbab   : > { %v4731_v41 = vmul.f32 0.25, %v4653_v21 }
 0xbac   : > { %v12559_v11 = vadd.f32 %v9471_v32, %v4730_v53  ;;  %v9480_v32 = vld [vmem:[%s13685_s2 + $0x90] sm:$0xff] }
 0xbad   : > { %v4657_v26 = vpop.f32.mrb[90].mxu0  ;;  %v12565_v23 = vadd.f32 %v9472_v12, %v4731_v41 }
 0xbae   : > { %4794 = vmax.xlane.f32.xlu0 %v12559_v11  ;;  %v4659_v6 = vpop.f32.mrb[91].mxu0  ;;  %v4732_v63 = vmul.f32 0.25, %v4657_v26 }
 0xbaf   : > { %v4733_v25 = vmul.f32 0.25, %v4659_v6  ;;  %v9481_v6 = vld [vmem:[%s13685_s2 + $0x70] sm:$0xff] }
 0xbb0   : > { %v12571_v18 = vadd.f32 %v9473_v0, %v4732_v63  ;;  %v9482_v63 = vld [vmem:[%s13685_s2 + $0x98] sm:$0xff] }
 0xbb1   : > { %v12581_v42 = vadd.f32 %v9474_v59, %v4733_v25  ;;  %v9483_v59 = vld [vmem:[%s13685_s2 + $0xa0] sm:$0xff] }
 0xbb2   : > { %4954 = vmax.xlane.f32.xlu0 %v12565_v23 }
 0xbb6   : > { %8833 = vrot.lane.b32.xlu1 %v13963_v29, %s9576_s14  ;;  %4796 = vmax.xlane.f32.xlu0 %v12571_v18 }
 0xbba   : > { %4956 = vmax.xlane.f32.xlu0 %v12581_v42 }
 0xbbd   : > { %v4663_v19 = vpop.f32.mrb[92].mxu0 }
 0xbbe   : > { %v4734_v37 = vmul.f32 0.25, %v4663_v19  ;;  %v4665_v27 = vpop.f32.mrb[93].mxu0 }
 0xbbf   : > { %v4735_v20 = vmul.f32 0.25, %v4665_v27 }
 0xbc0   : > { %v12587_v30 = vadd.f32 %v9475_v38, %v4734_v37 }
 0xbc1   : > { %v4669_v50 = vpop.f32.mrb[94].mxu0  ;;  %v12593_v24 = vadd.f32 %v9476_v40, %v4735_v20  ;;  %v9484_v20 = vld [vmem:[%s13685_s2 + $0xa8] sm:$0xff] }
 0xbc2   : > { %4798 = vmax.xlane.f32.xlu0 %v12587_v30  ;;  %v4671_v54 = vpop.f32.mrb[95].mxu0  ;;  %v4736_v21 = vmul.f32 0.25, %v4669_v50 }
 0xbc3   : > { %v4737_v39 = vmul.f32 0.25, %v4671_v54 }
 0xbc4   : > { %v12622_v12 = vadd.f32 %v9481_v6, %v4736_v21 }
 0xbc5   : > { %v12599_v22 = vadd.f32 %v9477_v7, %v4737_v39 }
 0xbc6   : > { %4958 = vmax.xlane.f32.xlu0 %v12593_v24 }
 0xbca   : > { %4960 = vmax.xlane.f32.xlu0 %v12599_v22  ;;  %v4675_v60 = vpop.f32.mrb[96].mxu0 }
 0xbcb   : > { %v4738_v15 = vmul.f32 0.25, %v4675_v60  ;;  %v4677_v47 = vpop.f32.mrb[97].mxu0  ;;  %v9485_v60 = vld [vmem:[%s13685_s2 + $0xb0] sm:$0xff] }
 0xbcc   : > { %v4739_v58 = vmul.f32 0.25, %v4677_v47 }
 0xbcd   : > { %v12605_v52 = vadd.f32 %v9478_v10, %v4738_v15  ;;  %v9486_v10 = vld [vmem:[%s13685_s2 + $0xc0] sm:$0xff] }
 0xbce   : > { %v4681_v51 = vpop.f32.mrb[98].mxu0  ;;  %v12611_v44 = vadd.f32 %v9479_v17, %v4739_v58 }
 0xbcf   : > { %v4683_v3 = vpop.f32.mrb[99].mxu0  ;;  %4802 = vmax.xlane.f32.xlu0 %v12605_v52  ;;  %v4740_v53 = vmul.f32 0.25, %v4681_v51 }
 0xbd0   : > { %v4741_v26 = vmul.f32 0.25, %v4683_v3 }
 0xbd1   : > { %v12617_v41 = vadd.f32 %v9480_v32, %v4740_v53  ;;  %v9487_v53 = vld [vmem:[%s13685_s2 + $0xb8] sm:$0xff] }
 0xbd2   : > { %v12629_v0 = vadd.f32 %v9482_v63, %v4741_v26  ;;  %v9488_v26 = vld [vmem:[%s13685_s2 + $0xd0] sm:$0xff] }
 0xbd3   : > { %4962 = vmax.xlane.f32.xlu0 %v12611_v44 }
 0xbd7   : > { %4804 = vmax.xlane.f32.xlu0 %v12617_v41 }
 0xbda   : > { %4800 = vmax.xlane.f32.xlu1 %v12622_v12 }
 0xbdb   : > { %v4687_v25 = vpop.f32.mrb[100].mxu0  ;;  %4964 = vmax.xlane.f32.xlu0 %v12629_v0 }
 0xbdc   : > { %v4742_v4 = vmul.f32 0.25, %v4687_v25  ;;  %v4689_v29 = vpop.f32.mrb[101].mxu0 }
 0xbdd   : > { %v4743_v37 = vmul.f32 0.25, %v4689_v29  ;;  %v9489_v29 = vld [vmem:[%s13685_s2 + $0xc8] sm:$0xff] }
 0xbde   : > { %v12635_v19 = vadd.f32 %v9483_v59, %v4742_v4 }
 0xbdf   : > { %v4693_v27 = vpop.f32.mrb[102].mxu0  ;;  %v12641_v50 = vadd.f32 %v9484_v20, %v4743_v37 }
 0xbe0   : > { %v4695_v38 = vpop.f32.mrb[103].mxu0  ;;  %4806 = vmax.xlane.f32.xlu0 %v12635_v19  ;;  %v4744_v54 = vmul.f32 0.25, %v4693_v27  ;;  %v9490_v27 = vld [vmem:[%s13685_s2 + $0xe0] sm:$0xff] }
 0xbe1   : > { %v4745_v47 = vmul.f32 0.25, %v4695_v38 }
 0xbe2   : > { %v12647_v15 = vadd.f32 %v9485_v60, %v4744_v54 }
 0xbe3   : > { %v4699_v40 = vpop.f32.mrb[104].mxu0  ;;  %v12659_v21 = vadd.f32 %v9487_v53, %v4745_v47  ;;  %v9492_v47 = vld [vmem:[%s13685_s2 + $0xf0] sm:$0xff]  ;;  %v9494_v53 = vld [vmem:[%s13685_s2 + $0xf8] sm:$0xff] }
 0xbe4   : > { %v4746_v39 = vmul.f32 0.25, %v4699_v40  ;;  %v4701_v7 = vpop.f32.mrb[105].mxu0  ;;  %4966 = vmax.xlane.f32.xlu0 %v12641_v50 }
 0xbe5   : > { %v4747_v32 = vmul.f32 0.25, %v4701_v7 }
 0xbe6   : > { %v12652_v58 = vadd.f32 %v9486_v10, %v4746_v39  ;;  %v9491_v39 = vld [vmem:[%s13685_s2 + $0xd8] sm:$0xff] }
 0xbe7   : > { %v4705_v51 = vpop.f32.mrb[106].mxu0  ;;  %v12671_v59 = vadd.f32 %v9489_v29, %v4747_v32 }
 0xbe8   : > { %v4748_v3 = vmul.f32 0.25, %v4705_v51  ;;  %4810 = vmax.xlane.f32.xlu1 %v12652_v58  ;;  %v4707_v17 = vpop.f32.mrb[107].mxu0  ;;  %4808 = vmax.xlane.f32.xlu0 %v12647_v15  ;;  %v9493_v51 = vld [vmem:[%s13685_s2 + $0xe8] sm:$0xff] }
 0xbe9   : > { %v4749_v37 = vmul.f32 0.25, %v4707_v17 }
 0xbea   : > { %v12664_v6 = vadd.f32 %v9488_v26, %v4748_v3 }
 0xbeb   : > { %v4711_v63 = vpop.f32.mrb[108].mxu0  ;;  %v12683_v7 = vadd.f32 %v9491_v39, %v4749_v37 }
 0xbec   : > { %v4750_v25 = vmul.f32 0.25, %v4711_v63  ;;  %4812 = vmax.xlane.f32.xlu1 %v12664_v6  ;;  %v4713_v4 = vpop.f32.mrb[109].mxu0  ;;  %4968 = vmax.xlane.f32.xlu0 %v12659_v21 }
 0xbed   : > { %v4751_v60 = vmul.f32 0.25, %v4713_v4 }
 0xbee   : > { %v12676_v38 = vadd.f32 %v9490_v27, %v4750_v25 }
 0xbef   : > { %v4717_v20 = vpop.f32.mrb[110].mxu0  ;;  %v12695_v3 = vadd.f32 %v9493_v51, %v4751_v60 }
 0xbf0   : > { %v4752_v54 = vmul.f32 0.25, %v4717_v20  ;;  %4814 = vmax.xlane.f32.xlu1 %v12676_v38  ;;  %v4719_v40 = vpop.f32.mrb[111].mxu0  ;;  %4970 = vmax.xlane.f32.xlu0 %v12671_v59 }
 0xbf1   : > { %v4753_v17 = vmul.f32 0.25, %v4719_v40 }
 0xbf2   : > { %v12688_v10 = vadd.f32 %v9492_v47, %v4752_v54 }
 0xbf3   : > { %v12701_v32 = vadd.f32 %v9494_v53, %v4753_v17 }
 0xbf4   : > { %4816 = vmax.xlane.f32.xlu1 %v12688_v10  ;;  %4972 = vmax.xlane.f32.xlu0 %v12683_v7 }
 0xbf8   : > { %4974 = vmax.xlane.f32.xlu0 %v12695_v3 }
 0xbfc   : > { %4976 = vmax.xlane.f32.xlu0 %v12701_v32 }
 0xc1f   : > { %v4787_v26 = vpop.xlane.xlu0 %4786 }
 0xc20   : > { %v4818_v63 = vsub.f32 %v12511_v9, %v4787_v26  ;;  %v4947_v25 = vpop.xlane.xlu1 %4946 }
 0xc21   : > { %v4978_v4 = vsub.f32 %v12516_v1, %v4947_v25 }
 0xc22   : > { %v4834_v29 = vmul.f32 1.442695, %v4818_v63 }
 0xc23   : > { %v4994_v37 = vmul.f32 1.442695, %v4978_v4 }
 0xc24   : > { %9157 = vpow2.f32 %v4834_v29  ;;  %v4789_v27 = vpop.xlane.xlu1 %4788  ;;  %v4949_v20 = vpop.xlane.xlu0 %4948 }
 0xc25   : > { %9159 = vpow2.f32 %v4994_v37  ;;  %v4819_v54 = vsub.f32 %v12523_v49, %v4789_v27  ;;  %v4979_v40 = vsub.f32 %v12528_v2, %v4949_v20 }
 0xc27   : > { %v4836_v39 = vmul.f32 1.442695, %v4819_v54  ;;  %v4996_v60 = vmul.f32 1.442695, %v4979_v40 }
 0xc29   : > { %9161 = vpow2.f32 %v4836_v39 }
 0xc2a   : > { %9163 = vpow2.f32 %v4996_v60 }
 0xc2d   : > { %v4791_v47 = vpop.xlane.xlu0 %4790 }
 0xc2e   : > { %v4820_v9 = vsub.f32 %v12535_v28, %v4791_v47  ;;  %v9158_v51 = vpop.eup %9157 }
 0xc2f   : > { %v9160_v17 = vpop.eup %9159  ;;  %4866 = vadd.xlane.f32.xlu0 %v9158_v51 }
 0xc30   : > { %v4838_v1 = vmul.f32 1.442695, %v4820_v9  ;;  %5298 = vmatprep.mubr.f32.mxu1 %v9160_v17  ;;  %5026 = vadd.xlane.f32.xlu1 %v9160_v17 }
 0xc31   : > { %v4951_v53 = vpop.xlane.xlu0 %4950 }
 0xc32   : > { %9165 = vpow2.f32 %v4838_v1  ;;  %v4980_v26 = vsub.f32 %v12541_v56, %v4951_v53  ;;  %v4953_v49 = vpop.xlane.xlu1 %4952 }
 0xc33   : > { %v4981_v2 = vsub.f32 %v12546_v34, %v4953_v49  ;;  %v9162_v63 = vpop.eup %9161 }
 0xc34   : > { %v4998_v25 = vmul.f32 1.442695, %v4980_v26  ;;  %v9164_v4 = vpop.eup %9163  ;;  %4868 = vadd.xlane.f32.xlu0 %v9162_v63 }
 0xc35   : > { %v5000_v29 = vmul.f32 1.442695, %v4981_v2  ;;  %v4793_v37 = vpop.xlane.xlu0 %4792  ;;  %5028 = vadd.xlane.f32.xlu1 %v9164_v4 }
 0xc36   : > { %9167 = vpow2.f32 %v4998_v25  ;;  %v4821_v28 = vsub.f32 %v12553_v8, %v4793_v37  ;;  %v8834_v27 = vpop.permute.xlu1 %8833 }
 0xc37   : > { %v8836_v20 = vunpack.i.h.bf16 %v8834_v27  ;;  %v8835_v54 = vunpack.i.l.bf16 %v8834_v27  ;;  %9169 = vpow2.f32 %v5000_v29 }
 0xc38   : > { %v4840_v40 = vmul.f32 1.442695, %v4821_v28 }
 0xc39   : > { %v8610_v39 = vpack.c.bf16 %v8836_v20, %v8835_v54 }
 0xc3a   : > { %9171 = vpow2.f32 %v4840_v40 }
 0xc3b   : > { %8611 = vmatpush3.bf16.msra.mxu1 %v8610_v39  ;;  %v4795_v34 = vpop.xlane.xlu0 %4794 }
 0xc3c   : > { %v9166_v56 = vpop.eup %9165  ;;  %v4822_v60 = vsub.f32 %v12559_v11, %v4795_v34 }
 0xc3d   : > { %4870 = vadd.xlane.f32.xlu0 %v9166_v56 }
 0xc3e   : > { %5299 = vmatmul.mubr.f32.vlgmr.msra.gmra.mrb[96].mxu1 %v9158_v51  ;;  %v4842_v47 = vmul.f32 1.442695, %v4822_v60 }
 0xc3f   : > { %5303 = vmatprep.mubr.f32.mxu1 %v9164_v4  ;;  %v4955_v17 = vpop.xlane.xlu0 %4954 }
 0xc40   : > { %v9168_v9 = vpop.eup %9167  ;;  %9173 = vpow2.f32 %v4842_v47  ;;  %v4982_v8 = vsub.f32 %v12565_v23, %v4955_v17 }
 0xc41   : > { %5030 = vadd.xlane.f32.xlu1 %v9168_v9  ;;  %v9170_v1 = vpop.eup %9169 }
 0xc42   : > { %5304 = vmatmul.mubr.f32.gmra.mrb[98].mxu1 %v9162_v63  ;;  %v5002_v53 = vmul.f32 1.442695, %v4982_v8 }
 0xc43   : > { %5308 = vmatprep.mubr.f32.mxu1 %v9168_v9  ;;  %v4797_v49 = vpop.xlane.xlu0 %4796 }
 0xc44   : > { %v9172_v26 = vpop.eup %9171  ;;  %9175 = vpow2.f32 %v5002_v53  ;;  %v4823_v11 = vsub.f32 %v12571_v18, %v4797_v49 }
 0xc45   : > { %5032 = vadd.xlane.f32.xlu1 %v9170_v1  ;;  %4872 = vadd.xlane.f32.xlu0 %v9172_v26 }
 0xc46   : > { %5309 = vmatmul.mubr.f32.gmra.mrb[100].mxu1 %v9166_v56  ;;  %v4844_v51 = vmul.f32 1.442695, %v4823_v11 }
 0xc47   : > { %5313 = vmatprep.mubr.f32.mxu1 %v9170_v1  ;;  %v4957_v2 = vpop.xlane.xlu0 %4956 }
 0xc48   : > { %9177 = vpow2.f32 %v4844_v51  ;;  %v4983_v25 = vsub.f32 %v12581_v42, %v4957_v2 }
 0xc4a   : > { %5314 = vmatmul.mubr.f32.gmra.mrb[102].mxu1 %v9172_v26  ;;  %v9174_v23 = vpop.eup %9173  ;;  %v5004_v63 = vmul.f32 1.442695, %v4983_v25 }
 0xc4b   : > { %4874 = vadd.xlane.f32.xlu0 %v9174_v23 }
 0xc4c   : > { %9179 = vpow2.f32 %v5004_v63 }
 0xc4e   : > { %v9176_v4 = vpop.eup %9175 }
 0xc4f   : > { %5034 = vadd.xlane.f32.xlu1 %v9176_v4  ;;  %v4799_v29 = vpop.xlane.xlu0 %4798  ;;  %5318 = vmatprep.mubr.f32.mxu1 %v9176_v4 }
 0xc50   : > { %v4824_v37 = vsub.f32 %v12587_v30, %v4799_v29  ;;  %5319 = vmatmul.mubr.f32.gmra.mrb[104].mxu1 %v9174_v23 }
 0xc52   : > { %v9178_v18 = vpop.eup %9177  ;;  %v4846_v28 = vmul.f32 1.442695, %v4824_v37 }
 0xc53   : > { %4876 = vadd.xlane.f32.xlu0 %v9178_v18  ;;  %v4959_v27 = vpop.xlane.xlu0 %4958 }
 0xc54   : > { %9181 = vpow2.f32 %v4846_v28  ;;  %v4984_v20 = vsub.f32 %v12593_v24, %v4959_v27 }
 0xc56   : > { %v9180_v42 = vpop.eup %9179  ;;  %v5006_v54 = vmul.f32 1.442695, %v4984_v20 }
 0xc57   : > { %5036 = vadd.xlane.f32.xlu1 %v9180_v42  ;;  %v4961_v40 = vpop.xlane.xlu0 %4960  ;;  %5323 = vmatprep.mubr.f32.mxu1 %v9180_v42 }
 0xc58   : > { %9183 = vpow2.f32 %v5006_v54  ;;  %v4985_v39 = vsub.f32 %v12599_v22, %v4961_v40  ;;  %5324 = vmatmul.mubr.f32.gmra.mrb[106].mxu1 %v9178_v18  ;;  %v5396_v18 = vld [vmem:[%s13687_s4 + $0xe8] sm:$0xff] }
 0xc5a   : > { %v5008_v56 = vmul.f32 1.442695, %v4985_v39 }
 0xc5c   : > { %9185 = vpow2.f32 %v5008_v56  ;;  %v4803_v30 = vpop.xlane.xlu0 %4802 }
 0xc5d   : > { %v4826_v22 = vsub.f32 %v12605_v52, %v4803_v30 }
 0xc5e   : > { %v9182_v34 = vpop.eup %9181 }
 0xc5f   : > { %4878 = vadd.xlane.f32.xlu0 %v9182_v34  ;;  %v4850_v51 = vmul.f32 1.442695, %v4826_v22 }
 0xc60   : > { %v4963_v60 = vpop.xlane.xlu0 %4962 }
 0xc61   : > { %v4986_v9 = vsub.f32 %v12611_v44, %v4963_v60 }
 0xc62   : > { %v9184_v47 = vpop.eup %9183 }
 0xc63   : > { %5038 = vadd.xlane.f32.xlu1 %v9184_v47  ;;  %5328 = vmatprep.mubr.f32.mxu1 %v9184_v47  ;;  %v5010_v24 = vmul.f32 1.442695, %v4986_v9 }
 0xc64   : > { %5329 = vmatmul.mubr.f32.gmra.mrb[108].mxu1 %v9182_v34  ;;  %v4805_v17 = vpop.xlane.xlu0 %4804 }
 0xc65   : > { %9187 = vpow2.f32 %v5010_v24  ;;  %v4827_v44 = vsub.f32 %v12617_v41, %v4805_v17  ;;  %v5395_v41 = vld [vmem:[%s13687_s4 + $0xe0] sm:$0xff] }
 0xc66   : > { %v9186_v8 = vpop.eup %9185 }
 0xc67   : > { %v4801_v1 = vpop.xlane.xlu1 %4800  ;;  %5040 = vadd.xlane.f32.xlu1 %v9186_v8  ;;  %5333 = vmatprep.mubr.f32.mxu1 %v9186_v8  ;;  %v4852_v23 = vmul.f32 1.442695, %v4827_v44 }
 0xc68   : > { %v4825_v53 = vsub.f32 %v12622_v12, %v4801_v1  ;;  %v4965_v49 = vpop.xlane.xlu0 %4964 }
 0xc69   : > { %v4987_v11 = vsub.f32 %v12629_v0, %v4965_v49 }
 0xc6a   : > { %v4848_v26 = vmul.f32 1.442695, %v4825_v53 }
 0xc6b   : > { %v5012_v2 = vmul.f32 1.442695, %v4987_v11 }
 0xc6c   : > { %9189 = vpow2.f32 %v4848_v26 }
 0xc6d   : > { %9191 = vpow2.f32 %v5012_v2  ;;  %v4807_v25 = vpop.xlane.xlu0 %4806 }
 0xc6e   : > { %9193 = vpow2.f32 %v4850_v51  ;;  %v4828_v52 = vsub.f32 %v12635_v19, %v4807_v25  ;;  %v8612_v19 = vpack.c.bf16 %v5396_v18, %v5395_v41  ;;  %v5397_v41 = vld [vmem:[%s13687_s4 + $0xf0] sm:$0xff]  ;;  %v5398_v18 = vld [vmem:[%s13687_s4 + $0xf8] sm:$0xff] }
 0xc6f   : > { %v9188_v63 = vpop.eup %9187  ;;  %9195 = vpow2.f32 %v4852_v23 }
 0xc70   : > { %5042 = vadd.xlane.f32.xlu1 %v9188_v63  ;;  %v4854_v29 = vmul.f32 1.442695, %v4828_v52  ;;  %8613 = vmatprep.subr.bf16.mxu1 %v8612_v19 }
 0xc71   : > { %v4967_v12 = vpop.xlane.xlu0 %4966  ;;  %8615 = vmatpush3.bf16.msra.mxu1 %v8612_v19 }
 0xc72   : > { %v4988_v4 = vsub.f32 %v12641_v50, %v4967_v12 }
 0xc74   : > { %v5014_v0 = vmul.f32 1.442695, %v4988_v4 }
 0xc75   : > { %v4811_v28 = vpop.xlane.xlu1 %4810  ;;  %v4809_v27 = vpop.xlane.xlu0 %4808 }
 0xc76   : > { %v9190_v37 = vpop.eup %9189  ;;  %9197 = vpow2.f32 %v5014_v0  ;;  %v4829_v20 = vsub.f32 %v12647_v15, %v4809_v27  ;;  %v4830_v54 = vsub.f32 %v12652_v58, %v4811_v28  ;;  %v8616_v28 = vpack.c.bf16 %v5398_v18, %v5397_v41 }
 0xc77   : > { %4880 = vadd.xlane.f32.xlu0 %v9190_v37  ;;  %5334 = vmatmul.mubr.f32.gmra.mrb[110].mxu1 %v9190_v37  ;;  %v9192_v50 = vpop.eup %9191  ;;  %9199 = vpow2.f32 %v4854_v29 }
 0xc78   : > { %5338 = vmatprep.mubr.f32.mxu1 %v9188_v63  ;;  %v9194_v42 = vpop.eup %9193  ;;  %v4856_v40 = vmul.f32 1.442695, %v4829_v20  ;;  %5044 = vadd.xlane.f32.xlu1 %v9192_v50  ;;  %v4858_v15 = vmul.f32 1.442695, %v4830_v54 }
 0xc79   : > { %v4813_v39 = vpop.xlane.xlu1 %4812  ;;  %v4969_v56 = vpop.xlane.xlu0 %4968  ;;  %8617 = vmatprep.subr.bf16.mxu1 %v8616_v28 }
 0xc7a   : > { %v4989_v30 = vsub.f32 %v12659_v21, %v4969_v56  ;;  %9201 = vpow2.f32 %v4856_v40  ;;  %v9196_v34 = vpop.eup %9195  ;;  %v4831_v60 = vsub.f32 %v12664_v6, %v4813_v39  ;;  %8619 = vmatpush3.bf16.msra.mxu1 %v8616_v28 }
 0xc7b   : > { %4882 = vadd.xlane.f32.xlu0 %v9194_v42  ;;  %5339 = vmatmul.mubr.f32.gmra.mrb[112].mxu1 %v9194_v42 }
 0xc7c   : > { %5343 = vmatprep.mubr.f32.mxu1 %v9192_v50  ;;  %v5016_v47 = vmul.f32 1.442695, %v4989_v30  ;;  %v4860_v8 = vmul.f32 1.442695, %v4831_v60 }
 0xc7d   : > { %v4815_v9 = vpop.xlane.xlu1 %4814  ;;  %v4971_v24 = vpop.xlane.xlu0 %4970 }
 0xc7e   : > { %v4990_v58 = vsub.f32 %v12671_v59, %v4971_v24  ;;  %9203 = vpow2.f32 %v5016_v47  ;;  %v4832_v1 = vsub.f32 %v12676_v38, %v4815_v9  ;;  %v13965_v47 = vld [vmem:[#allocation32_spill] sm:$0xff] }
 0xc7f   : > { %4884 = vadd.xlane.f32.xlu0 %v9196_v34  ;;  %5344 = vmatmul.mubr.f32.gmra.mrb[114].mxu1 %v9196_v34  ;;  %9205 = vpow2.f32 %v4858_v15  ;;  %v13964_v15 = vld [vmem:[#allocation33_spill] sm:$0xff] }
 0xc80   : > { %v9198_v17 = vpop.eup %9197  ;;  %v5018_v21 = vmul.f32 1.442695, %v4990_v58  ;;  %v4862_v49 = vmul.f32 1.442695, %v4832_v1 }
 0xc81   : > { %v9200_v22 = vpop.eup %9199  ;;  %v4817_v53 = vpop.xlane.xlu1 %4816  ;;  %5046 = vadd.xlane.f32.xlu1 %v9198_v17  ;;  %5348 = vmatprep.mubr.f32.mxu1 %v9198_v17 }
 0xc82   : > { %v4973_v26 = vpop.xlane.xlu0 %4972  ;;  %9207 = vpow2.f32 %v5018_v21  ;;  %v4833_v59 = vsub.f32 %v12688_v10, %v4817_v53 }
 0xc83   : > { %v4991_v6 = vsub.f32 %v12683_v7, %v4973_v26  ;;  %4886 = vadd.xlane.f32.xlu0 %v9200_v22  ;;  %5349 = vmatmul.mubr.f32.gmra.mrb[116].mxu1 %v9200_v22  ;;  %9209 = vpow2.f32 %v4860_v8 }
 0xc84   : > { %v9202_v51 = vpop.eup %9201  ;;  %v4864_v2 = vmul.f32 1.442695, %v4833_v59 }
 0xc85   : > { %v5020_v11 = vmul.f32 1.442695, %v4991_v6 }
 0xc86   : > { %v4975_v44 = vpop.xlane.xlu0 %4974 }
 0xc87   : > { %v4992_v38 = vsub.f32 %v12695_v3, %v4975_v44  ;;  %4888 = vadd.xlane.f32.xlu0 %v9202_v51  ;;  %9211 = vpow2.f32 %v5020_v11 }
 0xc88   : > { %9213 = vpow2.f32 %v4862_v49  ;;  %v9204_v23 = vpop.eup %9203 }
 0xc89   : > { %v5022_v25 = vmul.f32 1.442695, %v4992_v38  ;;  %v9206_v7 = vpop.eup %9205  ;;  %5048 = vadd.xlane.f32.xlu1 %v9204_v23  ;;  %5353 = vmatprep.mubr.f32.mxu1 %v9204_v23 }
 0xc8a   : > { %v4977_v63 = vpop.xlane.xlu0 %4976  ;;  %5354 = vmatmul.mubr.f32.gmra.mrb[118].mxu1 %v9202_v51 }
 0xc8b   : > { %9215 = vpow2.f32 %v5022_v25  ;;  %v4993_v52 = vsub.f32 %v12701_v32, %v4977_v63  ;;  %4890 = vadd.xlane.f32.xlu0 %v9206_v7 }
 0xc8c   : > { %9217 = vpow2.f32 %v4864_v2  ;;  %v9208_v12 = vpop.eup %9207 }
 0xc8d   : > { %v5024_v10 = vmul.f32 1.442695, %v4993_v52  ;;  %v9210_v4 = vpop.eup %9209  ;;  %5050 = vadd.xlane.f32.xlu1 %v9208_v12  ;;  %5358 = vmatprep.mubr.f32.mxu1 %v9208_v12 }
 0xc8e   : > { %5359 = vmatmul.mubr.f32.gmra.mrb[120].mxu1 %v9206_v7 }
 0xc8f   : > { %9219 = vpow2.f32 %v5024_v10  ;;  %4892 = vadd.xlane.f32.xlu0 %v9210_v4 }
 0xc91   : > { %v9212_v3 = vpop.eup %9211 }
 0xc92   : > { %v9214_v29 = vpop.eup %9213  ;;  %5052 = vadd.xlane.f32.xlu1 %v9212_v3  ;;  %5363 = vmatprep.mubr.f32.mxu1 %v9212_v3 }
 0xc93   : > { %5364 = vmatmul.mubr.f32.gmra.mrb[122].mxu1 %v9210_v4  ;;  %4894 = vadd.xlane.f32.xlu0 %v9214_v29 }
 0xc95   : > { %v9216_v37 = vpop.eup %9215 }
 0xc96   : > { %5368 = vmatprep.mubr.f32.mxu1 %v9216_v37  ;;  %v9218_v32 = vpop.eup %9217  ;;  %5054 = vadd.xlane.f32.xlu1 %v9216_v37 }
 0xc97   : > { %5369 = vmatmul.mubr.f32.gmra.mrb[124].mxu1 %v9214_v29  ;;  %4896 = vadd.xlane.f32.xlu0 %v9218_v32 }
 0xc99   : > { %v9220_v0 = vpop.eup %9219 }
 0xc9a   : > { %5373 = vmatprep.mubr.f32.mxu1 %v9220_v0  ;;  %5056 = vadd.xlane.f32.xlu1 %v9220_v0 }
 0xc9b   : > { %5374 = vmatmul.mubr.f32.gmra.mrb[126].mxu1 %v9218_v32 }
 0xcbc   : > { %v4867_v19 = vpop.xlane.xlu0 %4866 }
 0xcbd   : > { %v5027_v27 = vpop.xlane.xlu1 %5026  ;;  %9221 = vrcp.f32 %v4867_v19 }
 0xcbe   : > { %9223 = vrcp.f32 %v5027_v27 }
 0xcc1   : > { %v4869_v50 = vpop.xlane.xlu0 %4868 }
 0xcc2   : > { %v5029_v20 = vpop.xlane.xlu1 %5028  ;;  %9225 = vrcp.f32 %v4869_v50 }
 0xcc3   : > { %9227 = vrcp.f32 %v5029_v20 }
 0xcc7   : > { %v9222_v39 = vpop.eup %9221 }
 0xcc8   : > { %v9224_v30 = vpop.eup %9223  ;;  %v4914_v60 = vmul.f32 %v9222_v39, %v13964_v15 }
 0xcc9   : > { %v5074_v9 = vmul.f32 %v9224_v30, %v13965_v47 }
 0xcca   : > { %v4871_v54 = vpop.xlane.xlu0 %4870 }
 0xccb   : > { %v5090_v1 = vadd.f32 %v5074_v9, %v4914_v60 }
 0xccc   : > { %v9226_v34 = vpop.eup %9225 }
 0xccd   : > { %v9228_v24 = vpop.eup %9227  ;;  %v4915_v22 = vmul.f32 %v9226_v34, %v13964_v15 }
 0xcce   : > { %v5031_v42 = vpop.xlane.xlu1 %5030  ;;  %v5075_v53 = vmul.f32 %v9228_v24, %v13965_v47 }
 0xccf   : > { %9229 = vrcp.f32 %v5031_v42 }
 0xcd0   : > { %9231 = vrcp.f32 %v4871_v54  ;;  %v5091_v38 = vadd.f32 %v5075_v53, %v4915_v22 }
 0xcd2   : > { %v5033_v40 = vpop.xlane.xlu1 %5032  ;;  %v4873_v56 = vpop.xlane.xlu0 %4872 }
 0xcd3   : > { %9233 = vrcp.f32 %v5033_v40 }
 0xcd4   : > { %9235 = vrcp.f32 %v4873_v56 }
 0xcd8   : > { %v4875_v6 = vpop.xlane.xlu0 %4874 }
 0xcd9   : > { %v9230_v26 = vpop.eup %9229 }
 0xcda   : > { %v9232_v11 = vpop.eup %9231  ;;  %v5076_v25 = vmul.f32 %v9230_v26, %v13965_v47 }
 0xcdb   : > { %v4916_v52 = vmul.f32 %v9232_v11, %v13964_v15 }
 0xcdc   : > { %v5035_v17 = vpop.xlane.xlu1 %5034 }
 0xcdd   : > { %9237 = vrcp.f32 %v5035_v17  ;;  %v9234_v44 = vpop.eup %9233  ;;  %v5092_v4 = vadd.f32 %v5076_v25, %v4916_v52 }
 0xcde   : > { %9239 = vrcp.f32 %v4875_v6  ;;  %v9236_v23 = vpop.eup %9235  ;;  %v5077_v37 = vmul.f32 %v9234_v44, %v13965_v47 }
 0xcdf   : > { %v4917_v29 = vmul.f32 %v9236_v23, %v13964_v15 }
 0xce0   : > { %v4877_v32 = vpop.xlane.xlu0 %4876 }
 0xce1   : > { %v5093_v27 = vadd.f32 %v5077_v37, %v4917_v29 }
 0xce4   : > { %v5037_v10 = vpop.xlane.xlu1 %5036 }
 0xce5   : > { %9241 = vrcp.f32 %v5037_v10 }
 0xce6   : > { %9243 = vrcp.f32 %v4877_v32 }
 0xce7   : > { %v9238_v28 = vpop.eup %9237 }
 0xce8   : > { %v9240_v20 = vpop.eup %9239  ;;  %v5078_v42 = vmul.f32 %v9238_v28, %v13965_v47 }
 0xce9   : > { %v4918_v40 = vmul.f32 %v9240_v20, %v13964_v15 }
 0xceb   : > { %v5094_v30 = vadd.f32 %v5078_v42, %v4918_v40 }
 0xcec   : > { %v4879_v9 = vpop.xlane.xlu0 %4878 }
 0xcef   : > { %v9242_v60 = vpop.eup %9241 }
 0xcf0   : > { %v5039_v56 = vpop.xlane.xlu1 %5038  ;;  %v5079_v17 = vmul.f32 %v9242_v60, %v13965_v47 }
 0xcf1   : > { %9245 = vrcp.f32 %v5039_v56 }
 0xcf2   : > { %9247 = vrcp.f32 %v4879_v9 }
 0xcf4   : > { %v5041_v11 = vpop.xlane.xlu1 %5040 }
 0xcfd   : > { %v5043_v23 = vpop.xlane.xlu1 %5042 }
 0xd04   : > { %v4881_v26 = vpop.xlane.xlu0 %4880 }
 0xd05   : > { %9249 = vrcp.f32 %v4881_v26 }
 0xd06   : > { %9251 = vrcp.f32 %v5041_v11 }
 0xd11   : > { %v7968_v58 = vpop.f32.mrb[96].mxu1 }
 0xd12   : > { %v7969_v8 = vpop.f32.mrb[97].mxu1 }
 0xd13   : > { %v7970_v21 = vadd.f32 %v7969_v8, %v7968_v58  ;;  %v9244_v58 = vpop.eup %9243 }
 0xd15   : > { %v5379_v49 = vmul.f32 %v7970_v21, %v5090_v1  ;;  %v7971_v59 = vpop.f32.mrb[98].mxu1  ;;  %v4919_v1 = vmul.f32 %v9244_v58, %v13964_v15 }
 0xd16   : > { %v7972_v51 = vpop.f32.mrb[99].mxu1 }
 0xd17   : > { %v7973_v2 = vadd.f32 %v7972_v51, %v7971_v59  ;;  %8308 = vmatprep.mubr.msk.f32.mxu1 %vm595_vm0, %v5379_v49  ;;  %v5095_v22 = vadd.f32 %v5079_v17, %v4919_v1  ;;  %v9246_v49 = vpop.eup %9245  ;;  %v4883_v51 = vpop.xlane.xlu0 %4882 }
 0xd18   : > { %v9248_v59 = vpop.eup %9247  ;;  %v5080_v44 = vmul.f32 %v9246_v49, %v13965_v47  ;;  %9253 = vrcp.f32 %v4883_v51 }
 0xd19   : > { %v5380_v63 = vmul.f32 %v7973_v2, %v5091_v38  ;;  %v7974_v7 = vpop.f32.mrb[100].mxu1  ;;  %v4920_v2 = vmul.f32 %v9248_v59, %v13964_v15  ;;  %9255 = vrcp.f32 %v5043_v23  ;;  %v9250_v29 = vpop.eup %9249 }
 0xd1a   : > { %v7975_v12 = vpop.f32.mrb[101].mxu1  ;;  %v9252_v32 = vpop.eup %9251 }
 0xd1b   : > { %v7976_v3 = vadd.f32 %v7975_v12, %v7974_v7  ;;  %8309 = vmatmul.mubr.msk.f32.vlgmr.msra.gmra.mrb[128].mxu1 %vm595_vm0, %v5380_v63  ;;  %v5096_v63 = vadd.f32 %v5080_v44, %v4920_v2  ;;  %v4885_v52 = vpop.xlane.xlu0 %4884  ;;  %v5045_v12 = vpop.xlane.xlu1 %5044 }
 0xd1c   : > { %9257 = vrcp.f32 %v4885_v52 }
 0xd1d   : > { %v5381_v0 = vmul.f32 %v7976_v3, %v5092_v4  ;;  %v7977_v41 = vpop.f32.mrb[102].mxu1  ;;  %9259 = vrcp.f32 %v5045_v12 }
 0xd1e   : > { %v7978_v18 = vpop.f32.mrb[103].mxu1 }
 0xd1f   : > { %v7979_v19 = vadd.f32 %v7978_v18, %v7977_v41  ;;  %8311 = vmatprep.mubr.msk.f32.mxu1 %vm595_vm0, %v5381_v0  ;;  %v5047_v4 = vpop.xlane.xlu1 %5046  ;;  %v4887_v3 = vpop.xlane.xlu0 %4886  ;;  %v4921_v41 = vmul.f32 %v9250_v29, %v13964_v15 }
 0xd20   : > { %9261 = vrcp.f32 %v4887_v3 }
 0xd21   : > { %v5382_v50 = vmul.f32 %v7979_v19, %v5093_v27  ;;  %9263 = vrcp.f32 %v5047_v4  ;;  %v5081_v27 = vmul.f32 %v9252_v32, %v13965_v47 }
 0xd22   : > { %v9254_v18 = vpop.eup %9253 }
 0xd23   : > { %8312 = vmatmul.mubr.msk.f32.gmra.mrb[130].mxu1 %vm595_vm0, %v5382_v50  ;;  %v7980_v54 = vpop.f32.mrb[104].mxu1  ;;  %v5049_v37 = vpop.xlane.xlu1 %5048  ;;  %v5097_v42 = vadd.f32 %v5081_v27, %v4921_v41  ;;  %v4922_v40 = vmul.f32 %v9254_v18, %v13964_v15 }
 0xd24   : > { %v7981_v39 = vpop.f32.mrb[105].mxu1  ;;  %v4889_v0 = vpop.xlane.xlu0 %4888  ;;  %9265 = vrcp.f32 %v5049_v37 }
 0xd25   : > { %v7982_v34 = vadd.f32 %v7981_v39, %v7980_v54  ;;  %v9256_v19 = vpop.eup %9255  ;;  %9267 = vrcp.f32 %v4889_v0 }
 0xd26   : > { %v9258_v39 = vpop.eup %9257  ;;  %v5082_v60 = vmul.f32 %v9256_v19, %v13965_v47 }
 0xd27   : > { %v5383_v24 = vmul.f32 %v7982_v34, %v5094_v30  ;;  %v5051_v50 = vpop.xlane.xlu1 %5050  ;;  %v9260_v9 = vpop.eup %9259 }
 0xd28   : > { %v4891_v56 = vpop.xlane.xlu0 %4890  ;;  %v5098_v58 = vadd.f32 %v5082_v60, %v4922_v40  ;;  %v5083_v26 = vmul.f32 %v9260_v9, %v13965_v47  ;;  %9269 = vrcp.f32 %v5051_v50 }
 0xd29   : > { %8314 = vmatprep.mubr.msk.f32.mxu1 %vm595_vm0, %v5383_v24  ;;  %9271 = vrcp.f32 %v4891_v56 }
 0xd2a   : > { %v9262_v1 = vpop.eup %9261 }
 0xd2b   : > { %v7983_v8 = vpop.f32.mrb[106].mxu1  ;;  %v9264_v49 = vpop.eup %9263  ;;  %v4924_v44 = vmul.f32 %v9262_v1, %v13964_v15 }
 0xd2c   : > { %v7984_v21 = vpop.f32.mrb[107].mxu1  ;;  %v4893_v59 = vpop.xlane.xlu0 %4892 }
 0xd2d   : > { %v7985_v53 = vadd.f32 %v7984_v21, %v7983_v8  ;;  %v4923_v8 = vmul.f32 %v9258_v39, %v13964_v15  ;;  %v5053_v21 = vpop.xlane.xlu1 %5052 }
 0xd2e   : > { %9273 = vrcp.f32 %v5053_v21  ;;  %v9266_v12 = vpop.eup %9265 }
 0xd2f   : > { %v5384_v6 = vmul.f32 %v7985_v53, %v5095_v22  ;;  %v5099_v11 = vadd.f32 %v5083_v26, %v4923_v8  ;;  %9275 = vrcp.f32 %v4893_v59  ;;  %v9268_v3 = vpop.eup %9267  ;;  %v5085_v37 = vmul.f32 %v9266_v12, %v13965_v47 }
 0xd30   : > { %v4925_v18 = vmul.f32 %v9268_v3, %v13964_v15  ;;  %v12799_v3 = vld [vmem:[%s13688_s5 + $0xd] ss:$0 sm:$0xff] }
 0xd31   : > { %8315 = vmatmul.mubr.msk.f32.gmra.mrb[132].mxu1 %vm595_vm0, %v5384_v6  ;;  %v5055_v23 = vpop.xlane.xlu1 %5054 }
 0xd32   : > { %9277 = vrcp.f32 %v5055_v23  ;;  %v9270_v32 = vpop.eup %9269  ;;  %v5101_v19 = vadd.f32 %v5085_v37, %v4925_v18 }
 0xd33   : > { %v5086_v50 = vmul.f32 %v9270_v32, %v13965_v47 }
 0xd35   : > { %v5057_v29 = vpop.xlane.xlu1 %5056 }
 0xd37   : > { %v7986_v38 = vpop.f32.mrb[108].mxu1 }
 0xd38   : > { %v7987_v25 = vpop.f32.mrb[109].mxu1 }
 0xd39   : > { %v7988_v7 = vadd.f32 %v7987_v25, %v7986_v38  ;;  %v5084_v25 = vmul.f32 %v9264_v49, %v13965_v47 }
 0xd3b   : > { %v5385_v10 = vmul.f32 %v7988_v7, %v5096_v63  ;;  %v5100_v7 = vadd.f32 %v5084_v25, %v4924_v44 }
 0xd3d   : > { %8317 = vmatprep.mubr.msk.f32.mxu1 %vm595_vm0, %v5385_v10  ;;  %v4895_v10 = vpop.xlane.xlu0 %4894 }
 0xd3e   : > { %9279 = vrcp.f32 %v4895_v10 }
 0xd3f   : > { %9281 = vrcp.f32 %v5057_v29 }
 0xd41   : > { %v4897_v0 = vpop.xlane.xlu0 %4896 }
 0xd42   : > { %9283 = vrcp.f32 %v4897_v0 }
 0xd4a   : > { %v7989_v28 = vpop.f32.mrb[110].mxu1 }
 0xd4b   : > { %v7990_v20 = vpop.f32.mrb[111].mxu1 }
 0xd4c   : > { %v7991_v54 = vadd.f32 %v7990_v20, %v7989_v28  ;;  %v9272_v28 = vpop.eup %9271 }
 0xd4d   : > { %v4926_v39 = vmul.f32 %v9272_v28, %v13964_v15 }
 0xd4e   : > { %v5386_v30 = vmul.f32 %v7991_v54, %v5097_v42  ;;  %v7992_v34 = vpop.f32.mrb[112].mxu1  ;;  %v9274_v42 = vpop.eup %9273 }
 0xd4f   : > { %v7993_v24 = vpop.f32.mrb[113].mxu1  ;;  %v9276_v56 = vpop.eup %9275  ;;  %v5087_v9 = vmul.f32 %v9274_v42, %v13965_v47 }
 0xd50   : > { %v7994_v17 = vadd.f32 %v7993_v24, %v7992_v34  ;;  %8318 = vmatmul.mubr.msk.f32.gmra.mrb[134].mxu1 %vm595_vm0, %v5386_v30  ;;  %v5102_v34 = vadd.f32 %v5086_v50, %v4926_v39  ;;  %v9278_v24 = vpop.eup %9277  ;;  %v4927_v8 = vmul.f32 %v9276_v56, %v13964_v15 }
 0xd51   : > { %v9280_v1 = vpop.eup %9279  ;;  %v5088_v26 = vmul.f32 %v9278_v24, %v13965_v47 }
 0xd52   : > { %v5387_v22 = vmul.f32 %v7994_v17, %v5098_v58  ;;  %v7995_v53 = vpop.f32.mrb[114].mxu1 }
 0xd53   : > { %v7996_v6 = vpop.f32.mrb[115].mxu1 }
 0xd54   : > { %v7997_v51 = vadd.f32 %v7996_v6, %v7995_v53  ;;  %8320 = vmatprep.mubr.msk.f32.mxu1 %vm595_vm0, %v5387_v22  ;;  %v5103_v22 = vadd.f32 %v5087_v9, %v4927_v8  ;;  %v9282_v6 = vpop.eup %9281 }
 0xd55   : > { %v5089_v25 = vmul.f32 %v9282_v6, %v13965_v47 }
 0xd56   : > { %v5388_v38 = vmul.f32 %v7997_v51, %v5099_v11  ;;  %v7998_v2 = vpop.f32.mrb[116].mxu1  ;;  %v4928_v11 = vmul.f32 %v9280_v1, %v13964_v15  ;;  %v9284_v51 = vpop.eup %9283 }
 0xd57   : > { %v7999_v63 = vpop.f32.mrb[117].mxu1 }
 0xd58   : > { %8321 = vmatmul.mubr.msk.f32.gmra.mrb[136].mxu1 %vm595_vm0, %v5388_v38  ;;  %v8000_v52 = vadd.f32 %v7999_v63, %v7998_v2  ;;  %v5104_v38 = vadd.f32 %v5088_v26, %v4928_v11 }
 0xd5a   : > { %v5389_v4 = vmul.f32 %v8000_v52, %v5100_v7  ;;  %v4929_v7 = vmul.f32 %v9284_v51, %v13964_v15 }
 0xd5c   : > { %8323 = vmatprep.mubr.msk.f32.mxu1 %vm595_vm0, %v5389_v4  ;;  %v5105_v10 = vadd.f32 %v5089_v25, %v4929_v7 }
 0xd5d   : > { %v8001_v41 = vpop.f32.mrb[118].mxu1 }
 0xd5e   : > { %v8002_v27 = vpop.f32.mrb[119].mxu1 }
 0xd5f   : > { %v8003_v20 = vadd.f32 %v8002_v27, %v8001_v41 }
 0xd61   : > { %v5390_v54 = vmul.f32 %v8003_v20, %v5101_v19  ;;  %v8004_v40 = vpop.f32.mrb[120].mxu1 }
 0xd62   : > { %v8005_v30 = vpop.f32.mrb[121].mxu1 }
 0xd63   : > { %v8006_v60 = vadd.f32 %v8005_v30, %v8004_v40  ;;  %8324 = vmatmul.mubr.msk.f32.gmra.mrb[138].mxu1 %vm595_vm0, %v5390_v54 }
 0xd65   : > { %v5391_v58 = vmul.f32 %v8006_v60, %v5102_v34 }
 0xd66   : > { %v8007_v17 = vpop.f32.mrb[122].mxu1 }
 0xd67   : > { %v8008_v21 = vpop.f32.mrb[123].mxu1  ;;  %8326 = vmatprep.mubr.msk.f32.mxu1 %vm595_vm0, %v5391_v58 }
 0xd68   : > { %v8009_v53 = vadd.f32 %v8008_v21, %v8007_v17 }
 0xd6a   : > { %v5392_v49 = vmul.f32 %v8009_v53, %v5103_v22  ;;  %v8010_v59 = vpop.f32.mrb[124].mxu1 }
 0xd6b   : > { %v8011_v44 = vpop.f32.mrb[125].mxu1 }
 0xd6c   : > { %v8012_v2 = vadd.f32 %v8011_v44, %v8010_v59  ;;  %8327 = vmatmul.mubr.msk.f32.gmra.mrb[140].mxu1 %vm595_vm0, %v5392_v49 }
 0xd6e   : > { %v5393_v23 = vmul.f32 %v8012_v2, %v5104_v38  ;;  %v8013_v63 = vpop.f32.mrb[126].mxu1 }
 0xd6f   : > { %v8014_v52 = vpop.f32.mrb[127].mxu1 }
 0xd70   : > { %v8015_v12 = vadd.f32 %v8014_v52, %v8013_v63  ;;  %8329 = vmatprep.mubr.msk.f32.mxu1 %vm595_vm0, %v5393_v23 }
 0xd72   : > { %v5394_v4 = vmul.f32 %v8015_v12, %v5105_v10 }
 0xd74   : > { %8330 = vmatmul.mubr.msk.f32.gmra.mrb[142].mxu1 %vm595_vm0, %v5394_v4 }
 0xdee   : > { %v8310_v29 = vpop.f32.mrb[128].mxu1 }
 0xdef   : > { %v5524_v47 = vadd.f32 %v8310_v29, %v12799_v3  ;;  %v5518_v37 = vpop.f32.mrb[129].mxu1 }
 0xdf0   : > { %v5519_v32 = vadd.f32 %v12799_v3, %v5518_v37 }
 0xdf1   : > { %v12804_v15 = vadd.f32 %v5524_v47, %v12230_v45 }
 0xdf2   : > { %v12807_v0 = vadd.f32 %v5519_v32, %v12227_v31 }
 0xdf3   : > { %v5618_v41 = vsel %vm595_vm0, %v12804_v15, 0.0 }
 0xdf4   : > { %5619 = vadd.xlane.f32.xlu1 %v5618_v41  ;;  %v5615_v18 = vsel %vm595_vm0, %v12807_v0, 0.0 }
 0xdf5   : > { %5616 = vadd.xlane.f32.xlu0 %v5615_v18 }
 0xdf6   : > { %v8313_v28 = vpop.f32.mrb[130].mxu1 }
 0xdf7   : > { %v5534_v27 = vadd.f32 %v8313_v28, %v12799_v3  ;;  %v5528_v19 = vpop.f32.mrb[131].mxu1 }
 0xdf8   : > { %v5529_v20 = vadd.f32 %v12799_v3, %v5528_v19 }
 0xdf9   : > { %v12816_v45 = vadd.f32 %v5534_v27, %v12264_v55 }
 0xdfa   : > { %v12819_v31 = vadd.f32 %v5529_v20, %v12261_v16 }
 0xdfb   : > { %v5624_v50 = vsel %vm595_vm0, %v12816_v45, 0.0 }
 0xdfc   : > { %5625 = vadd.xlane.f32.xlu1 %v5624_v50  ;;  %v5621_v42 = vsel %vm595_vm0, %v12819_v31, 0.0 }
 0xdfd   : > { %5622 = vadd.xlane.f32.xlu0 %v5621_v42 }
 0xe04   : > { %v8316_v54 = vpop.f32.mrb[132].mxu1 }
 0xe05   : > { %v5544_v40 = vadd.f32 %v8316_v54, %v12799_v3  ;;  %v5538_v39 = vpop.f32.mrb[133].mxu1 }
 0xe06   : > { %v5539_v56 = vadd.f32 %v12799_v3, %v5538_v39 }
 0xe07   : > { %v12828_v55 = vadd.f32 %v5544_v40, %v12298_v48 }
 0xe08   : > { %v12831_v16 = vadd.f32 %v5539_v56, %v12290_v61 }
 0xe09   : > { %v5630_v30 = vsel %vm595_vm0, %v12828_v55, 0.0 }
 0xe0a   : > { %5631 = vadd.xlane.f32.xlu1 %v5630_v30  ;;  %v5627_v34 = vsel %vm595_vm0, %v12831_v16, 0.0 }
 0xe0b   : > { %5628 = vadd.xlane.f32.xlu0 %v5627_v34 }
 0xe23   : > { %v8319_v60 = vpop.f32.mrb[134].mxu1 }
 0xe24   : > { %v5554_v9 = vadd.f32 %v8319_v60, %v12799_v3  ;;  %v5548_v24 = vpop.f32.mrb[135].mxu1 }
 0xe25   : > { %v5549_v58 = vadd.f32 %v12799_v3, %v5548_v24 }
 0xe26   : > { %v12840_v48 = vadd.f32 %v5554_v9, %v12343_v57 }
 0xe27   : > { %v12843_v61 = vadd.f32 %v5549_v58, %v12340_v43 }
 0xe28   : > { %v5636_v17 = vsel %vm595_vm0, %v12840_v48, 0.0 }
 0xe29   : > { %5637 = vadd.xlane.f32.xlu1 %v5636_v17  ;;  %v5633_v8 = vsel %vm595_vm0, %v12843_v61, 0.0 }
 0xe2a   : > { %5634 = vadd.xlane.f32.xlu0 %v5633_v8 }
 0xe2b   : > { %v8322_v1 = vpop.f32.mrb[136].mxu1 }
 0xe2c   : > { %v5564_v21 = vadd.f32 %v8322_v1, %v12799_v3  ;;  %v5558_v22 = vpop.f32.mrb[137].mxu1 }
 0xe2d   : > { %v5559_v53 = vadd.f32 %v12799_v3, %v5558_v22 }
 0xe2e   : > { %v12852_v57 = vadd.f32 %v5564_v21, %v12411_v33 }
 0xe2f   : > { %v12855_v43 = vadd.f32 %v5559_v53, %v12402_v46 }
 0xe30   : > { %v5642_v26 = vsel %vm595_vm0, %v12852_v57, 0.0 }
 0xe31   : > { %5643 = vadd.xlane.f32.xlu1 %v5642_v26  ;;  %v5639_v6 = vsel %vm595_vm0, %v12855_v43, 0.0 }
 0xe32   : > { %5640 = vadd.xlane.f32.xlu0 %v5639_v6 }
 0xe36   : > { %v8325_v49 = vpop.f32.mrb[138].mxu1 }
 0xe37   : > { %v5574_v59 = vadd.f32 %v8325_v49, %v12799_v3  ;;  %v5568_v11 = vpop.f32.mrb[139].mxu1 }
 0xe38   : > { %v5569_v51 = vadd.f32 %v12799_v3, %v5568_v11 }
 0xe39   : > { %v12864_v33 = vadd.f32 %v5574_v59, %v12444_v62 }
 0xe3a   : > { %v12867_v46 = vadd.f32 %v5569_v51, %v12436_v5 }
 0xe3b   : > { %v5648_v44 = vsel %vm595_vm0, %v12864_v33, 0.0 }
 0xe3c   : > { %5649 = vadd.xlane.f32.xlu1 %v5648_v44  ;;  %v5645_v38 = vsel %vm595_vm0, %v12867_v46, 0.0 }
 0xe3d   : > { %5646 = vadd.xlane.f32.xlu0 %v5645_v38 }
 0xe3f   : > { %v8328_v2 = vpop.f32.mrb[140].mxu1 }
 0xe40   : > { %v5584_v25 = vadd.f32 %v8328_v2, %v12799_v3  ;;  %v5578_v23 = vpop.f32.mrb[141].mxu1 }
 0xe41   : > { %v5579_v63 = vadd.f32 %v12799_v3, %v5578_v23 }
 0xe42   : > { %v12876_v62 = vadd.f32 %v5584_v25, %v12457_v35 }
 0xe43   : > { %v12879_v5 = vadd.f32 %v5579_v63, %v12448_v36 }
 0xe44   : > { %v5654_v7 = vsel %vm595_vm0, %v12876_v62, 0.0 }
 0xe45   : > { %5655 = vadd.xlane.f32.xlu1 %v5654_v7  ;;  %v5651_v52 = vsel %vm595_vm0, %v12879_v5, 0.0 }
 0xe46   : > { %5652 = vadd.xlane.f32.xlu0 %v5651_v52 }
 0xe47   : > { %v8331_v10 = vpop.f32.mrb[142].mxu1 }
 0xe48   : > { %v5594_v12 = vadd.f32 %v8331_v10, %v12799_v3  ;;  %v5588_v4 = vpop.f32.mrb[143].mxu1 }
 0xe49   : > { %v5589_v29 = vadd.f32 %v12799_v3, %v5588_v4 }
 0xe4a   : > { %v12888_v35 = vadd.f32 %v5594_v12, %v12467_v14 }
 0xe4b   : > { %v12891_v36 = vadd.f32 %v5589_v29, %v12464_v13 }
 0xe4c   : > { %v5660_v47 = vsel %vm595_vm0, %v12888_v35, 0.0 }
 0xe4d   : > { %5661 = vadd.xlane.f32.xlu1 %v5660_v47  ;;  %v5657_v37 = vsel %vm595_vm0, %v12891_v36, 0.0 }
 0xe4e   : > { %5658 = vadd.xlane.f32.xlu0 %v5657_v37 }
 0xe81   : > { %v5620_v32 = vpop.xlane.xlu1 %5619 }
 0xe82   : > { %v5664_v41 = vmul.f32 0.03125, %v5620_v32  ;;  %v5617_v18 = vpop.xlane.xlu0 %5616 }
 0xe83   : > { %v5663_v28 = vmul.f32 0.03125, %v5617_v18 }
 0xe84   : > { %v12898_v3 = vsub.f32 %v12804_v15, %v5664_v41 }
 0xe85   : > { %v12901_v14 = vsub.f32 %v12807_v0, %v5663_v28 }
 0xe86   : > { %v5696_v13 = vmul.f32 %v12898_v3, %v12898_v3 }
 0xe87   : > { %v5695_v27 = vmul.f32 %v12901_v14, %v12901_v14 }
 0xe88   : > { %v5714_v19 = vsel %vm595_vm0, %v5696_v13, 0.0 }
 0xe89   : > { %v5626_v20 = vpop.xlane.xlu1 %5625  ;;  %5715 = vadd.xlane.f32.xlu1 %v5714_v19  ;;  %v5711_v50 = vsel %vm595_vm0, %v5695_v27, 0.0 }
 0xe8a   : > { %v5666_v42 = vmul.f32 0.03125, %v5626_v20  ;;  %5712 = vadd.xlane.f32.xlu0 %v5711_v50  ;;  %v5623_v54 = vpop.xlane.xlu0 %5622 }
 0xe8b   : > { %v5665_v15 = vmul.f32 0.03125, %v5623_v54 }
 0xe8c   : > { %v12910_v40 = vsub.f32 %v12816_v45, %v5666_v42 }
 0xe8d   : > { %v12913_v0 = vsub.f32 %v12819_v31, %v5665_v15 }
 0xe8e   : > { %v5698_v39 = vmul.f32 %v12910_v40, %v12910_v40 }
 0xe8f   : > { %v5697_v56 = vmul.f32 %v12913_v0, %v12913_v0 }
 0xe90   : > { %v5720_v30 = vsel %vm595_vm0, %v5698_v39, 0.0 }
 0xe91   : > { %5721 = vadd.xlane.f32.xlu1 %v5720_v30  ;;  %v5717_v34 = vsel %vm595_vm0, %v5697_v56, 0.0 }
 0xe92   : > { %5718 = vadd.xlane.f32.xlu0 %v5717_v34 }
 0xe97   : > { %v5632_v60 = vpop.xlane.xlu1 %5631 }
 0xe98   : > { %v5668_v9 = vmul.f32 0.03125, %v5632_v60  ;;  %v5629_v24 = vpop.xlane.xlu0 %5628 }
 0xe99   : > { %v5667_v45 = vmul.f32 0.03125, %v5629_v24 }
 0xe9a   : > { %v12922_v58 = vsub.f32 %v12828_v55, %v5668_v9  ;;  %v5975_v55 = vld [vmem:[%s13687_s4 + $0x100] sm:$0xff] }
 0xe9b   : > { %v12925_v31 = vsub.f32 %v12831_v16, %v5667_v45  ;;  %v5976_v16 = vld [vmem:[%s13687_s4 + $0x108] sm:$0xff] }
 0xe9c   : > { %v5700_v17 = vmul.f32 %v12922_v58, %v12922_v58  ;;  %v8620_v22 = vpack.c.bf16 %v5976_v16, %v5975_v55 }
 0xe9d   : > { %v5699_v8 = vmul.f32 %v12925_v31, %v12925_v31 }
 0xe9e   : > { %v5726_v1 = vsel %vm595_vm0, %v5700_v17, 0.0  ;;  %8621 = vmatprep.subr.bf16.mxu0 %v8620_v22 }
 0xe9f   : > { %5727 = vadd.xlane.f32.xlu1 %v5726_v1  ;;  %v5723_v21 = vsel %vm595_vm0, %v5699_v8, 0.0  ;;  %8623 = vmatpush3.bf16.msra.mxu0 %v8620_v22 }
 0xea0   : > { %5724 = vadd.xlane.f32.xlu0 %v5723_v21 }
 0xeb6   : > { %v5638_v53 = vpop.xlane.xlu1 %5637 }
 0xeb7   : > { %v5670_v26 = vmul.f32 0.03125, %v5638_v53  ;;  %v5635_v6 = vpop.xlane.xlu0 %5634  ;;  %v6194_v53 = vld [vmem:[%s13687_s4 + $0x128] sm:$0xff] }
 0xeb8   : > { %v5669_v49 = vmul.f32 0.03125, %v5635_v6 }
 0xeb9   : > { %v12940_v59 = vsub.f32 %v12840_v48, %v5670_v26  ;;  %v5977_v48 = vld [vmem:[%s13687_s4 + $0x110] sm:$0xff] }
 0xeba   : > { %v12943_v11 = vsub.f32 %v12843_v61, %v5669_v49  ;;  %v5978_v61 = vld [vmem:[%s13687_s4 + $0x118] sm:$0xff] }
 0xebb   : > { %v5702_v51 = vmul.f32 %v12940_v59, %v12940_v59  ;;  %v8624_v52 = vpack.c.bf16 %v5978_v61, %v5977_v48 }
 0xebc   : > { %v5701_v44 = vmul.f32 %v12943_v11, %v12943_v11 }
 0xebd   : > { %v5732_v38 = vsel %vm595_vm0, %v5702_v51, 0.0  ;;  %8625 = vmatprep.subr.bf16.mxu0 %v8624_v52 }
 0xebe   : > { %v5644_v2 = vpop.xlane.xlu1 %5643  ;;  %5733 = vadd.xlane.f32.xlu1 %v5732_v38  ;;  %v5729_v25 = vsel %vm595_vm0, %v5701_v44, 0.0  ;;  %8627 = vmatpush3.bf16.msra.mxu0 %v8624_v52 }
 0xebf   : > { %v5672_v23 = vmul.f32 0.03125, %v5644_v2  ;;  %5730 = vadd.xlane.f32.xlu0 %v5729_v25  ;;  %v5641_v63 = vpop.xlane.xlu0 %5640 }
 0xec0   : > { %v5671_v7 = vmul.f32 0.03125, %v5641_v63 }
 0xec1   : > { %v12958_v10 = vsub.f32 %v12852_v57, %v5672_v23 }
 0xec2   : > { %v12961_v12 = vsub.f32 %v12855_v43, %v5671_v7 }
 0xec3   : > { %v5704_v4 = vmul.f32 %v12958_v10, %v12958_v10 }
 0xec4   : > { %v5703_v29 = vmul.f32 %v12961_v12, %v12961_v12 }
 0xec5   : > { %v5738_v47 = vsel %vm595_vm0, %v5704_v4, 0.0 }
 0xec6   : > { %5739 = vadd.xlane.f32.xlu1 %v5738_v47  ;;  %v5735_v37 = vsel %vm595_vm0, %v5703_v29, 0.0 }
 0xec7   : > { %5736 = vadd.xlane.f32.xlu0 %v5735_v37 }
 0xec9   : > { %v5650_v32 = vpop.xlane.xlu1 %5649 }
 0xeca   : > { %v5674_v57 = vmul.f32 0.03125, %v5650_v32  ;;  %v5647_v41 = vpop.xlane.xlu0 %5646 }
 0xecb   : > { %v5673_v18 = vmul.f32 0.03125, %v5647_v41 }
 0xecc   : > { %v12970_v43 = vsub.f32 %v12864_v33, %v5674_v57 }
 0xecd   : > { %v12973_v28 = vsub.f32 %v12867_v46, %v5673_v18 }
 0xece   : > { %v5706_v13 = vmul.f32 %v12970_v43, %v12970_v43 }
 0xecf   : > { %v5705_v27 = vmul.f32 %v12973_v28, %v12973_v28 }
 0xed0   : > { %v5744_v19 = vsel %vm595_vm0, %v5706_v13, 0.0 }
 0xed1   : > { %5745 = vadd.xlane.f32.xlu1 %v5744_v19  ;;  %v5741_v50 = vsel %vm595_vm0, %v5705_v27, 0.0 }
 0xed2   : > { %v5656_v20 = vpop.xlane.xlu1 %5655  ;;  %5742 = vadd.xlane.f32.xlu0 %v5741_v50 }
 0xed3   : > { %v5676_v42 = vmul.f32 0.03125, %v5656_v20  ;;  %v5653_v54 = vpop.xlane.xlu0 %5652 }
 0xed4   : > { %v5675_v33 = vmul.f32 0.03125, %v5653_v54 }
 0xed5   : > { %v12982_v15 = vsub.f32 %v12876_v62, %v5676_v42 }
 0xed6   : > { %v12985_v46 = vsub.f32 %v12879_v5, %v5675_v33 }
 0xed7   : > { %v5708_v39 = vmul.f32 %v12982_v15, %v12982_v15 }
 0xed8   : > { %v5707_v56 = vmul.f32 %v12985_v46, %v12985_v46 }
 0xed9   : > { %v5750_v30 = vsel %vm595_vm0, %v5708_v39, 0.0 }
 0xeda   : > { %5751 = vadd.xlane.f32.xlu1 %v5750_v30  ;;  %v5662_v34 = vpop.xlane.xlu1 %5661  ;;  %v5747_v60 = vsel %vm595_vm0, %v5707_v56, 0.0 }
 0xedb   : > { %v5678_v9 = vmul.f32 0.03125, %v5662_v34  ;;  %5748 = vadd.xlane.f32.xlu0 %v5747_v60  ;;  %v5659_v24 = vpop.xlane.xlu0 %5658 }
 0xedc   : > { %v5677_v62 = vmul.f32 0.03125, %v5659_v24  ;;  %v13014_v24 = vld [vmem:[%s13688_s5 + $0xe] ss:$0 sm:$0xff] }
 0xedd   : > { %v12994_v45 = vsub.f32 %v12888_v35, %v5678_v9 }
 0xede   : > { %v12997_v5 = vsub.f32 %v12891_v36, %v5677_v62  ;;  %v6193_v36 = vld [vmem:[%s13687_s4 + $0x120] sm:$0xff] }
 0xedf   : > { %v5710_v17 = vmul.f32 %v12994_v45, %v12994_v45  ;;  %v8628_v6 = vpack.c.bf16 %v6194_v53, %v6193_v36 }
 0xee0   : > { %v5709_v8 = vmul.f32 %v12997_v5, %v12997_v5 }
 0xee1   : > { %v5756_v1 = vsel %vm595_vm0, %v5710_v17, 0.0  ;;  %8629 = vmatprep.subr.bf16.mxu1 %v8628_v6 }
 0xee2   : > { %5757 = vadd.xlane.f32.xlu1 %v5756_v1  ;;  %v5753_v21 = vsel %vm595_vm0, %v5709_v8, 0.0  ;;  %8631 = vmatpush3.bf16.msra.mxu1 %v8628_v6  ;;  %v13021_v1 = vld [vmem:[%s13688_s5 + $0xf] ss:$0 sm:$0xff] }
 0xee3   : > { %5754 = vadd.xlane.f32.xlu0 %v5753_v21 }
 0xf16   : > { %v5716_v55 = vpop.xlane.xlu1 %5715 }
 0xf17   : > { %v5760_v16 = vmul.f32 0.03125, %v5716_v55  ;;  %v5713_v22 = vpop.xlane.xlu0 %5712 }
 0xf18   : > { %v5759_v35 = vmul.f32 0.03125, %v5713_v22 }
 0xf19   : > { %v5776_v26 = vadd.f32 1e-08, %v5760_v16 }
 0xf1a   : > { %v5775_v49 = vadd.f32 1e-08, %v5759_v35 }
 0xf1b   : > { %9285 = vrsqrt.f32 %v5776_v26  ;;  %vm5800_vm13 = vcmp.eq.f32.partialorder %v5776_v26, inf  ;;  %v5803_v7 = vand.u32 2147483648, %v5776_v26  ;;  %vm5802_vm14 = vcmp.eq.f32.partialorder %v5776_v26, 0.0 }
 0xf1c   : > { %9287 = vrsqrt.f32 %v5775_v49  ;;  %vm5793_vm15 = vcmp.eq.f32.partialorder %v5775_v49, inf  ;;  %v5796_v29 = vand.u32 2147483648, %v5775_v49  ;;  %vm5795_vm2 = vcmp.eq.f32.partialorder %v5775_v49, 0.0 }
 0xf1e   : > { %v5722_v51 = vpop.xlane.xlu1 %5721 }
 0xf1f   : > { %v5762_v44 = vmul.f32 0.03125, %v5722_v51  ;;  %v5719_v38 = vpop.xlane.xlu0 %5718 }
 0xf20   : > { %v5761_v2 = vmul.f32 0.03125, %v5719_v38 }
 0xf21   : > { %v5778_v25 = vadd.f32 1e-08, %v5762_v44 }
 0xf22   : > { %v5777_v23 = vadd.f32 1e-08, %v5761_v2 }
 0xf23   : > { %9289 = vrsqrt.f32 %v5778_v25  ;;  %vm5814_vm3 = vcmp.eq.f32.partialorder %v5778_v25, inf  ;;  %vm5816_vm4 = vcmp.eq.f32.partialorder %v5778_v25, 0.0  ;;  %v5817_v20 = vand.u32 2147483648, %v5778_v25 }
 0xf24   : > { %9291 = vrsqrt.f32 %v5777_v23  ;;  %vm5807_vm5 = vcmp.eq.f32.partialorder %v5777_v23, inf  ;;  %v5810_v33 = vand.u32 2147483648, %v5777_v23  ;;  %vm5809_vm6 = vcmp.eq.f32.partialorder %v5777_v23, 0.0 }
 0xf25   : > { %v9286_v63 = vpop.eup %9285 }
 0xf26   : > { %v9288_v48 = vpop.eup %9287  ;;  %v5799_v61 = vmul.f32 %v9286_v63, %v5776_v26 }
 0xf27   : > { %v5792_v52 = vmul.f32 %v9288_v48, %v5775_v49 }
 0xf28   : > { %v5801_v4 = vsel %vm5800_vm13, %v5776_v26, %v5799_v61 }
 0xf29   : > { %v5804_v47 = vsel %vm5802_vm14, %v5803_v7, %v5801_v4  ;;  %v5794_v37 = vsel %vm5793_vm15, %v5775_v49, %v5792_v52 }
 0xf2a   : > { %9293 = vrcp.f32 %v5804_v47  ;;  %v5797_v32 = vsel %vm5795_vm2, %v5796_v29, %v5794_v37 }
 0xf2b   : > { %9295 = vrcp.f32 %v5797_v32 }
 0xf2c   : > { %v5728_v41 = vpop.xlane.xlu1 %5727 }
 0xf2d   : > { %v9290_v57 = vpop.eup %9289  ;;  %v5764_v27 = vmul.f32 0.03125, %v5728_v41  ;;  %v5725_v19 = vpop.xlane.xlu0 %5724 }
 0xf2e   : > { %v9292_v18 = vpop.eup %9291  ;;  %v5813_v13 = vmul.f32 %v9290_v57, %v5778_v25  ;;  %v5763_v42 = vmul.f32 0.03125, %v5725_v19 }
 0xf2f   : > { %v5806_v50 = vmul.f32 %v9292_v18, %v5777_v23  ;;  %v5780_v39 = vadd.f32 1e-08, %v5764_v27 }
 0xf30   : > { %v5815_v54 = vsel %vm5814_vm3, %v5778_v25, %v5813_v13  ;;  %v5779_v34 = vadd.f32 1e-08, %v5763_v42 }
 0xf31   : > { %v5818_v56 = vsel %vm5816_vm4, %v5817_v20, %v5815_v54  ;;  %v5808_v30 = vsel %vm5807_vm5, %v5777_v23, %v5806_v50  ;;  %vm5828_vm7 = vcmp.eq.f32.partialorder %v5780_v39, inf  ;;  %v5831_v51 = vand.u32 2147483648, %v5780_v39 }
 0xf32   : > { %9297 = vrcp.f32 %v5818_v56  ;;  %v5811_v60 = vsel %vm5809_vm6, %v5810_v33, %v5808_v30  ;;  %vm5830_vm8 = vcmp.eq.f32.partialorder %v5780_v39, 0.0  ;;  %vm5821_vm9 = vcmp.eq.f32.partialorder %v5779_v34, inf }
 0xf33   : > { %9299 = vrcp.f32 %v5811_v60  ;;  %v5824_v25 = vand.u32 2147483648, %v5779_v34  ;;  %vm5823_vm1 = vcmp.eq.f32.partialorder %v5779_v34, 0.0 }
 0xf34   : > { %v9294_v9 = vpop.eup %9293  ;;  %9301 = vrsqrt.f32 %v5780_v39 }
 0xf35   : > { %v9296_v62 = vpop.eup %9295  ;;  %9303 = vrsqrt.f32 %v5779_v34  ;;  %v5906_v17 = vmul.f32 %v9294_v9, %v12898_v3 }
 0xf36   : > { %v5904_v8 = vmul.f32 %v9296_v62, %v12901_v14 }
 0xf37   : > { %v5940_v21 = vmul.f32 %v13014_v24, %v5906_v17 }
 0xf38   : > { %v5939_v55 = vmul.f32 %v13014_v24, %v5904_v8 }
 0xf39   : > { %v13029_v22 = vadd.f32 %v13021_v1, %v5940_v21 }
 0xf3a   : > { %v13026_v16 = vadd.f32 %v13021_v1, %v5939_v55 }
 0xf3c   : > { %v9298_v35 = vpop.eup %9297  ;;  %8340 = vmatprep.mubr.msk.f32.mxu0 %vm595_vm0, %v13026_v16 }
 0xf3d   : > { %v9300_v3 = vpop.eup %9299  ;;  %8341 = vmatmul.mubr.msk.f32.vlgmr.msra.gmra.mrb[112].mxu0 %vm595_vm0, %v13029_v22  ;;  %v5910_v14 = vmul.f32 %v9298_v35, %v12910_v40 }
 0xf3e   : > { %v9302_v36 = vpop.eup %9301  ;;  %v5908_v53 = vmul.f32 %v9300_v3, %v12913_v0 }
 0xf3f   : > { %v9304_v26 = vpop.eup %9303  ;;  %v5827_v6 = vmul.f32 %v9302_v36, %v5780_v39  ;;  %v5942_v49 = vmul.f32 %v13014_v24, %v5910_v14 }
 0xf40   : > { %v5820_v44 = vmul.f32 %v9304_v26, %v5779_v34  ;;  %v5941_v38 = vmul.f32 %v13014_v24, %v5908_v53 }
 0xf41   : > { %v5829_v2 = vsel %vm5828_vm7, %v5780_v39, %v5827_v6  ;;  %v13043_v48 = vadd.f32 %v13021_v1, %v5942_v49 }
 0xf42   : > { %v5832_v23 = vsel %vm5830_vm8, %v5831_v51, %v5829_v2  ;;  %v5822_v63 = vsel %vm5821_vm9, %v5779_v34, %v5820_v44  ;;  %v13040_v40 = vadd.f32 %v13021_v1, %v5941_v38 }
 0xf43   : > { %9305 = vrcp.f32 %v5832_v23  ;;  %v5825_v0 = vsel %vm5823_vm1, %v5824_v25, %v5822_v63 }
 0xf44   : > { %9307 = vrcp.f32 %v5825_v0  ;;  %8343 = vmatprep.mubr.msk.f32.mxu0 %vm595_vm0, %v13040_v40 }
 0xf45   : > { %8344 = vmatmul.mubr.msk.f32.gmra.mrb[114].mxu0 %vm595_vm0, %v13043_v48 }
 0xf4b   : > { %v5734_v61 = vpop.xlane.xlu1 %5733 }
 0xf4c   : > { %v5766_v7 = vmul.f32 0.03125, %v5734_v61  ;;  %v5731_v52 = vpop.xlane.xlu0 %5730 }
 0xf4d   : > { %v9306_v4 = vpop.eup %9305  ;;  %v5765_v29 = vmul.f32 0.03125, %v5731_v52 }
 0xf4e   : > { %v9308_v47 = vpop.eup %9307  ;;  %v5782_v37 = vadd.f32 1e-08, %v5766_v7  ;;  %v5914_v32 = vmul.f32 %v9306_v4, %v12922_v58 }
 0xf4f   : > { %v5781_v57 = vadd.f32 1e-08, %v5765_v29  ;;  %v5912_v41 = vmul.f32 %v9308_v47, %v12925_v31 }
 0xf50   : > { %9309 = vrsqrt.f32 %v5782_v37  ;;  %v5944_v13 = vmul.f32 %v13014_v24, %v5914_v32  ;;  %vm5842_vm10 = vcmp.eq.f32.partialorder %v5782_v37, inf  ;;  %v5845_v30 = vand.u32 2147483648, %v5782_v37 }
 0xf51   : > { %9311 = vrsqrt.f32 %v5781_v57  ;;  %v5943_v18 = vmul.f32 %v13014_v24, %v5912_v41  ;;  %vm5844_vm11 = vcmp.eq.f32.partialorder %v5782_v37, 0.0  ;;  %vm5835_vm12 = vcmp.eq.f32.partialorder %v5781_v57, inf }
 0xf52   : > { %v13057_v54 = vadd.f32 %v13021_v1, %v5944_v13  ;;  %v5838_v9 = vand.u32 2147483648, %v5781_v57  ;;  %vm5837_vm13 = vcmp.eq.f32.partialorder %v5781_v57, 0.0 }
 0xf53   : > { %v5740_v27 = vpop.xlane.xlu1 %5739  ;;  %v13054_v20 = vadd.f32 %v13021_v1, %v5943_v18 }
 0xf54   : > { %v5768_v19 = vmul.f32 0.03125, %v5740_v27  ;;  %v5737_v50 = vpop.xlane.xlu0 %5736 }
 0xf55   : > { %v5767_v42 = vmul.f32 0.03125, %v5737_v50  ;;  %8346 = vmatprep.mubr.msk.f32.mxu0 %vm595_vm0, %v13054_v20 }
 0xf56   : > { %v5784_v58 = vadd.f32 1e-08, %v5768_v19  ;;  %8347 = vmatmul.mubr.msk.f32.gmra.mrb[116].mxu0 %vm595_vm0, %v13057_v54 }
 0xf57   : > { %v5783_v31 = vadd.f32 1e-08, %v5767_v42 }
 0xf58   : > { %9313 = vrsqrt.f32 %v5784_v58  ;;  %vm5856_vm14 = vcmp.eq.f32.partialorder %v5784_v58, inf  ;;  %vm5858_vm15 = vcmp.eq.f32.partialorder %v5784_v58, 0.0  ;;  %v5859_v26 = vand.u32 2147483648, %v5784_v58 }
 0xf59   : > { %9315 = vrsqrt.f32 %v5783_v31  ;;  %vm5849_vm2 = vcmp.eq.f32.partialorder %v5783_v31, inf  ;;  %v5852_v44 = vand.u32 2147483648, %v5783_v31  ;;  %vm5851_vm3 = vcmp.eq.f32.partialorder %v5783_v31, 0.0 }
 0xf5a   : > { %v9310_v33 = vpop.eup %9309 }
 0xf5b   : > { %v9312_v39 = vpop.eup %9311  ;;  %v5841_v56 = vmul.f32 %v9310_v33, %v5782_v37 }
 0xf5c   : > { %v5834_v34 = vmul.f32 %v9312_v39, %v5781_v57 }
 0xf5d   : > { %v5843_v60 = vsel %vm5842_vm10, %v5782_v37, %v5841_v56 }
 0xf5e   : > { %v5846_v62 = vsel %vm5844_vm11, %v5845_v30, %v5843_v60  ;;  %v5836_v17 = vsel %vm5835_vm12, %v5781_v57, %v5834_v34  ;;  %v5746_v21 = vpop.xlane.xlu1 %5745 }
 0xf5f   : > { %9317 = vrcp.f32 %v5846_v62  ;;  %v5839_v8 = vsel %vm5837_vm13, %v5838_v9, %v5836_v17  ;;  %v5770_v35 = vmul.f32 0.03125, %v5746_v21  ;;  %v5743_v3 = vpop.xlane.xlu0 %5742 }
 0xf60   : > { %9319 = vrcp.f32 %v5839_v8  ;;  %v5769_v53 = vmul.f32 0.03125, %v5743_v3 }
 0xf61   : > { %v5786_v49 = vadd.f32 1e-08, %v5770_v35 }
 0xf62   : > { %v9314_v55 = vpop.eup %9313  ;;  %v5785_v38 = vadd.f32 1e-08, %v5769_v53 }
 0xf63   : > { %v9316_v14 = vpop.eup %9315  ;;  %v5855_v36 = vmul.f32 %v9314_v55, %v5784_v58  ;;  %9321 = vrsqrt.f32 %v5786_v49  ;;  %vm5870_vm4 = vcmp.eq.f32.partialorder %v5786_v49, inf  ;;  %vm5872_vm5 = vcmp.eq.f32.partialorder %v5786_v49, 0.0 }
 0xf64   : > { %v5848_v6 = vmul.f32 %v9316_v14, %v5783_v31  ;;  %v5873_v42 = vand.u32 2147483648, %v5786_v49  ;;  %vm5863_vm6 = vcmp.eq.f32.partialorder %v5785_v38, inf  ;;  %v5866_v62 = vand.u32 2147483648, %v5785_v38 }
 0xf65   : > { %v5857_v51 = vsel %vm5856_vm14, %v5784_v58, %v5855_v36  ;;  %vm5865_vm7 = vcmp.eq.f32.partialorder %v5785_v38, 0.0 }
 0xf66   : > { %v5860_v2 = vsel %vm5858_vm15, %v5859_v26, %v5857_v51  ;;  %v5850_v25 = vsel %vm5849_vm2, %v5783_v31, %v5848_v6 }
 0xf67   : > { %9323 = vrcp.f32 %v5860_v2  ;;  %v5853_v23 = vsel %vm5851_vm3, %v5852_v44, %v5850_v25  ;;  %v5752_v0 = vpop.xlane.xlu1 %5751 }
 0xf68   : > { %9325 = vrcp.f32 %v5853_v23  ;;  %v5772_v7 = vmul.f32 0.03125, %v5752_v0  ;;  %v5749_v52 = vpop.xlane.xlu0 %5748 }
 0xf69   : > { %v9318_v63 = vpop.eup %9317  ;;  %9327 = vrsqrt.f32 %v5785_v38  ;;  %v5771_v29 = vmul.f32 0.03125, %v5749_v52 }
 0xf6a   : > { %v9320_v61 = vpop.eup %9319  ;;  %v5918_v4 = vmul.f32 %v9318_v63, %v12940_v59  ;;  %v5788_v37 = vadd.f32 1e-08, %v5772_v7 }
 0xf6b   : > { %v5916_v47 = vmul.f32 %v9320_v61, %v12943_v11  ;;  %v5787_v32 = vadd.f32 1e-08, %v5771_v29 }
 0xf6c   : > { %v5946_v41 = vmul.f32 %v13014_v24, %v5918_v4  ;;  %9329 = vrsqrt.f32 %v5788_v37  ;;  %vm5884_vm8 = vcmp.eq.f32.partialorder %v5788_v37, inf  ;;  %v5887_v26 = vand.u32 2147483648, %v5788_v37 }
 0xf6d   : > { %v5945_v57 = vmul.f32 %v13014_v24, %v5916_v47  ;;  %9331 = vrsqrt.f32 %v5787_v32  ;;  %v9322_v18 = vpop.eup %9321  ;;  %vm5886_vm9 = vcmp.eq.f32.partialorder %v5788_v37, 0.0  ;;  %vm5877_vm1 = vcmp.eq.f32.partialorder %v5787_v32, inf }
 0xf6e   : > { %v5869_v19 = vmul.f32 %v9322_v18, %v5786_v49  ;;  %v13071_v59 = vadd.f32 %v13021_v1, %v5946_v41  ;;  %v5880_v51 = vand.u32 2147483648, %v5787_v32  ;;  %vm5879_vm10 = vcmp.eq.f32.partialorder %v5787_v32, 0.0 }
 0xf6f   : > { %v13068_v13 = vadd.f32 %v13021_v1, %v5945_v57  ;;  %v5758_v50 = vpop.xlane.xlu1 %5757 }
 0xf70   : > { %v5774_v58 = vmul.f32 0.03125, %v5758_v50  ;;  %v5755_v31 = vpop.xlane.xlu0 %5754  ;;  %v5871_v56 = vsel %vm5870_vm4, %v5786_v49, %v5869_v19 }
 0xf71   : > { %v9324_v27 = vpop.eup %9323  ;;  %8349 = vmatprep.mubr.msk.f32.mxu0 %vm595_vm0, %v13068_v13  ;;  %v5773_v30 = vmul.f32 0.03125, %v5755_v31  ;;  %v5874_v60 = vsel %vm5872_vm5, %v5873_v42, %v5871_v56 }
 0xf72   : > { %v9326_v11 = vpop.eup %9325  ;;  %v5922_v33 = vmul.f32 %v9324_v27, %v12958_v10  ;;  %8350 = vmatmul.mubr.msk.f32.gmra.mrb[118].mxu0 %vm595_vm0, %v13071_v59  ;;  %v5790_v17 = vadd.f32 1e-08, %v5774_v58  ;;  %9333 = vrcp.f32 %v5874_v60 }
 0xf73   : > { %v9328_v39 = vpop.eup %9327  ;;  %v5920_v34 = vmul.f32 %v9326_v11, %v12961_v12  ;;  %v5789_v8 = vadd.f32 1e-08, %v5773_v30 }
 0xf74   : > { %v5862_v9 = vmul.f32 %v9328_v39, %v5785_v38  ;;  %v5948_v55 = vmul.f32 %v13014_v24, %v5922_v33  ;;  %9335 = vrsqrt.f32 %v5790_v17  ;;  %vm5898_vm11 = vcmp.eq.f32.partialorder %v5790_v17, inf }
 0xf75   : > { %v5947_v21 = vmul.f32 %v13014_v24, %v5920_v34  ;;  %9337 = vrsqrt.f32 %v5789_v8  ;;  %vm5900_vm12 = vcmp.eq.f32.partialorder %v5790_v17, 0.0  ;;  %v5901_v52 = vand.u32 2147483648, %v5790_v17 }
 0xf76   : > { %v5864_v10 = vsel %vm5863_vm6, %v5785_v38, %v5862_v9  ;;  %v9330_v3 = vpop.eup %9329  ;;  %v13085_v53 = vadd.f32 %v13021_v1, %v5948_v55  ;;  %vm5891_vm13 = vcmp.eq.f32.partialorder %v5789_v8, inf  ;;  %v5894_v47 = vand.u32 2147483648, %v5789_v8  ;;  %v6195_v9 = vld [vmem:[%s13687_s4 + $0x130] sm:$0xff] }
 0xf77   : > { %v5867_v35 = vsel %vm5865_vm7, %v5866_v62, %v5864_v10  ;;  %v13082_v14 = vadd.f32 %v13021_v1, %v5947_v21  ;;  %v9332_v12 = vpop.eup %9331  ;;  %v5883_v36 = vmul.f32 %v9330_v3, %v5788_v37  ;;  %vm5893_vm14 = vcmp.eq.f32.partialorder %v5789_v8, 0.0  ;;  %v6196_v62 = vld [vmem:[%s13687_s4 + $0x138] sm:$0xff] }
 0xf78   : > { %9339 = vrcp.f32 %v5867_v35  ;;  %v5876_v6 = vmul.f32 %v9332_v12, %v5787_v32 }
 0xf79   : > { %8352 = vmatprep.mubr.msk.f32.mxu0 %vm595_vm0, %v13082_v14  ;;  %v5885_v49 = vsel %vm5884_vm8, %v5788_v37, %v5883_v36 }
 0xf7a   : > { %8353 = vmatmul.mubr.msk.f32.gmra.mrb[120].mxu0 %vm595_vm0, %v13085_v53  ;;  %v5888_v44 = vsel %vm5886_vm9, %v5887_v26, %v5885_v49  ;;  %v5878_v38 = vsel %vm5877_vm1, %v5787_v32, %v5876_v6 }
 0xf7b   : > { %9341 = vrcp.f32 %v5888_v44  ;;  %v5881_v2 = vsel %vm5879_vm10, %v5880_v51, %v5878_v38 }
 0xf7c   : > { %9343 = vrcp.f32 %v5881_v2  ;;  %v9334_v25 = vpop.eup %9333 }
 0xf7d   : > { %v5926_v63 = vmul.f32 %v9334_v25, %v12970_v43 }
 0xf7e   : > { %v9336_v23 = vpop.eup %9335 }
 0xf7f   : > { %v9338_v0 = vpop.eup %9337  ;;  %v5897_v61 = vmul.f32 %v9336_v23, %v5790_v17  ;;  %v5950_v41 = vmul.f32 %v13014_v24, %v5926_v63 }
 0xf80   : > { %v5890_v4 = vmul.f32 %v9338_v0, %v5789_v8 }
 0xf81   : > { %v5899_v29 = vsel %vm5898_vm11, %v5790_v17, %v5897_v61  ;;  %v13099_v11 = vadd.f32 %v13021_v1, %v5950_v41 }
 0xf82   : > { %v9340_v7 = vpop.eup %9339  ;;  %v5902_v32 = vsel %vm5900_vm12, %v5901_v52, %v5899_v29  ;;  %v5892_v57 = vsel %vm5891_vm13, %v5789_v8, %v5890_v4  ;;  %v8632_v8 = vpack.c.bf16 %v6196_v62, %v6195_v9 }
 0xf83   : > { %v5924_v37 = vmul.f32 %v9340_v7, %v12973_v28  ;;  %9345 = vrcp.f32 %v5902_v32  ;;  %v5895_v18 = vsel %vm5893_vm14, %v5894_v47, %v5892_v57 }
 0xf84   : > { %9347 = vrcp.f32 %v5895_v18  ;;  %8633 = vmatprep.subr.bf16.mxu1 %v8632_v8 }
 0xf85   : > { %v5949_v43 = vmul.f32 %v13014_v24, %v5924_v37  ;;  %v9342_v27 = vpop.eup %9341  ;;  %8635 = vmatpush3.bf16.msra.mxu1 %v8632_v8 }
 0xf86   : > { %v9344_v50 = vpop.eup %9343  ;;  %v5930_v28 = vmul.f32 %v9342_v27, %v12982_v15 }
 0xf87   : > { %v13096_v19 = vadd.f32 %v13021_v1, %v5949_v43  ;;  %v5928_v42 = vmul.f32 %v9344_v50, %v12985_v46 }
 0xf88   : > { %v5952_v58 = vmul.f32 %v13014_v24, %v5930_v28 }
 0xf89   : > { %8355 = vmatprep.mubr.msk.f32.mxu0 %vm595_vm0, %v13096_v19  ;;  %v5951_v31 = vmul.f32 %v13014_v24, %v5928_v42 }
 0xf8a   : > { %8356 = vmatmul.mubr.msk.f32.gmra.mrb[122].mxu0 %vm595_vm0, %v13099_v11  ;;  %v13113_v39 = vadd.f32 %v13021_v1, %v5952_v58 }
 0xf8b   : > { %v13110_v33 = vadd.f32 %v13021_v1, %v5951_v31 }
 0xf8d   : > { %v9346_v56 = vpop.eup %9345  ;;  %8358 = vmatprep.mubr.msk.f32.mxu0 %vm595_vm0, %v13110_v33 }
 0xf8e   : > { %v9348_v15 = vpop.eup %9347  ;;  %8359 = vmatmul.mubr.msk.f32.gmra.mrb[124].mxu0 %vm595_vm0, %v13113_v39  ;;  %v5934_v46 = vmul.f32 %v9346_v56, %v12994_v45 }
 0xf8f   : > { %v5932_v30 = vmul.f32 %v9348_v15, %v12997_v5  ;;  %v7547_v5 = vld [vmem:[%s13688_s5 + $0x10] ss:$0 sm:$0xff] }
 0xf90   : > { %v5954_v34 = vmul.f32 %v13014_v24, %v5934_v46 }
 0xf91   : > { %v5953_v60 = vmul.f32 %v13014_v24, %v5932_v30 }
 0xf92   : > { %v13133_v45 = vadd.f32 %v13021_v1, %v5954_v34 }
 0xf93   : > { %v13130_v17 = vadd.f32 %v13021_v1, %v5953_v60 }
 0xf95   : > { %8361 = vmatprep.mubr.msk.f32.mxu0 %vm595_vm0, %v13130_v17 }
 0xf96   : > { %8362 = vmatmul.mubr.msk.f32.gmra.mrb[126].mxu0 %vm595_vm0, %v13133_v45 }
0x1010   : > { %v8342_v24 = vpop.f32.mrb[112].mxu0 }
0x1011   : > { %v6104_v21 = vadd.f32 %v8342_v24, %v7547_v5  ;;  %v6098_v55 = vpop.f32.mrb[113].mxu0 }
0x1012   : > { %v6099_v10 = vadd.f32 %v7547_v5, %v6098_v55  ;;  %v13161_v55 = vld [vmem:[%s13688_s5 + $0x11] ss:$0 sm:$0xff] }
0x1013   : > { %v6178_v3 = vmax.f32 %v6104_v21, 0.0 }
0x1014   : > { %v6177_v35 = vmax.f32 %v6099_v10, 0.0 }
0x1016   : > { %8372 = vmatprep.mubr.msk.f32.mxu1 %vm595_vm0, %v6177_v35 }
0x1017   : > { %8373 = vmatmul.mubr.msk.f32.vlgmr.msra.gmra.mrb[144].mxu1 %vm595_vm0, %v6178_v3 }
0x1018   : > { %v8345_v1 = vpop.f32.mrb[114].mxu0 }
0x1019   : > { %v6114_v12 = vadd.f32 %v8345_v1, %v7547_v5  ;;  %v6108_v36 = vpop.f32.mrb[115].mxu0 }
0x101a   : > { %v6109_v26 = vadd.f32 %v7547_v5, %v6108_v36 }
0x101b   : > { %v6180_v49 = vmax.f32 %v6114_v12, 0.0  ;;  %v9495_v12 = vld [vmem:[%s9752_s13 + $0x8] sm:$0xff] }
0x101c   : > { %v6179_v6 = vmax.f32 %v6109_v26, 0.0  ;;  %v9496_v26 = vld [vmem:[%s9752_s13] sm:$0xff] }
0x101e   : > { %8375 = vmatprep.mubr.msk.f32.mxu1 %vm595_vm0, %v6179_v6 }
0x101f   : > { %8376 = vmatmul.mubr.msk.f32.gmra.mrb[146].mxu1 %vm595_vm0, %v6180_v49 }
0x1029   : > { %v8348_v51 = vpop.f32.mrb[116].mxu0 }
0x102a   : > { %v6124_v44 = vadd.f32 %v8348_v51, %v7547_v5  ;;  %v6118_v38 = vpop.f32.mrb[117].mxu0 }
0x102b   : > { %v6119_v2 = vadd.f32 %v7547_v5, %v6118_v38 }
0x102c   : > { %v6182_v23 = vmax.f32 %v6124_v44, 0.0 }
0x102d   : > { %v6181_v25 = vmax.f32 %v6119_v2, 0.0 }
0x102f   : > { %8378 = vmatprep.mubr.msk.f32.mxu1 %vm595_vm0, %v6181_v25 }
0x1030   : > { %8379 = vmatmul.mubr.msk.f32.gmra.mrb[148].mxu1 %vm595_vm0, %v6182_v23  ;;  %v9497_v23 = vld [vmem:[%s9752_s13 + $0x18] sm:$0xff] }
0x1045   : > { %v8351_v63 = vpop.f32.mrb[118].mxu0 }
0x1046   : > { %v6134_v0 = vadd.f32 %v8351_v63, %v7547_v5  ;;  %v6128_v61 = vpop.f32.mrb[119].mxu0 }
0x1047   : > { %v6129_v7 = vadd.f32 %v7547_v5, %v6128_v61 }
0x1048   : > { %v6184_v4 = vmax.f32 %v6134_v0, 0.0  ;;  %v9498_v0 = vld [vmem:[%s9752_s13 + $0x10] sm:$0xff] }
0x1049   : > { %v6183_v52 = vmax.f32 %v6129_v7, 0.0 }
0x104b   : > { %8381 = vmatprep.mubr.msk.f32.mxu1 %vm595_vm0, %v6183_v52 }
0x104c   : > { %8382 = vmatmul.mubr.msk.f32.gmra.mrb[150].mxu1 %vm595_vm0, %v6184_v4 }
0x104d   : > { %v8354_v29 = vpop.f32.mrb[120].mxu0 }
0x104e   : > { %v6144_v47 = vadd.f32 %v8354_v29, %v7547_v5  ;;  %v6138_v37 = vpop.f32.mrb[121].mxu0 }
0x104f   : > { %v6139_v32 = vadd.f32 %v7547_v5, %v6138_v37 }
0x1050   : > { %v6186_v41 = vmax.f32 %v6144_v47, 0.0 }
0x1051   : > { %v6185_v57 = vmax.f32 %v6139_v32, 0.0  ;;  %v9499_v32 = vld [vmem:[%s9752_s13 + $0x28] sm:$0xff] }
0x1053   : > { %8384 = vmatprep.mubr.msk.f32.mxu1 %vm595_vm0, %v6185_v57 }
0x1054   : > { %8385 = vmatmul.mubr.msk.f32.gmra.mrb[152].mxu1 %vm595_vm0, %v6186_v41  ;;  %v9500_v41 = vld [vmem:[%s9752_s13 + $0x20] sm:$0xff] }
0x105d   : > { %v8357_v18 = vpop.f32.mrb[122].mxu0 }
0x105e   : > { %v6154_v43 = vadd.f32 %v8357_v18, %v7547_v5  ;;  %v6148_v27 = vpop.f32.mrb[123].mxu0 }
0x105f   : > { %v6149_v50 = vadd.f32 %v7547_v5, %v6148_v27 }
0x1060   : > { %v6188_v42 = vmax.f32 %v6154_v43, 0.0 }
0x1061   : > { %v6187_v28 = vmax.f32 %v6149_v50, 0.0  ;;  %v8360_v58 = vpop.f32.mrb[124].mxu0 }
0x1062   : > { %v6164_v31 = vadd.f32 %v8360_v58, %v7547_v5  ;;  %v6158_v56 = vpop.f32.mrb[125].mxu0 }
0x1063   : > { %8387 = vmatprep.mubr.msk.f32.mxu1 %vm595_vm0, %v6187_v28  ;;  %v6159_v15 = vadd.f32 %v7547_v5, %v6158_v56 }
0x1064   : > { %8388 = vmatmul.mubr.msk.f32.gmra.mrb[154].mxu1 %vm595_vm0, %v6188_v42  ;;  %v6190_v30 = vmax.f32 %v6164_v31, 0.0  ;;  %v9501_v31 = vld [vmem:[%s9752_s13 + $0x38] sm:$0xff] }
0x1065   : > { %v6189_v46 = vmax.f32 %v6159_v15, 0.0  ;;  %v9502_v15 = vld [vmem:[%s9752_s13 + $0x30] sm:$0xff] }
0x1067   : > { %8390 = vmatprep.mubr.msk.f32.mxu1 %vm595_vm0, %v6189_v46 }
0x1068   : > { %8391 = vmatmul.mubr.msk.f32.gmra.mrb[156].mxu1 %vm595_vm0, %v6190_v30 }
0x1069   : > { %v8363_v34 = vpop.f32.mrb[126].mxu0 }
0x106a   : > { %v6174_v60 = vadd.f32 %v8363_v34, %v7547_v5  ;;  %v6168_v9 = vpop.f32.mrb[127].mxu0 }
0x106b   : > { %v6169_v62 = vadd.f32 %v7547_v5, %v6168_v9 }
0x106c   : > { %v6192_v24 = vmax.f32 %v6174_v60, 0.0 }
0x106d   : > { %v6191_v8 = vmax.f32 %v6169_v62, 0.0 }
0x106f   : > { %8393 = vmatprep.mubr.msk.f32.mxu1 %vm595_vm0, %v6191_v8 }
0x1070   : > { %8394 = vmatmul.mubr.msk.f32.gmra.mrb[158].mxu1 %vm595_vm0, %v6192_v24  ;;  %v9503_v24 = vld [vmem:[%s9752_s13 + $0x48] sm:$0xff] }
0x10ea   : > { %v8374_v21 = vpop.f32.mrb[144].mxu1 }
0x10eb   : > { %v6391_v10 = vadd.f32 %v8374_v21, %v13029_v22  ;;  %v6311_v35 = vpop.f32.mrb[145].mxu1 }
0x10ec   : > { %v6390_v3 = vadd.f32 %v6311_v35, %v13026_v16 }
0x10ed   : > { %v6412_v1 = vadd.f32 %v13161_v55, %v6391_v10  ;;  %v9504_v10 = vld [vmem:[%s9752_s13 + $0x40] sm:$0xff] }
0x10ee   : > { %v6411_v5 = vadd.f32 %v13161_v55, %v6390_v3 }
0x10ef   : > { %v13168_v36 = vmul.f32 %v9495_v12, %v6412_v1 }
0x10f0   : > { %v13171_v6 = vmul.f32 %v9496_v26, %v6411_v5 }
0x10f1   : > { %v6448_v49 = vsel %vm595_vm0, %v13168_v36, 0.0 }
0x10f2   : > { %6449 = vadd.xlane.f32.xlu1 %v6448_v49  ;;  %v8377_v22 = vpop.f32.mrb[146].mxu1  ;;  %v6445_v16 = vsel %vm595_vm0, %v13171_v6, 0.0 }
0x10f3   : > { %v6393_v51 = vadd.f32 %v8377_v22, %v13043_v48  ;;  %6446 = vadd.xlane.f32.xlu0 %v6445_v16  ;;  %v6321_v44 = vpop.f32.mrb[147].mxu1  ;;  %v9505_v22 = vld [vmem:[%s9752_s13 + $0x58] sm:$0xff] }
0x10f4   : > { %v6392_v38 = vadd.f32 %v6321_v44, %v13040_v40  ;;  %v9506_v44 = vld [vmem:[%s9752_s13 + $0x50] sm:$0xff] }
0x10f5   : > { %v6414_v2 = vadd.f32 %v13161_v55, %v6393_v51 }
0x10f6   : > { %v6413_v25 = vadd.f32 %v13161_v55, %v6392_v38 }
0x10f7   : > { %v13182_v63 = vmul.f32 %v9497_v23, %v6414_v2 }
0x10f8   : > { %v13185_v61 = vmul.f32 %v9498_v0, %v6413_v25 }
0x10f9   : > { %v6454_v7 = vsel %vm595_vm0, %v13182_v63, 0.0 }
0x10fa   : > { %6455 = vadd.xlane.f32.xlu1 %v6454_v7  ;;  %v6451_v48 = vsel %vm595_vm0, %v13185_v61, 0.0 }
0x10fb   : > { %6452 = vadd.xlane.f32.xlu0 %v6451_v48  ;;  %v9507_v48 = vld [vmem:[%s9752_s13 + $0x68] sm:$0xff] }
0x1103   : > { %v8380_v40 = vpop.f32.mrb[148].mxu1 }
0x1104   : > { %v6395_v52 = vadd.f32 %v8380_v40, %v13057_v54  ;;  %v6331_v4 = vpop.f32.mrb[149].mxu1 }
0x1105   : > { %v6394_v29 = vadd.f32 %v6331_v4, %v13054_v20 }
0x1106   : > { %v6416_v47 = vadd.f32 %v13161_v55, %v6395_v52  ;;  %v9508_v52 = vld [vmem:[%s9752_s13 + $0x60] sm:$0xff] }
0x1107   : > { %v6415_v37 = vadd.f32 %v13161_v55, %v6394_v29 }
0x1108   : > { %v13196_v57 = vmul.f32 %v9499_v32, %v6416_v47 }
0x1109   : > { %v13199_v18 = vmul.f32 %v9500_v41, %v6415_v37 }
0x110a   : > { %v6460_v43 = vsel %vm595_vm0, %v13196_v57, 0.0 }
0x110b   : > { %6461 = vadd.xlane.f32.xlu1 %v6460_v43  ;;  %v6457_v54 = vsel %vm595_vm0, %v13199_v18, 0.0 }
0x110c   : > { %6458 = vadd.xlane.f32.xlu0 %v6457_v54  ;;  %v9509_v54 = vld [vmem:[%s9752_s13 + $0x78] sm:$0xff] }
0x111f   : > { %v8383_v20 = vpop.f32.mrb[150].mxu1 }
0x1120   : > { %v6397_v27 = vadd.f32 %v8383_v20, %v13071_v59  ;;  %v6341_v50 = vpop.f32.mrb[151].mxu1 }
0x1121   : > { %v6396_v28 = vadd.f32 %v6341_v50, %v13068_v13 }
0x1122   : > { %v6418_v42 = vadd.f32 %v13161_v55, %v6397_v27  ;;  %v9510_v27 = vld [vmem:[%s9752_s13 + $0x70] sm:$0xff]  ;;  %s13372_s13 = sand.u32 1, %s9565_s25  }
0x1123   : > { %v6417_v58 = vadd.f32 %v13161_v55, %v6396_v28  ;;  %s7301_s19 = sshll.u32 %s13372_s13, 8  ;;  %s7302_s14 = sshll.u32 %s13372_s13, 1 }
0x1124   : > { %v13210_v56 = vmul.f32 %v9501_v31, %v6418_v42  ;;  %s13389_s16 = scalar_lea.vmem [#allocation2], %s7301_s19  ;;  %s467_s18 = scalar_lea.vmem [#allocation3], %s7302_s14 }
0x1125   : > { %v13213_v46 = vmul.f32 %v9502_v15, %v6417_v58  ;;  %s7205_s20 = sshll.u32 %s467_s18, 4  ;;  %s7192_s28 = scalar_lea.sflag [#allocation4], %s13372_s13  ;;  %s13641_s20 = int_to_ptr.vmem [resolvable:$true] %s7205_s20 }
0x1126   : > { %v6466_v30 = vsel %vm595_vm0, %v13210_v56, 0.0  ;;  %s9511_s19 = scalar_lea.vmem %s13641_s20, 32  ;;  %p9518_p3 = scmp.lt.s32.totalorder %s13641_s20, %s9516_s8 }
0x1127   : > { %6467 = vadd.xlane.f32.xlu1 %v6466_v30  ;;  %v8386_v59 = vpop.f32.mrb[152].mxu1  ;;  %v6463_v13 = vsel %vm595_vm0, %v13213_v46, 0.0  ;;  %p9512_p0 = scmp.ne.s32.totalorder %s13641_s20, %s9511_s19  ;;  %p9519_p4 = scmp.lt.s32.totalorder %s9517_s9, %s9511_s19 }
0x1128   : > { %v6399_v34 = vadd.f32 %v8386_v59, %v13085_v53  ;;  %6464 = vadd.xlane.f32.xlu0 %v6463_v13  ;;  %v6351_v60 = vpop.f32.mrb[153].mxu1 }
0x1129   : > { %v6398_v9 = vadd.f32 %v6351_v60, %v13082_v14  ;;  %p9513_p1 = pnand %p9512_p0, %p9657_p6  ;;  %p9520_p5 = por %p9519_p4, %p9518_p3 }
0x112a   : > { %v6420_v62 = vadd.f32 %v13161_v55, %v6399_v34 }
0x112b   : > { %v6419_v8 = vadd.f32 %v13161_v55, %v6398_v9  ;;  %p9514_p2 = pneg %p9513_p1 }
0x112c   : > { %v13224_v21 = vmul.f32 %v9503_v24, %v6420_v62 }
0x112d   : > { %v13227_v35 = vmul.f32 %v9504_v10, %v6419_v8  ;;  %p9521_p7 = pnand %p9520_p5, %p9514_p2 }
0x112e   : > { %v6472_v3 = vsel %vm595_vm0, %v13224_v21, 0.0 }
0x112f   : > { %6473 = vadd.xlane.f32.xlu1 %v6472_v3  ;;  %v6469_v53 = vsel %vm595_vm0, %v13227_v35, 0.0 }
0x1130   : > { %6470 = vadd.xlane.f32.xlu0 %v6469_v53 }
0x1137   : > { %v8389_v14 = vpop.f32.mrb[154].mxu1 }
0x1138   : > { %v6401_v1 = vadd.f32 %v8389_v14, %v13099_v11  ;;  %v6361_v5 = vpop.f32.mrb[155].mxu1 }
0x1139   : > { %v6400_v12 = vadd.f32 %v6361_v5, %v13096_v19 }
0x113a   : > { %v6422_v26 = vadd.f32 %v13161_v55, %v6401_v1 }
0x113b   : > { %v6421_v49 = vadd.f32 %v13161_v55, %v6400_v12  ;;  %v8392_v51 = vpop.f32.mrb[156].mxu1 }
0x113c   : > { %v13238_v16 = vmul.f32 %v9505_v22, %v6422_v26  ;;  %v6403_v11 = vadd.f32 %v8392_v51, %v13113_v39  ;;  %v6371_v25 = vpop.f32.mrb[157].mxu1 }
0x113d   : > { %v13241_v38 = vmul.f32 %v9506_v44, %v6421_v49  ;;  %v6402_v23 = vadd.f32 %v6371_v25, %v13110_v33 }
0x113e   : > { %v6478_v2 = vsel %vm595_vm0, %v13238_v16, 0.0  ;;  %v6424_v0 = vadd.f32 %v13161_v55, %v6403_v11 }
0x113f   : > { %6479 = vadd.xlane.f32.xlu1 %v6478_v2  ;;  %v6475_v19 = vsel %vm595_vm0, %v13241_v38, 0.0  ;;  %v6423_v7 = vadd.f32 %v13161_v55, %v6402_v23 }
0x1140   : > { %6476 = vadd.xlane.f32.xlu0 %v6475_v19  ;;  %v13252_v40 = vmul.f32 %v9507_v48, %v6424_v0 }
0x1141   : > { %v13255_v4 = vmul.f32 %v9508_v52, %v6423_v7 }
0x1142   : > { %v6484_v39 = vsel %vm595_vm0, %v13252_v40, 0.0 }
0x1143   : > { %6485 = vadd.xlane.f32.xlu1 %v6484_v39  ;;  %v8395_v29 = vpop.f32.mrb[158].mxu1  ;;  %v6481_v33 = vsel %vm595_vm0, %v13255_v4, 0.0 }
0x1144   : > { %v6405_v47 = vadd.f32 %v8395_v29, %v13133_v45  ;;  %6482 = vadd.xlane.f32.xlu0 %v6481_v33  ;;  %v6381_v37 = vpop.f32.mrb[159].mxu1 }
0x1145   : > { %v6404_v32 = vadd.f32 %v6381_v37, %v13130_v17 }
0x1146   : > { %v6426_v41 = vadd.f32 %v13161_v55, %v6405_v47 }
0x1147   : > { %v6425_v43 = vadd.f32 %v13161_v55, %v6404_v32 }
0x1148   : > { %v13266_v20 = vmul.f32 %v9509_v54, %v6426_v41 }
0x1149   : > { %v13269_v50 = vmul.f32 %v9510_v27, %v6425_v43 }
0x114a   : > { %v6490_v28 = vsel %vm595_vm0, %v13266_v20, 0.0 }
0x114b   : > { %6491 = vadd.xlane.f32.xlu1 %v6490_v28  ;;  %v6487_v45 = vsel %vm595_vm0, %v13269_v50, 0.0 }
0x114c   : > { %6488 = vadd.xlane.f32.xlu0 %v6487_v45 }
0x117f   : > { %v6450_v42 = vpop.xlane.xlu1 %6449 }
0x1180   : > { %v6494_v17 = vmul.f32 0.03125, %v6450_v42  ;;  %v6447_v58 = vpop.xlane.xlu0 %6446 }
0x1181   : > { %v6493_v31 = vmul.f32 0.03125, %v6447_v58 }
0x1182   : > { %v13276_v55 = vsub.f32 %v13168_v36, %v6494_v17 }
0x1183   : > { %v13279_v15 = vsub.f32 %v13171_v6, %v6493_v31 }
0x1184   : > { %v6526_v30 = vmul.f32 %v13276_v55, %v13276_v55 }
0x1185   : > { %v6525_v59 = vmul.f32 %v13279_v15, %v13279_v15 }
0x1186   : > { %v6544_v13 = vsel %vm595_vm0, %v6526_v30, 0.0 }
0x1187   : > { %v6456_v34 = vpop.xlane.xlu1 %6455  ;;  %6545 = vadd.xlane.f32.xlu1 %v6544_v13  ;;  %v6541_v60 = vsel %vm595_vm0, %v6525_v59, 0.0 }
0x1188   : > { %v6496_v9 = vmul.f32 0.03125, %v6456_v34  ;;  %6542 = vadd.xlane.f32.xlu0 %v6541_v60  ;;  %v6453_v62 = vpop.xlane.xlu0 %6452 }
0x1189   : > { %v6495_v36 = vmul.f32 0.03125, %v6453_v62 }
0x118a   : > { %v13288_v8 = vsub.f32 %v13182_v63, %v6496_v9 }
0x118b   : > { %v13291_v6 = vsub.f32 %v13185_v61, %v6495_v36 }
0x118c   : > { %v6528_v24 = vmul.f32 %v13288_v8, %v13288_v8 }
0x118d   : > { %v6527_v10 = vmul.f32 %v13291_v6, %v13291_v6 }
0x118e   : > { %v6550_v3 = vsel %vm595_vm0, %v6528_v24, 0.0 }
0x118f   : > { %6551 = vadd.xlane.f32.xlu1 %v6550_v3  ;;  %v6547_v53 = vsel %vm595_vm0, %v6527_v10, 0.0 }
0x1190   : > { %6548 = vadd.xlane.f32.xlu0 %v6547_v53 }
0x1198   : > { %v6462_v14 = vpop.xlane.xlu1 %6461 }
0x1199   : > { %v6498_v1 = vmul.f32 0.03125, %v6462_v14  ;;  %v6459_v5 = vpop.xlane.xlu0 %6458 }
0x119a   : > { %v6497_v63 = vmul.f32 0.03125, %v6459_v5 }
0x119b   : > { %v13300_v12 = vsub.f32 %v13196_v57, %v6498_v1 }
0x119c   : > { %v13303_v61 = vsub.f32 %v13199_v18, %v6497_v63 }
0x119d   : > { %v6530_v26 = vmul.f32 %v13300_v12, %v13300_v12 }
0x119e   : > { %v6529_v49 = vmul.f32 %v13303_v61, %v13303_v61 }
0x119f   : > { %v6556_v22 = vsel %vm595_vm0, %v6530_v26, 0.0 }
0x11a0   : > { %6557 = vadd.xlane.f32.xlu1 %v6556_v22  ;;  %v6553_v51 = vsel %vm595_vm0, %v6529_v49, 0.0 }
0x11a1   : > { %6554 = vadd.xlane.f32.xlu0 %v6553_v51 }
0x11b4   : > { %v6468_v44 = vpop.xlane.xlu1 %6467 }
0x11b5   : > { %v6500_v2 = vmul.f32 0.03125, %v6468_v44  ;;  %v6465_v11 = vpop.xlane.xlu0 %6464 }
0x11b6   : > { %v6499_v57 = vmul.f32 0.03125, %v6465_v11 }
0x11b7   : > { %v13312_v25 = vsub.f32 %v13210_v56, %v6500_v2 }
0x11b8   : > { %v13315_v18 = vsub.f32 %v13213_v46, %v6499_v57 }
0x11b9   : > { %v6532_v19 = vmul.f32 %v13312_v25, %v13312_v25 }
0x11ba   : > { %v6531_v23 = vmul.f32 %v13315_v18, %v13315_v18 }
0x11bb   : > { %v6562_v0 = vsel %vm595_vm0, %v6532_v19, 0.0 }
0x11bc   : > { %v6474_v7 = vpop.xlane.xlu1 %6473  ;;  %6563 = vadd.xlane.f32.xlu1 %v6562_v0  ;;  %v6559_v48 = vsel %vm595_vm0, %v6531_v23, 0.0 }
0x11bd   : > { %v6502_v52 = vmul.f32 0.03125, %v6474_v7  ;;  %6560 = vadd.xlane.f32.xlu0 %v6559_v48  ;;  %v6471_v39 = vpop.xlane.xlu0 %6470 }
0x11be   : > { %v6501_v56 = vmul.f32 0.03125, %v6471_v39 }
0x11bf   : > { %v13324_v29 = vsub.f32 %v13224_v21, %v6502_v52 }
0x11c0   : > { %v13327_v46 = vsub.f32 %v13227_v35, %v6501_v56 }
0x11c1   : > { %v6534_v33 = vmul.f32 %v13324_v29, %v13324_v29 }
0x11c2   : > { %v6533_v47 = vmul.f32 %v13327_v46, %v13327_v46 }
0x11c3   : > { %v6568_v37 = vsel %vm595_vm0, %v6534_v33, 0.0 }
0x11c4   : > { %6569 = vadd.xlane.f32.xlu1 %v6568_v37  ;;  %v6565_v32 = vsel %vm595_vm0, %v6533_v47, 0.0 }
0x11c5   : > { %6566 = vadd.xlane.f32.xlu0 %v6565_v32 }
0x11cc   : > { %v6480_v41 = vpop.xlane.xlu1 %6479 }
0x11cd   : > { %v6504_v43 = vmul.f32 0.03125, %v6480_v41  ;;  %v6477_v54 = vpop.xlane.xlu0 %6476 }
0x11ce   : > { %v6503_v21 = vmul.f32 0.03125, %v6477_v54 }
0x11cf   : > { %v13336_v27 = vsub.f32 %v13238_v16, %v6504_v43 }
0x11d0   : > { %v13339_v35 = vsub.f32 %v13241_v38, %v6503_v21  ;;  %v6486_v45 = vpop.xlane.xlu1 %6485 }
0x11d1   : > { %v6536_v28 = vmul.f32 %v13336_v27, %v13336_v27  ;;  %v6506_v17 = vmul.f32 0.03125, %v6486_v45  ;;  %v6483_v31 = vpop.xlane.xlu0 %6482 }
0x11d2   : > { %v6535_v42 = vmul.f32 %v13339_v35, %v13339_v35  ;;  %v6505_v59 = vmul.f32 0.03125, %v6483_v31 }
0x11d3   : > { %v6574_v58 = vsel %vm595_vm0, %v6536_v28, 0.0  ;;  %v13348_v16 = vsub.f32 %v13252_v40, %v6506_v17 }
0x11d4   : > { %6575 = vadd.xlane.f32.xlu1 %v6574_v58  ;;  %v6571_v30 = vsel %vm595_vm0, %v6535_v42, 0.0  ;;  %v13351_v38 = vsub.f32 %v13255_v4, %v6505_v59 }
0x11d5   : > { %6572 = vadd.xlane.f32.xlu0 %v6571_v30  ;;  %v6538_v13 = vmul.f32 %v13348_v16, %v13348_v16 }
0x11d6   : > { %v6537_v34 = vmul.f32 %v13351_v38, %v13351_v38 }
0x11d7   : > { %v6580_v60 = vsel %vm595_vm0, %v6538_v13, 0.0 }
0x11d8   : > { %6581 = vadd.xlane.f32.xlu1 %v6580_v60  ;;  %v6492_v9 = vpop.xlane.xlu1 %6491  ;;  %v6577_v62 = vsel %vm595_vm0, %v6537_v34, 0.0 }
0x11d9   : > { %v6508_v36 = vmul.f32 0.03125, %v6492_v9  ;;  %6578 = vadd.xlane.f32.xlu0 %v6577_v62  ;;  %v6489_v40 = vpop.xlane.xlu0 %6488  ;;  %v13378_v62 = vld [vmem:[%s13688_s5 + $0x12] ss:$0 sm:$0xff] }
0x11da   : > { %v6507_v24 = vmul.f32 0.03125, %v6489_v40 }
0x11db   : > { %v13360_v10 = vsub.f32 %v13266_v20, %v6508_v36 }
0x11dc   : > { %v13363_v4 = vsub.f32 %v13269_v50, %v6507_v24  ;;  %v13385_v24 = vld [vmem:[%s13688_s5 + $0x13] ss:$0 sm:$0xff] }
0x11dd   : > { %v6540_v3 = vmul.f32 %v13360_v10, %v13360_v10 }
0x11de   : > { %v6539_v53 = vmul.f32 %v13363_v4, %v13363_v4 }
0x11df   : > { %v6586_v14 = vsel %vm595_vm0, %v6540_v3, 0.0 }
0x11e0   : > { %6587 = vadd.xlane.f32.xlu1 %v6586_v14  ;;  %v6583_v1 = vsel %vm595_vm0, %v6539_v53, 0.0  ;;  %v6806_v14 = vld [vmem:[%s13389_s16 + $0x8] sm:$0xff] }
0x11e1   : > { %6584 = vadd.xlane.f32.xlu0 %v6583_v1  ;;  %v6805_v1 = vld [vmem:[%s13389_s16] sm:$0xff] }
0x1214   : > { %v6546_v5 = vpop.xlane.xlu1 %6545 }
0x1215   : > { %v6590_v63 = vmul.f32 0.03125, %v6546_v5  ;;  %v6543_v26 = vpop.xlane.xlu0 %6542  ;;  %v6822_v5 = vld [vmem:[%s13389_s16 + $0x88] sm:$0xff] }
0x1216   : > { %v6589_v20 = vmul.f32 0.03125, %v6543_v26  ;;  %v6821_v26 = vld [vmem:[%s13389_s16 + $0x80] sm:$0xff] }
0x1217   : > { %v6606_v49 = vadd.f32 1e-08, %v6590_v63 }
0x1218   : > { %v6605_v22 = vadd.f32 1e-08, %v6589_v20 }
0x1219   : > { %9349 = vrsqrt.f32 %v6606_v49  ;;  %vm6630_vm15 = vcmp.eq.f32.partialorder %v6606_v49, inf  ;;  %v6633_v7 = vand.u32 2147483648, %v6606_v49  ;;  %vm6632_vm2 = vcmp.eq.f32.partialorder %v6606_v49, 0.0 }
0x121a   : > { %9351 = vrsqrt.f32 %v6605_v22  ;;  %vm6623_vm3 = vcmp.eq.f32.partialorder %v6605_v22, inf  ;;  %v6626_v39 = vand.u32 2147483648, %v6605_v22  ;;  %vm6625_vm4 = vcmp.eq.f32.partialorder %v6605_v22, 0.0 }
0x121c   : > { %v6552_v50 = vpop.xlane.xlu1 %6551 }
0x121d   : > { %v6592_v51 = vmul.f32 0.03125, %v6552_v50  ;;  %v6549_v44 = vpop.xlane.xlu0 %6548 }
0x121e   : > { %v6591_v2 = vmul.f32 0.03125, %v6549_v44 }
0x121f   : > { %v6608_v11 = vadd.f32 1e-08, %v6592_v51 }
0x1220   : > { %v6607_v57 = vadd.f32 1e-08, %v6591_v2 }
0x1221   : > { %9353 = vrsqrt.f32 %v6608_v11  ;;  %vm6644_vm5 = vcmp.eq.f32.partialorder %v6608_v11, inf  ;;  %v6647_v43 = vand.u32 2147483648, %v6608_v11  ;;  %vm6646_vm6 = vcmp.eq.f32.partialorder %v6608_v11, 0.0 }
0x1222   : > { %9355 = vrsqrt.f32 %v6607_v57  ;;  %vm6637_vm7 = vcmp.eq.f32.partialorder %v6607_v57, inf  ;;  %v6640_v28 = vand.u32 2147483648, %v6607_v57  ;;  %vm6639_vm8 = vcmp.eq.f32.partialorder %v6607_v57, 0.0 }
0x1223   : > { %v9350_v19 = vpop.eup %9349 }
0x1224   : > { %v9352_v23 = vpop.eup %9351  ;;  %v6629_v0 = vmul.f32 %v9350_v19, %v6606_v49 }
0x1225   : > { %v6622_v48 = vmul.f32 %v9352_v23, %v6605_v22 }
0x1226   : > { %v6631_v52 = vsel %vm6630_vm15, %v6606_v49, %v6629_v0 }
0x1227   : > { %v6624_v56 = vsel %vm6623_vm3, %v6605_v22, %v6622_v48  ;;  %v6634_v33 = vsel %vm6632_vm2, %v6633_v7, %v6631_v52  ;;  %v6824_v52 = vld [vmem:[%s13389_s16 + $0x98] sm:$0xff] }
0x1228   : > { %9357 = vrcp.f32 %v6634_v33  ;;  %v6627_v47 = vsel %vm6625_vm4, %v6626_v39, %v6624_v56  ;;  %v6808_v39 = vld [vmem:[%s13389_s16 + $0x18] sm:$0xff] }
0x1229   : > { %9359 = vrcp.f32 %v6627_v47 }
0x122b   : > { %v9354_v37 = vpop.eup %9353 }
0x122c   : > { %v9356_v32 = vpop.eup %9355  ;;  %v6643_v41 = vmul.f32 %v9354_v37, %v6608_v11 }
0x122d   : > { %v6636_v54 = vmul.f32 %v9356_v32, %v6607_v57  ;;  %v6558_v45 = vpop.xlane.xlu1 %6557 }
0x122e   : > { %v6645_v21 = vsel %vm6644_vm5, %v6608_v11, %v6643_v41  ;;  %v6594_v17 = vmul.f32 0.03125, %v6558_v45  ;;  %v6555_v58 = vpop.xlane.xlu0 %6554  ;;  %v6823_v45 = vld [vmem:[%s13389_s16 + $0x90] sm:$0xff] }
0x122f   : > { %v6638_v42 = vsel %vm6637_vm7, %v6607_v57, %v6636_v54  ;;  %v6648_v31 = vsel %vm6646_vm6, %v6647_v43, %v6645_v21  ;;  %v6593_v30 = vmul.f32 0.03125, %v6555_v58 }
0x1230   : > { %9361 = vrcp.f32 %v6648_v31  ;;  %v6641_v59 = vsel %vm6639_vm8, %v6640_v28, %v6638_v42  ;;  %v6610_v13 = vadd.f32 1e-08, %v6594_v17  ;;  %v6807_v42 = vld [vmem:[%s13389_s16 + $0x10] sm:$0xff] }
0x1231   : > { %9363 = vrcp.f32 %v6641_v59  ;;  %v6609_v60 = vadd.f32 1e-08, %v6593_v30 }
0x1232   : > { %v9358_v34 = vpop.eup %9357  ;;  %9365 = vrsqrt.f32 %v6610_v13  ;;  %vm6658_vm9 = vcmp.eq.f32.partialorder %v6610_v13, inf  ;;  %vm6660_vm1 = vcmp.eq.f32.partialorder %v6610_v13, 0.0 }
0x1233   : > { %v9360_v9 = vpop.eup %9359  ;;  %9367 = vrsqrt.f32 %v6609_v60  ;;  %v6736_v36 = vmul.f32 %v9358_v34, %v13276_v55  ;;  %vm6651_vm10 = vcmp.eq.f32.partialorder %v6609_v60, inf  ;;  %v6654_v33 = vand.u32 2147483648, %v6609_v60 }
0x1234   : > { %v6734_v40 = vmul.f32 %v9360_v9, %v13279_v15  ;;  %vm6653_vm11 = vcmp.eq.f32.partialorder %v6609_v60, 0.0 }
0x1235   : > { %v6770_v3 = vmul.f32 %v13378_v62, %v6736_v36 }
0x1236   : > { %v6769_v53 = vmul.f32 %v13378_v62, %v6734_v40 }
0x1237   : > { %v6790_v55 = vadd.f32 %v13385_v24, %v6770_v3 }
0x1238   : > { %v6789_v15 = vadd.f32 %v13385_v24, %v6769_v53 }
0x1239   : > { %v6838_v49 = vmul.f32 %v6806_v14, %v6790_v55  ;;  %v6854_v50 = vmul.f32 %v6822_v5, %v6790_v55 }
0x123a   : > { %v9362_v63 = vpop.eup %9361  ;;  %v6837_v22 = vmul.f32 %v6805_v1, %v6789_v15  ;;  %v6853_v19 = vmul.f32 %v6821_v26, %v6789_v15  ;;  %v6826_v26 = vld [vmem:[%s13389_s16 + $0xa8] sm:$0xff] }
0x123b   : > { %v9364_v20 = vpop.eup %9363  ;;  %v6740_v51 = vmul.f32 %v9362_v63, %v13288_v8  ;;  %v6872_v11 = vsel %vm595_vm0, %v6838_v49, 0.0  ;;  %v6661_v8 = vand.u32 2147483648, %v6610_v13  ;;  %v6920_v47 = vsel %vm595_vm0, %v6854_v50, 0.0 }
0x123c   : > { %v6738_v44 = vmul.f32 %v9364_v20, %v13291_v6  ;;  %v9366_v2 = vpop.eup %9365  ;;  %v6869_v57 = vsel %vm595_vm0, %v6837_v22, 0.0  ;;  %6873 = vadd.xlane.f32.xlu1 %v6872_v11  ;;  %v6917_v41 = vsel %vm595_vm0, %v6853_v19, 0.0  ;;  %v6810_v20 = vld [vmem:[%s13389_s16 + $0x28] sm:$0xff] }
0x123d   : > { %v9368_v23 = vpop.eup %9367  ;;  %v6657_v0 = vmul.f32 %v9366_v2, %v6610_v13  ;;  %6870 = vadd.xlane.f32.xlu0 %v6869_v57  ;;  %v6772_v7 = vmul.f32 %v13378_v62, %v6740_v51 }
0x123e   : > { %v6771_v48 = vmul.f32 %v13378_v62, %v6738_v44  ;;  %v6650_v6 = vmul.f32 %v9368_v23, %v6609_v60  ;;  %v6825_v23 = vld [vmem:[%s13389_s16 + $0xa0] sm:$0xff] }
0x123f   : > { %v6659_v56 = vsel %vm6658_vm9, %v6610_v13, %v6657_v0  ;;  %v6792_v37 = vadd.f32 %v13385_v24, %v6772_v7  ;;  %v6809_v0 = vld [vmem:[%s13389_s16 + $0x20] sm:$0xff] }
0x1240   : > { %v6652_v32 = vsel %vm6651_vm10, %v6609_v60, %v6650_v6  ;;  %v6791_v43 = vadd.f32 %v13385_v24, %v6771_v48  ;;  %v6662_v54 = vsel %vm6660_vm1, %v6661_v8, %v6659_v56  ;;  %6921 = vadd.xlane.f32.xlu1 %v6920_v47 }
0x1241   : > { %6918 = vadd.xlane.f32.xlu0 %v6917_v41  ;;  %v6856_v21 = vmul.f32 %v6824_v52, %v6792_v37  ;;  %v6840_v28 = vmul.f32 %v6808_v39, %v6792_v37  ;;  %9369 = vrcp.f32 %v6662_v54  ;;  %v6655_v17 = vsel %vm6653_vm11, %v6654_v33, %v6652_v32 }
0x1242   : > { %9371 = vrcp.f32 %v6655_v17  ;;  %v6855_v30 = vmul.f32 %v6823_v45, %v6791_v43  ;;  %v6839_v59 = vmul.f32 %v6807_v42, %v6791_v43 }
0x1243   : > { %v6926_v58 = vsel %vm595_vm0, %v6856_v21, 0.0  ;;  %v6878_v31 = vsel %vm595_vm0, %v6840_v28, 0.0 }
0x1244   : > { %6927 = vadd.xlane.f32.xlu1 %v6926_v58  ;;  %v6923_v13 = vsel %vm595_vm0, %v6855_v30, 0.0  ;;  %v6875_v34 = vsel %vm595_vm0, %v6839_v59, 0.0 }
0x1245   : > { %6879 = vadd.xlane.f32.xlu0 %v6878_v31 }
0x1248   : > { %6924 = vadd.xlane.f32.xlu1 %v6923_v13 }
0x1249   : > { %v6564_v60 = vpop.xlane.xlu1 %6563  ;;  %6876 = vadd.xlane.f32.xlu0 %v6875_v34 }
0x124a   : > { %v6596_v9 = vmul.f32 0.03125, %v6564_v60  ;;  %v6561_v36 = vpop.xlane.xlu0 %6560 }
0x124b   : > { %v9370_v40 = vpop.eup %9369  ;;  %v6595_v3 = vmul.f32 0.03125, %v6561_v36 }
0x124c   : > { %v6612_v53 = vadd.f32 1e-08, %v6596_v9  ;;  %v6744_v14 = vmul.f32 %v9370_v40, %v13300_v12  ;;  %v9372_v1 = vpop.eup %9371 }
0x124d   : > { %v6611_v55 = vadd.f32 1e-08, %v6595_v3  ;;  %v6742_v5 = vmul.f32 %v9372_v1, %v13303_v61 }
0x124e   : > { %9373 = vrsqrt.f32 %v6612_v53  ;;  %v6774_v15 = vmul.f32 %v13378_v62, %v6744_v14  ;;  %vm6672_vm12 = vcmp.eq.f32.partialorder %v6612_v53, inf  ;;  %vm6674_vm13 = vcmp.eq.f32.partialorder %v6612_v53, 0.0 }
0x124f   : > { %9375 = vrsqrt.f32 %v6611_v55  ;;  %v6773_v51 = vmul.f32 %v13378_v62, %v6742_v5  ;;  %v6675_v56 = vand.u32 2147483648, %v6612_v53  ;;  %vm6665_vm14 = vcmp.eq.f32.partialorder %v6611_v55, inf }
0x1250   : > { %v6794_v50 = vadd.f32 %v13385_v24, %v6774_v15  ;;  %vm6667_vm15 = vcmp.eq.f32.partialorder %v6611_v55, 0.0  ;;  %v6668_v37 = vand.u32 2147483648, %v6611_v55 }
0x1251   : > { %v6570_v63 = vpop.xlane.xlu1 %6569  ;;  %v6793_v57 = vadd.f32 %v13385_v24, %v6773_v51  ;;  %v6828_v51 = vld [vmem:[%s13389_s16 + $0xb8] sm:$0xff] }
0x1252   : > { %v6598_v49 = vmul.f32 0.03125, %v6570_v63  ;;  %v6567_v22 = vpop.xlane.xlu0 %6566  ;;  %v6858_v2 = vmul.f32 %v6826_v26, %v6794_v50  ;;  %v6842_v11 = vmul.f32 %v6810_v20, %v6794_v50 }
0x1253   : > { %v6597_v12 = vmul.f32 0.03125, %v6567_v22  ;;  %v6857_v8 = vmul.f32 %v6825_v23, %v6793_v57  ;;  %v6841_v6 = vmul.f32 %v6809_v0, %v6793_v57 }
0x1254   : > { %v6614_v44 = vadd.f32 1e-08, %v6598_v49  ;;  %v6932_v7 = vsel %vm595_vm0, %v6858_v2, 0.0  ;;  %v6884_v48 = vsel %vm595_vm0, %v6842_v11, 0.0 }
0x1255   : > { %v6613_v19 = vadd.f32 1e-08, %v6597_v12  ;;  %6933 = vadd.xlane.f32.xlu1 %v6932_v7  ;;  %6885 = vadd.xlane.f32.xlu0 %v6884_v48  ;;  %v6929_v41 = vsel %vm595_vm0, %v6857_v8, 0.0  ;;  %v6881_v43 = vsel %vm595_vm0, %v6841_v6, 0.0  ;;  %v6812_v12 = vld [vmem:[%s13389_s16 + $0x38] sm:$0xff]  ;;  %v6811_v7 = vld [vmem:[%s13389_s16 + $0x30] sm:$0xff] }
0x1256   : > { %9377 = vrsqrt.f32 %v6614_v44  ;;  %vm6686_vm2 = vcmp.eq.f32.partialorder %v6614_v44, inf  ;;  %v6689_v34 = vand.u32 2147483648, %v6614_v44  ;;  %vm6688_vm4 = vcmp.eq.f32.partialorder %v6614_v44, 0.0 }
0x1257   : > { %9379 = vrsqrt.f32 %v6613_v19  ;;  %vm6679_vm3 = vcmp.eq.f32.partialorder %v6613_v19, inf  ;;  %v6682_v40 = vand.u32 2147483648, %v6613_v19  ;;  %vm6681_vm5 = vcmp.eq.f32.partialorder %v6613_v19, 0.0 }
0x1258   : > { %v9374_v61 = vpop.eup %9373 }
0x1259   : > { %v9376_v52 = vpop.eup %9375  ;;  %v6671_v39 = vmul.f32 %v9374_v61, %v6612_v53  ;;  %6930 = vadd.xlane.f32.xlu1 %v6929_v41  ;;  %6882 = vadd.xlane.f32.xlu0 %v6881_v43  ;;  %v6827_v61 = vld [vmem:[%s13389_s16 + $0xb0] sm:$0xff] }
0x125a   : > { %v6664_v33 = vmul.f32 %v9376_v52, %v6611_v55 }
0x125b   : > { %v6673_v47 = vsel %vm6672_vm12, %v6612_v53, %v6671_v39 }
0x125c   : > { %v6666_v32 = vsel %vm6665_vm14, %v6611_v55, %v6664_v33  ;;  %v6676_v54 = vsel %vm6674_vm13, %v6675_v56, %v6673_v47 }
0x125d   : > { %9381 = vrcp.f32 %v6676_v54  ;;  %v6669_v21 = vsel %vm6667_vm15, %v6668_v37, %v6666_v32 }
0x125e   : > { %9383 = vrcp.f32 %v6669_v21 }
0x1260   : > { %v9378_v28 = vpop.eup %9377 }
0x1261   : > { %v6576_v45 = vpop.xlane.xlu1 %6575  ;;  %v9380_v42 = vpop.eup %9379  ;;  %v6685_v17 = vmul.f32 %v9378_v28, %v6614_v44 }
0x1262   : > { %v6600_v58 = vmul.f32 0.03125, %v6576_v45  ;;  %v6573_v31 = vpop.xlane.xlu0 %6572  ;;  %v6678_v30 = vmul.f32 %v9380_v42, %v6613_v19 }
0x1263   : > { %v6599_v59 = vmul.f32 0.03125, %v6573_v31  ;;  %v6687_v13 = vsel %vm6686_vm2, %v6614_v44, %v6685_v17 }
0x1264   : > { %v13429_v60 = vadd.f32 1e-08, %v6600_v58  ;;  %v6680_v9 = vsel %vm6679_vm3, %v6613_v19, %v6678_v30  ;;  %v6690_v3 = vsel %vm6688_vm4, %v6689_v34, %v6687_v13  ;;  %vm7015_vm3 = vcmask 195712  }
0x1265   : > { %v13431_v36 = vadd.f32 1e-08, %v6599_v59  ;;  %v6582_v53 = vpop.xlane.xlu1 %6581  ;;  %v6683_v15 = vsel %vm6681_vm5, %v6682_v40, %v6680_v9  ;;  %vm7022_vm4 = vcmask 261312   ;;  %vm7029_vm5 = vcmask 326912  }
0x1266   : > { %9385 = vrsqrt.f32 %v13429_v60  ;;  %v6602_v1 = vmul.f32 0.03125, %v6582_v53  ;;  %v6579_v55 = vpop.xlane.xlu0 %6578  ;;  %vm6700_vm6 = vcmp.eq.f32.partialorder %v13429_v60, inf  ;;  %vm6702_vm7 = vcmp.eq.f32.partialorder %v13429_v60, 0.0 }
0x1267   : > { %9387 = vrsqrt.f32 %v13431_v36  ;;  %v9382_v14 = vpop.eup %9381  ;;  %v6601_v63 = vmul.f32 0.03125, %v6579_v55  ;;  %v6703_v6 = vand.u32 2147483648, %v13429_v60  ;;  %vm6693_vm8 = vcmp.eq.f32.partialorder %v13431_v36, inf }
0x1268   : > { %v9384_v5 = vpop.eup %9383  ;;  %v6748_v26 = vmul.f32 %v9382_v14, %v13312_v25  ;;  %9389 = vrcp.f32 %v6690_v3  ;;  %v13436_v20 = vadd.f32 1e-08, %v6602_v1  ;;  %vm6695_vm9 = vcmp.eq.f32.partialorder %v13431_v36, 0.0  ;;  %v6814_v1 = vld [vmem:[%s13389_s16 + $0x48] sm:$0xff] }
0x1269   : > { %v6746_v49 = vmul.f32 %v9384_v5, %v13315_v18  ;;  %9391 = vrcp.f32 %v6683_v15  ;;  %v13439_v22 = vadd.f32 1e-08, %v6601_v63  ;;  %v6696_v28 = vand.u32 2147483648, %v13431_v36  ;;  %v6829_v63 = vld [vmem:[%s13389_s16 + $0xc0] sm:$0xff] }
0x126a   : > { %v6776_v50 = vmul.f32 %v13378_v62, %v6748_v26  ;;  %9393 = vrsqrt.f32 %v13436_v20  ;;  %vm6714_vm1 = vcmp.eq.f32.partialorder %v13436_v20, inf  ;;  %vm6716_vm10 = vcmp.eq.f32.partialorder %v13436_v20, 0.0  ;;  %v6813_v26 = vld [vmem:[%s13389_s16 + $0x40] sm:$0xff] }
0x126b   : > { %9395 = vrsqrt.f32 %v13439_v22  ;;  %v6775_v44 = vmul.f32 %v13378_v62, %v6746_v49  ;;  %v6717_v17 = vand.u32 2147483648, %v13436_v20  ;;  %vm6707_vm11 = vcmp.eq.f32.partialorder %v13439_v22, inf }
0x126c   : > { %v6796_v25 = vadd.f32 %v13385_v24, %v6776_v50  ;;  %v6710_v14 = vand.u32 2147483648, %v13439_v22  ;;  %vm6709_vm12 = vcmp.eq.f32.partialorder %v13439_v22, 0.0 }
0x126d   : > { %v6588_v18 = vpop.xlane.xlu1 %6587  ;;  %v6795_v0 = vadd.f32 %v13385_v24, %v6775_v44 }
0x126e   : > { %v6604_v11 = vmul.f32 0.03125, %v6588_v18  ;;  %v6585_v57 = vpop.xlane.xlu0 %6584  ;;  %v6860_v19 = vmul.f32 %v6828_v51, %v6796_v25  ;;  %v6844_v23 = vmul.f32 %v6812_v12, %v6796_v25 }
0x126f   : > { %v6603_v52 = vmul.f32 0.03125, %v6585_v57  ;;  %v6859_v41 = vmul.f32 %v6827_v61, %v6795_v0  ;;  %v6843_v43 = vmul.f32 %v6811_v7, %v6795_v0 }
0x1270   : > { %v9386_v2 = vpop.eup %9385  ;;  %v13456_v56 = vadd.f32 1e-08, %v6604_v11  ;;  %v6938_v33 = vsel %vm595_vm0, %v6860_v19, 0.0  ;;  %v6890_v47 = vsel %vm595_vm0, %v6844_v23, 0.0 }
0x1271   : > { %v9388_v48 = vpop.eup %9387  ;;  %v6699_v8 = vmul.f32 %v9386_v2, %v13429_v60  ;;  %v13461_v32 = vadd.f32 1e-08, %v6603_v52  ;;  %6939 = vadd.xlane.f32.xlu1 %v6938_v33  ;;  %6891 = vadd.xlane.f32.xlu0 %v6890_v47  ;;  %v6935_v58 = vsel %vm595_vm0, %v6859_v41, 0.0  ;;  %v6887_v31 = vsel %vm595_vm0, %v6843_v43, 0.0  ;;  %v6816_v41 = vld [vmem:[%s13389_s16 + $0x58] sm:$0xff] }
0x1272   : > { %v6692_v39 = vmul.f32 %v9388_v48, %v13431_v36  ;;  %v9390_v37 = vpop.eup %9389  ;;  %9397 = vrsqrt.f32 %v13456_v56  ;;  %vm6728_vm13 = vcmp.eq.f32.partialorder %v13456_v56, inf  ;;  %vm6730_vm14 = vcmp.eq.f32.partialorder %v13456_v56, 0.0 }
0x1273   : > { %v9392_v54 = vpop.eup %9391  ;;  %v6701_v21 = vsel %vm6700_vm6, %v13429_v60, %v6699_v8  ;;  %9399 = vrsqrt.f32 %v13461_v32  ;;  %v6752_v30 = vmul.f32 %v9390_v37, %v13324_v29  ;;  %v6731_v11 = vand.u32 2147483648, %v13456_v56 }
0x1274   : > { %v6694_v45 = vsel %vm6693_vm8, %v13431_v36, %v6692_v39  ;;  %v9394_v42 = vpop.eup %9393  ;;  %v6750_v34 = vmul.f32 %v9392_v54, %v13327_v46  ;;  %v6704_v9 = vsel %vm6702_vm7, %v6703_v6, %v6701_v21  ;;  %v6830_v46 = vld [vmem:[%s13389_s16 + $0xc8] sm:$0xff]  ;;  %vm6721_vm15 = vcmp.eq.f32.partialorder %v13461_v32, inf }
0x1275   : > { %v9396_v59 = vpop.eup %9395  ;;  %v6713_v13 = vmul.f32 %v9394_v42, %v13436_v20  ;;  %6936 = vadd.xlane.f32.xlu1 %v6935_v58  ;;  %6888 = vadd.xlane.f32.xlu0 %v6887_v31  ;;  %v6778_v3 = vmul.f32 %v13378_v62, %v6752_v30  ;;  %9401 = vrcp.f32 %v6704_v9  ;;  %v6697_v29 = vsel %vm6695_vm9, %v6696_v28, %v6694_v45  ;;  %v6815_v45 = vld [vmem:[%s13389_s16 + $0x50] sm:$0xff]  ;;  %v6834_v30 = vld [vmem:[%s13389_s16 + $0xe8] sm:$0xff] }
0x1276   : > { %v6706_v40 = vmul.f32 %v9396_v59, %v13439_v22  ;;  %v6777_v60 = vmul.f32 %v13378_v62, %v6750_v34  ;;  %9403 = vrcp.f32 %v6697_v29  ;;  %vm6723_vm2 = vcmp.eq.f32.partialorder %v13461_v32, 0.0  ;;  %v6818_v59 = vld [vmem:[%s13389_s16 + $0x68] sm:$0xff] }
0x1277   : > { %v6715_v53 = vsel %vm6714_vm1, %v13436_v20, %v6713_v13  ;;  %v6798_v15 = vadd.f32 %v13385_v24, %v6778_v3  ;;  %v6724_v23 = vand.u32 2147483648, %v13461_v32  ;;  %vm7036_vm6 = vcmask 392512  }
0x1278   : > { %v6708_v55 = vsel %vm6707_vm11, %v13439_v22, %v6706_v40  ;;  %v6718_v36 = vsel %vm6716_vm10, %v6717_v17, %v6715_v53  ;;  %v6797_v5 = vadd.f32 %v13385_v24, %v6777_v60  ;;  %vm7043_vm7 = vcmask 458112  }
0x1279   : > { %9405 = vrcp.f32 %v6718_v36  ;;  %v6711_v49 = vsel %vm6709_vm12, %v6710_v14, %v6708_v55  ;;  %v6862_v50 = vmul.f32 %v6830_v46, %v6798_v15  ;;  %v6846_v51 = vmul.f32 %v6814_v1, %v6798_v15  ;;  %v6833_v15 = vld [vmem:[%s13389_s16 + $0xe0] sm:$0xff] }
0x127a   : > { %9407 = vrcp.f32 %v6711_v49  ;;  %v6861_v22 = vmul.f32 %v6829_v63, %v6797_v5  ;;  %v6845_v18 = vmul.f32 %v6813_v26, %v6797_v5  ;;  %v6817_v36 = vld [vmem:[%s13389_s16 + $0x60] sm:$0xff]  ;;  %v6835_v49 = vld [vmem:[%s13389_s16 + $0xf0] sm:$0xff]  ;;  %vm7050_vm8 = vcmask 523712  }
0x127b   : > { %v6944_v25 = vsel %vm595_vm0, %v6862_v50, 0.0  ;;  %v6896_v44 = vsel %vm595_vm0, %v6846_v51, 0.0  ;;  %v6819_v50 = vld [vmem:[%s13389_s16 + $0x70] sm:$0xff]  ;;  %vm7057_vm9 = vcmask 589312   ;;  %vm7064_vm1 = vcmask 654912  }
0x127c   : > { %v9398_v12 = vpop.eup %9397  ;;  %6945 = vadd.xlane.f32.xlu1 %v6944_v25  ;;  %6897 = vadd.xlane.f32.xlu0 %v6896_v44  ;;  %v6941_v7 = vsel %vm595_vm0, %v6861_v22, 0.0  ;;  %v6893_v48 = vsel %vm595_vm0, %v6845_v18, 0.0  ;;  %vm7071_vm10 = vcmask 720512   ;;  %vm7078_vm11 = vcmask 786112  }
0x127d   : > { %v9400_v2 = vpop.eup %9399  ;;  %v6727_v20 = vmul.f32 %v9398_v12, %v13456_v56  ;;  %vm7085_vm12 = vcmask 851712  }
0x127e   : > { %v6720_v57 = vmul.f32 %v9400_v2, %v13461_v32 }
0x127f   : > { %v6729_v19 = vsel %vm6728_vm13, %v13456_v56, %v6727_v20  ;;  %v9402_v0 = vpop.eup %9401  ;;  %v6836_v20 = vld [vmem:[%s13389_s16 + $0xf8] sm:$0xff]  ;;  %vm7092_vm13 = vcmask 917312  }
0x1280   : > { %v6722_v61 = vsel %vm6721_vm15, %v13461_v32, %v6720_v57  ;;  %v6732_v8 = vsel %vm6730_vm14, %v6731_v11, %v6729_v19  ;;  %v9404_v6 = vpop.eup %9403  ;;  %6942 = vadd.xlane.f32.xlu1 %v6941_v7  ;;  %6894 = vadd.xlane.f32.xlu0 %v6893_v48  ;;  %v6756_v52 = vmul.f32 %v9402_v0, %v13336_v27  ;;  %v6832_v32 = vld [vmem:[%s13389_s16 + $0xd8] sm:$0xff]  ;;  %vm7099_vm14 = vcmask 982912  }
0x1281   : > { %v6725_v39 = vsel %vm6723_vm2, %v6724_v23, %v6722_v61  ;;  %9409 = vrcp.f32 %v6732_v8  ;;  %v6754_v56 = vmul.f32 %v9404_v6, %v13339_v35  ;;  %v6831_v35 = vld [vmem:[%s13389_s16 + $0xd0] sm:$0xff]  ;;  %v6820_v11 = vld [vmem:[%s13389_s16 + $0x78] sm:$0xff]  ;;  %vm7106_vm15 = vcmask 1048512  }
0x1282   : > { %9411 = vrcp.f32 %v6725_v39  ;;  %v6780_v47 = vmul.f32 %v13378_v62, %v6756_v52  ;;  %vm7187_vm2 = vcmask 1041409  }
0x1283   : > { %v9406_v33 = vpop.eup %9405  ;;  %v6779_v43 = vmul.f32 %v13378_v62, %v6754_v56 }
0x1284   : > { %v9408_v37 = vpop.eup %9407  ;;  %v6760_v54 = vmul.f32 %v9406_v33, %v13348_v16  ;;  %v6800_v27 = vadd.f32 %v13385_v24, %v6780_v47 }
0x1285   : > { %v6758_v21 = vmul.f32 %v9408_v37, %v13351_v38  ;;  %v6799_v28 = vadd.f32 %v13385_v24, %v6779_v43 }
0x1286   : > { %v6782_v42 = vmul.f32 %v13378_v62, %v6760_v54  ;;  %v6864_v17 = vmul.f32 %v6832_v32, %v6800_v27  ;;  %v6848_v58 = vmul.f32 %v6816_v41, %v6800_v27  ;;  %v13966_v54 = vlaneseq }
0x1287   : > { %v6781_v13 = vmul.f32 %v13378_v62, %v6758_v21  ;;  %v6863_v38 = vmul.f32 %v6831_v35, %v6799_v28  ;;  %v6847_v9 = vmul.f32 %v6815_v45, %v6799_v28 }
0x1288   : > { %v6802_v31 = vadd.f32 %v13385_v24, %v6782_v42  ;;  %v6950_v16 = vsel %vm595_vm0, %v6864_v17, 0.0  ;;  %v6902_v34 = vsel %vm595_vm0, %v6848_v58, 0.0  ;;  %v13566_v27 = vand.u32 127, %v13966_v54  ;;  %v13967_v42 = vld [vmem:[#allocation41_spill] sm:$0xff] }
0x1289   : > { %6951 = vadd.xlane.f32.xlu1 %v6950_v16  ;;  %6903 = vadd.xlane.f32.xlu0 %v6902_v34  ;;  %v6801_v14 = vadd.f32 %v13385_v24, %v6781_v13  ;;  %v6947_v46 = vsel %vm595_vm0, %v6863_v38, 0.0  ;;  %v6899_v1 = vsel %vm595_vm0, %v6847_v9, 0.0 }
0x128a   : > { %v6866_v3 = vmul.f32 %v6834_v30, %v6802_v31  ;;  %v6850_v29 = vmul.f32 %v6818_v59, %v6802_v31  ;;  %v7003_v35 = vadd.s32 4294967288, %v13566_v27  ;;  %v7010_v45 = vadd.s32 4294967280, %v13566_v27 }
0x128b   : > { %v9410_v40 = vpop.eup %9409  ;;  %v6865_v51 = vmul.f32 %v6833_v15, %v6801_v14  ;;  %v6849_v12 = vmul.f32 %v6817_v36, %v6801_v14  ;;  %v7001_v58 = vsub.s32 %v13566_v27, %v13967_v42  ;;  %v7024_v30 = vadd.s32 4294967264, %v13566_v27 }
0x128c   : > { %v9412_v53 = vpop.eup %9411  ;;  %v6764_v55 = vmul.f32 %v9410_v40, %v13360_v10  ;;  %v6956_v5 = vsel %vm595_vm0, %v6866_v3, 0.0  ;;  %v6908_v63 = vsel %vm595_vm0, %v6850_v29, 0.0  ;;  %v7006_v17 = vsub.s32 %v7003_v35, %v13967_v42 }
0x128d   : > { %v6762_v60 = vmul.f32 %v9412_v53, %v13363_v4  ;;  %6948 = vadd.xlane.f32.xlu1 %v6947_v46  ;;  %6900 = vadd.xlane.f32.xlu0 %v6899_v1  ;;  %v6953_v22 = vsel %vm595_vm0, %v6865_v51, 0.0  ;;  %v6905_v18 = vsel %vm595_vm0, %v6849_v12, 0.0  ;;  %v7013_v31 = vsub.s32 %v7010_v45, %v13967_v42 }
0x128e   : > { %v6784_v10 = vmul.f32 %v13378_v62, %v6764_v55  ;;  %v7017_v16 = vadd.s32 4294967272, %v13566_v27  ;;  %v7038_v34 = vadd.s32 4294967248, %v13566_v27  ;;  %v7027_v14 = vsub.s32 %v7024_v30, %v13967_v42 }
0x128f   : > { %v6783_v26 = vmul.f32 %v13378_v62, %v6762_v60  ;;  %v7031_v1 = vadd.s32 4294967256, %v13566_v27  ;;  %v7045_v60 = vadd.s32 4294967240, %v13566_v27 }
0x1290   : > { %v6804_v2 = vadd.f32 %v13385_v24, %v6784_v10  ;;  %v7020_v46 = vsub.s32 %v7017_v16, %v13967_v42 }
0x1291   : > { %v6803_v4 = vadd.f32 %v13385_v24, %v6783_v26  ;;  %6957 = vadd.xlane.f32.xlu1 %v6956_v5  ;;  %6909 = vadd.xlane.f32.xlu0 %v6908_v63  ;;  %v7041_v63 = vsub.s32 %v7038_v34, %v13967_v42  ;;  %v7052_v26 = vadd.s32 4294967232, %v13566_v27  ;;  %v7094_v34 = vadd.s32 4294967184, %v13566_v27 }
0x1292   : > { %v6868_v23 = vmul.f32 %v6836_v20, %v6804_v2  ;;  %v6852_v62 = vmul.f32 %v6820_v11, %v6804_v2 }
0x1293   : > { %v6867_v25 = vmul.f32 %v6835_v49, %v6803_v4  ;;  %v6851_v44 = vmul.f32 %v6819_v50, %v6803_v4  ;;  %v7055_v11 = vsub.s32 %v7052_v26, %v13967_v42 }
0x1294   : > { %v6962_v0 = vsel %vm595_vm0, %v6868_v23, 0.0  ;;  %v6914_v61 = vsel %vm595_vm0, %v6852_v62, 0.0 }
0x1295   : > { %6954 = vadd.xlane.f32.xlu1 %v6953_v22  ;;  %6906 = vadd.xlane.f32.xlu0 %v6905_v18  ;;  %v6959_v57 = vsel %vm595_vm0, %v6867_v25, 0.0  ;;  %v6911_v19 = vsel %vm595_vm0, %v6851_v44, 0.0  ;;  %vm7008_vm0 = vcmask 130112   ;;  %v7034_v25 = vsub.s32 %v7031_v1, %v13967_v42 }
0x1296   : > { %v7048_v44 = vsub.s32 %v7045_v60, %v13967_v42  ;;  %v7097_v60 = vsub.s32 %v7094_v34, %v13967_v42 }
0x1299   : > { %6960 = vadd.xlane.f32.xlu1 %v6959_v57  ;;  %6912 = vadd.xlane.f32.xlu0 %v6911_v19  ;;  %v7066_v57 = vadd.s32 4294967216, %v13566_v27 }
0x129d   : > { %6963 = vadd.xlane.f32.xlu1 %v6962_v0  ;;  %6915 = vadd.xlane.f32.xlu0 %v6914_v61 }
0x12c9   : > { %v6874_v7 = vpop.xlane.xlu1 %6873 }
0x12ca   : > { %v6871_v24 = vpop.xlane.xlu0 %6870  ;;  %v7007_v38 = vrot.slane %v6874_v7, %v7006_v17 }
0x12cb   : > { %v7002_v9 = vrot.slane %v6871_v24, %v7001_v58  ;;  %v7059_v24 = vadd.s32 4294967224, %v13566_v27 }
0x12cd   : > { %v6922_v48 = vpop.xlane.xlu1 %6921  ;;  %v7009_v36 = vsel %vm7008_vm0, %v7007_v38, %v7002_v9  ;;  %v7062_v35 = vsub.s32 %v7059_v24, %v13967_v42 }
0x12ce   : > { %v6919_v8 = vpop.xlane.xlu0 %6918  ;;  %v7115_v40 = vrot.slane %v6922_v48, %v7006_v17  ;;  %v7073_v48 = vadd.s32 4294967208, %v13566_v27 }
0x12cf   : > { %v7111_v3 = vrot.slane %v6919_v8, %v7001_v58 }
0x12d0   : > { %v7076_v45 = vsub.s32 %v7073_v48, %v13967_v42 }
0x12d1   : > { %v6928_v6 = vpop.xlane.xlu1 %6927  ;;  %v7116_v5 = vsel %vm7008_vm0, %v7115_v40, %v7111_v3 }
0x12d2   : > { %v6880_v52 = vpop.xlane.xlu0 %6879  ;;  %v7125_v4 = vrot.slane %v6928_v6, %v7020_v46 }
0x12d3   : > { %v7021_v10 = vrot.slane %v6880_v52, %v7020_v46 }
0x12d5   : > { %v6925_v39 = vpop.xlane.xlu1 %6924 }
0x12d6   : > { %v6877_v56 = vpop.xlane.xlu0 %6876  ;;  %v7120_v29 = vrot.slane %v6925_v39, %v7013_v31 }
0x12d7   : > { %v7014_v53 = vrot.slane %v6877_v56, %v7013_v31  ;;  %v7069_v56 = vsub.s32 %v7066_v57, %v13967_v42 }
0x12d8   : > { %v7121_v49 = vsel %vm7015_vm3, %v7120_v29, %v7116_v5  ;;  %v7087_v29 = vadd.s32 4294967192, %v13566_v27 }
0x12d9   : > { %v7016_v50 = vsel %vm7015_vm3, %v7014_v53, %v7009_v36  ;;  %v7126_v2 = vsel %vm7022_vm4, %v7125_v4, %v7121_v49 }
0x12da   : > { %v7023_v20 = vsel %vm7022_vm4, %v7021_v10, %v7016_v50  ;;  %v7090_v26 = vsub.s32 %v7087_v29, %v13967_v42 }
0x12e2   : > { %v13557_v33 = vpop.xlane.xlu1 %6933  ;;  %v13559_v47 = vpop.xlane.xlu0 %6885 }
0x12e3   : > { %v7135_v61 = vrot.slane %v13557_v33, %v7034_v25  ;;  %v7035_v7 = vrot.slane %v13559_v47, %v7034_v25 }
0x12e6   : > { %v6931_v37 = vpop.xlane.xlu1 %6930  ;;  %v6883_v32 = vpop.xlane.xlu0 %6882 }
0x12e7   : > { %v7130_v51 = vrot.slane %v6931_v37, %v7027_v14  ;;  %v7028_v12 = vrot.slane %v6883_v32, %v7027_v14  ;;  %v7080_v37 = vadd.s32 4294967200, %v13566_v27 }
0x12e9   : > { %v7131_v19 = vsel %vm7029_vm5, %v7130_v51, %v7126_v2  ;;  %v7030_v23 = vsel %vm7029_vm5, %v7028_v12, %v7023_v20  ;;  %v7083_v16 = vsub.s32 %v7080_v37, %v13967_v42 }
0x12ea   : > { %v7136_v52 = vsel %vm7036_vm6, %v7135_v61, %v7131_v19  ;;  %v7037_v39 = vsel %vm7036_vm6, %v7035_v7, %v7030_v23 }
0x12fe   : > { %v13561_v41 = vpop.xlane.xlu1 %6939  ;;  %v13563_v43 = vpop.xlane.xlu0 %6891 }
0x1302   : > { %v13568_v21 = vpop.xlane.xlu1 %6936  ;;  %v13570_v28 = vpop.xlane.xlu0 %6888 }
0x1303   : > { %v7140_v62 = vrot.slane %v13568_v21, %v7041_v63  ;;  %v7042_v0 = vrot.slane %v13570_v28, %v7041_v63  ;;  %v7145_v21 = vrot.slane %v13561_v41, %v7048_v44  ;;  %v7049_v28 = vrot.slane %v13563_v43, %v7048_v44 }
0x1305   : > { %v7141_v32 = vsel %vm7043_vm7, %v7140_v62, %v7136_v52  ;;  %v7044_v33 = vsel %vm7043_vm7, %v7042_v0, %v7037_v39 }
0x1306   : > { %v7146_v31 = vsel %vm7050_vm8, %v7145_v21, %v7141_v32  ;;  %v7051_v30 = vsel %vm7050_vm8, %v7049_v28, %v7044_v33 }
0x1309   : > { %v13579_v59 = vpop.xlane.xlu1 %6945  ;;  %v13581_v13 = vpop.xlane.xlu0 %6897 }
0x130a   : > { %v7155_v40 = vrot.slane %v13579_v59, %v7062_v35  ;;  %v7063_v3 = vrot.slane %v13581_v13, %v7062_v35 }
0x130d   : > { %v6943_v55 = vpop.xlane.xlu1 %6942  ;;  %v6895_v15 = vpop.xlane.xlu0 %6894 }
0x130e   : > { %v7150_v54 = vrot.slane %v6943_v55, %v7055_v11  ;;  %v7056_v47 = vrot.slane %v6895_v15, %v7055_v11  ;;  %v7101_v55 = vadd.s32 4294967176, %v13566_v27 }
0x1310   : > { %v7151_v38 = vsel %vm7057_vm9, %v7150_v54, %v7146_v31  ;;  %v7058_v41 = vsel %vm7057_vm9, %v7056_v47, %v7051_v30  ;;  %v7104_v27 = vsub.s32 %v7101_v55, %v13967_v42 }
0x1311   : > { %v7156_v46 = vsel %vm7064_vm1, %v7155_v40, %v7151_v38  ;;  %v7065_v1 = vsel %vm7064_vm1, %v7063_v3, %v7058_v41 }
0x1316   : > { %v13593_v22 = vpop.xlane.xlu1 %6951  ;;  %v13595_v18 = vpop.xlane.xlu0 %6903 }
0x1317   : > { %v7165_v13 = vrot.slane %v13593_v22, %v7076_v45  ;;  %v7077_v63 = vrot.slane %v13595_v18, %v7076_v45 }
0x131a   : > { %v6949_v8 = vpop.xlane.xlu1 %6948  ;;  %v6901_v6 = vpop.xlane.xlu0 %6900 }
0x131b   : > { %v7160_v9 = vrot.slane %v6949_v8, %v7069_v56  ;;  %v7070_v43 = vrot.slane %v6901_v6, %v7069_v56 }
0x131d   : > { %v7161_v15 = vsel %vm7071_vm10, %v7160_v9, %v7156_v46  ;;  %v7072_v36 = vsel %vm7071_vm10, %v7070_v43, %v7065_v1 }
0x131e   : > { %v6958_v17 = vpop.xlane.xlu1 %6957  ;;  %v6910_v58 = vpop.xlane.xlu0 %6909  ;;  %v7166_v51 = vsel %vm7078_vm11, %v7165_v13, %v7161_v15  ;;  %v7079_v12 = vsel %vm7078_vm11, %v7077_v63, %v7072_v36 }
0x131f   : > { %v7175_v22 = vrot.slane %v6958_v17, %v7090_v26  ;;  %v7091_v2 = vrot.slane %v6910_v58, %v7090_v26 }
0x1322   : > { %v6955_v53 = vpop.xlane.xlu1 %6954  ;;  %v6907_v14 = vpop.xlane.xlu0 %6906 }
0x1323   : > { %v7170_v5 = vrot.slane %v6955_v53, %v7083_v16  ;;  %v7084_v59 = vrot.slane %v6907_v14, %v7083_v16 }
0x1325   : > { %v7171_v4 = vsel %vm7085_vm12, %v7170_v5, %v7166_v51  ;;  %v7086_v10 = vsel %vm7085_vm12, %v7084_v59, %v7079_v12 }
0x1326   : > { %v6961_v49 = vpop.xlane.xlu1 %6960  ;;  %v6913_v50 = vpop.xlane.xlu0 %6912  ;;  %v7176_v11 = vsel %vm7092_vm13, %v7175_v22, %v7171_v4  ;;  %v7093_v42 = vsel %vm7092_vm13, %v7091_v2, %v7086_v10 }
0x1327   : > { %v7180_v25 = vrot.slane %v6961_v49, %v7097_v60  ;;  %v7098_v44 = vrot.slane %v6913_v50, %v7097_v60 }
0x1329   : > { %v7181_v23 = vsel %vm7099_vm14, %v7180_v25, %v7176_v11  ;;  %v7100_v62 = vsel %vm7099_vm14, %v7098_v44, %v7093_v42 }
0x132a   : > { %v6964_v18 = vpop.xlane.xlu1 %6963  ;;  %v6916_v20 = vpop.xlane.xlu0 %6915 }
0x132b   : > { %v7185_v57 = vrot.slane %v6964_v18, %v7104_v27  ;;  %v7105_v19 = vrot.slane %v6916_v20, %v7104_v27 }
0x132d   : > { %v7186_v0 = vsel %vm7106_vm15, %v7185_v57, %v7181_v23  ;;  %v7107_v61 = vsel %vm7106_vm15, %v7105_v19, %v7100_v62 }
0x132e   : > { %v7188_v7 = vsel %vm7187_vm2, %v7186_v0, %v7107_v61 }
0x132f   : > { %7190 = vst [vmem:[%s467_s18] sm:$0x3] %v7188_v7 }
0x1330   : > { %9524 = shalt.err (!%p9521_p7)
}
0x1331   : > { %s9525_s13 = scalar_lea.hbm %s13639_s23, 32  ;;  %s9529_s14 = scalar_lea.hbm %s13690_s7, 64 }
0x1332   : > { %p9526_p10 = scmp.ne.s32.totalorder %s13639_s23, %s9525_s13  ;;  %p9530_p13 = scmp.lt.u32.totalorder %s13639_s23, %s13690_s7 }
0x1333   : > { %p9531_p0 = scmp.lt.u32.totalorder %s9529_s14, %s9525_s13  ;;  %p9533_p2 = scmp.lt.u32.totalorder %s9525_s13, %s13639_s23 }
0x1334   : > { %p9527_p11 = pnand %p9526_p10, %p9657_p6 }
0x1335   : > { %p9532_p1 = por %p9531_p0, %p9530_p13 }
0x1336   : > { %p9528_p12 = pneg %p9527_p11 }
0x1337   : > { %p9534_p3 = por %p9533_p2, %p9532_p1 }
0x1339   : > { %p9535_p4 = pnand %p9534_p3, %p9528_p12 }
0x133b   : > { %9538 = shalt.err (!%p9535_p4)
}
0x133c   : > { %8636 = dma.vmem_to_hbm [thread:$0]  (%p9657_p6), %s13641_s20, 32, %s13639_s23, %s7192_s28  }
0x133d PF: > { %s7217_s21 = sand.u32 1, %s9561_s24   ;;  %p8639_p5 = pnand %p7296_p9, %p9661_p8 }
0x133e   : > { %s7218_s22 = scalar_lea.sflag [#allocation4], %s7217_s21 }
0x133f   : > { %9556 = dma.done.wait (!%p8639_p5), %s7218_s22, 32  }
0x1340   : > { %9558 = vsyncadd (!%p8639_p5), %s7218_s22, 4294967264  ;;  %p17_p7 = scmp.ge.s32.totalorder %s9643_s30, 4   ;;  %s13968_s24 = smov %s9565_s25 }
0x1341   : > { %s13969_s25 = smov %s9569_s26  ;;  %s13970_s26 = smov %s9655_s10 }
0x1342   : > { %s13971_s27 = smov %s9643_s30  ;;  %19 = sbr.rel (!%p17_p7) target bundleno = 3 (0x3), region = 132 }
0x1349   :  { %7223 = vsyncpa [#allocation4], 1 }
0x134a   :  { %7225 = vsyncpa [#allocation4 + $0x1], 1 }

</bundles_post_ra>
